<compile_context>
chip_gen: v7x
topology: tpu7x:2x2x1
jax: 0.10.0
libtpu: 0.0.40
codegen_flags: <defaults>
</compile_context>

<pallas_src>
import jax
import jax.numpy as jnp
from jax import lax
from jax.experimental import pallas as pl
from jax.experimental.pallas import tpu as pltpu

# Layer widths of the ChessEval MLP.
D_IN, D1, D2, D3, D4, D_OUT = 768, 1024, 512, 256, 64, 1
LN_EPS = 1e-5


def _round_up(n, m):
    return ((n + m - 1) // m) * m


def _layernorm_relu(h, gamma, beta, eps=LN_EPS):
    # Explicit (h - mu) reuse so a lowering change can't double the VPU work.
    mu = jnp.mean(h, axis=-1, keepdims=True)          # XLU reduction
    d = h - mu
    var = jnp.mean(d * d, axis=-1, keepdims=True)     # XLU reduction
    inv = lax.rsqrt(var + eps)                        # EUP (free slot vs VALU)
    return jnp.maximum(d * inv * gamma + beta, 0.0)


def chess_eval_kernel(
    x_ref,
    w1_ref, b1_ref, g1_ref, be1_ref,
    w2_ref, b2_ref, g2_ref, be2_ref,
    w3_ref, b3_ref, g3_ref, be3_ref,
    w4_ref, b4_ref,
    w5_ref, b5_ref,
    o_ref,
):
    h = x_ref[...]  # (TILE_B, 768) f32

    # Linear(768,1024) -> LayerNorm -> ReLU   (Dropout is identity at eval)
    h = jnp.dot(h.astype(jnp.bfloat16), w1_ref[...],
                preferred_element_type=jnp.float32) + b1_ref[...]
    h = _layernorm_relu(h, g1_ref[...], be1_ref[...])

    # Linear(1024,512) -> LayerNorm -> ReLU
    h = jnp.dot(h.astype(jnp.bfloat16), w2_ref[...],
                preferred_element_type=jnp.float32) + b2_ref[...]
    h = _layernorm_relu(h, g2_ref[...], be2_ref[...])

    # Linear(512,256) -> LayerNorm -> ReLU
    h = jnp.dot(h.astype(jnp.bfloat16), w3_ref[...],
                preferred_element_type=jnp.float32) + b3_ref[...]
    h = _layernorm_relu(h, g3_ref[...], be3_ref[...])

    # Linear(256,64) -> ReLU
    h = jnp.maximum(
        jnp.dot(h.astype(jnp.bfloat16), w4_ref[...],
                preferred_element_type=jnp.float32) + b4_ref[...],
        0.0,
    )

    # Linear(64,1) on the VPU/XLU: w5 is stored as a (1, 64) f32 row, so this is
    # a broadcast multiply + lane reduction (avoids a 1-column MXU matmul).
    o_ref[...] = jnp.sum(h * w5_ref[...], axis=-1, keepdims=True) + b5_ref[...]


def _param_index_map(i):
    # Parameters: same block for every batch tile -> fetched once, stay resident.
    return (0, 0)


def _batch_index_map(i):
    # x / out: walk the batch dimension.
    return (i, 0)


def _default_max_tile_b():
    # v5e/v6e have 128 MiB VMEM per TC -> 512-row tiles amortize grid-step
    # overhead; v7x has 64 MiB per TC -> stay at 256.
    try:
        info = pltpu.get_tpu_info()
        vmem = getattr(info, "vmem_capacity_bytes", None)
        if vmem is not None and int(vmem) >= (100 << 20):
            return 512
    except Exception:
        pass
    return 256


def _choose_tile_b(B, max_tile_b):
    if B <= 128:
        # Single small tile; 16-row granularity matches bf16 sublane packing.
        return max(16, _round_up(B, 16))
    # Large batches: 128-row (lane/MXU friendly) granularity; aim for >= 2 tiles
    # so the grid can shard across both TensorCores on v7x.
    tile = min(max_tile_b, _round_up(pl.cdiv(B, 2), 128))
    return max(128, tile)


def _run_pallas(x_padded, param_args, tile_b, num_tiles, single_buffer_params):
    padded_b = x_padded.shape[0]

    in_specs = [pl.BlockSpec((tile_b, D_IN), _batch_index_map)]
    if single_buffer_params:
        # Constant index_map -> never re-fetched; single-buffer to halve the
        # resident weight VMEM and drop the redundant second prefetch DMA.
        in_specs += [
            pl.BlockSpec(p.shape, _param_index_map, pipeline_mode=pl.Buffered(1))
            for p in param_args
        ]
    else:
        in_specs += [pl.BlockSpec(p.shape, _param_index_map) for p in param_args]
    out_spec = pl.BlockSpec((tile_b, D_OUT), _batch_index_map)

    # Advisory cost estimate so XLA can schedule/overlap around the kernel.
    mm_flops = 2 * padded_b * (D_IN * D1 + D1 * D2 + D2 * D3 + D3 * D4 + D4 * D_OUT)
    param_bytes = sum(int(p.size) * p.dtype.itemsize for p in param_args)
    cost = pl.CostEstimate(
        flops=mm_flops,
        transcendentals=3 * padded_b,  # one rsqrt per LayerNorm row
        bytes_accessed=param_bytes + padded_b * D_IN * 4 + padded_b * D_OUT * 4,
    )

    # Only shard the batch axis across cores when there is more than one tile:
    # a single tile is weight-DMA bound and splitting would duplicate the
    # (~2.9 MiB bf16) weight fetch on each core for no benefit.
    dim_sem = ("parallel",) if num_tiles > 1 else ("arbitrary",)

    return pl.pallas_call(
        chess_eval_kernel,
        out_shape=jax.ShapeDtypeStruct((padded_b, D_OUT), jnp.float32),
        grid=(num_tiles,),
        in_specs=in_specs,
        out_specs=out_spec,
        cost_estimate=cost,
        compiler_params=pltpu.CompilerParams(
            dimension_semantics=dim_sem,
            # ~3 MiB single-buffered bf16 weights + double-buffered x tiles +
            # activations: comfortably inside 32 MiB even at 512-row tiles, and
            # well under v7x's 64 MiB physical VMEM per TensorCore.
            vmem_limit_bytes=32 << 20,
        ),
    )(x_padded, *param_args)


def chess_eval_forward(x, params, *, tile_b=None):
    """x: (B, 768) float32. params from init_params(). Returns (B, 1) float32."""
    B = x.shape[0]
    if tile_b is None:
        tile_b = _choose_tile_b(B, _default_max_tile_b())
    else:
        tile_b = max(16, _round_up(tile_b, 16))

    padded_b = _round_up(B, tile_b)
    if padded_b != B:
        # Padded rows are zero; LayerNorm on them stays finite because
        # rsqrt(0 + LN_EPS) is finite, and the rows are sliced off below.
        x = jnp.pad(x, ((0, padded_b - B), (0, 0)))
    num_tiles = padded_b // tile_b

    param_args = (
        params["w1"], params["b1"], params["g1"], params["be1"],
        params["w2"], params["b2"], params["g2"], params["be2"],
        params["w3"], params["b3"], params["g3"], params["be3"],
        params["w4"], params["b4"],
        params["w5"], params["b5"],
    )

    try:
        out = _run_pallas(x, param_args, tile_b, num_tiles, True)
    except Exception:
        # Fallback for JAX builds that reject single-buffered (Buffered(1))
        # pipeline_mode on constant-index inputs.
        out = _run_pallas(x, param_args, tile_b, num_tiles, False)
    return out[:B]


def init_params(key):
    dims = [(D_IN, D1), (D1, D2), (D2, D3), (D3, D4), (D4, D_OUT)]
    params = {}
    keys = jax.random.split(key, 2 * len(dims))
    for i, (din, dout) in enumerate(dims):
        bound = 1.0 / jnp.sqrt(din)
        # PyTorch stores (out, in); we store the transpose (in, out) so the
        # kernel computes y = x @ W + b.
        w = jax.random.uniform(keys[2 * i], (din, dout), jnp.float32, -bound, bound)
        b = jax.random.uniform(keys[2 * i + 1], (1, dout), jnp.float32, -bound, bound)
        if i < 4:
            params[f"w{i + 1}"] = w.astype(jnp.bfloat16)  # HBM traffic dominates
        else:
            # Final (64, 1) layer runs on the VPU; store as a (1, 64) f32 row.
            params[f"w{i + 1}"] = w.T.astype(jnp.float32)
        params[f"b{i + 1}"] = b
    # LayerNorm affine params (PyTorch default init: gamma=1, beta=0).
    for i, d in enumerate([D1, D2, D3]):
        params[f"g{i + 1}"] = jnp.ones((1, d), jnp.float32)
        params[f"be{i + 1}"] = jnp.zeros((1, d), jnp.float32)
    return params


def reference_forward(x, p):
    def ln(h, g, b):
        mu = jnp.mean(h, axis=-1, keepdims=True)
        var = jnp.mean((h - mu) ** 2, axis=-1, keepdims=True)
        return (h - mu) / jnp.sqrt(var + LN_EPS) * g + b

    w1, w2, w3, w4 = (p[k].astype(jnp.float32) for k in ("w1", "w2", "w3", "w4"))
    h = jnp.maximum(ln(x @ w1 + p["b1"], p["g1"], p["be1"]), 0.0)
    h = jnp.maximum(ln(h @ w2 + p["b2"], p["g2"], p["be2"]), 0.0)
    h = jnp.maximum(ln(h @ w3 + p["b3"], p["g3"], p["be3"]), 0.0)
    h = jnp.maximum(h @ w4 + p["b4"], 0.0)
    return h @ p["w5"].T + p["b5"]


if __name__ == "__main__":
    key = jax.random.PRNGKey(0)
    k_params, k_x = jax.random.split(key)
    params = init_params(k_params)

    # Small batch: single tile (rounded to 16 rows).
    B = 8
    x = jax.random.normal(k_x, (B, D_IN), jnp.float32)
    out = jax.block_until_ready(chess_eval_forward(x, params))
    ref = reference_forward(x, params)
    assert out.shape == (B, D_OUT)
    assert jnp.allclose(out, ref, atol=3e-2, rtol=3e-2), float(jnp.max(jnp.abs(out - ref)))

    # Ragged batch with several tiles (exercises padding + resident weights).
    B2 = 40
    x2 = jax.random.normal(jax.random.PRNGKey(1), (B2, D_IN), jnp.float32)
    out2 = jax.block_until_ready(chess_eval_forward(x2, params, tile_b=16))
    ref2 = reference_forward(x2, params)
    assert out2.shape == (B2, D_OUT)
    assert jnp.allclose(out2, ref2, atol=3e-2, rtol=3e-2), float(jnp.max(jnp.abs(out2 - ref2)))

    # Larger batch with default tiling (exercises the 128-row, >=2-tile path).
    B3 = 160
    x3 = jax.random.normal(jax.random.PRNGKey(2), (B3, D_IN), jnp.float32)
    out3 = jax.block_until_ready(chess_eval_forward(x3, params))
    ref3 = reference_forward(x3, params)
    assert out3.shape == (B3, D_OUT)
    assert jnp.allclose(out3, ref3, atol=3e-2, rtol=3e-2), float(jnp.max(jnp.abs(out3 - ref3)))

    # TODO(synk): training-mode Dropout (RNG mask) is not implemented; eval-mode
    # identity matches the PyTorch module under model.eval().
    print("KERNEL_OK")
</pallas_src>

<mosaic_0001>
module attributes {stable_mosaic.version = 11 : i64} {
  func.func @chess_eval_kernel(%arg0: i32, %arg1: memref<16x768xf32, #tpu.memory_space<vmem>>, %arg2: memref<768x1024xbf16, #tpu.memory_space<vmem>>, %arg3: memref<1x1024xf32, #tpu.memory_space<vmem>>, %arg4: memref<1x1024xf32, #tpu.memory_space<vmem>>, %arg5: memref<1x1024xf32, #tpu.memory_space<vmem>>, %arg6: memref<1024x512xbf16, #tpu.memory_space<vmem>>, %arg7: memref<1x512xf32, #tpu.memory_space<vmem>>, %arg8: memref<1x512xf32, #tpu.memory_space<vmem>>, %arg9: memref<1x512xf32, #tpu.memory_space<vmem>>, %arg10: memref<512x256xbf16, #tpu.memory_space<vmem>>, %arg11: memref<1x256xf32, #tpu.memory_space<vmem>>, %arg12: memref<1x256xf32, #tpu.memory_space<vmem>>, %arg13: memref<1x256xf32, #tpu.memory_space<vmem>>, %arg14: memref<256x64xbf16, #tpu.memory_space<vmem>>, %arg15: memref<1x64xf32, #tpu.memory_space<vmem>>, %arg16: memref<1x64xf32, #tpu.memory_space<vmem>>, %arg17: memref<1x1xf32, #tpu.memory_space<vmem>>, %arg18: memref<16x1xf32, #tpu.memory_space<vmem>>) attributes {dimension_semantics = [#tpu.dimension_semantics<arbitrary>], iteration_bounds = array<i64: 1>, scalar_prefetch = 0 : i64, scratch_operands = 0 : i64, tpu.core_type = #tpu.core_type<tc>, window_params = [{transform_indices = @transform_0, window_bounds = array<i64: 16, 768>}, {pipeline_mode = #tpu.pipeline_mode<synchronous>, transform_indices = @transform_1, window_bounds = array<i64: 768, 1024>}, {pipeline_mode = #tpu.pipeline_mode<synchronous>, transform_indices = @transform_2, window_bounds = array<i64: 1, 1024>}, {pipeline_mode = #tpu.pipeline_mode<synchronous>, transform_indices = @transform_3, window_bounds = array<i64: 1, 1024>}, {pipeline_mode = #tpu.pipeline_mode<synchronous>, transform_indices = @transform_4, window_bounds = array<i64: 1, 1024>}, {pipeline_mode = #tpu.pipeline_mode<synchronous>, transform_indices = @transform_5, window_bounds = array<i64: 1024, 512>}, {pipeline_mode = #tpu.pipeline_mode<synchronous>, transform_indices = @transform_6, window_bounds = array<i64: 1, 512>}, {pipeline_mode = #tpu.pipeline_mode<synchronous>, transform_indices = @transform_7, window_bounds = array<i64: 1, 512>}, {pipeline_mode = #tpu.pipeline_mode<synchronous>, transform_indices = @transform_8, window_bounds = array<i64: 1, 512>}, {pipeline_mode = #tpu.pipeline_mode<synchronous>, transform_indices = @transform_9, window_bounds = array<i64: 512, 256>}, {pipeline_mode = #tpu.pipeline_mode<synchronous>, transform_indices = @transform_10, window_bounds = array<i64: 1, 256>}, {pipeline_mode = #tpu.pipeline_mode<synchronous>, transform_indices = @transform_11, window_bounds = array<i64: 1, 256>}, {pipeline_mode = #tpu.pipeline_mode<synchronous>, transform_indices = @transform_12, window_bounds = array<i64: 1, 256>}, {pipeline_mode = #tpu.pipeline_mode<synchronous>, transform_indices = @transform_13, window_bounds = array<i64: 256, 64>}, {pipeline_mode = #tpu.pipeline_mode<synchronous>, transform_indices = @transform_14, window_bounds = array<i64: 1, 64>}, {pipeline_mode = #tpu.pipeline_mode<synchronous>, transform_indices = @transform_15, window_bounds = array<i64: 1, 64>}, {pipeline_mode = #tpu.pipeline_mode<synchronous>, transform_indices = @transform_16, window_bounds = array<i64: 1, 1>}, {transform_indices = @transform_17, window_bounds = array<i64: 16, 1>}]} {
    %c0 = arith.constant 0 : index
    %c0_0 = arith.constant 0 : index
    %0 = vector.load %arg1[%c0, %c0_0] : memref<16x768xf32, #tpu.memory_space<vmem>>, vector<16x768xf32>
    %1 = arith.truncf %0 : vector<16x768xf32> to vector<16x768xbf16>
    %c0_1 = arith.constant 0 : index
    %c0_2 = arith.constant 0 : index
    %2 = vector.load %arg2[%c0_1, %c0_2] : memref<768x1024xbf16, #tpu.memory_space<vmem>>, vector<768x1024xbf16>
    %cst = arith.constant dense<0.000000e+00> : vector<16x1024xf32>
    %3 = tpu.matmul %1, %2, %cst {dimension_numbers = #tpu.dot_dimension_numbers<[1], [0], [0], [1], [0, 0, 1, 1], [], []>} : vector<16x768xbf16>, vector<768x1024xbf16>, vector<16x1024xf32> -> vector<16x1024xf32>
    %c0_3 = arith.constant 0 : index
    %c0_4 = arith.constant 0 : index
    %4 = vector.load %arg3[%c0_3, %c0_4] : memref<1x1024xf32, #tpu.memory_space<vmem>>, vector<1x1024xf32>
    %5 = vector.broadcast %4 : vector<1x1024xf32> to vector<16x1024xf32>
    %6 = arith.addf %3, %5 : vector<16x1024xf32>
    %c0_5 = arith.constant 0 : index
    %c0_6 = arith.constant 0 : index
    %7 = vector.load %arg4[%c0_5, %c0_6] : memref<1x1024xf32, #tpu.memory_space<vmem>>, vector<1x1024xf32>
    %c0_7 = arith.constant 0 : index
    %c0_8 = arith.constant 0 : index
    %8 = vector.load %arg5[%c0_7, %c0_8] : memref<1x1024xf32, #tpu.memory_space<vmem>>, vector<1x1024xf32>
    %cst_9 = arith.constant dense<0.000000e+00> : vector<16xf32>
    %9 = vector.multi_reduction <add>, %6, %cst_9 [1] : vector<16x1024xf32> to vector<16xf32>
    %10 = vector.shape_cast %9 : vector<16xf32> to vector<16x1xf32>
    %cst_10 = arith.constant 1.024000e+03 : f32
    %11 = vector.broadcast %cst_10 : f32 to vector<16x1xf32>
    %12 = arith.divf %10, %11 : vector<16x1xf32>
    %13 = vector.broadcast %12 : vector<16x1xf32> to vector<16x1024xf32>
    %14 = arith.subf %6, %13 : vector<16x1024xf32>
    %15 = arith.mulf %14, %14 : vector<16x1024xf32>
    %cst_11 = arith.constant dense<0.000000e+00> : vector<16xf32>
    %16 = vector.multi_reduction <add>, %15, %cst_11 [1] : vector<16x1024xf32> to vector<16xf32>
    %17 = vector.shape_cast %16 : vector<16xf32> to vector<16x1xf32>
    %cst_12 = arith.constant 1.024000e+03 : f32
    %18 = vector.broadcast %cst_12 : f32 to vector<16x1xf32>
    %19 = arith.divf %17, %18 : vector<16x1xf32>
    %cst_13 = arith.constant 9.99999974E-6 : f32
    %20 = vector.broadcast %cst_13 : f32 to vector<16x1xf32>
    %21 = arith.addf %19, %20 : vector<16x1xf32>
    %22 = math.rsqrt %21 : vector<16x1xf32>
    %23 = vector.broadcast %22 : vector<16x1xf32> to vector<16x1024xf32>
    %24 = arith.mulf %14, %23 : vector<16x1024xf32>
    %25 = vector.broadcast %7 : vector<1x1024xf32> to vector<16x1024xf32>
    %26 = arith.mulf %24, %25 : vector<16x1024xf32>
    %27 = vector.broadcast %8 : vector<1x1024xf32> to vector<16x1024xf32>
    %28 = arith.addf %26, %27 : vector<16x1024xf32>
    %cst_14 = arith.constant 0.000000e+00 : f32
    %29 = vector.broadcast %cst_14 : f32 to vector<16x1024xf32>
    %30 = arith.maximumf %28, %29 : vector<16x1024xf32>
    %31 = arith.truncf %30 : vector<16x1024xf32> to vector<16x1024xbf16>
    %c0_15 = arith.constant 0 : index
    %c0_16 = arith.constant 0 : index
    %32 = vector.load %arg6[%c0_15, %c0_16] : memref<1024x512xbf16, #tpu.memory_space<vmem>>, vector<1024x512xbf16>
    %cst_17 = arith.constant dense<0.000000e+00> : vector<16x512xf32>
    %33 = tpu.matmul %31, %32, %cst_17 {dimension_numbers = #tpu.dot_dimension_numbers<[1], [0], [0], [1], [0, 0, 1, 1], [], []>} : vector<16x1024xbf16>, vector<1024x512xbf16>, vector<16x512xf32> -> vector<16x512xf32>
    %c0_18 = arith.constant 0 : index
    %c0_19 = arith.constant 0 : index
    %34 = vector.load %arg7[%c0_18, %c0_19] : memref<1x512xf32, #tpu.memory_space<vmem>>, vector<1x512xf32>
    %35 = vector.broadcast %34 : vector<1x512xf32> to vector<16x512xf32>
    %36 = arith.addf %33, %35 : vector<16x512xf32>
    %c0_20 = arith.constant 0 : index
    %c0_21 = arith.constant 0 : index
    %37 = vector.load %arg8[%c0_20, %c0_21] : memref<1x512xf32, #tpu.memory_space<vmem>>, vector<1x512xf32>
    %c0_22 = arith.constant 0 : index
    %c0_23 = arith.constant 0 : index
    %38 = vector.load %arg9[%c0_22, %c0_23] : memref<1x512xf32, #tpu.memory_space<vmem>>, vector<1x512xf32>
    %cst_24 = arith.constant dense<0.000000e+00> : vector<16xf32>
    %39 = vector.multi_reduction <add>, %36, %cst_24 [1] : vector<16x512xf32> to vector<16xf32>
    %40 = vector.shape_cast %39 : vector<16xf32> to vector<16x1xf32>
    %cst_25 = arith.constant 5.120000e+02 : f32
    %41 = vector.broadcast %cst_25 : f32 to vector<16x1xf32>
    %42 = arith.divf %40, %41 : vector<16x1xf32>
    %43 = vector.broadcast %42 : vector<16x1xf32> to vector<16x512xf32>
    %44 = arith.subf %36, %43 : vector<16x512xf32>
    %45 = arith.mulf %44, %44 : vector<16x512xf32>
    %cst_26 = arith.constant dense<0.000000e+00> : vector<16xf32>
    %46 = vector.multi_reduction <add>, %45, %cst_26 [1] : vector<16x512xf32> to vector<16xf32>
    %47 = vector.shape_cast %46 : vector<16xf32> to vector<16x1xf32>
    %cst_27 = arith.constant 5.120000e+02 : f32
    %48 = vector.broadcast %cst_27 : f32 to vector<16x1xf32>
    %49 = arith.divf %47, %48 : vector<16x1xf32>
    %cst_28 = arith.constant 9.99999974E-6 : f32
    %50 = vector.broadcast %cst_28 : f32 to vector<16x1xf32>
    %51 = arith.addf %49, %50 : vector<16x1xf32>
    %52 = math.rsqrt %51 : vector<16x1xf32>
    %53 = vector.broadcast %52 : vector<16x1xf32> to vector<16x512xf32>
    %54 = arith.mulf %44, %53 : vector<16x512xf32>
    %55 = vector.broadcast %37 : vector<1x512xf32> to vector<16x512xf32>
    %56 = arith.mulf %54, %55 : vector<16x512xf32>
    %57 = vector.broadcast %38 : vector<1x512xf32> to vector<16x512xf32>
    %58 = arith.addf %56, %57 : vector<16x512xf32>
    %cst_29 = arith.constant 0.000000e+00 : f32
    %59 = vector.broadcast %cst_29 : f32 to vector<16x512xf32>
    %60 = arith.maximumf %58, %59 : vector<16x512xf32>
    %61 = arith.truncf %60 : vector<16x512xf32> to vector<16x512xbf16>
    %c0_30 = arith.constant 0 : index
    %c0_31 = arith.constant 0 : index
    %62 = vector.load %arg10[%c0_30, %c0_31] : memref<512x256xbf16, #tpu.memory_space<vmem>>, vector<512x256xbf16>
    %cst_32 = arith.constant dense<0.000000e+00> : vector<16x256xf32>
    %63 = tpu.matmul %61, %62, %cst_32 {dimension_numbers = #tpu.dot_dimension_numbers<[1], [0], [0], [1], [0, 0, 1, 1], [], []>} : vector<16x512xbf16>, vector<512x256xbf16>, vector<16x256xf32> -> vector<16x256xf32>
    %c0_33 = arith.constant 0 : index
    %c0_34 = arith.constant 0 : index
    %64 = vector.load %arg11[%c0_33, %c0_34] : memref<1x256xf32, #tpu.memory_space<vmem>>, vector<1x256xf32>
    %65 = vector.broadcast %64 : vector<1x256xf32> to vector<16x256xf32>
    %66 = arith.addf %63, %65 : vector<16x256xf32>
    %c0_35 = arith.constant 0 : index
    %c0_36 = arith.constant 0 : index
    %67 = vector.load %arg12[%c0_35, %c0_36] : memref<1x256xf32, #tpu.memory_space<vmem>>, vector<1x256xf32>
    %c0_37 = arith.constant 0 : index
    %c0_38 = arith.constant 0 : index
    %68 = vector.load %arg13[%c0_37, %c0_38] : memref<1x256xf32, #tpu.memory_space<vmem>>, vector<1x256xf32>
    %cst_39 = arith.constant dense<0.000000e+00> : vector<16xf32>
    %69 = vector.multi_reduction <add>, %66, %cst_39 [1] : vector<16x256xf32> to vector<16xf32>
    %70 = vector.shape_cast %69 : vector<16xf32> to vector<16x1xf32>
    %cst_40 = arith.constant 2.560000e+02 : f32
    %71 = vector.broadcast %cst_40 : f32 to vector<16x1xf32>
    %72 = arith.divf %70, %71 : vector<16x1xf32>
    %73 = vector.broadcast %72 : vector<16x1xf32> to vector<16x256xf32>
    %74 = arith.subf %66, %73 : vector<16x256xf32>
    %75 = arith.mulf %74, %74 : vector<16x256xf32>
    %cst_41 = arith.constant dense<0.000000e+00> : vector<16xf32>
    %76 = vector.multi_reduction <add>, %75, %cst_41 [1] : vector<16x256xf32> to vector<16xf32>
    %77 = vector.shape_cast %76 : vector<16xf32> to vector<16x1xf32>
    %cst_42 = arith.constant 2.560000e+02 : f32
    %78 = vector.broadcast %cst_42 : f32 to vector<16x1xf32>
    %79 = arith.divf %77, %78 : vector<16x1xf32>
    %cst_43 = arith.constant 9.99999974E-6 : f32
    %80 = vector.broadcast %cst_43 : f32 to vector<16x1xf32>
    %81 = arith.addf %79, %80 : vector<16x1xf32>
    %82 = math.rsqrt %81 : vector<16x1xf32>
    %83 = vector.broadcast %82 : vector<16x1xf32> to vector<16x256xf32>
    %84 = arith.mulf %74, %83 : vector<16x256xf32>
    %85 = vector.broadcast %67 : vector<1x256xf32> to vector<16x256xf32>
    %86 = arith.mulf %84, %85 : vector<16x256xf32>
    %87 = vector.broadcast %68 : vector<1x256xf32> to vector<16x256xf32>
    %88 = arith.addf %86, %87 : vector<16x256xf32>
    %cst_44 = arith.constant 0.000000e+00 : f32
    %89 = vector.broadcast %cst_44 : f32 to vector<16x256xf32>
    %90 = arith.maximumf %88, %89 : vector<16x256xf32>
    %91 = arith.truncf %90 : vector<16x256xf32> to vector<16x256xbf16>
    %c0_45 = arith.constant 0 : index
    %c0_46 = arith.constant 0 : index
    %92 = vector.load %arg14[%c0_45, %c0_46] : memref<256x64xbf16, #tpu.memory_space<vmem>>, vector<256x64xbf16>
    %cst_47 = arith.constant dense<0.000000e+00> : vector<16x64xf32>
    %93 = tpu.matmul %91, %92, %cst_47 {dimension_numbers = #tpu.dot_dimension_numbers<[1], [0], [0], [1], [0, 0, 1, 1], [], []>} : vector<16x256xbf16>, vector<256x64xbf16>, vector<16x64xf32> -> vector<16x64xf32>
    %c0_48 = arith.constant 0 : index
    %c0_49 = arith.constant 0 : index
    %94 = vector.load %arg15[%c0_48, %c0_49] : memref<1x64xf32, #tpu.memory_space<vmem>>, vector<1x64xf32>
    %95 = vector.broadcast %94 : vector<1x64xf32> to vector<16x64xf32>
    %96 = arith.addf %93, %95 : vector<16x64xf32>
    %cst_50 = arith.constant 0.000000e+00 : f32
    %97 = vector.broadcast %cst_50 : f32 to vector<16x64xf32>
    %98 = arith.maximumf %96, %97 : vector<16x64xf32>
    %c0_51 = arith.constant 0 : index
    %c0_52 = arith.constant 0 : index
    %99 = vector.load %arg16[%c0_51, %c0_52] : memref<1x64xf32, #tpu.memory_space<vmem>>, vector<1x64xf32>
    %100 = vector.broadcast %99 : vector<1x64xf32> to vector<16x64xf32>
    %101 = arith.mulf %98, %100 : vector<16x64xf32>
    %cst_53 = arith.constant dense<0.000000e+00> : vector<16xf32>
    %102 = vector.multi_reduction <add>, %101, %cst_53 [1] : vector<16x64xf32> to vector<16xf32>
    %103 = vector.shape_cast %102 : vector<16xf32> to vector<16x1xf32>
    %c0_54 = arith.constant 0 : index
    %c0_55 = arith.constant 0 : index
    %104 = vector.load %arg17[%c0_54, %c0_55] : memref<1x1xf32, #tpu.memory_space<vmem>>, vector<1x1xf32>
    %105 = vector.broadcast %104 : vector<1x1xf32> to vector<16x1xf32>
    %106 = arith.addf %103, %105 : vector<16x1xf32>
    %c0_56 = arith.constant 0 : index
    %c0_57 = arith.constant 0 : index
    %107 = vector.load %arg18[%c0_56, %c0_57] : memref<16x1xf32, #tpu.memory_space<vmem>>, vector<16x1xf32>
    tpu.vector_store %arg18[%c0_56, %c0_57], %106 {strides = array<i32>} : memref<16x1xf32, #tpu.memory_space<vmem>>, vector<16x1xf32>,
    return
  }
  func.func @transform_0(%arg0: i32) -> (i32, i32) {
    %c0_i32 = arith.constant 0 : i32
    %c0_i32_0 = arith.constant 0 : i32
    return %arg0, %c0_i32 : i32, i32
  }
  func.func @transform_1(%arg0: i32) -> (i32, i32) {
    %c0_i32 = arith.constant 0 : i32
    %c0_i32_0 = arith.constant 0 : i32
    %c0_i32_1 = arith.constant 0 : i32
    return %c0_i32, %c0_i32_0 : i32, i32
  }
  func.func @transform_2(%arg0: i32) -> (i32, i32) {
    %c0_i32 = arith.constant 0 : i32
    %c0_i32_0 = arith.constant 0 : i32
    %c0_i32_1 = arith.constant 0 : i32
    return %c0_i32, %c0_i32_0 : i32, i32
  }
  func.func @transform_3(%arg0: i32) -> (i32, i32) {
    %c0_i32 = arith.constant 0 : i32
    %c0_i32_0 = arith.constant 0 : i32
    %c0_i32_1 = arith.constant 0 : i32
    return %c0_i32, %c0_i32_0 : i32, i32
  }
  func.func @transform_4(%arg0: i32) -> (i32, i32) {
    %c0_i32 = arith.constant 0 : i32
    %c0_i32_0 = arith.constant 0 : i32
    %c0_i32_1 = arith.constant 0 : i32
    return %c0_i32, %c0_i32_0 : i32, i32
  }
  func.func @transform_5(%arg0: i32) -> (i32, i32) {
    %c0_i32 = arith.constant 0 : i32
    %c0_i32_0 = arith.constant 0 : i32
    %c0_i32_1 = arith.constant 0 : i32
    return %c0_i32, %c0_i32_0 : i32, i32
  }
  func.func @transform_6(%arg0: i32) -> (i32, i32) {
    %c0_i32 = arith.constant 0 : i32
    %c0_i32_0 = arith.constant 0 : i32
    %c0_i32_1 = arith.constant 0 : i32
    return %c0_i32, %c0_i32_0 : i32, i32
  }
  func.func @transform_7(%arg0: i32) -> (i32, i32) {
    %c0_i32 = arith.constant 0 : i32
    %c0_i32_0 = arith.constant 0 : i32
    %c0_i32_1 = arith.constant 0 : i32
    return %c0_i32, %c0_i32_0 : i32, i32
  }
  func.func @transform_8(%arg0: i32) -> (i32, i32) {
    %c0_i32 = arith.constant 0 : i32
    %c0_i32_0 = arith.constant 0 : i32
    %c0_i32_1 = arith.constant 0 : i32
    return %c0_i32, %c0_i32_0 : i32, i32
  }
  func.func @transform_9(%arg0: i32) -> (i32, i32) {
    %c0_i32 = arith.constant 0 : i32
    %c0_i32_0 = arith.constant 0 : i32
    %c0_i32_1 = arith.constant 0 : i32
    return %c0_i32, %c0_i32_0 : i32, i32
  }
  func.func @transform_10(%arg0: i32) -> (i32, i32) {
    %c0_i32 = arith.constant 0 : i32
    %c0_i32_0 = arith.constant 0 : i32
    %c0_i32_1 = arith.constant 0 : i32
    return %c0_i32, %c0_i32_0 : i32, i32
  }
  func.func @transform_11(%arg0: i32) -> (i32, i32) {
    %c0_i32 = arith.constant 0 : i32
    %c0_i32_0 = arith.constant 0 : i32
    %c0_i32_1 = arith.constant 0 : i32
    return %c0_i32, %c0_i32_0 : i32, i32
  }
  func.func @transform_12(%arg0: i32) -> (i32, i32) {
    %c0_i32 = arith.constant 0 : i32
    %c0_i32_0 = arith.constant 0 : i32
    %c0_i32_1 = arith.constant 0 : i32
    return %c0_i32, %c0_i32_0 : i32, i32
  }
  func.func @transform_13(%arg0: i32) -> (i32, i32) {
    %c0_i32 = arith.constant 0 : i32
    %c0_i32_0 = arith.constant 0 : i32
    %c0_i32_1 = arith.constant 0 : i32
    return %c0_i32, %c0_i32_0 : i32, i32
  }
  func.func @transform_14(%arg0: i32) -> (i32, i32) {
    %c0_i32 = arith.constant 0 : i32
    %c0_i32_0 = arith.constant 0 : i32
    %c0_i32_1 = arith.constant 0 : i32
    return %c0_i32, %c0_i32_0 : i32, i32
  }
  func.func @transform_15(%arg0: i32) -> (i32, i32) {
    %c0_i32 = arith.constant 0 : i32
    %c0_i32_0 = arith.constant 0 : i32
    %c0_i32_1 = arith.constant 0 : i32
    return %c0_i32, %c0_i32_0 : i32, i32
  }
  func.func @transform_16(%arg0: i32) -> (i32, i32) {
    %c0_i32 = arith.constant 0 : i32
    %c0_i32_0 = arith.constant 0 : i32
    %c0_i32_1 = arith.constant 0 : i32
    return %c0_i32, %c0_i32_0 : i32, i32
  }
  func.func @transform_17(%arg0: i32) -> (i32, i32) {
    %c0_i32 = arith.constant 0 : i32
    %c0_i32_0 = arith.constant 0 : i32
    return %arg0, %c0_i32 : i32, i32
  }
}

module attributes {stable_mosaic.version = 11 : i64} {
  func.func @chess_eval_kernel(%arg0: i32, %arg1: memref<16x768xf32, #tpu.memory_space<vmem>>, %arg2: memref<768x1024xbf16, #tpu.memory_space<vmem>>, %arg3: memref<1x1024xf32, #tpu.memory_space<vmem>>, %arg4: memref<1x1024xf32, #tpu.memory_space<vmem>>, %arg5: memref<1x1024xf32, #tpu.memory_space<vmem>>, %arg6: memref<1024x512xbf16, #tpu.memory_space<vmem>>, %arg7: memref<1x512xf32, #tpu.memory_space<vmem>>, %arg8: memref<1x512xf32, #tpu.memory_space<vmem>>, %arg9: memref<1x512xf32, #tpu.memory_space<vmem>>, %arg10: memref<512x256xbf16, #tpu.memory_space<vmem>>, %arg11: memref<1x256xf32, #tpu.memory_space<vmem>>, %arg12: memref<1x256xf32, #tpu.memory_space<vmem>>, %arg13: memref<1x256xf32, #tpu.memory_space<vmem>>, %arg14: memref<256x64xbf16, #tpu.memory_space<vmem>>, %arg15: memref<1x64xf32, #tpu.memory_space<vmem>>, %arg16: memref<1x64xf32, #tpu.memory_space<vmem>>, %arg17: memref<1x1xf32, #tpu.memory_space<vmem>>, %arg18: memref<16x1xf32, #tpu.memory_space<vmem>>) attributes {dimension_semantics = [#tpu.dimension_semantics<arbitrary>], iteration_bounds = array<i64: 1>, scalar_prefetch = 0 : i64, scratch_operands = 0 : i64, tpu.core_type = #tpu.core_type<tc>, window_params = [{transform_indices = @transform_0, window_bounds = array<i64: 16, 768>}, {pipeline_mode = #tpu.pipeline_mode<synchronous>, transform_indices = @transform_1, window_bounds = array<i64: 768, 1024>}, {pipeline_mode = #tpu.pipeline_mode<synchronous>, transform_indices = @transform_2, window_bounds = array<i64: 1, 1024>}, {pipeline_mode = #tpu.pipeline_mode<synchronous>, transform_indices = @transform_3, window_bounds = array<i64: 1, 1024>}, {pipeline_mode = #tpu.pipeline_mode<synchronous>, transform_indices = @transform_4, window_bounds = array<i64: 1, 1024>}, {pipeline_mode = #tpu.pipeline_mode<synchronous>, transform_indices = @transform_5, window_bounds = array<i64: 1024, 512>}, {pipeline_mode = #tpu.pipeline_mode<synchronous>, transform_indices = @transform_6, window_bounds = array<i64: 1, 512>}, {pipeline_mode = #tpu.pipeline_mode<synchronous>, transform_indices = @transform_7, window_bounds = array<i64: 1, 512>}, {pipeline_mode = #tpu.pipeline_mode<synchronous>, transform_indices = @transform_8, window_bounds = array<i64: 1, 512>}, {pipeline_mode = #tpu.pipeline_mode<synchronous>, transform_indices = @transform_9, window_bounds = array<i64: 512, 256>}, {pipeline_mode = #tpu.pipeline_mode<synchronous>, transform_indices = @transform_10, window_bounds = array<i64: 1, 256>}, {pipeline_mode = #tpu.pipeline_mode<synchronous>, transform_indices = @transform_11, window_bounds = array<i64: 1, 256>}, {pipeline_mode = #tpu.pipeline_mode<synchronous>, transform_indices = @transform_12, window_bounds = array<i64: 1, 256>}, {pipeline_mode = #tpu.pipeline_mode<synchronous>, transform_indices = @transform_13, window_bounds = array<i64: 256, 64>}, {pipeline_mode = #tpu.pipeline_mode<synchronous>, transform_indices = @transform_14, window_bounds = array<i64: 1, 64>}, {pipeline_mode = #tpu.pipeline_mode<synchronous>, transform_indices = @transform_15, window_bounds = array<i64: 1, 64>}, {pipeline_mode = #tpu.pipeline_mode<synchronous>, transform_indices = @transform_16, window_bounds = array<i64: 1, 1>}, {transform_indices = @transform_17, window_bounds = array<i64: 16, 1>}]} {
    %c0 = arith.constant 0 : index
    %c0_0 = arith.constant 0 : index
    %0 = vector.load %arg1[%c0, %c0_0] : memref<16x768xf32, #tpu.memory_space<vmem>>, vector<16x768xf32>
    %1 = arith.truncf %0 : vector<16x768xf32> to vector<16x768xbf16>
    %c0_1 = arith.constant 0 : index
    %c0_2 = arith.constant 0 : index
    %2 = vector.load %arg2[%c0_1, %c0_2] : memref<768x1024xbf16, #tpu.memory_space<vmem>>, vector<768x1024xbf16>
    %cst = arith.constant dense<0.000000e+00> : vector<16x1024xf32>
    %3 = tpu.matmul %1, %2, %cst {dimension_numbers = #tpu.dot_dimension_numbers<[1], [0], [0], [1], [0, 0, 1, 1], [], []>} : vector<16x768xbf16>, vector<768x1024xbf16>, vector<16x1024xf32> -> vector<16x1024xf32>
    %c0_3 = arith.constant 0 : index
    %c0_4 = arith.constant 0 : index
    %4 = vector.load %arg3[%c0_3, %c0_4] : memref<1x1024xf32, #tpu.memory_space<vmem>>, vector<1x1024xf32>
    %5 = vector.broadcast %4 : vector<1x1024xf32> to vector<16x1024xf32>
    %6 = arith.addf %3, %5 : vector<16x1024xf32>
    %c0_5 = arith.constant 0 : index
    %c0_6 = arith.constant 0 : index
    %7 = vector.load %arg4[%c0_5, %c0_6] : memref<1x1024xf32, #tpu.memory_space<vmem>>, vector<1x1024xf32>
    %c0_7 = arith.constant 0 : index
    %c0_8 = arith.constant 0 : index
    %8 = vector.load %arg5[%c0_7, %c0_8] : memref<1x1024xf32, #tpu.memory_space<vmem>>, vector<1x1024xf32>
    %cst_9 = arith.constant dense<0.000000e+00> : vector<16xf32>
    %9 = vector.multi_reduction <add>, %6, %cst_9 [1] : vector<16x1024xf32> to vector<16xf32>
    %10 = vector.shape_cast %9 : vector<16xf32> to vector<16x1xf32>
    %cst_10 = arith.constant 1.024000e+03 : f32
    %11 = vector.broadcast %cst_10 : f32 to vector<16x1xf32>
    %12 = arith.divf %10, %11 : vector<16x1xf32>
    %13 = vector.broadcast %12 : vector<16x1xf32> to vector<16x1024xf32>
    %14 = arith.subf %6, %13 : vector<16x1024xf32>
    %15 = arith.mulf %14, %14 : vector<16x1024xf32>
    %cst_11 = arith.constant dense<0.000000e+00> : vector<16xf32>
    %16 = vector.multi_reduction <add>, %15, %cst_11 [1] : vector<16x1024xf32> to vector<16xf32>
    %17 = vector.shape_cast %16 : vector<16xf32> to vector<16x1xf32>
    %cst_12 = arith.constant 1.024000e+03 : f32
    %18 = vector.broadcast %cst_12 : f32 to vector<16x1xf32>
    %19 = arith.divf %17, %18 : vector<16x1xf32>
    %cst_13 = arith.constant 9.99999974E-6 : f32
    %20 = vector.broadcast %cst_13 : f32 to vector<16x1xf32>
    %21 = arith.addf %19, %20 : vector<16x1xf32>
    %22 = math.rsqrt %21 : vector<16x1xf32>
    %23 = vector.broadcast %22 : vector<16x1xf32> to vector<16x1024xf32>
    %24 = arith.mulf %14, %23 : vector<16x1024xf32>
    %25 = vector.broadcast %7 : vector<1x1024xf32> to vector<16x1024xf32>
    %26 = arith.mulf %24, %25 : vector<16x1024xf32>
    %27 = vector.broadcast %8 : vector<1x1024xf32> to vector<16x1024xf32>
    %28 = arith.addf %26, %27 : vector<16x1024xf32>
    %cst_14 = arith.constant 0.000000e+00 : f32
    %29 = vector.broadcast %cst_14 : f32 to vector<16x1024xf32>
    %30 = arith.maximumf %28, %29 : vector<16x1024xf32>
    %31 = arith.truncf %30 : vector<16x1024xf32> to vector<16x1024xbf16>
    %c0_15 = arith.constant 0 : index
    %c0_16 = arith.constant 0 : index
    %32 = vector.load %arg6[%c0_15, %c0_16] : memref<1024x512xbf16, #tpu.memory_space<vmem>>, vector<1024x512xbf16>
    %cst_17 = arith.constant dense<0.000000e+00> : vector<16x512xf32>
    %33 = tpu.matmul %31, %32, %cst_17 {dimension_numbers = #tpu.dot_dimension_numbers<[1], [0], [0], [1], [0, 0, 1, 1], [], []>} : vector<16x1024xbf16>, vector<1024x512xbf16>, vector<16x512xf32> -> vector<16x512xf32>
    %c0_18 = arith.constant 0 : index
    %c0_19 = arith.constant 0 : index
    %34 = vector.load %arg7[%c0_18, %c0_19] : memref<1x512xf32, #tpu.memory_space<vmem>>, vector<1x512xf32>
    %35 = vector.broadcast %34 : vector<1x512xf32> to vector<16x512xf32>
    %36 = arith.addf %33, %35 : vector<16x512xf32>
    %c0_20 = arith.constant 0 : index
    %c0_21 = arith.constant 0 : index
    %37 = vector.load %arg8[%c0_20, %c0_21] : memref<1x512xf32, #tpu.memory_space<vmem>>, vector<1x512xf32>
    %c0_22 = arith.constant 0 : index
    %c0_23 = arith.constant 0 : index
    %38 = vector.load %arg9[%c0_22, %c0_23] : memref<1x512xf32, #tpu.memory_space<vmem>>, vector<1x512xf32>
    %cst_24 = arith.constant dense<0.000000e+00> : vector<16xf32>
    %39 = vector.multi_reduction <add>, %36, %cst_24 [1] : vector<16x512xf32> to vector<16xf32>
    %40 = vector.shape_cast %39 : vector<16xf32> to vector<16x1xf32>
    %cst_25 = arith.constant 5.120000e+02 : f32
    %41 = vector.broadcast %cst_25 : f32 to vector<16x1xf32>
    %42 = arith.divf %40, %41 : vector<16x1xf32>
    %43 = vector.broadcast %42 : vector<16x1xf32> to vector<16x512xf32>
    %44 = arith.subf %36, %43 : vector<16x512xf32>
    %45 = arith.mulf %44, %44 : vector<16x512xf32>
    %cst_26 = arith.constant dense<0.000000e+00> : vector<16xf32>
    %46 = vector.multi_reduction <add>, %45, %cst_26 [1] : vector<16x512xf32> to vector<16xf32>
    %47 = vector.shape_cast %46 : vector<16xf32> to vector<16x1xf32>
    %cst_27 = arith.constant 5.120000e+02 : f32
    %48 = vector.broadcast %cst_27 : f32 to vector<16x1xf32>
    %49 = arith.divf %47, %48 : vector<16x1xf32>
    %cst_28 = arith.constant 9.99999974E-6 : f32
    %50 = vector.broadcast %cst_28 : f32 to vector<16x1xf32>
    %51 = arith.addf %49, %50 : vector<16x1xf32>
    %52 = math.rsqrt %51 : vector<16x1xf32>
    %53 = vector.broadcast %52 : vector<16x1xf32> to vector<16x512xf32>
    %54 = arith.mulf %44, %53 : vector<16x512xf32>
    %55 = vector.broadcast %37 : vector<1x512xf32> to vector<16x512xf32>
    %56 = arith.mulf %54, %55 : vector<16x512xf32>
    %57 = vector.broadcast %38 : vector<1x512xf32> to vector<16x512xf32>
    %58 = arith.addf %56, %57 : vector<16x512xf32>
    %cst_29 = arith.constant 0.000000e+00 : f32
    %59 = vector.broadcast %cst_29 : f32 to vector<16x512xf32>
    %60 = arith.maximumf %58, %59 : vector<16x512xf32>
    %61 = arith.truncf %60 : vector<16x512xf32> to vector<16x512xbf16>
    %c0_30 = arith.constant 0 : index
    %c0_31 = arith.constant 0 : index
    %62 = vector.load %arg10[%c0_30, %c0_31] : memref<512x256xbf16, #tpu.memory_space<vmem>>, vector<512x256xbf16>
    %cst_32 = arith.constant dense<0.000000e+00> : vector<16x256xf32>
    %63 = tpu.matmul %61, %62, %cst_32 {dimension_numbers = #tpu.dot_dimension_numbers<[1], [0], [0], [1], [0, 0, 1, 1], [], []>} : vector<16x512xbf16>, vector<512x256xbf16>, vector<16x256xf32> -> vector<16x256xf32>
    %c0_33 = arith.constant 0 : index
    %c0_34 = arith.constant 0 : index
    %64 = vector.load %arg11[%c0_33, %c0_34] : memref<1x256xf32, #tpu.memory_space<vmem>>, vector<1x256xf32>
    %65 = vector.broadcast %64 : vector<1x256xf32> to vector<16x256xf32>
    %66 = arith.addf %63, %65 : vector<16x256xf32>
    %c0_35 = arith.constant 0 : index
    %c0_36 = arith.constant 0 : index
    %67 = vector.load %arg12[%c0_35, %c0_36] : memref<1x256xf32, #tpu.memory_space<vmem>>, vector<1x256xf32>
    %c0_37 = arith.constant 0 : index
    %c0_38 = arith.constant 0 : index
    %68 = vector.load %arg13[%c0_37, %c0_38] : memref<1x256xf32, #tpu.memory_space<vmem>>, vector<1x256xf32>
    %cst_39 = arith.constant dense<0.000000e+00> : vector<16xf32>
    %69 = vector.multi_reduction <add>, %66, %cst_39 [1] : vector<16x256xf32> to vector<16xf32>
    %70 = vector.shape_cast %69 : vector<16xf32> to vector<16x1xf32>
    %cst_40 = arith.constant 2.560000e+02 : f32
    %71 = vector.broadcast %cst_40 : f32 to vector<16x1xf32>
    %72 = arith.divf %70, %71 : vector<16x1xf32>
    %73 = vector.broadcast %72 : vector<16x1xf32> to vector<16x256xf32>
    %74 = arith.subf %66, %73 : vector<16x256xf32>
    %75 = arith.mulf %74, %74 : vector<16x256xf32>
    %cst_41 = arith.constant dense<0.000000e+00> : vector<16xf32>
    %76 = vector.multi_reduction <add>, %75, %cst_41 [1] : vector<16x256xf32> to vector<16xf32>
    %77 = vector.shape_cast %76 : vector<16xf32> to vector<16x1xf32>
    %cst_42 = arith.constant 2.560000e+02 : f32
    %78 = vector.broadcast %cst_42 : f32 to vector<16x1xf32>
    %79 = arith.divf %77, %78 : vector<16x1xf32>
    %cst_43 = arith.constant 9.99999974E-6 : f32
    %80 = vector.broadcast %cst_43 : f32 to vector<16x1xf32>
    %81 = arith.addf %79, %80 : vector<16x1xf32>
    %82 = math.rsqrt %81 : vector<16x1xf32>
    %83 = vector.broadcast %82 : vector<16x1xf32> to vector<16x256xf32>
    %84 = arith.mulf %74, %83 : vector<16x256xf32>
    %85 = vector.broadcast %67 : vector<1x256xf32> to vector<16x256xf32>
    %86 = arith.mulf %84, %85 : vector<16x256xf32>
    %87 = vector.broadcast %68 : vector<1x256xf32> to vector<16x256xf32>
    %88 = arith.addf %86, %87 : vector<16x256xf32>
    %cst_44 = arith.constant 0.000000e+00 : f32
    %89 = vector.broadcast %cst_44 : f32 to vector<16x256xf32>
    %90 = arith.maximumf %88, %89 : vector<16x256xf32>
    %91 = arith.truncf %90 : vector<16x256xf32> to vector<16x256xbf16>
    %c0_45 = arith.constant 0 : index
    %c0_46 = arith.constant 0 : index
    %92 = vector.load %arg14[%c0_45, %c0_46] : memref<256x64xbf16, #tpu.memory_space<vmem>>, vector<256x64xbf16>
    %cst_47 = arith.constant dense<0.000000e+00> : vector<16x64xf32>
    %93 = tpu.matmul %91, %92, %cst_47 {dimension_numbers = #tpu.dot_dimension_numbers<[1], [0], [0], [1], [0, 0, 1, 1], [], []>} : vector<16x256xbf16>, vector<256x64xbf16>, vector<16x64xf32> -> vector<16x64xf32>
    %c0_48 = arith.constant 0 : index
    %c0_49 = arith.constant 0 : index
    %94 = vector.load %arg15[%c0_48, %c0_49] : memref<1x64xf32, #tpu.memory_space<vmem>>, vector<1x64xf32>
    %95 = vector.broadcast %94 : vector<1x64xf32> to vector<16x64xf32>
    %96 = arith.addf %93, %95 : vector<16x64xf32>
    %cst_50 = arith.constant 0.000000e+00 : f32
    %97 = vector.broadcast %cst_50 : f32 to vector<16x64xf32>
    %98 = arith.maximumf %96, %97 : vector<16x64xf32>
    %c0_51 = arith.constant 0 : index
    %c0_52 = arith.constant 0 : index
    %99 = vector.load %arg16[%c0_51, %c0_52] : memref<1x64xf32, #tpu.memory_space<vmem>>, vector<1x64xf32>
    %100 = vector.broadcast %99 : vector<1x64xf32> to vector<16x64xf32>
    %101 = arith.mulf %98, %100 : vector<16x64xf32>
    %cst_53 = arith.constant dense<0.000000e+00> : vector<16xf32>
    %102 = vector.multi_reduction <add>, %101, %cst_53 [1] : vector<16x64xf32> to vector<16xf32>
    %103 = vector.shape_cast %102 : vector<16xf32> to vector<16x1xf32>
    %c0_54 = arith.constant 0 : index
    %c0_55 = arith.constant 0 : index
    %104 = vector.load %arg17[%c0_54, %c0_55] : memref<1x1xf32, #tpu.memory_space<vmem>>, vector<1x1xf32>
    %105 = vector.broadcast %104 : vector<1x1xf32> to vector<16x1xf32>
    %106 = arith.addf %103, %105 : vector<16x1xf32>
    %c0_56 = arith.constant 0 : index
    %c0_57 = arith.constant 0 : index
    %107 = vector.load %arg18[%c0_56, %c0_57] : memref<16x1xf32, #tpu.memory_space<vmem>>, vector<16x1xf32>
    tpu.vector_store %arg18[%c0_56, %c0_57], %106 {strides = array<i32>} : memref<16x1xf32, #tpu.memory_space<vmem>>, vector<16x1xf32>,
    return
  }
  func.func @transform_0(%arg0: i32) -> (i32, i32) {
    %c0_i32 = arith.constant 0 : i32
    %c0_i32_0 = arith.constant 0 : i32
    return %arg0, %c0_i32 : i32, i32
  }
  func.func @transform_1(%arg0: i32) -> (i32, i32) {
    %c0_i32 = arith.constant 0 : i32
    %c0_i32_0 = arith.constant 0 : i32
    %c0_i32_1 = arith.constant 0 : i32
    return %c0_i32, %c0_i32_0 : i32, i32
  }
  func.func @transform_2(%arg0: i32) -> (i32, i32) {
    %c0_i32 = arith.constant 0 : i32
    %c0_i32_0 = arith.constant 0 : i32
    %c0_i32_1 = arith.constant 0 : i32
    return %c0_i32, %c0_i32_0 : i32, i32
  }
  func.func @transform_3(%arg0: i32) -> (i32, i32) {
    %c0_i32 = arith.constant 0 : i32
    %c0_i32_0 = arith.constant 0 : i32
    %c0_i32_1 = arith.constant 0 : i32
    return %c0_i32, %c0_i32_0 : i32, i32
  }
  func.func @transform_4(%arg0: i32) -> (i32, i32) {
    %c0_i32 = arith.constant 0 : i32
    %c0_i32_0 = arith.constant 0 : i32
    %c0_i32_1 = arith.constant 0 : i32
    return %c0_i32, %c0_i32_0 : i32, i32
  }
  func.func @transform_5(%arg0: i32) -> (i32, i32) {
    %c0_i32 = arith.constant 0 : i32
    %c0_i32_0 = arith.constant 0 : i32
    %c0_i32_1 = arith.constant 0 : i32
    return %c0_i32, %c0_i32_0 : i32, i32
  }
  func.func @transform_6(%arg0: i32) -> (i32, i32) {
    %c0_i32 = arith.constant 0 : i32
    %c0_i32_0 = arith.constant 0 : i32
    %c0_i32_1 = arith.constant 0 : i32
    return %c0_i32, %c0_i32_0 : i32, i32
  }
  func.func @transform_7(%arg0: i32) -> (i32, i32) {
    %c0_i32 = arith.constant 0 : i32
    %c0_i32_0 = arith.constant 0 : i32
    %c0_i32_1 = arith.constant 0 : i32
    return %c0_i32, %c0_i32_0 : i32, i32
  }
  func.func @transform_8(%arg0: i32) -> (i32, i32) {
    %c0_i32 = arith.constant 0 : i32
    %c0_i32_0 = arith.constant 0 : i32
    %c0_i32_1 = arith.constant 0 : i32
    return %c0_i32, %c0_i32_0 : i32, i32
  }
  func.func @transform_9(%arg0: i32) -> (i32, i32) {
    %c0_i32 = arith.constant 0 : i32
    %c0_i32_0 = arith.constant 0 : i32
    %c0_i32_1 = arith.constant 0 : i32
    return %c0_i32, %c0_i32_0 : i32, i32
  }
  func.func @transform_10(%arg0: i32) -> (i32, i32) {
    %c0_i32 = arith.constant 0 : i32
    %c0_i32_0 = arith.constant 0 : i32
    %c0_i32_1 = arith.constant 0 : i32
    return %c0_i32, %c0_i32_0 : i32, i32
  }
  func.func @transform_11(%arg0: i32) -> (i32, i32) {
    %c0_i32 = arith.constant 0 : i32
    %c0_i32_0 = arith.constant 0 : i32
    %c0_i32_1 = arith.constant 0 : i32
    return %c0_i32, %c0_i32_0 : i32, i32
  }
  func.func @transform_12(%arg0: i32) -> (i32, i32) {
    %c0_i32 = arith.constant 0 : i32
    %c0_i32_0 = arith.constant 0 : i32
    %c0_i32_1 = arith.constant 0 : i32
    return %c0_i32, %c0_i32_0 : i32, i32
  }
  func.func @transform_13(%arg0: i32) -> (i32, i32) {
    %c0_i32 = arith.constant 0 : i32
    %c0_i32_0 = arith.constant 0 : i32
    %c0_i32_1 = arith.constant 0 : i32
    return %c0_i32, %c0_i32_0 : i32, i32
  }
  func.func @transform_14(%arg0: i32) -> (i32, i32) {
    %c0_i32 = arith.constant 0 : i32
    %c0_i32_0 = arith.constant 0 : i32
    %c0_i32_1 = arith.constant 0 : i32
    return %c0_i32, %c0_i32_0 : i32, i32
  }
  func.func @transform_15(%arg0: i32) -> (i32, i32) {
    %c0_i32 = arith.constant 0 : i32
    %c0_i32_0 = arith.constant 0 : i32
    %c0_i32_1 = arith.constant 0 : i32
    return %c0_i32, %c0_i32_0 : i32, i32
  }
  func.func @transform_16(%arg0: i32) -> (i32, i32) {
    %c0_i32 = arith.constant 0 : i32
    %c0_i32_0 = arith.constant 0 : i32
    %c0_i32_1 = arith.constant 0 : i32
    return %c0_i32, %c0_i32_0 : i32, i32
  }
  func.func @transform_17(%arg0: i32) -> (i32, i32) {
    %c0_i32 = arith.constant 0 : i32
    %c0_i32_0 = arith.constant 0 : i32
    return %arg0, %c0_i32 : i32, i32
  }
}

</mosaic_0001>

<bundles_post_ra>
// kernel: tpu_custom_call.1
= control target key start
LH: loop header
LB: loop body
LE: loop exit
PB: predicated region body
PF: predicated region fallthrough
CT: control target
= control target key end

     0   :  { %s8568_s0 = inlined_call_operand.hbm [shape: f32[16,768], index: 0, kind: input, shape index: {}]   ;;  %s8569_s1 = inlined_call_operand.hbm [shape: bf16[768,1024], index: 1, kind: input, shape index: {}]   ;;  %s8570_s2 = inlined_call_operand.hbm [shape: f32[1,1024], index: 2, kind: input, shape index: {}]   ;;  %s8571_s3 = inlined_call_operand.hbm [shape: f32[1,1024], index: 3, kind: input, shape index: {}]   ;;  %s8572_s4 = inlined_call_operand.hbm [shape: f32[1,1024], index: 4, kind: input, shape index: {}]   ;;  %s8573_s5 = inlined_call_operand.hbm [shape: bf16[1024,512], index: 5, kind: input, shape index: {}]   ;;  %s8574_s6 = inlined_call_operand.hbm [shape: f32[1,512], index: 6, kind: input, shape index: {}]   ;;  %s8575_s7 = inlined_call_operand.hbm [shape: f32[1,512], index: 7, kind: input, shape index: {}]   ;;  %s8576_s8 = inlined_call_operand.hbm [shape: f32[1,512], index: 8, kind: input, shape index: {}]   ;;  %s8577_s9 = inlined_call_operand.hbm [shape: bf16[512,256], index: 9, kind: input, shape index: {}]   ;;  %s8578_s10 = inlined_call_operand.hbm [shape: f32[1,256], index: 10, kind: input, shape index: {}]   ;;  %s8579_s11 = inlined_call_operand.hbm [shape: f32[1,256], index: 11, kind: input, shape index: {}]   ;;  %s8580_s12 = inlined_call_operand.hbm [shape: f32[1,256], index: 12, kind: input, shape index: {}]   ;;  %s8581_s13 = inlined_call_operand.vmem [shape: bf16[256,64], index: 13, kind: input, shape index: {}]   ;;  %s8582_s14 = inlined_call_operand.hbm [shape: f32[1,64], index: 14, kind: input, shape index: {}]   ;;  %s8583_s15 = inlined_call_operand.hbm [shape: f32[1,64], index: 15, kind: input, shape index: {}]   ;;  %s8584_s16 = inlined_call_operand.<no memory space> [shape: f32[1,1], index: 16, kind: input, shape index: {}]   ;;  %s8585_s17 = inlined_call_operand.vmem [shape: f32[16,1], index: 17, kind: output, shape index: {}]  }
   0x1   :  { %8589 = sst [smem:[#allocation34_spill]] %s8568_s0  ;;  %v22_v0 = vstv %s8584_s16 }
   0x2   :  { %8590 = sst [smem:[#allocation35_spill]] %s8569_s1  ;;  %23 = vst [vmem:[#allocation2] sm:$0x1] %v22_v0 }
   0x3   :  { %8591 = sst [smem:[#allocation36_spill]] %s8585_s17 }
   0x4   :  { %24 = vsyncpa [#allocation4], 0 }
   0x5   :  { %25 = vsyncpa [#allocation6], 0 }
   0x6   :  { %26 = vsyncpa [#allocation9], 0 }
   0x7   :  { %27 = vsyncpa [#allocation12], 0 }
   0x8   :  { %28 = vsyncpa [#allocation15], 0 }
   0x9   :  { %29 = vsyncpa [#allocation18], 0 }
   0xa   :  { %30 = vsyncpa [#allocation21], 0 }
   0xb   :  { %31 = vsyncpa [#allocation24], 0  ;;  %s7861_s26 = smov [#allocation5]   ;;  %s8592_s0 = sld [smem:[#allocation35_spill]] }
   0xc   :  { %s49_s27 = sshll.u32 %s7861_s26, 4  ;;  %s50_s27 = int_to_ptr.vmem [resolvable:$true] %s49_s27 }
  0x11   :  { %s7515_s30 = scalar_lea.hbm %s8592_s0, 49152 }
  0x12   :  { %p7516_p0 = scmp.ne.s32.totalorder %s8592_s0, %s7515_s30  ;;  %p7519_p1 = scmp.lt.u32.totalorder %s7515_s30, %s8592_s0 }
  0x14   :  { %p7521_p2 = pnand %p7519_p1, %p7516_p0 }
  0x16   :  { %7524 = shalt.err (!%p7521_p2)
}
  0x17   :  { %s7525_s20 = scalar_lea.vmem %s50_s27, 49152  ;;  %p7530_p4 = scmp.lt.s32.totalorder %s50_s27, %s50_s27 }
  0x18   :  { %p7526_p3 = scmp.ne.s32.totalorder %s50_s27, %s7525_s20  ;;  %p7531_p5 = scmp.lt.s32.totalorder %s7525_s20, %s7525_s20 }
  0x1a   :  { %p7532_p6 = por %p7531_p5, %p7530_p4 }
  0x1c   :  { %p7533_p7 = pnand %p7532_p6, %p7526_p3 }
  0x1e   :  { %7536 = shalt.err (!%p7533_p7)
}
  0x1f   :  { %s7862_s21 = smov 512   ;;  %s7863_s22 = smov 32  }
  0x20   :  { %55 = dma.hbm_to_vmem [thread:$0]  %s8592_s0, 49152, %s50_s27, [#allocation6], %s7862_s21, %s7862_s21, %s7863_s22  }
  0x21   :  { %s7864_s25 = smov [#allocation8]   ;;  %s7865_s28 = smov [#allocation11]  }
  0x22   :  { %s72_s26 = sshll.u32 %s7864_s25, 4  ;;  %s91_s29 = sshll.u32 %s7865_s28, 4  ;;  %s73_s26 = int_to_ptr.vmem [resolvable:$true] %s72_s26  ;;  %s92_s29 = int_to_ptr.vmem [resolvable:$true] %s91_s29 }
  0x23   :  { %s7537_s19 = scalar_lea.hbm %s8571_s3, 128 }
  0x24   :  { %p7538_p8 = scmp.ne.s32.totalorder %s8571_s3, %s7537_s19  ;;  %p7541_p9 = scmp.lt.u32.totalorder %s7537_s19, %s8571_s3 }
  0x26   :  { %p7543_p10 = pnand %p7541_p9, %p7538_p8 }
  0x28   :  { %7546 = shalt.err (!%p7543_p10)
}
  0x29   :  { %s7547_s27 = scalar_lea.vmem %s73_s26, 128  ;;  %p7552_p12 = scmp.lt.s32.totalorder %s73_s26, %s73_s26 }
  0x2a   :  { %p7548_p11 = scmp.ne.s32.totalorder %s73_s26, %s7547_s27  ;;  %p7553_p13 = scmp.lt.s32.totalorder %s7547_s27, %s7547_s27 }
  0x2c   :  { %p7554_p0 = por %p7553_p13, %p7552_p12 }
  0x2e   :  { %p7555_p1 = pnand %p7554_p0, %p7548_p11 }
  0x30   :  { %7558 = shalt.err (!%p7555_p1)
}
  0x31   :  { %75 = dma.hbm_to_vmem [thread:$0]  %s8571_s3, 128, %s73_s26, [#allocation9]  }
  0x32   :  { %s7559_s24 = scalar_lea.hbm %s8573_s5, 32768 }
  0x33   :  { %p7560_p2 = scmp.ne.s32.totalorder %s8573_s5, %s7559_s24  ;;  %p7563_p3 = scmp.lt.u32.totalorder %s7559_s24, %s8573_s5 }
  0x35   :  { %p7565_p4 = pnand %p7563_p3, %p7560_p2 }
  0x37   :  { %7568 = shalt.err (!%p7565_p4)
}
  0x38   :  { %s7569_s18 = scalar_lea.vmem %s92_s29, 32768  ;;  %p7574_p6 = scmp.lt.s32.totalorder %s92_s29, %s92_s29 }
  0x39   :  { %p7570_p5 = scmp.ne.s32.totalorder %s92_s29, %s7569_s18  ;;  %p7575_p7 = scmp.lt.s32.totalorder %s7569_s18, %s7569_s18 }
  0x3b   :  { %p7576_p8 = por %p7575_p7, %p7574_p6 }
  0x3d   :  { %p7577_p9 = pnand %p7576_p8, %p7570_p5 }
  0x3f   :  { %7580 = shalt.err (!%p7577_p9)
}
  0x40   :  { %s7866_s3 = smov 256   ;;  %s7867_s26 = smov 16  }
  0x41   :  { %97 = dma.hbm_to_vmem [thread:$0]  %s8573_s5, 32768, %s92_s29, [#allocation12], %s7866_s3, %s7866_s3, %s7867_s26  }
  0x42   :  { %s7868_s1 = smov [#allocation14]   ;;  %s7869_s27 = smov [#allocation17]  }
  0x43   :  { %s114_s20 = sshll.u32 %s7868_s1, 4  ;;  %s133_s0 = sshll.u32 %s7869_s27, 4  ;;  %s115_s20 = int_to_ptr.vmem [resolvable:$true] %s114_s20  ;;  %s134_s0 = int_to_ptr.vmem [resolvable:$true] %s133_s0 }
  0x44   :  { %s7581_s23 = scalar_lea.hbm %s8575_s7, 64 }
  0x45   :  { %p7582_p10 = scmp.ne.s32.totalorder %s8575_s7, %s7581_s23  ;;  %p7585_p11 = scmp.lt.u32.totalorder %s7581_s23, %s8575_s7 }
  0x47   :  { %p7587_p12 = pnand %p7585_p11, %p7582_p10 }
  0x49   :  { %7590 = shalt.err (!%p7587_p12)
}
  0x4a   :  { %s7591_s5 = scalar_lea.vmem %s115_s20, 64  ;;  %p7596_p0 = scmp.lt.s32.totalorder %s115_s20, %s115_s20 }
  0x4b   :  { %p7592_p13 = scmp.ne.s32.totalorder %s115_s20, %s7591_s5  ;;  %p7597_p1 = scmp.lt.s32.totalorder %s7591_s5, %s7591_s5 }
  0x4d   :  { %p7598_p2 = por %p7597_p1, %p7596_p0 }
  0x4f   :  { %p7599_p3 = pnand %p7598_p2, %p7592_p13 }
  0x51   :  { %7602 = shalt.err (!%p7599_p3)
}
  0x52   :  { %117 = dma.hbm_to_vmem [thread:$0]  %s8575_s7, 64, %s115_s20, [#allocation15]  }
  0x53   :  { %s7603_s26 = scalar_lea.hbm %s8577_s9, 8192 }
  0x54   :  { %p7604_p4 = scmp.ne.s32.totalorder %s8577_s9, %s7603_s26  ;;  %p7607_p5 = scmp.lt.u32.totalorder %s7603_s26, %s8577_s9 }
  0x56   :  { %p7609_p6 = pnand %p7607_p5, %p7604_p4 }
  0x58   :  { %7612 = shalt.err (!%p7609_p6)
}
  0x59   :  { %s7613_s21 = scalar_lea.vmem %s134_s0, 8192  ;;  %p7618_p8 = scmp.lt.s32.totalorder %s134_s0, %s134_s0 }
  0x5a   :  { %p7614_p7 = scmp.ne.s32.totalorder %s134_s0, %s7613_s21  ;;  %p7619_p9 = scmp.lt.s32.totalorder %s7613_s21, %s7613_s21 }
  0x5c   :  { %p7620_p10 = por %p7619_p9, %p7618_p8 }
  0x5e   :  { %p7621_p11 = pnand %p7620_p10, %p7614_p7 }
  0x60   :  { %7624 = shalt.err (!%p7621_p11)
}
  0x61   :  { %s7870_s7 = smov 128   ;;  %s7871_s20 = smov 8  }
  0x62   :  { %139 = dma.hbm_to_vmem [thread:$0]  %s8577_s9, 8192, %s134_s0, [#allocation18], %s7870_s7, %s7870_s7, %s7871_s20  }
  0x63   :  { %s7872_s24 = smov [#allocation20]   ;;  %s7873_s25 = smov [#allocation23]  }
  0x64   :  { %s156_s17 = sshll.u32 %s7872_s24, 4  ;;  %s178_s28 = sshll.u32 %s7873_s25, 4  ;;  %s157_s17 = int_to_ptr.vmem [resolvable:$true] %s156_s17  ;;  %s179_s28 = int_to_ptr.vmem [resolvable:$true] %s178_s28 }
  0x65   :  { %s7625_s30 = scalar_lea.hbm %s8579_s11, 32 }
  0x66   :  { %p7626_p12 = scmp.ne.s32.totalorder %s8579_s11, %s7625_s30  ;;  %p7629_p13 = scmp.lt.u32.totalorder %s7625_s30, %s8579_s11 }
  0x68   :  { %p7631_p0 = pnand %p7629_p13, %p7626_p12 }
  0x6a   :  { %7634 = shalt.err (!%p7631_p0)
}
  0x6b   :  { %s7635_s9 = scalar_lea.vmem %s157_s17, 32  ;;  %p7640_p2 = scmp.lt.s32.totalorder %s157_s17, %s157_s17 }
  0x6c   :  { %p7636_p1 = scmp.ne.s32.totalorder %s157_s17, %s7635_s9  ;;  %p7641_p3 = scmp.lt.s32.totalorder %s7635_s9, %s7635_s9 }
  0x6e   :  { %p7642_p4 = por %p7641_p3, %p7640_p2 }
  0x70   :  { %p7643_p5 = pnand %p7642_p4, %p7636_p1 }
  0x72   :  { %7646 = shalt.err (!%p7643_p5)
}
  0x73   :  { %159 = dma.hbm_to_vmem [thread:$0]  %s8579_s11, 32, %s157_s17, [#allocation21]  }
  0x74   :  { %s7647_s21 = scalar_lea.hbm %s8582_s14, 16 }
  0x75   :  { %p7648_p6 = scmp.ne.s32.totalorder %s8582_s14, %s7647_s21  ;;  %p7651_p7 = scmp.lt.u32.totalorder %s7647_s21, %s8582_s14 }
  0x77   :  { %p7653_p8 = pnand %p7651_p7, %p7648_p6 }
  0x79   :  { %7656 = shalt.err (!%p7653_p8)
}
  0x7a   :  { %s7657_s24 = scalar_lea.vmem %s179_s28, 16  ;;  %s7661_s25 = scalar_lea.vmem %s179_s28, 32 }
  0x7b   :  { %p7658_p9 = scmp.ne.s32.totalorder %s179_s28, %s7657_s24  ;;  %p7662_p10 = scmp.lt.s32.totalorder %s179_s28, %s179_s28 }
  0x7c   :  { %p7663_p11 = scmp.lt.s32.totalorder %s7661_s25, %s7657_s24 }
  0x7e   :  { %p7664_p12 = por %p7663_p11, %p7662_p10 }
  0x80   :  { %p7665_p13 = pnand %p7664_p12, %p7658_p9 }
  0x82   :  { %7668 = shalt.err (!%p7665_p13)
}
  0x83   :  { %181 = dma.hbm_to_vmem [thread:$0]  %s8582_s14, 16, %s179_s28, [#allocation24]  }
  0x84   :  { %s7874_s5 = smov [#allocation3]   ;;  %s8593_s3 = sld [smem:[#allocation34_spill]] }
  0x85   :  { %s37_s29 = sshll.u32 %s7874_s5, 4  ;;  %s38_s29 = int_to_ptr.vmem [resolvable:$true] %s37_s29 }
  0x8a   :  { %s7669_s26 = scalar_lea.hbm %s8593_s3, 1536 }
  0x8b   :  { %p7670_p0 = scmp.ne.s32.totalorder %s8593_s3, %s7669_s26  ;;  %p7673_p1 = scmp.lt.u32.totalorder %s7669_s26, %s8593_s3 }
  0x8d   :  { %p7675_p2 = pnand %p7673_p1, %p7670_p0 }
  0x8f   :  { %7678 = shalt.err (!%p7675_p2)
}
  0x90   :  { %s7679_s1 = scalar_lea.vmem %s38_s29, 1536  ;;  %p7684_p4 = scmp.lt.s32.totalorder %s38_s29, %s38_s29 }
  0x91   :  { %p7680_p3 = scmp.ne.s32.totalorder %s38_s29, %s7679_s1  ;;  %p7685_p5 = scmp.lt.s32.totalorder %s7679_s1, %s7679_s1 }
  0x93   :  { %p7686_p6 = por %p7685_p5, %p7684_p4 }
  0x95   :  { %p7687_p7 = pnand %p7686_p6, %p7680_p3 }
  0x97   :  { %7690 = shalt.err (!%p7687_p7)
}
  0x98   :  { %s7875_s14 = smov 768   ;;  %s7876_s28 = smov 48  }
  0x99   :  { %43 = dma.hbm_to_vmem [thread:$0]  %s8593_s3, 1536, %s38_s29, [#allocation4], %s7875_s14, %s7875_s14, %s7876_s28  }
  0x9a   :  { %s7877_s7 = smov [#allocation7]   ;;  %s7878_s22 = smov [#allocation10]  }
  0x9b   :  { %s62_s20 = sshll.u32 %s7877_s7, 4  ;;  %s82_s23 = sshll.u32 %s7878_s22, 4  ;;  %s63_s20 = int_to_ptr.vmem [resolvable:$true] %s62_s20  ;;  %s83_s23 = int_to_ptr.vmem [resolvable:$true] %s82_s23 }
  0x9c   :  { %s7691_s11 = scalar_lea.hbm %s8570_s2, 128 }
  0x9d   :  { %p7692_p8 = scmp.ne.s32.totalorder %s8570_s2, %s7691_s11  ;;  %p7695_p9 = scmp.lt.u32.totalorder %s7691_s11, %s8570_s2 }
  0x9f   :  { %p7697_p10 = pnand %p7695_p9, %p7692_p8 }
  0xa1   :  { %7700 = shalt.err (!%p7697_p10)
}
  0xa2   :  { %s7701_s29 = scalar_lea.vmem %s63_s20, 128  ;;  %p7706_p12 = scmp.lt.s32.totalorder %s63_s20, %s63_s20 }
  0xa3   :  { %p7702_p11 = scmp.ne.s32.totalorder %s63_s20, %s7701_s29  ;;  %p7707_p13 = scmp.lt.s32.totalorder %s7701_s29, %s7701_s29 }
  0xa5   :  { %p7708_p0 = por %p7707_p13, %p7706_p12 }
  0xa7   :  { %p7709_p1 = pnand %p7708_p0, %p7702_p11 }
  0xa9   :  { %7712 = shalt.err (!%p7709_p1)
}
  0xaa   :  { %65 = dma.hbm_to_vmem [thread:$0]  %s8570_s2, 128, %s63_s20, [#allocation6]  }
  0xab   :  { %s7713_s0 = scalar_lea.hbm %s8572_s4, 128 }
  0xac   :  { %p7714_p2 = scmp.ne.s32.totalorder %s8572_s4, %s7713_s0  ;;  %p7717_p3 = scmp.lt.u32.totalorder %s7713_s0, %s8572_s4 }
  0xae   :  { %p7719_p4 = pnand %p7717_p3, %p7714_p2 }
  0xb0   :  { %7722 = shalt.err (!%p7719_p4)
}
  0xb1   :  { %s7723_s27 = scalar_lea.vmem %s83_s23, 128  ;;  %p7728_p6 = scmp.lt.s32.totalorder %s83_s23, %s83_s23 }
  0xb2   :  { %p7724_p5 = scmp.ne.s32.totalorder %s83_s23, %s7723_s27  ;;  %p7729_p7 = scmp.lt.s32.totalorder %s7723_s27, %s7723_s27 }
  0xb4   :  { %p7730_p8 = por %p7729_p7, %p7728_p6 }
  0xb6   :  { %p7731_p9 = pnand %p7730_p8, %p7724_p5 }
  0xb8   :  { %7734 = shalt.err (!%p7731_p9)
}
  0xb9   :  { %85 = dma.hbm_to_vmem [thread:$0]  %s8572_s4, 128, %s83_s23, [#allocation9]  }
  0xba   :  { %s7879_s7 = smov [#allocation13]   ;;  %s7880_s22 = smov [#allocation16]  }
  0xbb   :  { %s104_s20 = sshll.u32 %s7879_s7, 4  ;;  %s124_s24 = sshll.u32 %s7880_s22, 4  ;;  %s105_s20 = int_to_ptr.vmem [resolvable:$true] %s104_s20  ;;  %s125_s24 = int_to_ptr.vmem [resolvable:$true] %s124_s24 }
  0xbc   :  { %s7735_s17 = scalar_lea.hbm %s8574_s6, 64 }
  0xbd   :  { %p7736_p10 = scmp.ne.s32.totalorder %s8574_s6, %s7735_s17  ;;  %p7739_p11 = scmp.lt.u32.totalorder %s7735_s17, %s8574_s6 }
  0xbf   :  { %p7741_p12 = pnand %p7739_p11, %p7736_p10 }
  0xc1   :  { %7744 = shalt.err (!%p7741_p12)
}
  0xc2   :  { %s7745_s4 = scalar_lea.vmem %s105_s20, 64  ;;  %p7750_p0 = scmp.lt.s32.totalorder %s105_s20, %s105_s20 }
  0xc3   :  { %p7746_p13 = scmp.ne.s32.totalorder %s105_s20, %s7745_s4  ;;  %p7751_p1 = scmp.lt.s32.totalorder %s7745_s4, %s7745_s4 }
  0xc5   :  { %p7752_p2 = por %p7751_p1, %p7750_p0 }
  0xc7   :  { %p7753_p3 = pnand %p7752_p2, %p7746_p13 }
  0xc9   :  { %7756 = shalt.err (!%p7753_p3)
}
  0xca   :  { %107 = dma.hbm_to_vmem [thread:$0]  %s8574_s6, 64, %s105_s20, [#allocation12]  }
  0xcb   :  { %s7757_s9 = scalar_lea.hbm %s8576_s8, 64 }
  0xcc   :  { %p7758_p4 = scmp.ne.s32.totalorder %s8576_s8, %s7757_s9  ;;  %p7761_p5 = scmp.lt.u32.totalorder %s7757_s9, %s8576_s8 }
  0xce   :  { %p7763_p6 = pnand %p7761_p5, %p7758_p4 }
  0xd0   :  { %7766 = shalt.err (!%p7763_p6)
}
  0xd1   :  { %s7767_s28 = scalar_lea.vmem %s125_s24, 64  ;;  %p7772_p8 = scmp.lt.s32.totalorder %s125_s24, %s125_s24 }
  0xd2   :  { %p7768_p7 = scmp.ne.s32.totalorder %s125_s24, %s7767_s28  ;;  %p7773_p9 = scmp.lt.s32.totalorder %s7767_s28, %s7767_s28 }
  0xd4   :  { %p7774_p10 = por %p7773_p9, %p7772_p8 }
  0xd6   :  { %p7775_p11 = pnand %p7774_p10, %p7768_p7 }
  0xd8   :  { %7778 = shalt.err (!%p7775_p11)
}
  0xd9   :  { %127 = dma.hbm_to_vmem [thread:$0]  %s8576_s8, 64, %s125_s24, [#allocation15]  }
  0xda   :  { %s7881_s2 = smov [#allocation19]   ;;  %s7882_s7 = smov [#allocation22]  }
  0xdb   :  { %s146_s21 = sshll.u32 %s7881_s2, 4  ;;  %s166_s20 = sshll.u32 %s7882_s7, 4  ;;  %s147_s21 = int_to_ptr.vmem [resolvable:$true] %s146_s21  ;;  %s167_s20 = int_to_ptr.vmem [resolvable:$true] %s166_s20 }
  0xdc   :  { %s7779_s11 = scalar_lea.hbm %s8578_s10, 32 }
  0xdd   :  { %p7780_p12 = scmp.ne.s32.totalorder %s8578_s10, %s7779_s11  ;;  %p7783_p13 = scmp.lt.u32.totalorder %s7779_s11, %s8578_s10 }
  0xdf   :  { %p7785_p0 = pnand %p7783_p13, %p7780_p12 }
  0xe1   :  { %7788 = shalt.err (!%p7785_p0)
}
  0xe2   :  { %s7789_s8 = scalar_lea.vmem %s147_s21, 32  ;;  %p7794_p2 = scmp.lt.s32.totalorder %s147_s21, %s147_s21 }
  0xe3   :  { %p7790_p1 = scmp.ne.s32.totalorder %s147_s21, %s7789_s8  ;;  %p7795_p3 = scmp.lt.s32.totalorder %s7789_s8, %s7789_s8 }
  0xe5   :  { %p7796_p4 = por %p7795_p3, %p7794_p2 }
  0xe7   :  { %p7797_p5 = pnand %p7796_p4, %p7790_p1 }
  0xe9   :  { %7800 = shalt.err (!%p7797_p5)
}
  0xea   :  { %149 = dma.hbm_to_vmem [thread:$0]  %s8578_s10, 32, %s147_s21, [#allocation18]  }
  0xeb   :  { %s7801_s3 = scalar_lea.hbm %s8580_s12, 32 }
  0xec   :  { %p7802_p6 = scmp.ne.s32.totalorder %s8580_s12, %s7801_s3  ;;  %p7805_p7 = scmp.lt.u32.totalorder %s7801_s3, %s8580_s12 }
  0xee   :  { %p7807_p8 = pnand %p7805_p7, %p7802_p6 }
  0xf0   :  { %7810 = shalt.err (!%p7807_p8)
}
  0xf1   :  { %s7811_s16 = scalar_lea.vmem %s167_s20, 32  ;;  %p7816_p10 = scmp.lt.s32.totalorder %s167_s20, %s167_s20 }
  0xf2   :  { %p7812_p9 = scmp.ne.s32.totalorder %s167_s20, %s7811_s16  ;;  %p7817_p11 = scmp.lt.s32.totalorder %s7811_s16, %s7811_s16 }
  0xf4   :  { %p7818_p12 = por %p7817_p11, %p7816_p10 }
  0xf6   :  { %p7819_p13 = pnand %p7818_p12, %p7812_p9 }
  0xf8   :  { %7822 = shalt.err (!%p7819_p13)
}
  0xf9   :  { %169 = dma.hbm_to_vmem [thread:$0]  %s8580_s12, 32, %s167_s20, [#allocation21]  }
  0xfa   :  { %s7883_s14 = smov [#allocation25]   ;;  %s7823_s2 = scalar_lea.hbm %s8583_s15, 16 }
  0xfb   :  { %s188_s28 = sshll.u32 %s7883_s14, 4  ;;  %p7824_p0 = scmp.ne.s32.totalorder %s8583_s15, %s7823_s2  ;;  %s189_s28 = int_to_ptr.vmem [resolvable:$true] %s188_s28 }
  0xfc   :  { %p7827_p1 = scmp.lt.u32.totalorder %s7823_s2, %s8583_s15 }
  0xfe   :  { %p7829_p2 = pnand %p7827_p1, %p7824_p0 }
 0x100   :  { %7832 = shalt.err (!%p7829_p2)
}
 0x101   :  { %s7833_s11 = scalar_lea.vmem %s189_s28, 16  ;;  %s7837_s12 = scalar_lea.vmem %s189_s28, 32 }
 0x102   :  { %p7834_p3 = scmp.ne.s32.totalorder %s189_s28, %s7833_s11  ;;  %p7838_p4 = scmp.lt.s32.totalorder %s189_s28, %s189_s28 }
 0x103   :  { %p7839_p5 = scmp.lt.s32.totalorder %s7837_s12, %s7833_s11 }
 0x105   :  { %p7840_p6 = por %p7839_p5, %p7838_p4 }
 0x107   :  { %p7841_p7 = pnand %p7840_p6, %p7834_p3 }
 0x109   :  { %7844 = shalt.err (!%p7841_p7)
}
 0x10a   :  { %191 = dma.hbm_to_vmem [thread:$0]  %s8583_s15, 16, %s189_s28, [#allocation24]  }
 0x10b   :  { %7845 = dma.done.wait [#allocation4], 1536  }
 0x10c   :  { %7846 = vsyncadd [#allocation4], 4294965760 }
 0x10d   :  { %7847 = dma.done.wait [#allocation6], 49280  }
 0x10e   :  { %7848 = vsyncadd [#allocation6], 4294918016 }
 0x10f   :  { %7849 = dma.done.wait [#allocation9], 256  }
 0x110   :  { %7850 = vsyncadd [#allocation9], 4294967040 }
 0x111   :  { %7851 = dma.done.wait [#allocation12], 32832  }
 0x112   :  { %7852 = vsyncadd [#allocation12], 4294934464 }
 0x113   :  { %7853 = dma.done.wait [#allocation15], 128  }
 0x114   :  { %7854 = vsyncadd [#allocation15], 4294967168 }
 0x115   :  { %7855 = dma.done.wait [#allocation18], 8224  }
 0x116   :  { %7856 = vsyncadd [#allocation18], 4294959072 }
 0x117   :  { %7857 = dma.done.wait [#allocation21], 64  }
 0x118   :  { %7858 = vsyncadd [#allocation21], 4294967232 }
 0x119   :  { %7859 = dma.done.wait [#allocation24], 32  }
 0x11a   :  { %7860 = vsyncadd [#allocation24], 4294967264  ;;  %v258_v1 = vld [vmem:[#allocation5] sm:$0xff]  ;;  %v241_v54 = vld [vmem:[#allocation3 + $0x8] sm:$0xff]  ;;  %vm6120_vm0 = vcmask 523264   ;;  %vm6136_vm1 = vcmask 7168  }
 0x11b   :  { %v262_v2 = vld [vmem:[#allocation5 + $0x20] sm:$0xff]  ;;  %v247_v55 = vld [vmem:[#allocation3 + $0x38] sm:$0xff]  ;;  %v249_v63 = vld [vmem:[#allocation3 + $0x48] sm:$0xff]  ;;  %s8594_s18 = sld [smem:[#allocation36_spill]] }
 0x11c   :  { %v386_v3 = vld [vmem:[#allocation5 + $0x400] sm:$0xff]  ;;  %v6152_v4 = vcombine.high %v258_v1, %v262_v2  ;;  %v6151_v6 = vcombine.low %v258_v1, %v262_v2  ;;  %v8157_v59 = vpack.c.bf16 %v247_v55, %v241_v54  ;;  %v243_v60 = vld [vmem:[#allocation3 + $0x18] sm:$0xff] }
 0x11d   :  { %v390_v5 = vld [vmem:[#allocation5 + $0x420] sm:$0xff]  ;;  %v8160_v1 = vpack.c.bf16 %v249_v63, %v243_v60 }
 0x11e   :  { %v266_v7 = vld [vmem:[#allocation5 + $0x40] sm:$0xff]  ;;  %v6280_v9 = vcombine.high %v386_v3, %v390_v5  ;;  %v6279_v10 = vcombine.low %v386_v3, %v390_v5  ;;  %2604 = vmatprep.subr.bf16.mxu1 %v6152_v4  ;;  %2636 = vmatprep.mubr.bf16.mxu1 %v8157_v59 }
 0x11f   :  { %v270_v8 = vld [vmem:[#allocation5 + $0x60] sm:$0xff]  ;;  %2605 = vmatpush1.bf16.msra.mxu1 %v6151_v6  ;;  %2679 = vmatprep.mubr.bf16.mxu0 %v8160_v1 }
 0x120   :  { %v6160_v11 = vcombine.high %v266_v7, %v270_v8  ;;  %v394_v12 = vld [vmem:[#allocation5 + $0x440] sm:$0xff]  ;;  %2647 = vmatprep.subr.bf16.mxu0 %v6280_v9  ;;  %v6159_v19 = vcombine.low %v266_v7, %v270_v8 }
 0x121   :  { %v398_v13 = vld [vmem:[#allocation5 + $0x460] sm:$0xff]  ;;  %2648 = vmatpush1.bf16.msra.mxu0 %v6279_v10 }
 0x122   :  { %v274_v14 = vld [vmem:[#allocation5 + $0x80] sm:$0xff]  ;;  %v6288_v15 = vcombine.high %v394_v12, %v398_v13  ;;  %2606 = vmatprep.subr.bf16.mxu1 %v6160_v11  ;;  %v6287_v20 = vcombine.low %v394_v12, %v398_v13 }
 0x123   :  { %v278_v16 = vld [vmem:[#allocation5 + $0xa0] sm:$0xff]  ;;  %2607 = vmatpush1.bf16.msra.mxu1 %v6159_v19 }
 0x124   :  { %v402_v17 = vld [vmem:[#allocation5 + $0x480] sm:$0xff]  ;;  %v6168_v21 = vcombine.high %v274_v14, %v278_v16  ;;  %2649 = vmatprep.subr.bf16.mxu0 %v6288_v15  ;;  %v6167_v27 = vcombine.low %v274_v14, %v278_v16 }
 0x125   :  { %v406_v18 = vld [vmem:[#allocation5 + $0x4a0] sm:$0xff]  ;;  %2650 = vmatpush1.bf16.msra.mxu0 %v6287_v20 }
 0x126   :  { %v6296_v22 = vcombine.high %v402_v17, %v406_v18  ;;  %v282_v23 = vld [vmem:[#allocation5 + $0xc0] sm:$0xff]  ;;  %2608 = vmatprep.subr.bf16.mxu1 %v6168_v21  ;;  %v6295_v28 = vcombine.low %v402_v17, %v406_v18 }
 0x127   :  { %v286_v24 = vld [vmem:[#allocation5 + $0xe0] sm:$0xff]  ;;  %2609 = vmatpush1.bf16.msra.mxu1 %v6167_v27 }
 0x128   :  { %v410_v25 = vld [vmem:[#allocation5 + $0x4c0] sm:$0xff]  ;;  %v6176_v29 = vcombine.high %v282_v23, %v286_v24  ;;  %2651 = vmatprep.subr.bf16.mxu0 %v6296_v22  ;;  %v6175_v35 = vcombine.low %v282_v23, %v286_v24 }
 0x129   :  { %v414_v26 = vld [vmem:[#allocation5 + $0x4e0] sm:$0xff]  ;;  %2652 = vmatpush1.bf16.msra.mxu0 %v6295_v28 }
 0x12a   :  { %v6304_v30 = vcombine.high %v410_v25, %v414_v26  ;;  %v290_v31 = vld [vmem:[#allocation5 + $0x100] sm:$0xff]  ;;  %2610 = vmatprep.subr.bf16.mxu1 %v6176_v29  ;;  %v6303_v36 = vcombine.low %v410_v25, %v414_v26 }
 0x12b   :  { %v294_v32 = vld [vmem:[#allocation5 + $0x120] sm:$0xff]  ;;  %2611 = vmatpush1.bf16.msra.mxu1 %v6175_v35 }
 0x12c   :  { %v418_v33 = vld [vmem:[#allocation5 + $0x500] sm:$0xff]  ;;  %v6184_v37 = vcombine.high %v290_v31, %v294_v32  ;;  %2653 = vmatprep.subr.bf16.mxu0 %v6304_v30  ;;  %v6183_v43 = vcombine.low %v290_v31, %v294_v32 }
 0x12d   :  { %v422_v34 = vld [vmem:[#allocation5 + $0x520] sm:$0xff]  ;;  %2654 = vmatpush1.bf16.msra.mxu0 %v6303_v36 }
 0x12e   :  { %v6312_v38 = vcombine.high %v418_v33, %v422_v34  ;;  %v298_v39 = vld [vmem:[#allocation5 + $0x140] sm:$0xff]  ;;  %2612 = vmatprep.subr.bf16.mxu1 %v6184_v37  ;;  %v6311_v44 = vcombine.low %v418_v33, %v422_v34 }
 0x12f   :  { %v302_v40 = vld [vmem:[#allocation5 + $0x160] sm:$0xff]  ;;  %2613 = vmatpush1.bf16.msra.mxu1 %v6183_v43 }
 0x130   :  { %v426_v41 = vld [vmem:[#allocation5 + $0x540] sm:$0xff]  ;;  %v6192_v45 = vcombine.high %v298_v39, %v302_v40  ;;  %2655 = vmatprep.subr.bf16.mxu0 %v6312_v38  ;;  %v6191_v51 = vcombine.low %v298_v39, %v302_v40 }
 0x131   :  { %v430_v42 = vld [vmem:[#allocation5 + $0x560] sm:$0xff]  ;;  %2656 = vmatpush1.bf16.msra.mxu0 %v6311_v44 }
 0x132   :  { %v6320_v46 = vcombine.high %v426_v41, %v430_v42  ;;  %v306_v47 = vld [vmem:[#allocation5 + $0x180] sm:$0xff]  ;;  %2614 = vmatprep.subr.bf16.mxu1 %v6192_v45  ;;  %v6319_v52 = vcombine.low %v426_v41, %v430_v42 }
 0x133   :  { %v310_v48 = vld [vmem:[#allocation5 + $0x1a0] sm:$0xff]  ;;  %2615 = vmatpush1.bf16.msra.mxu1 %v6191_v51 }
 0x134   :  { %v434_v49 = vld [vmem:[#allocation5 + $0x580] sm:$0xff]  ;;  %v6200_v53 = vcombine.high %v306_v47, %v310_v48  ;;  %2657 = vmatprep.subr.bf16.mxu0 %v6320_v46  ;;  %v6199_v0 = vcombine.low %v306_v47, %v310_v48 }
 0x135   :  { %v438_v50 = vld [vmem:[#allocation5 + $0x5a0] sm:$0xff]  ;;  %2658 = vmatpush1.bf16.msra.mxu0 %v6319_v52 }
 0x136   :  { %v6328_v56 = vcombine.high %v434_v49, %v438_v50  ;;  %v314_v57 = vld [vmem:[#allocation5 + $0x1c0] sm:$0xff]  ;;  %2616 = vmatprep.subr.bf16.mxu1 %v6200_v53  ;;  %v6327_v2 = vcombine.low %v434_v49, %v438_v50 }
 0x137   :  { %v318_v58 = vld [vmem:[#allocation5 + $0x1e0] sm:$0xff]  ;;  %2617 = vmatpush1.bf16.msra.mxu1 %v6199_v0 }
 0x138   :  { %v442_v61 = vld [vmem:[#allocation5 + $0x5c0] sm:$0xff]  ;;  %v6208_v3 = vcombine.high %v314_v57, %v318_v58  ;;  %2659 = vmatprep.subr.bf16.mxu0 %v6328_v56  ;;  %v6207_v9 = vcombine.low %v314_v57, %v318_v58 }
 0x139   :  { %v446_v62 = vld [vmem:[#allocation5 + $0x5e0] sm:$0xff]  ;;  %2660 = vmatpush1.bf16.msra.mxu0 %v6327_v2 }
 0x13a   :  { %v6336_v4 = vcombine.high %v442_v61, %v446_v62  ;;  %v322_v5 = vld [vmem:[#allocation5 + $0x200] sm:$0xff]  ;;  %2618 = vmatprep.subr.bf16.mxu1 %v6208_v3  ;;  %v6335_v10 = vcombine.low %v442_v61, %v446_v62 }
 0x13b   :  { %v326_v6 = vld [vmem:[#allocation5 + $0x220] sm:$0xff]  ;;  %2619 = vmatpush1.bf16.msra.mxu1 %v6207_v9 }
 0x13c   :  { %v450_v7 = vld [vmem:[#allocation5 + $0x600] sm:$0xff]  ;;  %v6216_v11 = vcombine.high %v322_v5, %v326_v6  ;;  %2661 = vmatprep.subr.bf16.mxu0 %v6336_v4  ;;  %v6215_v17 = vcombine.low %v322_v5, %v326_v6 }
 0x13d   :  { %v454_v8 = vld [vmem:[#allocation5 + $0x620] sm:$0xff]  ;;  %2662 = vmatpush1.bf16.msra.mxu0 %v6335_v10 }
 0x13e   :  { %v6344_v12 = vcombine.high %v450_v7, %v454_v8  ;;  %v330_v13 = vld [vmem:[#allocation5 + $0x240] sm:$0xff]  ;;  %2620 = vmatprep.subr.bf16.mxu1 %v6216_v11  ;;  %v6343_v18 = vcombine.low %v450_v7, %v454_v8  ;;  %v259_v7 = vld [vmem:[#allocation5 + $0x8] sm:$0xff] }
 0x13f   :  { %v334_v14 = vld [vmem:[#allocation5 + $0x260] sm:$0xff]  ;;  %2621 = vmatpush1.bf16.msra.mxu1 %v6215_v17  ;;  %v263_v8 = vld [vmem:[#allocation5 + $0x28] sm:$0xff] }
 0x140   :  { %v458_v15 = vld [vmem:[#allocation5 + $0x640] sm:$0xff]  ;;  %v6224_v19 = vcombine.high %v330_v13, %v334_v14  ;;  %2663 = vmatprep.subr.bf16.mxu0 %v6344_v12  ;;  %v6223_v25 = vcombine.low %v330_v13, %v334_v14  ;;  %v246_v13 = vld [vmem:[#allocation3 + $0x30] sm:$0xff] }
 0x141   :  { %v462_v16 = vld [vmem:[#allocation5 + $0x660] sm:$0xff]  ;;  %2664 = vmatpush1.bf16.msra.mxu0 %v6343_v18 }
 0x142   :  { %v6352_v20 = vcombine.high %v458_v15, %v462_v16  ;;  %v338_v21 = vld [vmem:[#allocation5 + $0x280] sm:$0xff]  ;;  %2622 = vmatprep.subr.bf16.mxu1 %v6224_v19  ;;  %v6351_v26 = vcombine.low %v458_v15, %v462_v16  ;;  %v6154_v15 = vcombine.high %v259_v7, %v263_v8  ;;  %v242_v16 = vld [vmem:[#allocation3 + $0x10] sm:$0xff] }
 0x143   :  { %v342_v22 = vld [vmem:[#allocation5 + $0x2a0] sm:$0xff]  ;;  %2623 = vmatpush1.bf16.msra.mxu1 %v6223_v25  ;;  %v251_v25 = vld [vmem:[#allocation3 + $0x58] sm:$0xff] }
 0x144   :  { %v466_v23 = vld [vmem:[#allocation5 + $0x680] sm:$0xff]  ;;  %v6232_v27 = vcombine.high %v338_v21, %v342_v22  ;;  %2665 = vmatprep.subr.bf16.mxu0 %v6352_v20  ;;  %v6231_v33 = vcombine.low %v338_v21, %v342_v22  ;;  %v267_v20 = vld [vmem:[#allocation5 + $0x48] sm:$0xff] }
 0x145   :  { %v470_v24 = vld [vmem:[#allocation5 + $0x6a0] sm:$0xff]  ;;  %2666 = vmatpush1.bf16.msra.mxu0 %v6351_v26  ;;  %v271_v21 = vld [vmem:[#allocation5 + $0x68] sm:$0xff]  ;;  %v6153_v26 = vcombine.low %v259_v7, %v263_v8 }
 0x146   :  { %v6360_v28 = vcombine.high %v466_v23, %v470_v24  ;;  %v346_v29 = vld [vmem:[#allocation5 + $0x2c0] sm:$0xff]  ;;  %2624 = vmatprep.subr.bf16.mxu1 %v6232_v27  ;;  %v6359_v34 = vcombine.low %v466_v23, %v470_v24  ;;  %v245_v24 = vld [vmem:[#allocation3 + $0x28] sm:$0xff] }
 0x147   :  { %v350_v30 = vld [vmem:[#allocation5 + $0x2e0] sm:$0xff]  ;;  %2625 = vmatpush1.bf16.msra.mxu1 %v6231_v33  ;;  %v8167_v33 = vpack.c.bf16 %v251_v25, %v245_v24 }
 0x148   :  { %v474_v31 = vld [vmem:[#allocation5 + $0x6c0] sm:$0xff]  ;;  %v6240_v35 = vcombine.high %v346_v29, %v350_v30  ;;  %2667 = vmatprep.subr.bf16.mxu0 %v6360_v28  ;;  %v6239_v41 = vcombine.low %v346_v29, %v350_v30  ;;  %v6162_v29 = vcombine.high %v267_v20, %v271_v21 }
 0x149   :  { %v478_v32 = vld [vmem:[#allocation5 + $0x6e0] sm:$0xff]  ;;  %2668 = vmatpush1.bf16.msra.mxu0 %v6359_v34 }
 0x14a   :  { %v6368_v36 = vcombine.high %v474_v31, %v478_v32  ;;  %v354_v37 = vld [vmem:[#allocation5 + $0x300] sm:$0xff]  ;;  %2626 = vmatprep.subr.bf16.mxu1 %v6240_v35  ;;  %v6367_v42 = vcombine.low %v474_v31, %v478_v32  ;;  %v275_v31 = vld [vmem:[#allocation5 + $0x88] sm:$0xff] }
 0x14b   :  { %v358_v38 = vld [vmem:[#allocation5 + $0x320] sm:$0xff]  ;;  %2627 = vmatpush1.bf16.msra.mxu1 %v6239_v41  ;;  %v279_v32 = vld [vmem:[#allocation5 + $0xa8] sm:$0xff] }
 0x14c   :  { %v482_v39 = vld [vmem:[#allocation5 + $0x700] sm:$0xff]  ;;  %v6248_v43 = vcombine.high %v354_v37, %v358_v38  ;;  %2669 = vmatprep.subr.bf16.mxu0 %v6368_v36  ;;  %v6247_v49 = vcombine.low %v354_v37, %v358_v38  ;;  %v6161_v36 = vcombine.low %v267_v20, %v271_v21  ;;  %v6170_v38 = vcombine.high %v275_v31, %v279_v32  ;;  %v327_v21 = vld [vmem:[#allocation5 + $0x228] sm:$0xff] }
 0x14d   :  { %v486_v40 = vld [vmem:[#allocation5 + $0x720] sm:$0xff]  ;;  %2670 = vmatpush1.bf16.msra.mxu0 %v6367_v42  ;;  %v283_v42 = vld [vmem:[#allocation5 + $0xc8] sm:$0xff] }
 0x14e   :  { %v6376_v44 = vcombine.high %v482_v39, %v486_v40  ;;  %v362_v45 = vld [vmem:[#allocation5 + $0x340] sm:$0xff]  ;;  %2628 = vmatprep.subr.bf16.mxu1 %v6248_v43  ;;  %v6375_v50 = vcombine.low %v482_v39, %v486_v40  ;;  %v287_v43 = vld [vmem:[#allocation5 + $0xe8] sm:$0xff] }
 0x14f   :  { %v366_v46 = vld [vmem:[#allocation5 + $0x360] sm:$0xff]  ;;  %2629 = vmatpush1.bf16.msra.mxu1 %v6247_v49  ;;  %v291_v49 = vld [vmem:[#allocation5 + $0x108] sm:$0xff] }
 0x150   :  { %v490_v47 = vld [vmem:[#allocation5 + $0x740] sm:$0xff]  ;;  %v6256_v51 = vcombine.high %v362_v45, %v366_v46  ;;  %2671 = vmatprep.subr.bf16.mxu0 %v6376_v44  ;;  %v6255_v57 = vcombine.low %v362_v45, %v366_v46  ;;  %v6169_v44 = vcombine.low %v275_v31, %v279_v32  ;;  %v6178_v46 = vcombine.high %v283_v42, %v287_v43  ;;  %v335_v31 = vld [vmem:[#allocation5 + $0x268] sm:$0xff] }
 0x151   :  { %v494_v48 = vld [vmem:[#allocation5 + $0x760] sm:$0xff]  ;;  %2672 = vmatpush1.bf16.msra.mxu0 %v6375_v50 }
 0x152   :  { %v6384_v52 = vcombine.high %v490_v47, %v494_v48  ;;  %v370_v53 = vld [vmem:[#allocation5 + $0x380] sm:$0xff]  ;;  %2630 = vmatprep.subr.bf16.mxu1 %v6256_v51  ;;  %v6383_v58 = vcombine.low %v490_v47, %v494_v48  ;;  %v295_v51 = vld [vmem:[#allocation5 + $0x128] sm:$0xff] }
 0x153   :  { %v374_v54 = vld [vmem:[#allocation5 + $0x3a0] sm:$0xff]  ;;  %2631 = vmatpush1.bf16.msra.mxu1 %v6255_v57  ;;  %v299_v57 = vld [vmem:[#allocation5 + $0x148] sm:$0xff] }
 0x154   :  { %v498_v55 = vld [vmem:[#allocation5 + $0x780] sm:$0xff]  ;;  %v6264_v60 = vcombine.high %v370_v53, %v374_v54  ;;  %2673 = vmatprep.subr.bf16.mxu0 %v6384_v52  ;;  %v6263_v3 = vcombine.low %v370_v53, %v374_v54  ;;  %v6177_v52 = vcombine.low %v283_v42, %v287_v43  ;;  %v6186_v54 = vcombine.high %v291_v49, %v295_v51 }
 0x155   :  { %v502_v56 = vld [vmem:[#allocation5 + $0x7a0] sm:$0xff]  ;;  %2674 = vmatpush1.bf16.msra.mxu0 %v6383_v58 }
 0x156   :  { %v6392_v61 = vcombine.high %v498_v55, %v502_v56  ;;  %v378_v62 = vld [vmem:[#allocation5 + $0x3c0] sm:$0xff]  ;;  %2632 = vmatprep.subr.bf16.mxu1 %v6264_v60  ;;  %v6391_v4 = vcombine.low %v498_v55, %v502_v56  ;;  %v303_v60 = vld [vmem:[#allocation5 + $0x168] sm:$0xff] }
 0x157   :  { %v382_v63 = vld [vmem:[#allocation5 + $0x3e0] sm:$0xff]  ;;  %2633 = vmatpush1.bf16.msra.mxu1 %v6263_v3  ;;  %v307_v3 = vld [vmem:[#allocation5 + $0x188] sm:$0xff] }
 0x158   :  { %v506_v0 = vld [vmem:[#allocation5 + $0x7c0] sm:$0xff]  ;;  %v6272_v5 = vcombine.high %v378_v62, %v382_v63  ;;  %2675 = vmatprep.subr.bf16.mxu0 %v6392_v61  ;;  %v6271_v11 = vcombine.low %v378_v62, %v382_v63  ;;  %v6185_v61 = vcombine.low %v291_v49, %v295_v51  ;;  %v6194_v63 = vcombine.high %v299_v57, %v303_v60 }
 0x159   :  { %v510_v2 = vld [vmem:[#allocation5 + $0x7e0] sm:$0xff]  ;;  %2676 = vmatpush1.bf16.msra.mxu0 %v6391_v4 }
 0x15a   :  { %v6400_v6 = vcombine.high %v506_v0, %v510_v2  ;;  %v514_v9 = vld [vmem:[#allocation5 + $0x800] sm:$0xff]  ;;  %2634 = vmatprep.subr.bf16.mxu1 %v6272_v5  ;;  %v6399_v14 = vcombine.low %v506_v0, %v510_v2  ;;  %v311_v5 = vld [vmem:[#allocation5 + $0x1a8] sm:$0xff] }
 0x15b   :  { %v518_v10 = vld [vmem:[#allocation5 + $0x820] sm:$0xff]  ;;  %2635 = vmatpush1.bf16.msra.mxu1 %v6271_v11  ;;  %v6202_v8 = vcombine.high %v307_v3, %v311_v5  ;;  %v315_v11 = vld [vmem:[#allocation5 + $0x1c8] sm:$0xff] }
 0x15c   :  { %v240_v12 = vld [vmem:[#allocation3] sm:$0xff]  ;;  %2677 = vmatprep.subr.bf16.mxu0 %v6400_v6  ;;  %v6408_v18 = vcombine.high %v514_v9, %v518_v10  ;;  %v6407_v28 = vcombine.low %v514_v9, %v518_v10  ;;  %2733 = vmatprep.subr.bf16.mxu1 %v6154_v15  ;;  %v6193_v6 = vcombine.low %v299_v57, %v303_v60 }
 0x15d   :  { %v248_v17 = vld [vmem:[#allocation3 + $0x40] sm:$0xff]  ;;  %v8163_v22 = vpack.c.bf16 %v246_v13, %v240_v12  ;;  %2678 = vmatpush1.bf16.msra.mxu0 %v6399_v14  ;;  %v319_v13 = vld [vmem:[#allocation5 + $0x1e8] sm:$0xff]  ;;  %v6201_v14 = vcombine.low %v307_v3, %v311_v5 }
 0x15e   :  { %v522_v19 = vld [vmem:[#allocation5 + $0x840] sm:$0xff]  ;;  %v8165_v27 = vpack.c.bf16 %v248_v17, %v242_v16  ;;  %2690 = vmatprep.subr.bf16.mxu0 %v6408_v18  ;;  %v6210_v16 = vcombine.high %v315_v11, %v319_v13 }
 0x15f   :  { %v526_v23 = vld [vmem:[#allocation5 + $0x860] sm:$0xff]  ;;  %2637 = vmatmul.mubr.bf16.vlgmr.msra.gmra.mrb[0].mxu1 %v8163_v22 }
 0x160   :  { %v6416_v30 = vcombine.high %v522_v19, %v526_v23  ;;  %v530_v34 = vld [vmem:[#allocation5 + $0x880] sm:$0xff]  ;;  %2680 = vmatmul.mubr.bf16.vlgmr.msra.gmra.mrb[0].mxu0 %v8165_v27  ;;  %2734 = vmatpush1.bf16.msra.mxu1 %v6153_v26  ;;  %v6415_v37 = vcombine.low %v522_v19, %v526_v23  ;;  %v323_v19 = vld [vmem:[#allocation5 + $0x208] sm:$0xff]  ;;  %v6209_v23 = vcombine.low %v315_v11, %v319_v13 }
 0x161   :  { %v534_v35 = vld [vmem:[#allocation5 + $0x8a0] sm:$0xff]  ;;  %2691 = vmatpush1.bf16.msra.mxu0 %v6407_v28  ;;  %2735 = vmatprep.subr.bf16.mxu1 %v6162_v29  ;;  %v6218_v25 = vcombine.high %v323_v19, %v327_v21  ;;  %v331_v29 = vld [vmem:[#allocation5 + $0x248] sm:$0xff]  ;;  %v6217_v32 = vcombine.low %v323_v19, %v327_v21 }
 0x162   :  { %v538_v39 = vld [vmem:[#allocation5 + $0x8c0] sm:$0xff]  ;;  %2692 = vmatprep.subr.bf16.mxu0 %v6416_v30  ;;  %v6424_v41 = vcombine.high %v530_v34, %v534_v35  ;;  %2722 = vmatprep.mubr.bf16.mxu0 %v8167_v33  ;;  %v6423_v45 = vcombine.low %v530_v34, %v534_v35  ;;  %v6226_v35 = vcombine.high %v331_v29, %v335_v31 }
 0x163   :  { %v542_v40 = vld [vmem:[#allocation5 + $0x8e0] sm:$0xff]  ;;  %2765 = vmatprep.mubr.bf16.mxu1 %v8157_v59 }
 0x164   :  { %2736 = vmatpush1.bf16.msra.mxu1 %v6161_v36  ;;  %v546_v47 = vld [vmem:[#allocation5 + $0x900] sm:$0xff]  ;;  %v6432_v50 = vcombine.high %v538_v39, %v542_v40  ;;  %v6431_v53 = vcombine.low %v538_v39, %v542_v40  ;;  %v343_v40 = vld [vmem:[#allocation5 + $0x2a8] sm:$0xff] }
 0x165   :  { %2693 = vmatpush1.bf16.msra.mxu0 %v6415_v37  ;;  %2737 = vmatprep.subr.bf16.mxu1 %v6170_v38  ;;  %v550_v48 = vld [vmem:[#allocation5 + $0x920] sm:$0xff]  ;;  %v339_v38 = vld [vmem:[#allocation5 + $0x288] sm:$0xff] }
 0x166   :  { %2694 = vmatprep.subr.bf16.mxu0 %v6424_v41  ;;  %v554_v55 = vld [vmem:[#allocation5 + $0x940] sm:$0xff]  ;;  %v6440_v58 = vcombine.high %v546_v47, %v550_v48  ;;  %v6439_v62 = vcombine.low %v546_v47, %v550_v48  ;;  %v6225_v41 = vcombine.low %v331_v29, %v335_v31  ;;  %v6234_v43 = vcombine.high %v339_v38, %v343_v40  ;;  %v351_v48 = vld [vmem:[#allocation5 + $0x2e8] sm:$0xff] }
 0x167   :  { %v558_v56 = vld [vmem:[#allocation5 + $0x960] sm:$0xff]  ;;  %v6233_v49 = vcombine.low %v339_v38, %v343_v40 }
 0x168   :  { %2738 = vmatpush1.bf16.msra.mxu1 %v6169_v44  ;;  %v562_v0 = vld [vmem:[#allocation5 + $0x980] sm:$0xff]  ;;  %v6448_v4 = vcombine.high %v554_v55, %v558_v56  ;;  %v6447_v7 = vcombine.low %v554_v55, %v558_v56  ;;  %v359_v56 = vld [vmem:[#allocation5 + $0x328] sm:$0xff] }
 0x169   :  { %2695 = vmatpush1.bf16.msra.mxu0 %v6423_v45  ;;  %2739 = vmatprep.subr.bf16.mxu1 %v6178_v46  ;;  %v566_v2 = vld [vmem:[#allocation5 + $0x9a0] sm:$0xff]  ;;  %v347_v46 = vld [vmem:[#allocation5 + $0x2c8] sm:$0xff] }
 0x16a   :  { %2696 = vmatprep.subr.bf16.mxu0 %v6432_v50  ;;  %v570_v9 = vld [vmem:[#allocation5 + $0x9c0] sm:$0xff]  ;;  %v6456_v12 = vcombine.high %v562_v0, %v566_v2  ;;  %v6455_v15 = vcombine.low %v562_v0, %v566_v2  ;;  %v6242_v51 = vcombine.high %v347_v46, %v351_v48  ;;  %v6241_v57 = vcombine.low %v347_v46, %v351_v48  ;;  %v367_v2 = vld [vmem:[#allocation5 + $0x368] sm:$0xff]  ;;  %v276_v46 = vld [vmem:[#allocation5 + $0x90] sm:$0xff] }
 0x16b   :  { %v574_v10 = vld [vmem:[#allocation5 + $0x9e0] sm:$0xff]  ;;  %v280_v48 = vld [vmem:[#allocation5 + $0xb0] sm:$0xff] }
 0x16c   :  { %2740 = vmatpush1.bf16.msra.mxu1 %v6177_v52  ;;  %v578_v17 = vld [vmem:[#allocation5 + $0xa00] sm:$0xff]  ;;  %v6464_v20 = vcombine.high %v570_v9, %v574_v10  ;;  %v6463_v24 = vcombine.low %v570_v9, %v574_v10  ;;  %v375_v10 = vld [vmem:[#allocation5 + $0x3a8] sm:$0xff] }
 0x16d   :  { %2697 = vmatpush1.bf16.msra.mxu0 %v6431_v53  ;;  %2741 = vmatprep.subr.bf16.mxu1 %v6186_v54  ;;  %v582_v18 = vld [vmem:[#allocation5 + $0xa20] sm:$0xff]  ;;  %v355_v54 = vld [vmem:[#allocation5 + $0x308] sm:$0xff] }
 0x16e   :  { %2698 = vmatprep.subr.bf16.mxu0 %v6440_v58  ;;  %v586_v26 = vld [vmem:[#allocation5 + $0xa40] sm:$0xff]  ;;  %v6472_v30 = vcombine.high %v578_v17, %v582_v18  ;;  %v6471_v34 = vcombine.low %v578_v17, %v582_v18  ;;  %v6250_v60 = vcombine.high %v355_v54, %v359_v56  ;;  %v6249_v3 = vcombine.low %v355_v54, %v359_v56  ;;  %v383_v18 = vld [vmem:[#allocation5 + $0x3e8] sm:$0xff]  ;;  %v284_v54 = vld [vmem:[#allocation5 + $0xd0] sm:$0xff] }
 0x16f   :  { %v590_v28 = vld [vmem:[#allocation5 + $0xa60] sm:$0xff]  ;;  %v288_v56 = vld [vmem:[#allocation5 + $0xf0] sm:$0xff] }
 0x170   :  { %2742 = vmatpush1.bf16.msra.mxu1 %v6185_v61  ;;  %v594_v36 = vld [vmem:[#allocation5 + $0xa80] sm:$0xff]  ;;  %v6480_v39 = vcombine.high %v586_v26, %v590_v28  ;;  %v6479_v42 = vcombine.low %v586_v26, %v590_v28  ;;  %v264_v28 = vld [vmem:[#allocation5 + $0x30] sm:$0xff] }
 0x171   :  { %2699 = vmatpush1.bf16.msra.mxu0 %v6439_v62  ;;  %2743 = vmatprep.subr.bf16.mxu1 %v6194_v63  ;;  %v598_v37 = vld [vmem:[#allocation5 + $0xaa0] sm:$0xff]  ;;  %v363_v63 = vld [vmem:[#allocation5 + $0x348] sm:$0xff] }
 0x172   :  { %2700 = vmatprep.subr.bf16.mxu0 %v6448_v4  ;;  %v602_v44 = vld [vmem:[#allocation5 + $0xac0] sm:$0xff]  ;;  %v6488_v47 = vcombine.high %v594_v36, %v598_v37  ;;  %v6487_v50 = vcombine.low %v594_v36, %v598_v37  ;;  %v6258_v5 = vcombine.high %v363_v63, %v367_v2  ;;  %v6257_v11 = vcombine.low %v363_v63, %v367_v2  ;;  %v399_v36 = vld [vmem:[#allocation5 + $0x468] sm:$0xff]  ;;  %v268_v37 = vld [vmem:[#allocation5 + $0x50] sm:$0xff] }
 0x173   :  { %v606_v45 = vld [vmem:[#allocation5 + $0xae0] sm:$0xff]  ;;  %v292_v63 = vld [vmem:[#allocation5 + $0x110] sm:$0xff] }
 0x174   :  { %2744 = vmatpush1.bf16.msra.mxu1 %v6193_v6  ;;  %v610_v52 = vld [vmem:[#allocation5 + $0xb00] sm:$0xff]  ;;  %v6496_v55 = vcombine.high %v602_v44, %v606_v45  ;;  %v6495_v58 = vcombine.low %v602_v44, %v606_v45  ;;  %v403_v44 = vld [vmem:[#allocation5 + $0x488] sm:$0xff]  ;;  %v296_v2 = vld [vmem:[#allocation5 + $0x130] sm:$0xff] }
 0x175   :  { %2701 = vmatpush1.bf16.msra.mxu0 %v6447_v7  ;;  %2745 = vmatprep.subr.bf16.mxu1 %v6202_v8  ;;  %v614_v53 = vld [vmem:[#allocation5 + $0xb20] sm:$0xff]  ;;  %v371_v8 = vld [vmem:[#allocation5 + $0x388] sm:$0xff] }
 0x176   :  { %2702 = vmatprep.subr.bf16.mxu0 %v6456_v12  ;;  %v618_v61 = vld [vmem:[#allocation5 + $0xb40] sm:$0xff]  ;;  %v6504_v0 = vcombine.high %v610_v52, %v614_v53  ;;  %v6503_v4 = vcombine.low %v610_v52, %v614_v53  ;;  %v6266_v13 = vcombine.high %v371_v8, %v375_v10  ;;  %v6265_v19 = vcombine.low %v371_v8, %v375_v10  ;;  %v407_v45 = vld [vmem:[#allocation5 + $0x4a8] sm:$0xff]  ;;  %v300_v8 = vld [vmem:[#allocation5 + $0x150] sm:$0xff] }
 0x177   :  { %v622_v62 = vld [vmem:[#allocation5 + $0xb60] sm:$0xff]  ;;  %v411_v52 = vld [vmem:[#allocation5 + $0x4c8] sm:$0xff]  ;;  %v304_v10 = vld [vmem:[#allocation5 + $0x170] sm:$0xff] }
 0x178   :  { %2746 = vmatpush1.bf16.msra.mxu1 %v6201_v14  ;;  %v626_v6 = vld [vmem:[#allocation5 + $0xb80] sm:$0xff]  ;;  %v6512_v9 = vcombine.high %v618_v61, %v622_v62  ;;  %v6511_v12 = vcombine.low %v618_v61, %v622_v62  ;;  %v415_v53 = vld [vmem:[#allocation5 + $0x4e8] sm:$0xff] }
 0x179   :  { %2703 = vmatpush1.bf16.msra.mxu0 %v6455_v15  ;;  %2747 = vmatprep.subr.bf16.mxu1 %v6210_v16  ;;  %v630_v7 = vld [vmem:[#allocation5 + $0xba0] sm:$0xff]  ;;  %v379_v16 = vld [vmem:[#allocation5 + $0x3c8] sm:$0xff] }
 0x17a   :  { %2704 = vmatprep.subr.bf16.mxu0 %v6464_v20  ;;  %v634_v14 = vld [vmem:[#allocation5 + $0xbc0] sm:$0xff]  ;;  %v6520_v17 = vcombine.high %v626_v6, %v630_v7  ;;  %v6519_v20 = vcombine.low %v626_v6, %v630_v7  ;;  %v6274_v21 = vcombine.high %v379_v16, %v383_v18  ;;  %v6273_v31 = vcombine.low %v379_v16, %v383_v18  ;;  %v419_v61 = vld [vmem:[#allocation5 + $0x508] sm:$0xff]  ;;  %v308_v16 = vld [vmem:[#allocation5 + $0x190] sm:$0xff] }
 0x17b   :  { %v638_v15 = vld [vmem:[#allocation5 + $0xbe0] sm:$0xff]  ;;  %v423_v62 = vld [vmem:[#allocation5 + $0x528] sm:$0xff]  ;;  %v312_v18 = vld [vmem:[#allocation5 + $0x1b0] sm:$0xff] }
 0x17c   :  { %2748 = vmatpush1.bf16.msra.mxu1 %v6209_v23  ;;  %v387_v23 = vld [vmem:[#allocation5 + $0x408] sm:$0xff]  ;;  %v6528_v26 = vcombine.high %v634_v14, %v638_v15  ;;  %v244_v29 = vld [vmem:[#allocation3 + $0x20] sm:$0xff] }
 0x17d   :  { %2705 = vmatpush1.bf16.msra.mxu0 %v6463_v24  ;;  %2749 = vmatprep.subr.bf16.mxu1 %v6218_v25  ;;  %v391_v24 = vld [vmem:[#allocation5 + $0x428] sm:$0xff]  ;;  %v260_v25 = vld [vmem:[#allocation5 + $0x10] sm:$0xff] }
 0x17e   :  { %2706 = vmatprep.subr.bf16.mxu0 %v6472_v30  ;;  %v250_v30 = vld [vmem:[#allocation3 + $0x50] sm:$0xff]  ;;  %v6156_v38 = vcombine.high %v260_v25, %v264_v28  ;;  %v427_v6 = vld [vmem:[#allocation5 + $0x548] sm:$0xff] }
 0x17f   :  { %v8173_v40 = vpack.c.bf16 %v250_v30, %v244_v29  ;;  %v431_v7 = vld [vmem:[#allocation5 + $0x568] sm:$0xff]  ;;  %v6203_v30 = vcombine.low %v308_v16, %v312_v18 }
 0x180   :  { %2750 = vmatpush1.bf16.msra.mxu1 %v6217_v32  ;;  %v6527_v32 = vcombine.low %v634_v14, %v638_v15  ;;  %v435_v14 = vld [vmem:[#allocation5 + $0x588] sm:$0xff] }
 0x181   :  { %2707 = vmatpush1.bf16.msra.mxu0 %v6471_v34  ;;  %2751 = vmatprep.subr.bf16.mxu1 %v6226_v35  ;;  %v6282_v34 = vcombine.high %v387_v23, %v391_v24  ;;  %v395_v35 = vld [vmem:[#allocation5 + $0x448] sm:$0xff] }
 0x182   :  { %2708 = vmatprep.subr.bf16.mxu0 %v6480_v39  ;;  %v272_v39 = vld [vmem:[#allocation5 + $0x70] sm:$0xff]  ;;  %v439_v15 = vld [vmem:[#allocation5 + $0x5a8] sm:$0xff] }
 0x183   :  { %v6329_v29 = vcombine.low %v435_v14, %v439_v15 }
 0x184   :  { %2752 = vmatpush1.bf16.msra.mxu1 %v6225_v41  ;;  %v6281_v41 = vcombine.low %v387_v23, %v391_v24  ;;  %v443_v23 = vld [vmem:[#allocation5 + $0x5c8] sm:$0xff] }
 0x185   :  { %2709 = vmatpush1.bf16.msra.mxu0 %v6479_v42  ;;  %2753 = vmatprep.subr.bf16.mxu1 %v6234_v43  ;;  %v6155_v42 = vcombine.low %v260_v25, %v264_v28  ;;  %v6290_v43 = vcombine.high %v395_v35, %v399_v36  ;;  %v447_v24 = vld [vmem:[#allocation5 + $0x5e8] sm:$0xff]  ;;  %v6204_v25 = vcombine.high %v308_v16, %v312_v18  ;;  %v320_v28 = vld [vmem:[#allocation5 + $0x1f0] sm:$0xff] }
 0x186   :  { %2710 = vmatprep.subr.bf16.mxu0 %v6488_v47  ;;  %v6164_v47 = vcombine.high %v268_v37, %v272_v39  ;;  %v368_v16 = vld [vmem:[#allocation5 + $0x370] sm:$0xff] }
 0x188   :  { %2754 = vmatpush1.bf16.msra.mxu1 %v6233_v49  ;;  %v6289_v49 = vcombine.low %v395_v35, %v399_v36  ;;  %v324_v35 = vld [vmem:[#allocation5 + $0x210] sm:$0xff] }
 0x189   :  { %2711 = vmatpush1.bf16.msra.mxu0 %v6487_v50  ;;  %2755 = vmatprep.subr.bf16.mxu1 %v6242_v51  ;;  %v6163_v50 = vcombine.low %v268_v37, %v272_v39  ;;  %v6298_v51 = vcombine.high %v403_v44, %v407_v45  ;;  %v328_v37 = vld [vmem:[#allocation5 + $0x230] sm:$0xff] }
 0x18a   :  { %2712 = vmatprep.subr.bf16.mxu0 %v6496_v55  ;;  %v6172_v55 = vcombine.high %v276_v46, %v280_v48 }
 0x18c   :  { %2756 = vmatpush1.bf16.msra.mxu1 %v6241_v57  ;;  %v6297_v57 = vcombine.low %v403_v44, %v407_v45  ;;  %v332_v44 = vld [vmem:[#allocation5 + $0x250] sm:$0xff]  ;;  %v6220_v45 = vcombine.high %v324_v35, %v328_v37 }
 0x18d   :  { %2713 = vmatpush1.bf16.msra.mxu0 %v6495_v58  ;;  %2757 = vmatprep.subr.bf16.mxu1 %v6250_v60  ;;  %v6171_v58 = vcombine.low %v276_v46, %v280_v48  ;;  %v6306_v60 = vcombine.high %v411_v52, %v415_v53  ;;  %v336_v46 = vld [vmem:[#allocation5 + $0x270] sm:$0xff]  ;;  %v6219_v48 = vcombine.low %v324_v35, %v328_v37 }
 0x18e   :  { %2714 = vmatprep.subr.bf16.mxu0 %v6504_v0  ;;  %v6180_v0 = vcombine.high %v284_v54, %v288_v56  ;;  %v384_v35 = vld [vmem:[#allocation5 + $0x3f0] sm:$0xff] }
 0x190   :  { %2758 = vmatpush1.bf16.msra.mxu1 %v6249_v3  ;;  %v6305_v3 = vcombine.low %v411_v52, %v415_v53  ;;  %v340_v52 = vld [vmem:[#allocation5 + $0x290] sm:$0xff]  ;;  %v6228_v53 = vcombine.high %v332_v44, %v336_v46 }
 0x191   :  { %2715 = vmatpush1.bf16.msra.mxu0 %v6503_v4  ;;  %2759 = vmatprep.subr.bf16.mxu1 %v6258_v5  ;;  %v6179_v4 = vcombine.low %v284_v54, %v288_v56  ;;  %v6314_v5 = vcombine.high %v419_v61, %v423_v62  ;;  %v344_v54 = vld [vmem:[#allocation5 + $0x2b0] sm:$0xff]  ;;  %v6227_v56 = vcombine.low %v332_v44, %v336_v46 }
 0x192   :  { %2716 = vmatprep.subr.bf16.mxu0 %v6512_v9  ;;  %v6188_v9 = vcombine.high %v292_v63, %v296_v2  ;;  %v392_v44 = vld [vmem:[#allocation5 + $0x430] sm:$0xff] }
 0x194   :  { %2760 = vmatpush1.bf16.msra.mxu1 %v6257_v11  ;;  %v6313_v11 = vcombine.low %v419_v61, %v423_v62  ;;  %v348_v61 = vld [vmem:[#allocation5 + $0x2d0] sm:$0xff]  ;;  %v6236_v62 = vcombine.high %v340_v52, %v344_v54 }
 0x195   :  { %2717 = vmatpush1.bf16.msra.mxu0 %v6511_v12  ;;  %2761 = vmatprep.subr.bf16.mxu1 %v6266_v13  ;;  %v6187_v12 = vcombine.low %v292_v63, %v296_v2  ;;  %v6322_v13 = vcombine.high %v427_v6, %v431_v7  ;;  %v352_v63 = vld [vmem:[#allocation5 + $0x2f0] sm:$0xff]  ;;  %v6235_v2 = vcombine.low %v340_v52, %v344_v54  ;;  %v531_v54 = vld [vmem:[#allocation5 + $0x888] sm:$0xff] }
 0x196   :  { %2718 = vmatprep.subr.bf16.mxu0 %v6520_v17  ;;  %v6196_v17 = vcombine.high %v300_v8, %v304_v10  ;;  %v400_v52 = vld [vmem:[#allocation5 + $0x470] sm:$0xff] }
 0x198   :  { %2762 = vmatpush1.bf16.msra.mxu1 %v6265_v19  ;;  %v6321_v19 = vcombine.low %v427_v6, %v431_v7  ;;  %v356_v6 = vld [vmem:[#allocation5 + $0x310] sm:$0xff]  ;;  %v6244_v7 = vcombine.high %v348_v61, %v352_v63 }
 0x199   :  { %2719 = vmatpush1.bf16.msra.mxu0 %v6519_v20  ;;  %2763 = vmatprep.subr.bf16.mxu1 %v6274_v21  ;;  %v6195_v20 = vcombine.low %v300_v8, %v304_v10  ;;  %v6330_v21 = vcombine.high %v435_v14, %v439_v15  ;;  %v360_v8 = vld [vmem:[#allocation5 + $0x330] sm:$0xff]  ;;  %v6243_v10 = vcombine.low %v348_v61, %v352_v63  ;;  %v539_v63 = vld [vmem:[#allocation5 + $0x8c8] sm:$0xff] }
 0x19a   :  { %2720 = vmatprep.subr.bf16.mxu0 %v6528_v26  ;;  %v316_v26 = vld [vmem:[#allocation5 + $0x1d0] sm:$0xff]  ;;  %v6252_v15 = vcombine.high %v356_v6, %v360_v8  ;;  %v6251_v18 = vcombine.low %v356_v6, %v360_v8  ;;  %v547_v8 = vld [vmem:[#allocation5 + $0x908] sm:$0xff] }
 0x19b   :  { %v6212_v36 = vcombine.high %v316_v26, %v320_v28  ;;  %v6211_v39 = vcombine.low %v316_v26, %v320_v28  ;;  %v364_v14 = vld [vmem:[#allocation5 + $0x350] sm:$0xff] }
 0x19c   :  { %2764 = vmatpush1.bf16.msra.mxu1 %v6273_v31  ;;  %v6338_v31 = vcombine.high %v443_v23, %v447_v24  ;;  %v6259_v28 = vcombine.low %v364_v14, %v368_v16 }
 0x19d   :  { %2721 = vmatpush1.bf16.msra.mxu0 %v6527_v32  ;;  %2776 = vmatprep.subr.bf16.mxu1 %v6282_v34  ;;  %v451_v32 = vld [vmem:[#allocation5 + $0x608] sm:$0xff] }
 0x19e   :  { %2862 = vmatprep.subr.bf16.mxu0 %v6156_v38  ;;  %v455_v34 = vld [vmem:[#allocation5 + $0x628] sm:$0xff]  ;;  %v6337_v38 = vcombine.low %v443_v23, %v447_v24  ;;  %v372_v23 = vld [vmem:[#allocation5 + $0x390] sm:$0xff]  ;;  %v6260_v24 = vcombine.high %v364_v14, %v368_v16 }
 0x19f   :  { %2766 = vmatmul.mubr.bf16.vlgmr.msra.gmra.mrb[4].mxu1 %v8163_v22  ;;  %v555_v16 = vld [vmem:[#allocation5 + $0x948] sm:$0xff] }
 0x1a0   :  { %2723 = vmatmul.mubr.bf16.vlgmr.msra.gmra.mrb[0].mxu0 %v8173_v40  ;;  %2777 = vmatpush1.bf16.msra.mxu1 %v6281_v41  ;;  %v6346_v41 = vcombine.high %v451_v32, %v455_v34 }
 0x1a1   :  { %2863 = vmatpush1.bf16.msra.mxu0 %v6155_v42  ;;  %2778 = vmatprep.subr.bf16.mxu1 %v6290_v43  ;;  %v459_v42 = vld [vmem:[#allocation5 + $0x648] sm:$0xff] }
 0x1a2   :  { %2864 = vmatprep.subr.bf16.mxu0 %v6164_v47  ;;  %2808 = vmatprep.mubr.bf16.mxu1 %v8160_v1  ;;  %v463_v43 = vld [vmem:[#allocation5 + $0x668] sm:$0xff]  ;;  %v6345_v47 = vcombine.low %v451_v32, %v455_v34  ;;  %v380_v32 = vld [vmem:[#allocation5 + $0x3d0] sm:$0xff] }
 0x1a3   :  { %2894 = vmatprep.mubr.bf16.mxu0 %v8157_v59  ;;  %v6275_v46 = vcombine.low %v380_v32, %v384_v35 }
 0x1a4   :  { %2779 = vmatpush1.bf16.msra.mxu1 %v6289_v49  ;;  %v6354_v49 = vcombine.high %v459_v42, %v463_v43 }
 0x1a5   :  { %2865 = vmatpush1.bf16.msra.mxu0 %v6163_v50  ;;  %2780 = vmatprep.subr.bf16.mxu1 %v6298_v51  ;;  %v467_v50 = vld [vmem:[#allocation5 + $0x688] sm:$0xff] }
 0x1a6   :  { %2866 = vmatprep.subr.bf16.mxu0 %v6172_v55  ;;  %v471_v51 = vld [vmem:[#allocation5 + $0x6a8] sm:$0xff]  ;;  %v6353_v55 = vcombine.low %v459_v42, %v463_v43  ;;  %v388_v42 = vld [vmem:[#allocation5 + $0x410] sm:$0xff]  ;;  %v6276_v43 = vcombine.high %v380_v32, %v384_v35 }
 0x1a7   :  { %v571_v35 = vld [vmem:[#allocation5 + $0x9c8] sm:$0xff] }
 0x1a8   :  { %2781 = vmatpush1.bf16.msra.mxu1 %v6297_v57  ;;  %v6362_v57 = vcombine.high %v467_v50, %v471_v51 }
 0x1a9   :  { %2867 = vmatpush1.bf16.msra.mxu0 %v6171_v58  ;;  %2782 = vmatprep.subr.bf16.mxu1 %v6306_v60  ;;  %v475_v58 = vld [vmem:[#allocation5 + $0x6c8] sm:$0xff] }
 0x1aa   :  { %2868 = vmatprep.subr.bf16.mxu0 %v6180_v0  ;;  %v479_v60 = vld [vmem:[#allocation5 + $0x6e8] sm:$0xff]  ;;  %v6361_v0 = vcombine.low %v467_v50, %v471_v51  ;;  %v396_v50 = vld [vmem:[#allocation5 + $0x450] sm:$0xff]  ;;  %v6284_v51 = vcombine.high %v388_v42, %v392_v44 }
 0x1ab   :  { %v6292_v61 = vcombine.high %v396_v50, %v400_v52 }
 0x1ac   :  { %2783 = vmatpush1.bf16.msra.mxu1 %v6305_v3  ;;  %v6370_v3 = vcombine.high %v475_v58, %v479_v60 }
 0x1ad   :  { %2869 = vmatpush1.bf16.msra.mxu0 %v6179_v4  ;;  %2784 = vmatprep.subr.bf16.mxu1 %v6314_v5  ;;  %v483_v4 = vld [vmem:[#allocation5 + $0x708] sm:$0xff] }
 0x1ae   :  { %2870 = vmatprep.subr.bf16.mxu0 %v6188_v9  ;;  %v487_v5 = vld [vmem:[#allocation5 + $0x728] sm:$0xff]  ;;  %v6369_v9 = vcombine.low %v475_v58, %v479_v60  ;;  %v404_v58 = vld [vmem:[#allocation5 + $0x490] sm:$0xff] }
 0x1af   :  { %v408_v60 = vld [vmem:[#allocation5 + $0x4b0] sm:$0xff] }
 0x1b0   :  { %2785 = vmatpush1.bf16.msra.mxu1 %v6313_v11  ;;  %v6378_v11 = vcombine.high %v483_v4, %v487_v5  ;;  %v6300_v6 = vcombine.high %v404_v58, %v408_v60 }
 0x1b1   :  { %2871 = vmatpush1.bf16.msra.mxu0 %v6187_v12  ;;  %2786 = vmatprep.subr.bf16.mxu1 %v6322_v13  ;;  %v491_v12 = vld [vmem:[#allocation5 + $0x748] sm:$0xff] }
 0x1b2   :  { %2872 = vmatprep.subr.bf16.mxu0 %v6196_v17  ;;  %v495_v13 = vld [vmem:[#allocation5 + $0x768] sm:$0xff]  ;;  %v6377_v17 = vcombine.low %v483_v4, %v487_v5  ;;  %v412_v4 = vld [vmem:[#allocation5 + $0x4d0] sm:$0xff] }
 0x1b3   :  { %v6385_v26 = vcombine.low %v491_v12, %v495_v13  ;;  %v416_v5 = vld [vmem:[#allocation5 + $0x4f0] sm:$0xff] }
 0x1b4   :  { %2787 = vmatpush1.bf16.msra.mxu1 %v6321_v19  ;;  %v6386_v19 = vcombine.high %v491_v12, %v495_v13  ;;  %v420_v12 = vld [vmem:[#allocation5 + $0x510] sm:$0xff]  ;;  %v6308_v14 = vcombine.high %v412_v4, %v416_v5 }
 0x1b5   :  { %2873 = vmatpush1.bf16.msra.mxu0 %v6195_v20  ;;  %2788 = vmatprep.subr.bf16.mxu1 %v6330_v21  ;;  %v499_v20 = vld [vmem:[#allocation5 + $0x788] sm:$0xff]  ;;  %v424_v13 = vld [vmem:[#allocation5 + $0x530] sm:$0xff] }
 0x1b6   :  { %2874 = vmatprep.subr.bf16.mxu0 %v6204_v25  ;;  %v503_v21 = vld [vmem:[#allocation5 + $0x7a8] sm:$0xff]  ;;  %v376_v25 = vld [vmem:[#allocation5 + $0x3b0] sm:$0xff] }
 0x1b7   :  { %v6268_v34 = vcombine.high %v372_v23, %v376_v25  ;;  %v6267_v37 = vcombine.low %v372_v23, %v376_v25  ;;  %v6316_v23 = vcombine.high %v420_v12, %v424_v13  ;;  %v563_v25 = vld [vmem:[#allocation5 + $0x988] sm:$0xff] }
 0x1b8   :  { %2789 = vmatpush1.bf16.msra.mxu1 %v6329_v29  ;;  %v6394_v29 = vcombine.high %v499_v20, %v503_v21 }
 0x1b9   :  { %2875 = vmatpush1.bf16.msra.mxu0 %v6203_v30  ;;  %2790 = vmatprep.subr.bf16.mxu1 %v6338_v31  ;;  %v507_v30 = vld [vmem:[#allocation5 + $0x7c8] sm:$0xff] }
 0x1ba   :  { %2876 = vmatprep.subr.bf16.mxu0 %v6212_v36  ;;  %v511_v31 = vld [vmem:[#allocation5 + $0x7e8] sm:$0xff]  ;;  %v6393_v36 = vcombine.low %v499_v20, %v503_v21  ;;  %v428_v20 = vld [vmem:[#allocation5 + $0x550] sm:$0xff] }
 0x1bb   :  { %v432_v21 = vld [vmem:[#allocation5 + $0x570] sm:$0xff] }
 0x1bc   :  { %2791 = vmatpush1.bf16.msra.mxu1 %v6337_v38  ;;  %v6402_v38 = vcombine.high %v507_v30, %v511_v31  ;;  %v6324_v32 = vcombine.high %v428_v20, %v432_v21 }
 0x1bd   :  { %2877 = vmatpush1.bf16.msra.mxu0 %v6211_v39  ;;  %2792 = vmatprep.subr.bf16.mxu1 %v6346_v41  ;;  %v515_v39 = vld [vmem:[#allocation5 + $0x808] sm:$0xff] }
 0x1be   :  { %2878 = vmatprep.subr.bf16.mxu0 %v6220_v45  ;;  %v519_v41 = vld [vmem:[#allocation5 + $0x828] sm:$0xff]  ;;  %v6401_v45 = vcombine.low %v507_v30, %v511_v31  ;;  %v436_v30 = vld [vmem:[#allocation5 + $0x590] sm:$0xff] }
 0x1bf   :  { %v440_v31 = vld [vmem:[#allocation5 + $0x5b0] sm:$0xff] }
 0x1c0   :  { %2793 = vmatpush1.bf16.msra.mxu1 %v6345_v47  ;;  %v6410_v47 = vcombine.high %v515_v39, %v519_v41 }
 0x1c1   :  { %2879 = vmatpush1.bf16.msra.mxu0 %v6219_v48  ;;  %2794 = vmatprep.subr.bf16.mxu1 %v6354_v49  ;;  %v523_v48 = vld [vmem:[#allocation5 + $0x848] sm:$0xff] }
 0x1c2   :  { %2880 = vmatprep.subr.bf16.mxu0 %v6228_v53  ;;  %v527_v49 = vld [vmem:[#allocation5 + $0x868] sm:$0xff]  ;;  %v6409_v53 = vcombine.low %v515_v39, %v519_v41  ;;  %v444_v39 = vld [vmem:[#allocation5 + $0x5d0] sm:$0xff] }
 0x1c3   :  { %v448_v41 = vld [vmem:[#allocation5 + $0x5f0] sm:$0xff] }
 0x1c4   :  { %2795 = vmatpush1.bf16.msra.mxu1 %v6353_v55  ;;  %v535_v55 = vld [vmem:[#allocation5 + $0x8a8] sm:$0xff] }
 0x1c5   :  { %2881 = vmatpush1.bf16.msra.mxu0 %v6227_v56  ;;  %2796 = vmatprep.subr.bf16.mxu1 %v6362_v57  ;;  %v6283_v56 = vcombine.low %v388_v42, %v392_v44  ;;  %v6418_v57 = vcombine.high %v523_v48, %v527_v49  ;;  %v6332_v42 = vcombine.high %v436_v30, %v440_v31  ;;  %v579_v44 = vld [vmem:[#allocation5 + $0xa08] sm:$0xff] }
 0x1c6   :  { %2882 = vmatprep.subr.bf16.mxu0 %v6236_v62  ;;  %v6417_v62 = vcombine.low %v523_v48, %v527_v49  ;;  %v452_v48 = vld [vmem:[#allocation5 + $0x610] sm:$0xff] }
 0x1c7   :  { %v456_v49 = vld [vmem:[#allocation5 + $0x630] sm:$0xff] }
 0x1c8   :  { %2797 = vmatpush1.bf16.msra.mxu1 %v6361_v0  ;;  %v543_v0 = vld [vmem:[#allocation5 + $0x8e8] sm:$0xff] }
 0x1c9   :  { %2883 = vmatpush1.bf16.msra.mxu0 %v6235_v2  ;;  %2798 = vmatprep.subr.bf16.mxu1 %v6370_v3  ;;  %v6291_v2 = vcombine.low %v396_v50, %v400_v52  ;;  %v6426_v3 = vcombine.high %v531_v54, %v535_v55  ;;  %v6340_v50 = vcombine.high %v444_v39, %v448_v41  ;;  %v587_v52 = vld [vmem:[#allocation5 + $0xa48] sm:$0xff] }
 0x1ca   :  { %2884 = vmatprep.subr.bf16.mxu0 %v6244_v7  ;;  %v6425_v7 = vcombine.low %v531_v54, %v535_v55  ;;  %v6339_v54 = vcombine.low %v444_v39, %v448_v41  ;;  %v504_v39 = vld [vmem:[#allocation5 + $0x7b0] sm:$0xff] }
 0x1cc   :  { %2799 = vmatpush1.bf16.msra.mxu1 %v6369_v9  ;;  %v551_v9 = vld [vmem:[#allocation5 + $0x928] sm:$0xff] }
 0x1cd   :  { %2885 = vmatpush1.bf16.msra.mxu0 %v6243_v10  ;;  %2800 = vmatprep.subr.bf16.mxu1 %v6378_v11  ;;  %v6299_v10 = vcombine.low %v404_v58, %v408_v60  ;;  %v6434_v11 = vcombine.high %v539_v63, %v543_v0  ;;  %v6348_v58 = vcombine.high %v452_v48, %v456_v49 }
 0x1ce   :  { %2886 = vmatprep.subr.bf16.mxu0 %v6252_v15  ;;  %v6433_v15 = vcombine.low %v539_v63, %v543_v0  ;;  %v6347_v63 = vcombine.low %v452_v48, %v456_v49  ;;  %v512_v48 = vld [vmem:[#allocation5 + $0x7f0] sm:$0xff] }
 0x1d0   :  { %2801 = vmatpush1.bf16.msra.mxu1 %v6377_v17  ;;  %v559_v17 = vld [vmem:[#allocation5 + $0x968] sm:$0xff] }
 0x1d1   :  { %2887 = vmatpush1.bf16.msra.mxu0 %v6251_v18  ;;  %2802 = vmatprep.subr.bf16.mxu1 %v6386_v19  ;;  %v6307_v18 = vcombine.low %v412_v4, %v416_v5  ;;  %v6442_v19 = vcombine.high %v547_v8, %v551_v9 }
 0x1d2   :  { %2888 = vmatprep.subr.bf16.mxu0 %v6260_v24  ;;  %v6441_v24 = vcombine.low %v547_v8, %v551_v9 }
 0x1d4   :  { %2803 = vmatpush1.bf16.msra.mxu1 %v6385_v26  ;;  %v567_v26 = vld [vmem:[#allocation5 + $0x9a8] sm:$0xff] }
 0x1d5   :  { %2889 = vmatpush1.bf16.msra.mxu0 %v6259_v28  ;;  %2804 = vmatprep.subr.bf16.mxu1 %v6394_v29  ;;  %v6315_v28 = vcombine.low %v420_v12, %v424_v13  ;;  %v6450_v29 = vcombine.high %v555_v16, %v559_v17 }
 0x1d6   :  { %2890 = vmatprep.subr.bf16.mxu0 %v6268_v34  ;;  %v6449_v34 = vcombine.low %v555_v16, %v559_v17 }
 0x1d8   :  { %2805 = vmatpush1.bf16.msra.mxu1 %v6393_v36  ;;  %v575_v36 = vld [vmem:[#allocation5 + $0x9e8] sm:$0xff] }
 0x1d9   :  { %2891 = vmatpush1.bf16.msra.mxu0 %v6267_v37  ;;  %2806 = vmatprep.subr.bf16.mxu1 %v6402_v38  ;;  %v6323_v37 = vcombine.low %v428_v20, %v432_v21  ;;  %v6458_v38 = vcombine.high %v563_v25, %v567_v26  ;;  %v488_v20 = vld [vmem:[#allocation5 + $0x730] sm:$0xff] }
 0x1da   :  { %2892 = vmatprep.subr.bf16.mxu0 %v6276_v43  ;;  %v6457_v43 = vcombine.low %v563_v25, %v567_v26  ;;  %v619_v26 = vld [vmem:[#allocation5 + $0xb48] sm:$0xff] }
 0x1dc   :  { %2807 = vmatpush1.bf16.msra.mxu1 %v6401_v45  ;;  %v583_v45 = vld [vmem:[#allocation5 + $0xa28] sm:$0xff] }
 0x1dd   :  { %2893 = vmatpush1.bf16.msra.mxu0 %v6275_v46  ;;  %2819 = vmatprep.subr.bf16.mxu1 %v6410_v47  ;;  %v6331_v46 = vcombine.low %v436_v30, %v440_v31  ;;  %v6466_v47 = vcombine.high %v571_v35, %v575_v36  ;;  %v6474_v55 = vcombine.high %v579_v44, %v583_v45  ;;  %v496_v30 = vld [vmem:[#allocation5 + $0x770] sm:$0xff] }
 0x1de   :  { %2905 = vmatprep.subr.bf16.mxu0 %v6284_v51  ;;  %v6465_v51 = vcombine.low %v571_v35, %v575_v36  ;;  %v6473_v60 = vcombine.low %v579_v44, %v583_v45  ;;  %v627_v36 = vld [vmem:[#allocation5 + $0xb88] sm:$0xff] }
 0x1df   :  { %2809 = vmatmul.mubr.bf16.vlgmr.msra.gmra.mrb[4].mxu1 %v8165_v27  ;;  %v635_v45 = vld [vmem:[#allocation5 + $0xbc8] sm:$0xff] }
 0x1e0   :  { %2820 = vmatpush1.bf16.msra.mxu1 %v6409_v53  ;;  %2895 = vmatmul.mubr.bf16.vlgmr.msra.gmra.mrb[4].mxu0 %v8163_v22  ;;  %v591_v53 = vld [vmem:[#allocation5 + $0xa68] sm:$0xff] }
 0x1e1   :  { %2906 = vmatpush1.bf16.msra.mxu0 %v6283_v56  ;;  %2821 = vmatprep.subr.bf16.mxu1 %v6418_v57  ;;  %v460_v56 = vld [vmem:[#allocation5 + $0x650] sm:$0xff]  ;;  %v6482_v0 = vcombine.high %v587_v52, %v591_v53  ;;  %v6481_v5 = vcombine.low %v587_v52, %v591_v53  ;;  %v261_v53 = vld [vmem:[#allocation5 + $0x18] sm:$0xff] }
 0x1e2   :  { %2907 = vmatprep.subr.bf16.mxu0 %v6292_v61  ;;  %2851 = vmatprep.mubr.bf16.mxu1 %v8167_v33  ;;  %v464_v57 = vld [vmem:[#allocation5 + $0x670] sm:$0xff]  ;;  %v595_v61 = vld [vmem:[#allocation5 + $0xa88] sm:$0xff] }
 0x1e3   :  { %2937 = vmatprep.mubr.bf16.mxu0 %v8160_v1  ;;  %v6356_v4 = vcombine.high %v460_v56, %v464_v57  ;;  %v6355_v8 = vcombine.low %v460_v56, %v464_v57  ;;  %v520_v56 = vld [vmem:[#allocation5 + $0x830] sm:$0xff] }
 0x1e4   :  { %2822 = vmatpush1.bf16.msra.mxu1 %v6417_v62  ;;  %v599_v62 = vld [vmem:[#allocation5 + $0xaa8] sm:$0xff] }
 0x1e5   :  { %2908 = vmatpush1.bf16.msra.mxu0 %v6291_v2  ;;  %2823 = vmatprep.subr.bf16.mxu1 %v6426_v3  ;;  %v468_v2 = vld [vmem:[#allocation5 + $0x690] sm:$0xff]  ;;  %v6490_v9 = vcombine.high %v595_v61, %v599_v62  ;;  %v6489_v13 = vcombine.low %v595_v61, %v599_v62  ;;  %v269_v62 = vld [vmem:[#allocation5 + $0x58] sm:$0xff] }
 0x1e6   :  { %2909 = vmatprep.subr.bf16.mxu0 %v6300_v6  ;;  %v472_v3 = vld [vmem:[#allocation5 + $0x6b0] sm:$0xff]  ;;  %v603_v6 = vld [vmem:[#allocation5 + $0xac8] sm:$0xff] }
 0x1e7   :  { %v6364_v12 = vcombine.high %v468_v2, %v472_v3  ;;  %v6363_v16 = vcombine.low %v468_v2, %v472_v3  ;;  %v528_v2 = vld [vmem:[#allocation5 + $0x870] sm:$0xff] }
 0x1e8   :  { %2824 = vmatpush1.bf16.msra.mxu1 %v6425_v7  ;;  %v607_v7 = vld [vmem:[#allocation5 + $0xae8] sm:$0xff] }
 0x1e9   :  { %2910 = vmatpush1.bf16.msra.mxu0 %v6299_v10  ;;  %2825 = vmatprep.subr.bf16.mxu1 %v6434_v11  ;;  %v476_v10 = vld [vmem:[#allocation5 + $0x6d0] sm:$0xff]  ;;  %v6498_v17 = vcombine.high %v603_v6, %v607_v7  ;;  %v6497_v21 = vcombine.low %v603_v6, %v607_v7  ;;  %v277_v7 = vld [vmem:[#allocation5 + $0x98] sm:$0xff] }
 0x1ea   :  { %2911 = vmatprep.subr.bf16.mxu0 %v6308_v14  ;;  %v480_v11 = vld [vmem:[#allocation5 + $0x6f0] sm:$0xff]  ;;  %v611_v14 = vld [vmem:[#allocation5 + $0xb08] sm:$0xff] }
 0x1ec   :  { %2826 = vmatpush1.bf16.msra.mxu1 %v6433_v15  ;;  %v615_v15 = vld [vmem:[#allocation5 + $0xb28] sm:$0xff] }
 0x1ed   :  { %2912 = vmatpush1.bf16.msra.mxu0 %v6307_v18  ;;  %2827 = vmatprep.subr.bf16.mxu1 %v6442_v19  ;;  %v484_v18 = vld [vmem:[#allocation5 + $0x710] sm:$0xff]  ;;  %v6372_v19 = vcombine.high %v476_v10, %v480_v11  ;;  %v6505_v31 = vcombine.low %v611_v14, %v615_v15 }
 0x1ee   :  { %2913 = vmatprep.subr.bf16.mxu0 %v6316_v23  ;;  %v6371_v23 = vcombine.low %v476_v10, %v480_v11  ;;  %v6380_v25 = vcombine.high %v484_v18, %v488_v20  ;;  %v536_v10 = vld [vmem:[#allocation5 + $0x8b0] sm:$0xff] }
 0x1f0   :  { %2828 = vmatpush1.bf16.msra.mxu1 %v6441_v24  ;;  %v6506_v24 = vcombine.high %v611_v14, %v615_v15  ;;  %v285_v15 = vld [vmem:[#allocation5 + $0xd8] sm:$0xff] }
 0x1f1   :  { %2914 = vmatpush1.bf16.msra.mxu0 %v6315_v28  ;;  %2829 = vmatprep.subr.bf16.mxu1 %v6450_v29  ;;  %v623_v28 = vld [vmem:[#allocation5 + $0xb68] sm:$0xff]  ;;  %v492_v29 = vld [vmem:[#allocation5 + $0x750] sm:$0xff] }
 0x1f2   :  { %2915 = vmatprep.subr.bf16.mxu0 %v6324_v32  ;;  %v6379_v32 = vcombine.low %v484_v18, %v488_v20  ;;  %v6388_v35 = vcombine.high %v492_v29, %v496_v30  ;;  %v6513_v41 = vcombine.low %v619_v26, %v623_v28  ;;  %v544_v18 = vld [vmem:[#allocation5 + $0x8f0] sm:$0xff] }
 0x1f4   :  { %2830 = vmatpush1.bf16.msra.mxu1 %v6449_v34  ;;  %v6514_v34 = vcombine.high %v619_v26, %v623_v28  ;;  %v548_v26 = vld [vmem:[#allocation5 + $0x910] sm:$0xff] }
 0x1f5   :  { %2916 = vmatpush1.bf16.msra.mxu0 %v6323_v37  ;;  %2831 = vmatprep.subr.bf16.mxu1 %v6458_v38  ;;  %v631_v37 = vld [vmem:[#allocation5 + $0xba8] sm:$0xff]  ;;  %v500_v38 = vld [vmem:[#allocation5 + $0x790] sm:$0xff] }
 0x1f6   :  { %2917 = vmatprep.subr.bf16.mxu0 %v6332_v42  ;;  %v6387_v42 = vcombine.low %v492_v29, %v496_v30  ;;  %v6396_v44 = vcombine.high %v500_v38, %v504_v39  ;;  %v6521_v49 = vcombine.low %v627_v36, %v631_v37  ;;  %v552_v28 = vld [vmem:[#allocation5 + $0x930] sm:$0xff] }
 0x1f8   :  { %2832 = vmatpush1.bf16.msra.mxu1 %v6457_v43  ;;  %v6522_v43 = vcombine.high %v627_v36, %v631_v37  ;;  %v560_v36 = vld [vmem:[#allocation5 + $0x970] sm:$0xff] }
 0x1f9   :  { %2918 = vmatpush1.bf16.msra.mxu0 %v6331_v46  ;;  %2833 = vmatprep.subr.bf16.mxu1 %v6466_v47  ;;  %v639_v46 = vld [vmem:[#allocation5 + $0xbe8] sm:$0xff]  ;;  %v508_v47 = vld [vmem:[#allocation5 + $0x7d0] sm:$0xff] }
 0x1fa   :  { %2919 = vmatprep.subr.bf16.mxu0 %v6340_v50  ;;  %v6395_v50 = vcombine.low %v500_v38, %v504_v39  ;;  %v6404_v52 = vcombine.high %v508_v47, %v512_v48  ;;  %v6529_v57 = vcombine.low %v635_v45, %v639_v46  ;;  %v6443_v38 = vcombine.low %v548_v26, %v552_v28 }
 0x1fc   :  { %2834 = vmatpush1.bf16.msra.mxu1 %v6465_v51  ;;  %v6530_v51 = vcombine.high %v635_v45, %v639_v46  ;;  %v568_v45 = vld [vmem:[#allocation5 + $0x9b0] sm:$0xff] }
 0x1fd   :  { %2920 = vmatpush1.bf16.msra.mxu0 %v6339_v54  ;;  %2835 = vmatprep.subr.bf16.mxu1 %v6474_v55  ;;  %v265_v54 = vld [vmem:[#allocation5 + $0x38] sm:$0xff]  ;;  %v516_v55 = vld [vmem:[#allocation5 + $0x810] sm:$0xff] }
 0x1fe   :  { %2921 = vmatprep.subr.bf16.mxu0 %v6348_v58  ;;  %v6403_v58 = vcombine.low %v508_v47, %v512_v48  ;;  %v6412_v61 = vcombine.high %v516_v55, %v520_v56  ;;  %v6157_v3 = vcombine.low %v261_v53, %v265_v54 }
 0x200   :  { %2836 = vmatpush1.bf16.msra.mxu1 %v6473_v60  ;;  %v6158_v60 = vcombine.high %v261_v53, %v265_v54  ;;  %v572_v54 = vld [vmem:[#allocation5 + $0x9d0] sm:$0xff] }
 0x201   :  { %2922 = vmatpush1.bf16.msra.mxu0 %v6347_v63  ;;  %2837 = vmatprep.subr.bf16.mxu1 %v6482_v0  ;;  %v273_v63 = vld [vmem:[#allocation5 + $0x78] sm:$0xff]  ;;  %v524_v0 = vld [vmem:[#allocation5 + $0x850] sm:$0xff] }
 0x202   :  { %2923 = vmatprep.subr.bf16.mxu0 %v6356_v4  ;;  %v6411_v4 = vcombine.low %v516_v55, %v520_v56  ;;  %v6420_v6 = vcombine.high %v524_v0, %v528_v2  ;;  %v6165_v11 = vcombine.low %v269_v62, %v273_v63  ;;  %v576_v55 = vld [vmem:[#allocation5 + $0x9f0] sm:$0xff] }
 0x204   :  { %2838 = vmatpush1.bf16.msra.mxu1 %v6481_v5  ;;  %v6166_v5 = vcombine.high %v269_v62, %v273_v63  ;;  %v6468_v62 = vcombine.high %v572_v54, %v576_v55  ;;  %v325_v63 = vld [vmem:[#allocation5 + $0x218] sm:$0xff] }
 0x205   :  { %2924 = vmatpush1.bf16.msra.mxu0 %v6355_v8  ;;  %2839 = vmatprep.subr.bf16.mxu1 %v6490_v9  ;;  %v281_v8 = vld [vmem:[#allocation5 + $0xb8] sm:$0xff]  ;;  %v532_v9 = vld [vmem:[#allocation5 + $0x890] sm:$0xff] }
 0x206   :  { %2925 = vmatprep.subr.bf16.mxu0 %v6364_v12  ;;  %v6419_v12 = vcombine.low %v524_v0, %v528_v2  ;;  %v6428_v14 = vcombine.high %v532_v9, %v536_v10  ;;  %v6427_v20 = vcombine.low %v532_v9, %v536_v10  ;;  %v329_v0 = vld [vmem:[#allocation5 + $0x238] sm:$0xff]  ;;  %v580_v2 = vld [vmem:[#allocation5 + $0xa10] sm:$0xff] }
 0x207   :  { %v337_v9 = vld [vmem:[#allocation5 + $0x278] sm:$0xff]  ;;  %v588_v10 = vld [vmem:[#allocation5 + $0xa50] sm:$0xff] }
 0x208   :  { %2840 = vmatpush1.bf16.msra.mxu1 %v6489_v13  ;;  %v6174_v13 = vcombine.high %v277_v7, %v281_v8 }
 0x209   :  { %2926 = vmatpush1.bf16.msra.mxu0 %v6363_v16  ;;  %2841 = vmatprep.subr.bf16.mxu1 %v6498_v17  ;;  %v289_v16 = vld [vmem:[#allocation5 + $0xf8] sm:$0xff]  ;;  %v540_v17 = vld [vmem:[#allocation5 + $0x8d0] sm:$0xff] }
 0x20a   :  { %2927 = vmatprep.subr.bf16.mxu0 %v6372_v19  ;;  %v6173_v19 = vcombine.low %v277_v7, %v281_v8  ;;  %v6181_v29 = vcombine.low %v285_v15, %v289_v16  ;;  %v6435_v30 = vcombine.low %v540_v17, %v544_v18  ;;  %v333_v8 = vld [vmem:[#allocation5 + $0x258] sm:$0xff] }
 0x20c   :  { %2842 = vmatpush1.bf16.msra.mxu1 %v6497_v21  ;;  %v6182_v21 = vcombine.high %v285_v15, %v289_v16  ;;  %v341_v16 = vld [vmem:[#allocation5 + $0x298] sm:$0xff] }
 0x20d   :  { %2928 = vmatpush1.bf16.msra.mxu0 %v6371_v23  ;;  %2843 = vmatprep.subr.bf16.mxu1 %v6506_v24  ;;  %v6436_v23 = vcombine.high %v540_v17, %v544_v18  ;;  %v293_v24 = vld [vmem:[#allocation5 + $0x118] sm:$0xff]  ;;  %v596_v18 = vld [vmem:[#allocation5 + $0xa90] sm:$0xff] }
 0x20e   :  { %2929 = vmatprep.subr.bf16.mxu0 %v6380_v25  ;;  %v297_v25 = vld [vmem:[#allocation5 + $0x138] sm:$0xff] }
 0x20f   :  { %v6189_v37 = vcombine.low %v293_v24, %v297_v25  ;;  %v345_v17 = vld [vmem:[#allocation5 + $0x2b8] sm:$0xff] }
 0x210   :  { %2844 = vmatpush1.bf16.msra.mxu1 %v6505_v31  ;;  %v6190_v31 = vcombine.high %v293_v24, %v297_v25  ;;  %v349_v25 = vld [vmem:[#allocation5 + $0x2d8] sm:$0xff] }
 0x211   :  { %2930 = vmatpush1.bf16.msra.mxu0 %v6379_v32  ;;  %2845 = vmatprep.subr.bf16.mxu1 %v6514_v34  ;;  %v301_v32 = vld [vmem:[#allocation5 + $0x158] sm:$0xff] }
 0x212   :  { %2931 = vmatprep.subr.bf16.mxu0 %v6388_v35  ;;  %v305_v34 = vld [vmem:[#allocation5 + $0x178] sm:$0xff]  ;;  %v556_v35 = vld [vmem:[#allocation5 + $0x950] sm:$0xff] }
 0x213   :  { %v6198_v39 = vcombine.high %v301_v32, %v305_v34  ;;  %v6197_v46 = vcombine.low %v301_v32, %v305_v34  ;;  %v6451_v47 = vcombine.low %v556_v35, %v560_v36  ;;  %v357_v34 = vld [vmem:[#allocation5 + $0x318] sm:$0xff] }
 0x214   :  { %2846 = vmatpush1.bf16.msra.mxu1 %v6513_v41  ;;  %v6452_v41 = vcombine.high %v556_v35, %v560_v36  ;;  %v361_v35 = vld [vmem:[#allocation5 + $0x338] sm:$0xff]  ;;  %v612_v36 = vld [vmem:[#allocation5 + $0xb10] sm:$0xff] }
 0x215   :  { %2932 = vmatpush1.bf16.msra.mxu0 %v6387_v42  ;;  %2847 = vmatprep.subr.bf16.mxu1 %v6522_v43  ;;  %v309_v42 = vld [vmem:[#allocation5 + $0x198] sm:$0xff] }
 0x216   :  { %2933 = vmatprep.subr.bf16.mxu0 %v6396_v44  ;;  %v313_v43 = vld [vmem:[#allocation5 + $0x1b8] sm:$0xff]  ;;  %v564_v44 = vld [vmem:[#allocation5 + $0x990] sm:$0xff] }
 0x217   :  { %v6206_v48 = vcombine.high %v309_v42, %v313_v43 }
 0x218   :  { %2848 = vmatpush1.bf16.msra.mxu1 %v6521_v49 }
 0x219   :  { %2934 = vmatpush1.bf16.msra.mxu0 %v6395_v50  ;;  %2849 = vmatprep.subr.bf16.mxu1 %v6530_v51  ;;  %v6460_v50 = vcombine.high %v564_v44, %v568_v45  ;;  %v317_v51 = vld [vmem:[#allocation5 + $0x1d8] sm:$0xff] }
 0x21a   :  { %2935 = vmatprep.subr.bf16.mxu0 %v6404_v52  ;;  %v321_v52 = vld [vmem:[#allocation5 + $0x1f8] sm:$0xff] }
 0x21c   :  { %2850 = vmatpush1.bf16.msra.mxu1 %v6529_v57  ;;  %v6205_v57 = vcombine.low %v309_v42, %v313_v43  ;;  %v365_v43 = vld [vmem:[#allocation5 + $0x358] sm:$0xff] }
 0x21d   :  { %2936 = vmatpush1.bf16.msra.mxu0 %v6403_v58  ;;  %2991 = vmatprep.subr.bf16.mxu1 %v6158_v60  ;;  %v6459_v60 = vcombine.low %v564_v44, %v568_v45  ;;  %v369_v44 = vld [vmem:[#allocation5 + $0x378] sm:$0xff]  ;;  %v620_v45 = vld [vmem:[#allocation5 + $0xb50] sm:$0xff] }
 0x21e   :  { %2948 = vmatprep.subr.bf16.mxu0 %v6412_v61  ;;  %v6214_v61 = vcombine.high %v317_v51, %v321_v52 }
 0x21f   :  { %2852 = vmatmul.mubr.bf16.vlgmr.msra.gmra.mrb[4].mxu1 %v8173_v40 }
 0x220   :  { %2938 = vmatmul.mubr.bf16.vlgmr.msra.gmra.mrb[4].mxu0 %v8165_v27  ;;  %2992 = vmatpush1.bf16.msra.mxu1 %v6157_v3  ;;  %v584_v3 = vld [vmem:[#allocation5 + $0xa30] sm:$0xff] }
 0x221   :  { %2949 = vmatpush1.bf16.msra.mxu0 %v6411_v4  ;;  %2993 = vmatprep.subr.bf16.mxu1 %v6166_v5  ;;  %v6213_v4 = vcombine.low %v317_v51, %v321_v52  ;;  %v6467_v5 = vcombine.low %v572_v54, %v576_v55  ;;  %v6476_v7 = vcombine.high %v580_v2, %v584_v3  ;;  %v373_v52 = vld [vmem:[#allocation5 + $0x398] sm:$0xff]  ;;  %v628_v55 = vld [vmem:[#allocation5 + $0xb90] sm:$0xff] }
 0x222   :  { %2950 = vmatprep.subr.bf16.mxu0 %v6420_v6  ;;  %2980 = vmatprep.mubr.bf16.mxu0 %v8167_v33  ;;  %v6222_v6 = vcombine.high %v325_v63, %v329_v0  ;;  %v377_v54 = vld [vmem:[#allocation5 + $0x3b8] sm:$0xff] }
 0x223   :  { %3023 = vmatprep.mubr.bf16.mxu1 %v8157_v59  ;;  %v6444_v59 = vcombine.high %v548_v26, %v552_v28  ;;  %v353_v26 = vld [vmem:[#allocation5 + $0x2f8] sm:$0xff]  ;;  %v604_v28 = vld [vmem:[#allocation5 + $0xad0] sm:$0xff] }
 0x224   :  { %2994 = vmatpush1.bf16.msra.mxu1 %v6165_v11  ;;  %v592_v11 = vld [vmem:[#allocation5 + $0xa70] sm:$0xff] }
 0x225   :  { %2951 = vmatpush1.bf16.msra.mxu0 %v6419_v12  ;;  %2995 = vmatprep.subr.bf16.mxu1 %v6174_v13  ;;  %v6221_v12 = vcombine.low %v325_v63, %v329_v0  ;;  %v6475_v13 = vcombine.low %v580_v2, %v584_v3  ;;  %v6484_v15 = vcombine.high %v588_v10, %v592_v11  ;;  %v381_v0 = vld [vmem:[#allocation5 + $0x3d8] sm:$0xff]  ;;  %v636_v3 = vld [vmem:[#allocation5 + $0xbd0] sm:$0xff] }
 0x226   :  { %2952 = vmatprep.subr.bf16.mxu0 %v6428_v14  ;;  %v6230_v14 = vcombine.high %v333_v8, %v337_v9  ;;  %v385_v2 = vld [vmem:[#allocation5 + $0x3f8] sm:$0xff] }
 0x228   :  { %2996 = vmatpush1.bf16.msra.mxu1 %v6173_v19  ;;  %v600_v19 = vld [vmem:[#allocation5 + $0xab0] sm:$0xff] }
 0x229   :  { %2953 = vmatpush1.bf16.msra.mxu0 %v6427_v20  ;;  %2997 = vmatprep.subr.bf16.mxu1 %v6182_v21  ;;  %v6229_v20 = vcombine.low %v333_v8, %v337_v9  ;;  %v6483_v21 = vcombine.low %v588_v10, %v592_v11  ;;  %v6492_v24 = vcombine.high %v596_v18, %v600_v19  ;;  %v389_v9 = vld [vmem:[#allocation5 + $0x418] sm:$0xff] }
 0x22a   :  { %2954 = vmatprep.subr.bf16.mxu0 %v6436_v23  ;;  %v6238_v23 = vcombine.high %v341_v16, %v345_v17  ;;  %v393_v10 = vld [vmem:[#allocation5 + $0x438] sm:$0xff]  ;;  %v6277_v11 = vcombine.low %v381_v0, %v385_v2 }
 0x22c   :  { %2998 = vmatpush1.bf16.msra.mxu1 %v6181_v29  ;;  %v608_v29 = vld [vmem:[#allocation5 + $0xaf0] sm:$0xff] }
 0x22d   :  { %2955 = vmatpush1.bf16.msra.mxu0 %v6435_v30  ;;  %2999 = vmatprep.subr.bf16.mxu1 %v6190_v31  ;;  %v6237_v30 = vcombine.low %v341_v16, %v345_v17  ;;  %v6491_v31 = vcombine.low %v596_v18, %v600_v19  ;;  %v6500_v32 = vcombine.high %v604_v28, %v608_v29  ;;  %v405_v18 = vld [vmem:[#allocation5 + $0x498] sm:$0xff] }
 0x22e   :  { %2956 = vmatprep.subr.bf16.mxu0 %v6444_v59  ;;  %v6246_v59 = vcombine.high %v349_v25, %v353_v26  ;;  %v6285_v16 = vcombine.low %v389_v9, %v393_v10  ;;  %v409_v19 = vld [vmem:[#allocation5 + $0x4b8] sm:$0xff] }
 0x230   :  { %3000 = vmatpush1.bf16.msra.mxu1 %v6189_v37  ;;  %v616_v37 = vld [vmem:[#allocation5 + $0xb30] sm:$0xff] }
 0x231   :  { %2957 = vmatpush1.bf16.msra.mxu0 %v6443_v38  ;;  %3001 = vmatprep.subr.bf16.mxu1 %v6198_v39  ;;  %v6245_v38 = vcombine.low %v349_v25, %v353_v26  ;;  %v6499_v39 = vcombine.low %v604_v28, %v608_v29  ;;  %v6508_v42 = vcombine.high %v612_v36, %v616_v37  ;;  %v417_v25 = vld [vmem:[#allocation5 + $0x4f8] sm:$0xff] }
 0x232   :  { %v8187_v49 = vpop.f32.mrb[0].mxu1  ;;  %2958 = vmatprep.subr.bf16.mxu0 %v6452_v41  ;;  %v6254_v41 = vcombine.high %v357_v34, %v361_v35  ;;  %v6301_v26 = vcombine.low %v405_v18, %v409_v19 }
 0x233   :  { %v8189_v53 = vpop.f32.mrb[1].mxu1 }
 0x234   :  { %v8191_v56 = vpop.f32.mrb[2].mxu1  ;;  %3002 = vmatpush1.bf16.msra.mxu1 %v6197_v46  ;;  %v624_v46 = vld [vmem:[#allocation5 + $0xb70] sm:$0xff] }
 0x235   :  { %2959 = vmatpush1.bf16.msra.mxu0 %v6451_v47  ;;  %v8193_v58 = vpop.f32.mrb[3].mxu1  ;;  %3003 = vmatprep.subr.bf16.mxu1 %v6206_v48  ;;  %v6253_v47 = vcombine.low %v357_v34, %v361_v35  ;;  %v6507_v48 = vcombine.low %v612_v36, %v616_v37  ;;  %v6516_v51 = vcombine.high %v620_v45, %v624_v46  ;;  %v429_v34 = vld [vmem:[#allocation5 + $0x558] sm:$0xff]  ;;  %v8203_v35 = vld [vmem:[#allocation7] sm:$0xff] }
 0x236   :  { %2960 = vmatprep.subr.bf16.mxu0 %v6460_v50  ;;  %v6262_v50 = vcombine.high %v365_v43, %v369_v44 }
 0x238   :  { %3004 = vmatpush1.bf16.msra.mxu1 %v6205_v57  ;;  %v632_v57 = vld [vmem:[#allocation5 + $0xbb0] sm:$0xff] }
 0x239   :  { %2961 = vmatpush1.bf16.msra.mxu0 %v6459_v60  ;;  %3005 = vmatprep.subr.bf16.mxu1 %v6214_v61  ;;  %v6261_v60 = vcombine.low %v365_v43, %v369_v44  ;;  %v6515_v61 = vcombine.low %v620_v45, %v624_v46  ;;  %v6524_v63 = vcombine.high %v628_v55, %v632_v57 }
 0x23a   :  { %2962 = vmatprep.subr.bf16.mxu0 %v6468_v62  ;;  %v6270_v62 = vcombine.high %v373_v52, %v377_v54 }
 0x23c   :  { %3006 = vmatpush1.bf16.msra.mxu1 %v6213_v4  ;;  %v640_v4 = vld [vmem:[#allocation5 + $0xbf0] sm:$0xff] }
 0x23d   :  { %2963 = vmatpush1.bf16.msra.mxu0 %v6467_v5  ;;  %3007 = vmatprep.subr.bf16.mxu1 %v6222_v6  ;;  %v6269_v5 = vcombine.low %v373_v52, %v377_v54  ;;  %v6523_v6 = vcombine.low %v628_v55, %v632_v57  ;;  %v6532_v8 = vcombine.high %v636_v3, %v640_v4 }
 0x23e   :  { %2964 = vmatprep.subr.bf16.mxu0 %v6476_v7  ;;  %v6278_v7 = vcombine.high %v381_v0, %v385_v2  ;;  %v453_v2 = vld [vmem:[#allocation5 + $0x618] sm:$0xff] }
 0x240   :  { %3008 = vmatpush1.bf16.msra.mxu1 %v6221_v12  ;;  %v6531_v12 = vcombine.low %v636_v3, %v640_v4 }
 0x241   :  { %2965 = vmatpush1.bf16.msra.mxu0 %v6475_v13  ;;  %3009 = vmatprep.subr.bf16.mxu1 %v6230_v14  ;;  %v6286_v13 = vcombine.high %v389_v9, %v393_v10  ;;  %v397_v14 = vld [vmem:[#allocation5 + $0x458] sm:$0xff] }
 0x242   :  { %2966 = vmatprep.subr.bf16.mxu0 %v6484_v15  ;;  %v401_v15 = vld [vmem:[#allocation5 + $0x478] sm:$0xff] }
 0x243   :  { %v6294_v17 = vcombine.high %v397_v14, %v401_v15  ;;  %v473_v9 = vld [vmem:[#allocation5 + $0x6b8] sm:$0xff] }
 0x244   :  { %3010 = vmatpush1.bf16.msra.mxu1 %v6229_v20  ;;  %v6293_v20 = vcombine.low %v397_v14, %v401_v15 }
 0x245   :  { %2967 = vmatpush1.bf16.msra.mxu0 %v6483_v21  ;;  %3011 = vmatprep.subr.bf16.mxu1 %v6238_v23  ;;  %v6302_v21 = vcombine.high %v405_v18, %v409_v19  ;;  %v644_v23 = vlaneseq }
 0x246   :  { %2968 = vmatprep.subr.bf16.mxu0 %v6492_v24  ;;  %v413_v24 = vld [vmem:[#allocation5 + $0x4d8] sm:$0xff] }
 0x247   :  { %v6310_v28 = vcombine.high %v413_v24, %v417_v25  ;;  %v8198_v29 = vshrl.u32 %v644_v23, 7 }
 0x248   :  { %3012 = vmatpush1.bf16.msra.mxu1 %v6237_v30  ;;  %v421_v30 = vld [vmem:[#allocation5 + $0x518] sm:$0xff] }
 0x249   :  { %2969 = vmatpush1.bf16.msra.mxu0 %v6491_v31  ;;  %3013 = vmatprep.subr.bf16.mxu1 %v6246_v59  ;;  %v425_v31 = vld [vmem:[#allocation5 + $0x538] sm:$0xff]  ;;  %v8206_v36 = vsub.s32 1, %v8198_v29 }
 0x24a   :  { %2970 = vmatprep.subr.bf16.mxu0 %v6500_v32  ;;  %v6318_v59 = vcombine.high %v421_v30, %v425_v31  ;;  %v8201_v32 = vsub.s32 0, %v8198_v29  ;;  %v6317_v37 = vcombine.low %v421_v30, %v425_v31  ;;  %v509_v31 = vld [vmem:[#allocation5 + $0x7d8] sm:$0xff] }
 0x24b   :  { %v651_v43 = vrot.slane %v8203_v35, %v8206_v36 }
 0x24c   :  { %3014 = vmatpush1.bf16.msra.mxu1 %v6245_v38 }
 0x24d   :  { %2971 = vmatpush1.bf16.msra.mxu0 %v6499_v39  ;;  %3015 = vmatprep.subr.bf16.mxu1 %v6254_v41  ;;  %v647_v39 = vrot.slane %v8203_v35, %v8201_v32  ;;  %v437_v41 = vld [vmem:[#allocation5 + $0x598] sm:$0xff] }
 0x24e   :  { %2972 = vmatprep.subr.bf16.mxu0 %v6508_v42  ;;  %v441_v42 = vld [vmem:[#allocation5 + $0x5b8] sm:$0xff] }
 0x24f   :  { %v6334_v45 = vcombine.high %v437_v41, %v441_v42  ;;  %v2639_v46 = vadd.f32 %v8187_v49, %v647_v39  ;;  %v2643_v52 = vadd.f32 %v8191_v56, %v647_v39  ;;  %v6333_v57 = vcombine.low %v437_v41, %v441_v42  ;;  %v525_v41 = vld [vmem:[#allocation5 + $0x858] sm:$0xff] }
 0x250   :  { %3016 = vmatpush1.bf16.msra.mxu1 %v6253_v47  ;;  %v445_v47 = vld [vmem:[#allocation5 + $0x5d8] sm:$0xff] }
 0x251   :  { %2973 = vmatpush1.bf16.msra.mxu0 %v6507_v48  ;;  %3017 = vmatprep.subr.bf16.mxu1 %v6262_v50  ;;  %v449_v48 = vld [vmem:[#allocation5 + $0x5f8] sm:$0xff]  ;;  %v2641_v50 = vadd.f32 %v8189_v53, %v651_v43 }
 0x252   :  { %2974 = vmatprep.subr.bf16.mxu0 %v6516_v51  ;;  %v457_v53 = vld [vmem:[#allocation5 + $0x638] sm:$0xff]  ;;  %v6341_v56 = vcombine.low %v445_v47, %v449_v48 }
 0x253   :  { %v6350_v4 = vcombine.high %v453_v2, %v457_v53  ;;  %v529_v42 = vld [vmem:[#allocation5 + $0x878] sm:$0xff] }
 0x254   :  { %3018 = vmatpush1.bf16.msra.mxu1 %v6261_v60  ;;  %v2645_v60 = vadd.f32 %v8193_v58, %v651_v43  ;;  %v6349_v58 = vcombine.low %v453_v2, %v457_v53  ;;  %v565_v53 = vld [vmem:[#allocation5 + $0x998] sm:$0xff] }
 0x255   :  { %2975 = vmatpush1.bf16.msra.mxu0 %v6515_v61  ;;  %3019 = vmatprep.subr.bf16.mxu1 %v6270_v62 }
 0x256   :  { %2976 = vmatprep.subr.bf16.mxu0 %v6524_v63  ;;  %v6342_v63 = vcombine.high %v445_v47, %v449_v48  ;;  %v6421_v47 = vcombine.low %v525_v41, %v529_v42 }
 0x258   :  { %3020 = vmatpush1.bf16.msra.mxu1 %v6269_v5  ;;  %v461_v5 = vld [vmem:[#allocation5 + $0x658] sm:$0xff] }
 0x259   :  { %2977 = vmatpush1.bf16.msra.mxu0 %v6523_v6  ;;  %3021 = vmatprep.subr.bf16.mxu1 %v6278_v7  ;;  %v465_v6 = vld [vmem:[#allocation5 + $0x678] sm:$0xff] }
 0x25a   :  { %2978 = vmatprep.subr.bf16.mxu0 %v6532_v8  ;;  %v6358_v7 = vcombine.high %v461_v5, %v465_v6  ;;  %v469_v8 = vld [vmem:[#allocation5 + $0x698] sm:$0xff]  ;;  %v6357_v10 = vcombine.low %v461_v5, %v465_v6 }
 0x25b   :  { %v6365_v14 = vcombine.low %v469_v8, %v473_v9  ;;  %v573_v6 = vld [vmem:[#allocation5 + $0x9d8] sm:$0xff] }
 0x25c   :  { %3022 = vmatpush1.bf16.msra.mxu1 %v6277_v11  ;;  %v6366_v11 = vcombine.high %v469_v8, %v473_v9  ;;  %v581_v9 = vld [vmem:[#allocation5 + $0xa18] sm:$0xff] }
 0x25d   :  { %2979 = vmatpush1.bf16.msra.mxu0 %v6531_v12  ;;  %3034 = vmatprep.subr.bf16.mxu1 %v6286_v13  ;;  %v477_v12 = vld [vmem:[#allocation5 + $0x6d8] sm:$0xff] }
 0x25e   :  { %v481_v13 = vld [vmem:[#allocation5 + $0x6f8] sm:$0xff] }
 0x25f   :  { %3024 = vmatmul.mubr.bf16.vlgmr.msra.gmra.mrb[8].mxu1 %v8163_v22  ;;  %v6309_v22 = vcombine.low %v413_v24, %v417_v25  ;;  %v6374_v15 = vcombine.high %v477_v12, %v481_v13  ;;  %v6373_v18 = vcombine.low %v477_v12, %v481_v13  ;;  %v501_v25 = vld [vmem:[#allocation5 + $0x798] sm:$0xff] }
 0x260   :  { %2981 = vmatmul.mubr.bf16.vlgmr.msra.gmra.mrb[4].mxu0 %v8173_v40  ;;  %3035 = vmatpush1.bf16.msra.mxu1 %v6285_v16  ;;  %v485_v16 = vld [vmem:[#allocation5 + $0x718] sm:$0xff] }
 0x261   :  { %3036 = vmatprep.subr.bf16.mxu1 %v6294_v17  ;;  %3066 = vmatprep.mubr.bf16.mxu1 %v8160_v1  ;;  %v433_v1 = vld [vmem:[#allocation5 + $0x578] sm:$0xff] }
 0x262   :  { %v6326_v38 = vcombine.high %v429_v34, %v433_v1  ;;  %v6325_v44 = vcombine.low %v429_v34, %v433_v1  ;;  %v489_v17 = vld [vmem:[#allocation5 + $0x738] sm:$0xff] }
 0x263   :  { %v6382_v19 = vcombine.high %v485_v16, %v489_v17  ;;  %v6381_v23 = vcombine.low %v485_v16, %v489_v17  ;;  %v517_v1 = vld [vmem:[#allocation5 + $0x818] sm:$0xff] }
 0x264   :  { %3037 = vmatpush1.bf16.msra.mxu1 %v6293_v20  ;;  %v493_v20 = vld [vmem:[#allocation5 + $0x758] sm:$0xff] }
 0x265   :  { %3038 = vmatprep.subr.bf16.mxu1 %v6302_v21  ;;  %v497_v21 = vld [vmem:[#allocation5 + $0x778] sm:$0xff] }
 0x266   :  { %v6390_v24 = vcombine.high %v493_v20, %v497_v21  ;;  %v589_v13 = vld [vmem:[#allocation5 + $0xa58] sm:$0xff] }
 0x267   :  { %v597_v17 = vld [vmem:[#allocation5 + $0xa98] sm:$0xff] }
 0x268   :  { %3039 = vmatpush1.bf16.msra.mxu1 %v6301_v26  ;;  %v505_v26 = vld [vmem:[#allocation5 + $0x7b8] sm:$0xff] }
 0x269   :  { %3040 = vmatprep.subr.bf16.mxu1 %v6310_v28  ;;  %v6389_v28 = vcombine.low %v493_v20, %v497_v21  ;;  %v6398_v30 = vcombine.high %v501_v25, %v505_v26  ;;  %v605_v21 = vld [vmem:[#allocation5 + $0xad8] sm:$0xff] }
 0x26c   :  { %3041 = vmatpush1.bf16.msra.mxu1 %v6309_v22  ;;  %v513_v22 = vld [vmem:[#allocation5 + $0x7f8] sm:$0xff] }
 0x26d   :  { %3042 = vmatprep.subr.bf16.mxu1 %v6318_v59  ;;  %v6397_v59 = vcombine.low %v501_v25, %v505_v26  ;;  %v6406_v34 = vcombine.high %v509_v31, %v513_v22  ;;  %v613_v26 = vld [vmem:[#allocation5 + $0xb18] sm:$0xff] }
 0x270   :  { %3043 = vmatpush1.bf16.msra.mxu1 %v6317_v37  ;;  %v521_v37 = vld [vmem:[#allocation5 + $0x838] sm:$0xff] }
 0x271   :  { %3044 = vmatprep.subr.bf16.mxu1 %v6326_v38  ;;  %v6405_v38 = vcombine.low %v509_v31, %v513_v22  ;;  %v6414_v39 = vcombine.high %v517_v1, %v521_v37  ;;  %v6413_v43 = vcombine.low %v517_v1, %v521_v37  ;;  %v621_v22 = vld [vmem:[#allocation5 + $0xb58] sm:$0xff] }
 0x272   :  { %v629_v37 = vld [vmem:[#allocation5 + $0xb98] sm:$0xff] }
 0x273   :  { %v2724_v51 = vpop.f32.mrb[0].mxu0 }
 0x274   :  { %v8215_v54 = vadd.f32 %v2724_v51, %v2639_v46  ;;  %v2726_v55 = vpop.f32.mrb[1].mxu0  ;;  %3045 = vmatpush1.bf16.msra.mxu1 %v6325_v44  ;;  %v6422_v44 = vcombine.high %v525_v41, %v529_v42  ;;  %v537_v46 = vld [vmem:[#allocation5 + $0x8b8] sm:$0xff] }
 0x275   :  { %v8218_v61 = vadd.f32 %v2726_v55, %v2641_v50  ;;  %v2728_v62 = vpop.f32.mrb[2].mxu0  ;;  %3046 = vmatprep.subr.bf16.mxu1 %v6334_v45  ;;  %v533_v45 = vld [vmem:[#allocation5 + $0x898] sm:$0xff] }
 0x276   :  { %v8220_v49 = vadd.f32 %v2728_v62, %v2643_v52  ;;  %v2730_v0 = vpop.f32.mrb[3].mxu0  ;;  %v6430_v48 = vcombine.high %v533_v45, %v537_v46  ;;  %v541_v50 = vld [vmem:[#allocation5 + $0x8d8] sm:$0xff]  ;;  %v6429_v52 = vcombine.low %v533_v45, %v537_v46 }
 0x277   :  { %v8222_v3 = vadd.f32 %v2730_v0, %v2645_v60  ;;  %v545_v51 = vld [vmem:[#allocation5 + $0x8f8] sm:$0xff] }
 0x278   :  { %3047 = vmatpush1.bf16.msra.mxu1 %v6333_v57  ;;  %v6438_v55 = vcombine.high %v541_v50, %v545_v51  ;;  %v549_v57 = vld [vmem:[#allocation5 + $0x918] sm:$0xff]  ;;  %v6437_v62 = vcombine.low %v541_v50, %v545_v51 }
 0x279   :  { %3048 = vmatprep.subr.bf16.mxu1 %v6342_v63  ;;  %v553_v60 = vld [vmem:[#allocation5 + $0x938] sm:$0xff] }
 0x27a   :  { %v6446_v63 = vcombine.high %v549_v57, %v553_v60  ;;  %v557_v0 = vld [vmem:[#allocation5 + $0x958] sm:$0xff]  ;;  %v6445_v2 = vcombine.low %v549_v57, %v553_v60 }
 0x27b   :  { %v637_v42 = vld [vmem:[#allocation5 + $0xbd8] sm:$0xff] }
 0x27c   :  { %3049 = vmatpush1.bf16.msra.mxu1 %v6341_v56  ;;  %v569_v56 = vld [vmem:[#allocation5 + $0x9b8] sm:$0xff] }
 0x27d   :  { %3050 = vmatprep.subr.bf16.mxu1 %v6350_v4  ;;  %v6462_v5 = vcombine.high %v565_v53, %v569_v56 }
 0x280   :  { %3051 = vmatpush1.bf16.msra.mxu1 %v6349_v58  ;;  %v577_v58 = vld [vmem:[#allocation5 + $0x9f8] sm:$0xff] }
 0x281   :  { %3052 = vmatprep.subr.bf16.mxu1 %v6358_v7  ;;  %v6461_v7 = vcombine.low %v565_v53, %v569_v56  ;;  %v6470_v8 = vcombine.high %v573_v6, %v577_v58  ;;  %v3122_v53 = vadd.f32 %v8218_v61, %v8215_v54 }
 0x284   :  { %3053 = vmatpush1.bf16.msra.mxu1 %v6357_v10  ;;  %v585_v10 = vld [vmem:[#allocation5 + $0xa38] sm:$0xff] }
 0x285   :  { %3054 = vmatprep.subr.bf16.mxu1 %v6366_v11  ;;  %v6469_v11 = vcombine.low %v573_v6, %v577_v58  ;;  %v6478_v12 = vcombine.high %v581_v9, %v585_v10 }
 0x288   :  { %3055 = vmatpush1.bf16.msra.mxu1 %v6365_v14  ;;  %v593_v14 = vld [vmem:[#allocation5 + $0xa78] sm:$0xff] }
 0x289   :  { %3056 = vmatprep.subr.bf16.mxu1 %v6374_v15  ;;  %v6477_v15 = vcombine.low %v581_v9, %v585_v10  ;;  %v6486_v16 = vcombine.high %v589_v13, %v593_v14 }
 0x28c   :  { %3057 = vmatpush1.bf16.msra.mxu1 %v6373_v18  ;;  %v601_v18 = vld [vmem:[#allocation5 + $0xab8] sm:$0xff] }
 0x28d   :  { %3058 = vmatprep.subr.bf16.mxu1 %v6382_v19  ;;  %v6485_v19 = vcombine.low %v589_v13, %v593_v14  ;;  %v6494_v20 = vcombine.high %v597_v17, %v601_v18 }
 0x290   :  { %3059 = vmatpush1.bf16.msra.mxu1 %v6381_v23  ;;  %v609_v23 = vld [vmem:[#allocation5 + $0xaf8] sm:$0xff] }
 0x291   :  { %3060 = vmatprep.subr.bf16.mxu1 %v6390_v24  ;;  %v6493_v24 = vcombine.low %v597_v17, %v601_v18  ;;  %v6502_v25 = vcombine.high %v605_v21, %v609_v23 }
 0x294   :  { %3061 = vmatpush1.bf16.msra.mxu1 %v6389_v28  ;;  %v617_v28 = vld [vmem:[#allocation5 + $0xb38] sm:$0xff] }
 0x295   :  { %3062 = vmatprep.subr.bf16.mxu1 %v6398_v30  ;;  %v6501_v30 = vcombine.low %v605_v21, %v609_v23  ;;  %v6510_v31 = vcombine.high %v613_v26, %v617_v28 }
 0x298   :  { %3063 = vmatpush1.bf16.msra.mxu1 %v6397_v59  ;;  %v625_v59 = vld [vmem:[#allocation5 + $0xb78] sm:$0xff] }
 0x299   :  { %3064 = vmatprep.subr.bf16.mxu1 %v6406_v34  ;;  %v6509_v34 = vcombine.low %v613_v26, %v617_v28  ;;  %v6518_v1 = vcombine.high %v621_v22, %v625_v59 }
 0x29c   :  { %3065 = vmatpush1.bf16.msra.mxu1 %v6405_v38  ;;  %v633_v38 = vld [vmem:[#allocation5 + $0xbb8] sm:$0xff] }
 0x29d   :  { %3077 = vmatprep.subr.bf16.mxu1 %v6414_v39  ;;  %v6517_v39 = vcombine.low %v621_v22, %v625_v59  ;;  %v6526_v41 = vcombine.high %v629_v37, %v633_v38 }
 0x29f   :  { %3067 = vmatmul.mubr.bf16.vlgmr.msra.gmra.mrb[8].mxu1 %v8165_v27  ;;  %v561_v27 = vld [vmem:[#allocation5 + $0x978] sm:$0xff] }
 0x2a0   :  { %3078 = vmatpush1.bf16.msra.mxu1 %v6413_v43  ;;  %3109 = vmatprep.mubr.bf16.mxu1 %v8167_v33  ;;  %v6454_v33 = vcombine.high %v557_v0, %v561_v27  ;;  %v6453_v4 = vcombine.low %v557_v0, %v561_v27  ;;  %v641_v43 = vld [vmem:[#allocation5 + $0xbf8] sm:$0xff]  ;;  %v8233_v0 = vsub.s32 3, %v8198_v29  ;;  %v8236_v27 = vsub.s32 4, %v8198_v29 }
 0x2a1   :  { %3079 = vmatprep.subr.bf16.mxu1 %v6422_v44  ;;  %v6525_v44 = vcombine.low %v629_v37, %v633_v38  ;;  %v6534_v45 = vcombine.high %v637_v42, %v641_v43  ;;  %v6533_v46 = vcombine.low %v637_v42, %v641_v43  ;;  %v7007_v38 = vld [vmem:[#allocation11] ss:$16 sps:$4 sm:$0xff]   ;;  %v7012_v42 = vld [vmem:[#allocation11 + $0xc] ss:$16 sps:$4 sm:$0xff]   ;;  %v7015_v43 = vld [vmem:[#allocation11 + $0x24] ss:$16 sps:$4 sm:$0xff]  }
 0x2a4   :  { %3080 = vmatpush1.bf16.msra.mxu1 %v6421_v47 }
 0x2a5   :  { %3081 = vmatprep.subr.bf16.mxu1 %v6430_v48 }
 0x2a8   :  { %3082 = vmatpush1.bf16.msra.mxu1 %v6429_v52 }
 0x2a9   :  { %3083 = vmatprep.subr.bf16.mxu1 %v6438_v55 }
 0x2ac   :  { %3084 = vmatpush1.bf16.msra.mxu1 %v6437_v62  ;;  %v8228_v62 = vsub.s32 2, %v8198_v29 }
 0x2ad   :  { %3085 = vmatprep.subr.bf16.mxu1 %v6446_v63 }
 0x2ae   :  { %v655_v63 = vrot.slane %v8203_v35, %v8228_v62 }
 0x2b0   :  { %3086 = vmatpush1.bf16.msra.mxu1 %v6445_v2  ;;  %v659_v2 = vrot.slane %v8203_v35, %v8233_v0 }
 0x2b1   :  { %3087 = vmatprep.subr.bf16.mxu1 %v6454_v33  ;;  %v8243_v33 = vsub.s32 5, %v8198_v29 }
 0x2b4   :  { %3088 = vmatpush1.bf16.msra.mxu1 %v6453_v4  ;;  %v663_v4 = vrot.slane %v8203_v35, %v8236_v27 }
 0x2b5   :  { %3089 = vmatprep.subr.bf16.mxu1 %v6462_v5  ;;  %v3131_v5 = vadd.f32 %v8222_v3, %v8220_v49 }
 0x2b8   :  { %3090 = vmatpush1.bf16.msra.mxu1 %v6461_v7  ;;  %v667_v7 = vrot.slane %v8203_v35, %v8243_v33 }
 0x2b9   :  { %3091 = vmatprep.subr.bf16.mxu1 %v6470_v8 }
 0x2bc   :  { %3092 = vmatpush1.bf16.msra.mxu1 %v6469_v11  ;;  %v8264_v11 = vsub.s32 6, %v8198_v29 }
 0x2bd   :  { %3093 = vmatprep.subr.bf16.mxu1 %v6478_v12  ;;  %v8267_v12 = vsub.s32 7, %v8198_v29 }
 0x2be   :  { %v671_v18 = vrot.slane %v8203_v35, %v8264_v11 }
 0x2c0   :  { %3094 = vmatpush1.bf16.msra.mxu1 %v6477_v15 }
 0x2c1   :  { %3095 = vmatprep.subr.bf16.mxu1 %v6486_v16 }
 0x2c4   :  { %3096 = vmatpush1.bf16.msra.mxu1 %v6485_v19  ;;  %v675_v19 = vrot.slane %v8203_v35, %v8267_v12 }
 0x2c5   :  { %3097 = vmatprep.subr.bf16.mxu1 %v6494_v20 }
 0x2c8   :  { %3098 = vmatpush1.bf16.msra.mxu1 %v6493_v24 }
 0x2c9   :  { %3099 = vmatprep.subr.bf16.mxu1 %v6502_v25 }
 0x2cc   :  { %3100 = vmatpush1.bf16.msra.mxu1 %v6501_v30 }
 0x2cd   :  { %3101 = vmatprep.subr.bf16.mxu1 %v6510_v31 }
 0x2d0   :  { %3102 = vmatpush1.bf16.msra.mxu1 %v6509_v34 }
 0x2d1   :  { %3103 = vmatprep.subr.bf16.mxu1 %v6518_v1 }
 0x2d4   :  { %3104 = vmatpush1.bf16.msra.mxu1 %v6517_v39  ;;  %v7009_v39 = vld [vmem:[#allocation11 + $0x4] ss:$16 sps:$4 sm:$0xff]  }
 0x2d5   :  { %3105 = vmatprep.subr.bf16.mxu1 %v6526_v41  ;;  %v7010_v41 = vld [vmem:[#allocation11 + $0x8] ss:$16 sps:$4 sm:$0xff]   ;;  %4911 = vmatprep.subr.bf16.mxu0 %v7009_v39 }
 0x2d6   :  { %4912 = vmatpush1.bf16.msra.mxu0 %v7007_v38 }
 0x2d7   :  { %4913 = vmatprep.subr.bf16.mxu0 %v7015_v43 }
 0x2d8   :  { %3106 = vmatpush1.bf16.msra.mxu1 %v6525_v44  ;;  %v7018_v44 = vld [vmem:[#allocation11 + $0x2c] ss:$16 sps:$4 sm:$0xff]  }
 0x2d9   :  { %3107 = vmatprep.subr.bf16.mxu1 %v6534_v45  ;;  %v7013_v45 = vld [vmem:[#allocation11 + $0x20] ss:$16 sps:$4 sm:$0xff]  }
 0x2da   :  { %4914 = vmatpush1.bf16.msra.mxu0 %v7013_v45 }
 0x2dc   :  { %3108 = vmatpush1.bf16.msra.mxu1 %v6533_v46  ;;  %v7016_v46 = vld [vmem:[#allocation11 + $0x28] ss:$16 sps:$4 sm:$0xff]  }
 0x2dd   :  { %5083 = vmatprep.subr.bf16.mxu1 %v7012_v42 }
 0x2df   :  { %3110 = vmatmul.mubr.bf16.vlgmr.msra.gmra.mrb[8].mxu1 %v8173_v40 }
 0x2e0   :  { %5084 = vmatpush1.bf16.msra.mxu1 %v7010_v41 }
 0x2e1   :  { %5085 = vmatprep.subr.bf16.mxu1 %v7018_v44 }
 0x2e4   :  { %5086 = vmatpush1.bf16.msra.mxu1 %v7016_v46 }
 0x2f2   :  { %v2853_v47 = vpop.f32.mrb[4].mxu1 }
 0x2f3   :  { %v2855_v48 = vpop.f32.mrb[5].mxu1  ;;  %v8238_v40 = vadd.f32 %v2853_v47, %v655_v63  ;;  %v7021_v47 = vld [vmem:[#allocation11 + $0x44] ss:$16 sps:$4 sm:$0xff]  }
 0x2f4   :  { %v2857_v50 = vpop.f32.mrb[6].mxu1  ;;  %v8254_v58 = vadd.f32 %v2855_v48, %v659_v2  ;;  %v7024_v48 = vld [vmem:[#allocation11 + $0x4c] ss:$16 sps:$4 sm:$0xff]   ;;  %4915 = vmatprep.subr.bf16.mxu0 %v7021_v47 }
 0x2f5   :  { %v2859_v51 = vpop.f32.mrb[7].mxu1  ;;  %v8247_v56 = vadd.f32 %v2857_v50, %v655_v63  ;;  %v3123_v6 = vadd.f32 %v8238_v40, %v3122_v53  ;;  %v7019_v50 = vld [vmem:[#allocation11 + $0x40] ss:$16 sps:$4 sm:$0xff]   ;;  %5087 = vmatprep.subr.bf16.mxu1 %v7024_v48  ;;  %v7033_v63 = vld [vmem:[#allocation11 + $0x84] ss:$16 sps:$4 sm:$0xff]  }
 0x2f6   :  { %v8259_v9 = vadd.f32 %v2859_v51, %v659_v2  ;;  %v7022_v51 = vld [vmem:[#allocation11 + $0x48] ss:$16 sps:$4 sm:$0xff]   ;;  %4916 = vmatpush1.bf16.msra.mxu0 %v7019_v50  ;;  %v7036_v2 = vld [vmem:[#allocation11 + $0x8c] ss:$16 sps:$4 sm:$0xff]   ;;  %v7031_v53 = vld [vmem:[#allocation11 + $0x80] ss:$16 sps:$4 sm:$0xff]  }
 0x2f7   :  { %v3132_v8 = vadd.f32 %v8247_v56, %v3131_v5  ;;  %v3124_v13 = vadd.f32 %v8254_v58, %v3123_v6  ;;  %5088 = vmatpush1.bf16.msra.mxu1 %v7022_v51  ;;  %v7039_v5 = vld [vmem:[#allocation11 + $0xa4] ss:$16 sps:$4 sm:$0xff]   ;;  %v7042_v6 = vld [vmem:[#allocation11 + $0xac] ss:$16 sps:$4 sm:$0xff]  }
 0x2f9   :  { %v3133_v15 = vadd.f32 %v8259_v9, %v3132_v8  ;;  %v7040_v8 = vld [vmem:[#allocation11 + $0xa8] ss:$16 sps:$4 sm:$0xff]  }
 0x333   :  { %v2982_v52 = vpop.f32.mrb[4].mxu0 }
 0x334   :  { %v2984_v55 = vpop.f32.mrb[5].mxu0  ;;  %v8261_v10 = vadd.f32 %v2982_v52, %v663_v4  ;;  %v7027_v52 = vld [vmem:[#allocation11 + $0x64] ss:$16 sps:$4 sm:$0xff]  }
 0x335   :  { %v2986_v57 = vpop.f32.mrb[6].mxu0  ;;  %v8274_v17 = vadd.f32 %v2984_v55, %v667_v7  ;;  %v7030_v55 = vld [vmem:[#allocation11 + $0x6c] ss:$16 sps:$4 sm:$0xff]   ;;  %4917 = vmatprep.subr.bf16.mxu0 %v7027_v52 }
 0x336   :  { %v2988_v60 = vpop.f32.mrb[7].mxu0  ;;  %v8270_v14 = vadd.f32 %v2986_v57, %v663_v4  ;;  %v3125_v16 = vadd.f32 %v8261_v10, %v3124_v13  ;;  %v7025_v57 = vld [vmem:[#allocation11 + $0x60] ss:$16 sps:$4 sm:$0xff]   ;;  %5089 = vmatprep.subr.bf16.mxu1 %v7030_v55  ;;  %v7034_v4 = vld [vmem:[#allocation11 + $0x88] ss:$16 sps:$4 sm:$0xff]  }
 0x337   :  { %v8281_v29 = vadd.f32 %v2988_v60, %v667_v7  ;;  %v7028_v60 = vld [vmem:[#allocation11 + $0x68] ss:$16 sps:$4 sm:$0xff]   ;;  %4918 = vmatpush1.bf16.msra.mxu0 %v7025_v57  ;;  %v7037_v7 = vld [vmem:[#allocation11 + $0xa0] ss:$16 sps:$4 sm:$0xff]   ;;  %v7045_v13 = vld [vmem:[#allocation11 + $0xc4] ss:$16 sps:$4 sm:$0xff]  }
 0x338   :  { %v3134_v20 = vadd.f32 %v8270_v14, %v3133_v15  ;;  %v3126_v23 = vadd.f32 %v8274_v17, %v3125_v16  ;;  %5090 = vmatpush1.bf16.msra.mxu1 %v7028_v60  ;;  %4919 = vmatprep.subr.bf16.mxu0 %v7033_v63  ;;  %v7048_v15 = vld [vmem:[#allocation11 + $0xcc] ss:$16 sps:$4 sm:$0xff]   ;;  %v7043_v16 = vld [vmem:[#allocation11 + $0xc0] ss:$16 sps:$4 sm:$0xff]  }
 0x339   :  { %5091 = vmatprep.subr.bf16.mxu1 %v7036_v2 }
 0x33a   :  { %v3135_v30 = vadd.f32 %v8281_v29, %v3134_v20  ;;  %v7054_v20 = vld [vmem:[#allocation11 + $0xec] ss:$16 sps:$4 sm:$0xff]  }
 0x33b   :  { %4920 = vmatpush1.bf16.msra.mxu0 %v7031_v53 }
 0x33c   :  { %5092 = vmatpush1.bf16.msra.mxu1 %v7034_v4  ;;  %4921 = vmatprep.subr.bf16.mxu0 %v7039_v5 }
 0x33d   :  { %5093 = vmatprep.subr.bf16.mxu1 %v7042_v6 }
 0x33f   :  { %4922 = vmatpush1.bf16.msra.mxu0 %v7037_v7 }
 0x340   :  { %5094 = vmatpush1.bf16.msra.mxu1 %v7040_v8  ;;  %4923 = vmatprep.subr.bf16.mxu0 %v7045_v13 }
 0x341   :  { %5095 = vmatprep.subr.bf16.mxu1 %v7048_v15 }
 0x343   :  { %4924 = vmatpush1.bf16.msra.mxu0 %v7043_v16 }
 0x3b2   :  { %v3111_v21 = vpop.f32.mrb[8].mxu1 }
 0x3b3   :  { %v8284_v24 = vadd.f32 %v3111_v21, %v671_v18  ;;  %v3113_v25 = vpop.f32.mrb[9].mxu1  ;;  %v7049_v21 = vld [vmem:[#allocation11 + $0xe0] ss:$16 sps:$4 sm:$0xff]  }
 0x3b4   :  { %v8286_v26 = vadd.f32 %v3113_v25, %v675_v19  ;;  %v3115_v28 = vpop.f32.mrb[10].mxu1  ;;  %v7057_v25 = vld [vmem:[#allocation11 + $0x104] ss:$16 sps:$4 sm:$0xff]  }
 0x3b5   :  { %v8289_v31 = vadd.f32 %v3115_v28, %v671_v18  ;;  %v3117_v22 = vpop.f32.mrb[11].mxu1  ;;  %v3127_v35 = vadd.f32 %v8284_v24, %v3126_v23  ;;  %v7046_v18 = vld [vmem:[#allocation11 + $0xc8] ss:$16 sps:$4 sm:$0xff]   ;;  %v7060_v28 = vld [vmem:[#allocation11 + $0x10c] ss:$16 sps:$4 sm:$0xff]  }
 0x3b6   :  { %v8293_v34 = vadd.f32 %v3117_v22, %v675_v19  ;;  %v7051_v19 = vld [vmem:[#allocation11 + $0xe4] ss:$16 sps:$4 sm:$0xff]   ;;  %5096 = vmatpush1.bf16.msra.mxu1 %v7046_v18  ;;  %v7052_v23 = vld [vmem:[#allocation11 + $0xe8] ss:$16 sps:$4 sm:$0xff]  }
 0x3b7   :  { %v3136_v59 = vadd.f32 %v8289_v31, %v3135_v30  ;;  %v3128_v1 = vadd.f32 %v8286_v26, %v3127_v35  ;;  %4925 = vmatprep.subr.bf16.mxu0 %v7051_v19  ;;  %5097 = vmatprep.subr.bf16.mxu1 %v7054_v20  ;;  %v7055_v30 = vld [vmem:[#allocation11 + $0x100] ss:$16 sps:$4 sm:$0xff]   ;;  %v7058_v22 = vld [vmem:[#allocation11 + $0x108] ss:$16 sps:$4 sm:$0xff]  }
 0x3b8   :  { %4926 = vmatpush1.bf16.msra.mxu0 %v7049_v21 }
 0x3b9   :  { %3129 = vadd.xlane.f32.xlu0 %v3128_v1  ;;  %v3137_v37 = vadd.f32 %v8293_v34, %v3136_v59  ;;  %4927 = vmatprep.subr.bf16.mxu0 %v7057_v25  ;;  %v7066_v25 = vld [vmem:[#allocation11 + $0x12c] ss:$16 sps:$4 sm:$0xff]  }
 0x3ba   :  { %5098 = vmatpush1.bf16.msra.mxu1 %v7052_v23  ;;  %v7063_v23 = vld [vmem:[#allocation11 + $0x124] ss:$16 sps:$4 sm:$0xff]  }
 0x3bb   :  { %5099 = vmatprep.subr.bf16.mxu1 %v7060_v28  ;;  %v7064_v28 = vld [vmem:[#allocation11 + $0x128] ss:$16 sps:$4 sm:$0xff]  }
 0x3bc   :  { %4928 = vmatpush1.bf16.msra.mxu0 %v7055_v30  ;;  %v7069_v30 = vld [vmem:[#allocation11 + $0x144] ss:$16 sps:$4 sm:$0xff]  }
 0x3bd   :  { %3138 = vadd.xlane.f32.xlu0 %v3137_v37  ;;  %4929 = vmatprep.subr.bf16.mxu0 %v7063_v23 }
 0x3be   :  { %5100 = vmatpush1.bf16.msra.mxu1 %v7058_v22  ;;  %v7072_v22 = vld [vmem:[#allocation11 + $0x14c] ss:$16 sps:$4 sm:$0xff]  }
 0x3bf   :  { %5101 = vmatprep.subr.bf16.mxu1 %v7066_v25 }
 0x3c2   :  { %5102 = vmatpush1.bf16.msra.mxu1 %v7064_v28 }
 0x3c3   :  { %5103 = vmatprep.subr.bf16.mxu1 %v7072_v22 }
 0x446   :  { %v3130_v35 = vpop.xlane.xlu0 %3129 }
 0x447   :  { %v3141_v59 = vmul.f32 0.0009765625, %v3130_v35  ;;  %v7067_v35 = vld [vmem:[#allocation11 + $0x140] ss:$16 sps:$4 sm:$0xff]  }
 0x449   :  { %v8298_v1 = vsub.f32 %v8215_v54, %v3141_v59  ;;  %v8301_v37 = vsub.f32 %v8218_v61, %v3141_v59  ;;  %v8304_v38 = vsub.f32 %v8238_v40, %v3141_v59  ;;  %v8307_v42 = vsub.f32 %v8254_v58, %v3141_v59 }
 0x44a   :  { %v3139_v39 = vpop.xlane.xlu0 %3138  ;;  %v8314_v54 = vsub.f32 %v8261_v10, %v3141_v59  ;;  %v8328_v47 = vsub.f32 %v8274_v17, %v3141_v59 }
 0x44b   :  { %v3142_v41 = vmul.f32 0.0009765625, %v3139_v39  ;;  %v3159_v43 = vmul.f32 %v8298_v1, %v8298_v1  ;;  %v3160_v44 = vmul.f32 %v8301_v37, %v8301_v37  ;;  %v3161_v61 = vmul.f32 %v8304_v38, %v8304_v38  ;;  %v7073_v39 = vld [vmem:[#allocation11 + $0x160] ss:$16 sps:$4 sm:$0xff]  }
 0x44c   :  { %v3162_v10 = vmul.f32 %v8307_v42, %v8307_v42  ;;  %v3164_v60 = vmul.f32 %v8328_v47, %v8328_v47 }
 0x44d   :  { %v3175_v45 = vadd.f32 %v3160_v44, %v3159_v43  ;;  %v8319_v40 = vsub.f32 %v8220_v49, %v3142_v41  ;;  %v8322_v46 = vsub.f32 %v8222_v3, %v3142_v41  ;;  %v8325_v58 = vsub.f32 %v8247_v56, %v3142_v41  ;;  %v7076_v43 = vld [vmem:[#allocation11 + $0x168] ss:$16 sps:$4 sm:$0xff]   ;;  %v7078_v44 = vld [vmem:[#allocation11 + $0x16c] ss:$16 sps:$4 sm:$0xff]  }
 0x44e   :  { %v8335_v51 = vsub.f32 %v8259_v9, %v3142_v41  ;;  %v8340_v3 = vsub.f32 %v8284_v24, %v3141_v59  ;;  %v3163_v56 = vmul.f32 %v8314_v54, %v8314_v54  ;;  %v8345_v52 = vsub.f32 %v8270_v14, %v3142_v41 }
 0x44f   :  { %v3176_v48 = vadd.f32 %v3175_v45, %v3161_v61  ;;  %v3167_v50 = vmul.f32 %v8319_v40, %v8319_v40  ;;  %v3168_v49 = vmul.f32 %v8322_v46, %v8322_v46  ;;  %v3169_v55 = vmul.f32 %v8325_v58, %v8325_v58  ;;  %v7081_v61 = vld [vmem:[#allocation11 + $0x184] ss:$16 sps:$4 sm:$0xff]   ;;  %v7084_v45 = vld [vmem:[#allocation11 + $0x18c] ss:$16 sps:$4 sm:$0xff]  }
 0x450   :  { %v8350_v9 = vsub.f32 %v8286_v26, %v3141_v59  ;;  %v8355_v24 = vsub.f32 %v8281_v29, %v3142_v41  ;;  %v3170_v2 = vmul.f32 %v8335_v51, %v8335_v51  ;;  %v3165_v14 = vmul.f32 %v8340_v3, %v8340_v3  ;;  %v7070_v59 = vld [vmem:[#allocation11 + $0x148] ss:$16 sps:$4 sm:$0xff]  }
 0x451   :  { %v3177_v17 = vadd.f32 %v3176_v48, %v3162_v10  ;;  %v3184_v57 = vadd.f32 %v3168_v49, %v3167_v50  ;;  %v8362_v5 = vsub.f32 %v8289_v31, %v3142_v41  ;;  %v3171_v26 = vmul.f32 %v8345_v52, %v8345_v52  ;;  %5104 = vmatpush1.bf16.msra.mxu1 %v7070_v59  ;;  %v7079_v10 = vld [vmem:[#allocation11 + $0x180] ss:$16 sps:$4 sm:$0xff]   ;;  %v7082_v48 = vld [vmem:[#allocation11 + $0x188] ss:$16 sps:$4 sm:$0xff]   ;;  %v7087_v50 = vld [vmem:[#allocation11 + $0x1a4] ss:$16 sps:$4 sm:$0xff]  }
 0x452   :  { %v3166_v7 = vmul.f32 %v8350_v9, %v8350_v9  ;;  %v8369_v8 = vsub.f32 %v8293_v34, %v3142_v41  ;;  %v3172_v13 = vmul.f32 %v8355_v24, %v8355_v24  ;;  %v7061_v34 = vld [vmem:[#allocation11 + $0x120] ss:$16 sps:$4 sm:$0xff]   ;;  %v7075_v41 = vld [vmem:[#allocation11 + $0x164] ss:$16 sps:$4 sm:$0xff]   ;;  %5105 = vmatprep.subr.bf16.mxu1 %v7078_v44  ;;  %v7090_v49 = vld [vmem:[#allocation11 + $0x1ac] ss:$16 sps:$4 sm:$0xff]  }
 0x453   :  { %v3178_v63 = vadd.f32 %v3177_v17, %v3163_v56  ;;  %v3185_v53 = vadd.f32 %v3184_v57, %v3169_v55  ;;  %v3173_v31 = vmul.f32 %v8362_v5, %v8362_v5  ;;  %4930 = vmatpush1.bf16.msra.mxu0 %v7061_v34  ;;  %v7085_v56 = vld [vmem:[#allocation11 + $0x1a0] ss:$16 sps:$4 sm:$0xff]   ;;  %v7088_v17 = vld [vmem:[#allocation11 + $0x1a8] ss:$16 sps:$4 sm:$0xff]   ;;  %v7093_v55 = vld [vmem:[#allocation11 + $0x1c4] ss:$16 sps:$4 sm:$0xff]  }
 0x454   :  { %v3174_v19 = vmul.f32 %v8369_v8, %v8369_v8  ;;  %4931 = vmatprep.subr.bf16.mxu0 %v7069_v30  ;;  %v7096_v57 = vld [vmem:[#allocation11 + $0x1cc] ss:$16 sps:$4 sm:$0xff]  }
 0x455   :  { %v3179_v4 = vadd.f32 %v3178_v63, %v3164_v60  ;;  %v3186_v6 = vadd.f32 %v3185_v53, %v3170_v2  ;;  %5106 = vmatpush1.bf16.msra.mxu1 %v7076_v43  ;;  %v7091_v60 = vld [vmem:[#allocation11 + $0x1c0] ss:$16 sps:$4 sm:$0xff]   ;;  %v7094_v63 = vld [vmem:[#allocation11 + $0x1c8] ss:$16 sps:$4 sm:$0xff]   ;;  %v7099_v2 = vld [vmem:[#allocation11 + $0x1e4] ss:$16 sps:$4 sm:$0xff]  }
 0x456   :  { %5107 = vmatprep.subr.bf16.mxu1 %v7084_v45  ;;  %v7102_v53 = vld [vmem:[#allocation11 + $0x1ec] ss:$16 sps:$4 sm:$0xff]  }
 0x457   :  { %v3180_v29 = vadd.f32 %v3179_v4, %v3165_v14  ;;  %v3187_v15 = vadd.f32 %v3186_v6, %v3171_v26  ;;  %4932 = vmatpush1.bf16.msra.mxu0 %v7067_v35  ;;  %v7097_v14 = vld [vmem:[#allocation11 + $0x1e0] ss:$16 sps:$4 sm:$0xff]   ;;  %v7100_v4 = vld [vmem:[#allocation11 + $0x1e8] ss:$16 sps:$4 sm:$0xff]   ;;  %v7105_v26 = vld [vmem:[#allocation11 + $0x204] ss:$16 sps:$4 sm:$0xff]  }
 0x458   :  { %4933 = vmatprep.subr.bf16.mxu0 %v7075_v41  ;;  %v7108_v6 = vld [vmem:[#allocation11 + $0x20c] ss:$16 sps:$4 sm:$0xff]  }
 0x459   :  { %v3181_v16 = vadd.f32 %v3180_v29, %v3166_v7  ;;  %v3188_v18 = vadd.f32 %v3187_v15, %v3172_v13  ;;  %5108 = vmatpush1.bf16.msra.mxu1 %v7082_v48 }
 0x45a   :  { %5109 = vmatprep.subr.bf16.mxu1 %v7090_v49 }
 0x45b   :  { %3182 = vadd.xlane.f32.xlu1 %v3181_v16  ;;  %v3189_v20 = vadd.f32 %v3188_v18, %v3173_v31  ;;  %4934 = vmatpush1.bf16.msra.mxu0 %v7073_v39  ;;  %v3120_v18 = vld [vmem:[#allocation8] sm:$0xff] }
 0x45c   :  { %4935 = vmatprep.subr.bf16.mxu0 %v7081_v61  ;;  %v8382_v23 = vrot.slane %v3120_v18, %v8264_v11  ;;  %v3223_v34 = vrot.slane %v3120_v18, %v8206_v36  ;;  %v3219_v28 = vrot.slane %v3120_v18, %v8201_v32  ;;  %v3231_v35 = vrot.slane %v3120_v18, %v8233_v0 }
 0x45d   :  { %v3190_v21 = vadd.f32 %v3189_v20, %v3174_v19  ;;  %5110 = vmatpush1.bf16.msra.mxu1 %v7088_v17  ;;  %v3121_v19 = vld [vmem:[#allocation10] sm:$0xff]  ;;  %v3235_v20 = vrot.slane %v3120_v18, %v8236_v27  ;;  %v3227_v59 = vrot.slane %v3120_v18, %v8228_v62  ;;  %v3247_v43 = vrot.slane %v3120_v18, %v8267_v12 }
 0x45e   :  { %5111 = vmatprep.subr.bf16.mxu1 %v7096_v57  ;;  %v8385_v25 = vrot.slane %v3121_v19, %v8264_v11  ;;  %v3280_v30 = vrot.slane %v3121_v19, %v8206_v36  ;;  %v3276_v22 = vrot.slane %v3121_v19, %v8201_v32  ;;  %v3288_v39 = vrot.slane %v3121_v19, %v8233_v0 }
 0x45f   :  { %3191 = vadd.xlane.f32.xlu1 %v3190_v21  ;;  %4936 = vmatpush1.bf16.msra.mxu0 %v7079_v10  ;;  %v8379_v21 = vrot.slane %v3121_v19, %v8236_v27  ;;  %v3284_v41 = vrot.slane %v3121_v19, %v8228_v62  ;;  %v3239_v11 = vrot.slane %v3120_v18, %v8243_v33 }
 0x460   :  { %4937 = vmatprep.subr.bf16.mxu0 %v7087_v50 }
 0x461   :  { %5112 = vmatpush1.bf16.msra.mxu1 %v7094_v63 }
 0x462   :  { %5113 = vmatprep.subr.bf16.mxu1 %v7102_v53 }
 0x463   :  { %4938 = vmatpush1.bf16.msra.mxu0 %v7085_v56 }
 0x464   :  { %4939 = vmatprep.subr.bf16.mxu0 %v7093_v55 }
 0x465   :  { %5114 = vmatpush1.bf16.msra.mxu1 %v7100_v4 }
 0x466   :  { %5126 = vmatprep.subr.bf16.mxu1 %v7108_v6 }
 0x467   :  { %4940 = vmatpush1.bf16.msra.mxu0 %v7091_v60 }
 0x468   :  { %4941 = vmatprep.subr.bf16.mxu0 %v7099_v2 }
 0x46b   :  { %4942 = vmatpush1.bf16.msra.mxu0 %v7097_v14 }
 0x46c   :  { %4954 = vmatprep.subr.bf16.mxu0 %v7105_v26 }
 0x4e8   :  { %v3183_v7 = vpop.xlane.xlu1 %3182 }
 0x4e9   :  { %v3193_v29 = vmul.f32 0.0009765625, %v3183_v7 }
 0x4eb   :  { %v3195_v13 = vadd.f32 1e-05, %v3193_v29 }
 0x4ec   :  { %v3192_v15 = vpop.xlane.xlu1 %3191 }
 0x4ed   :  { %7503 = vrsqrt.f32 %v3195_v13  ;;  %v3194_v16 = vmul.f32 0.0009765625, %v3192_v15 }
 0x4ef   :  { %v3196_v31 = vadd.f32 1e-05, %v3194_v16 }
 0x4f1   :  { %7505 = vrsqrt.f32 %v3196_v31 }
 0x4f7   :  { %v7504_v27 = vpop.eup %7503 }
 0x4f8   :  { %v3200_v44 = vmul.f32 %v7504_v27, %v8301_v37  ;;  %v3199_v61 = vmul.f32 %v7504_v27, %v8298_v1  ;;  %v3202_v45 = vmul.f32 %v7504_v27, %v8307_v42  ;;  %v3201_v10 = vmul.f32 %v7504_v27, %v8304_v38 }
 0x4f9   :  { %v3204_v48 = vmul.f32 %v7504_v27, %v8328_v47  ;;  %v3203_v50 = vmul.f32 %v7504_v27, %v8314_v54  ;;  %v3206_v49 = vmul.f32 %v7504_v27, %v8350_v9  ;;  %v3205_v56 = vmul.f32 %v7504_v27, %v8340_v3 }
 0x4fa   :  { %v3257_v17 = vmul.f32 %v3223_v34, %v3200_v44  ;;  %v3256_v55 = vmul.f32 %v3219_v28, %v3199_v61  ;;  %v3259_v57 = vmul.f32 %v3231_v35, %v3202_v45  ;;  %v3258_v60 = vmul.f32 %v3227_v59, %v3201_v10 }
 0x4fb   :  { %v3261_v63 = vmul.f32 %v3239_v11, %v3204_v48  ;;  %v3296_v37 = vrot.slane %v3121_v19, %v8243_v33  ;;  %v3260_v1 = vmul.f32 %v3235_v20, %v3203_v50  ;;  %v3304_v42 = vrot.slane %v3121_v19, %v8267_v12  ;;  %v7506_v2 = vpop.eup %7505 }
 0x4fc   :  { %v3314_v38 = vadd.f32 %v3280_v30, %v3257_v17  ;;  %v3313_v53 = vadd.f32 %v3276_v22, %v3256_v55  ;;  %v3263_v47 = vmul.f32 %v3247_v43, %v3206_v49  ;;  %v3262_v54 = vmul.f32 %v8382_v23, %v3205_v56  ;;  %v7103_v49 = vld [vmem:[#allocation11 + $0x200] ss:$16 sps:$4 sm:$0xff]  }
 0x4fd   :  { %v3208_v9 = vmul.f32 %v7506_v2, %v8322_v46  ;;  %v3207_v3 = vmul.f32 %v7506_v2, %v8319_v40  ;;  %v3210_v14 = vmul.f32 %v7506_v2, %v8335_v51  ;;  %v3209_v4 = vmul.f32 %v7506_v2, %v8325_v58 }
 0x4fe   :  { %v3330_v26 = vmax.f32 %v3314_v38, 0.0  ;;  %v3329_v6 = vmax.f32 %v3313_v53, 0.0  ;;  %v3316_v33 = vadd.f32 %v3288_v39, %v3259_v57  ;;  %v3315_v7 = vadd.f32 %v3284_v41, %v3258_v60  ;;  %v7111_v57 = vld [vmem:[#allocation11 + $0x224] ss:$16 sps:$4 sm:$0xff]   ;;  %v7114_v60 = vld [vmem:[#allocation11 + $0x22c] ss:$16 sps:$4 sm:$0xff]  }
 0x4ff   :  { %v3265_v29 = vmul.f32 %v3223_v34, %v3208_v9  ;;  %v3264_v12 = vmul.f32 %v3219_v28, %v3207_v3  ;;  %v3267_v13 = vmul.f32 %v3231_v35, %v3210_v14  ;;  %v3266_v15 = vmul.f32 %v3227_v59, %v3209_v4  ;;  %v7112_v38 = vld [vmem:[#allocation11 + $0x228] ss:$16 sps:$4 sm:$0xff]   ;;  %v7120_v9 = vld [vmem:[#allocation11 + $0x24c] ss:$16 sps:$4 sm:$0xff]  }
 0x500   :  { %v3212_v16 = vmul.f32 %v7506_v2, %v8355_v24  ;;  %v3318_v31 = vadd.f32 %v3296_v37, %v3261_v63  ;;  %v3211_v18 = vmul.f32 %v7506_v2, %v8345_v52  ;;  %v3317_v46 = vadd.f32 %v8379_v21, %v3260_v1  ;;  %v7109_v1 = vld [vmem:[#allocation11 + $0x220] ss:$16 sps:$4 sm:$0xff]   ;;  %v7118_v4 = vld [vmem:[#allocation11 + $0x248] ss:$16 sps:$4 sm:$0xff]  }
 0x501   :  { %v3322_v40 = vadd.f32 %v3280_v30, %v3265_v29  ;;  %v3321_v19 = vadd.f32 %v3276_v22, %v3264_v12  ;;  %v3324_v51 = vadd.f32 %v3288_v39, %v3267_v13  ;;  %v3323_v27 = vadd.f32 %v3284_v41, %v3266_v15  ;;  %v7106_v30 = vld [vmem:[#allocation11 + $0x208] ss:$16 sps:$4 sm:$0xff]   ;;  %v7132_v12 = vld [vmem:[#allocation11 + $0x28c] ss:$16 sps:$4 sm:$0xff]   ;;  %v7127_v13 = vld [vmem:[#allocation11 + $0x280] ss:$16 sps:$4 sm:$0xff]  }
 0x502   :  { %v3332_v58 = vmax.f32 %v3316_v33, 0.0  ;;  %v3331_v44 = vmax.f32 %v3315_v7, 0.0  ;;  %v3269_v61 = vmul.f32 %v3239_v11, %v3212_v16  ;;  %v3268_v45 = vmul.f32 %v3235_v20, %v3211_v18  ;;  %v7121_v7 = vld [vmem:[#allocation11 + $0x260] ss:$16 sps:$4 sm:$0xff]   ;;  %v7124_v29 = vld [vmem:[#allocation11 + $0x268] ss:$16 sps:$4 sm:$0xff]  }
 0x503   :  { %v3338_v10 = vmax.f32 %v3322_v40, 0.0  ;;  %v3337_v34 = vmax.f32 %v3321_v19, 0.0  ;;  %v3340_v28 = vmax.f32 %v3324_v51, 0.0  ;;  %v3339_v35 = vmax.f32 %v3323_v27, 0.0  ;;  %v7130_v15 = vld [vmem:[#allocation11 + $0x288] ss:$16 sps:$4 sm:$0xff]  }
 0x504   :  { %v3326_v59 = vadd.f32 %v3296_v37, %v3269_v61  ;;  %v3334_v48 = vmax.f32 %v3318_v31, 0.0  ;;  %v3325_v24 = vadd.f32 %v8379_v21, %v3268_v45  ;;  %v3214_v52 = vmul.f32 %v7506_v2, %v8369_v8  ;;  %v7135_v16 = vld [vmem:[#allocation11 + $0x2a4] ss:$16 sps:$4 sm:$0xff]   ;;  %v7138_v31 = vld [vmem:[#allocation11 + $0x2ac] ss:$16 sps:$4 sm:$0xff]  }
 0x505   :  { %v3346_v50 = vpack.c.bf16 %v3338_v10, %v3330_v26  ;;  %v3345_v22 = vpack.c.bf16 %v3337_v34, %v3329_v6  ;;  %v8417_v39 = vpack.c.bf16 %v3339_v35, %v3331_v44  ;;  %v3333_v41 = vmax.f32 %v3317_v46, 0.0  ;;  %v7126_v6 = vld [vmem:[#allocation11 + $0x26c] ss:$16 sps:$4 sm:$0xff]   ;;  %v7133_v18 = vld [vmem:[#allocation11 + $0x2a0] ss:$16 sps:$4 sm:$0xff]  }
 0x506   :  { %v3342_v56 = vmax.f32 %v3326_v59, 0.0  ;;  %v3341_v11 = vmax.f32 %v3325_v24, 0.0  ;;  %v3271_v20 = vmul.f32 %v3247_v43, %v3214_v52  ;;  %v3320_v17 = vadd.f32 %v3304_v42, %v3263_v47  ;;  %v7117_v47 = vld [vmem:[#allocation11 + $0x244] ss:$16 sps:$4 sm:$0xff]   ;;  %v7136_v46 = vld [vmem:[#allocation11 + $0x2a8] ss:$16 sps:$4 sm:$0xff]  }
 0x507   :  { %4943 = vmatprep.mubr.bf16.mxu0 %v3346_v50  ;;  %5115 = vmatprep.mubr.bf16.mxu1 %v3346_v50  ;;  %v3348_v55 = vpack.c.bf16 %v3340_v28, %v3332_v58  ;;  %v3213_v21 = vmul.f32 %v7506_v2, %v8362_v5  ;;  %v3319_v53 = vadd.f32 %v8385_v25, %v3262_v54  ;;  %v7123_v54 = vld [vmem:[#allocation11 + $0x264] ss:$16 sps:$4 sm:$0xff]   ;;  %v7144_v19 = vld [vmem:[#allocation11 + $0x2cc] ss:$16 sps:$4 sm:$0xff]   ;;  %v7139_v51 = vld [vmem:[#allocation11 + $0x2c0] ss:$16 sps:$4 sm:$0xff]  }
 0x508   :  { %4944 = vmatmul.mubr.bf16.vlgmr.msra.gmra.mrb[8].mxu0 %v3345_v22  ;;  %5116 = vmatmul.mubr.bf16.vlgmr.msra.gmra.mrb[12].mxu1 %v3345_v22  ;;  %v8420_v8 = vpack.c.bf16 %v3342_v56, %v3334_v48  ;;  %v8422_v63 = vpack.c.bf16 %v3341_v11, %v3333_v41  ;;  %v3328_v37 = vadd.f32 %v3304_v42, %v3271_v20  ;;  %v3336_v5 = vmax.f32 %v3320_v17, 0.0  ;;  %v7115_v42 = vld [vmem:[#allocation11 + $0x240] ss:$16 sps:$4 sm:$0xff]   ;;  %v7141_v40 = vld [vmem:[#allocation11 + $0x2c4] ss:$16 sps:$4 sm:$0xff]  }
 0x509   :  { %4955 = vmatpush1.bf16.msra.mxu0 %v7103_v49  ;;  %5127 = vmatpush1.bf16.msra.mxu1 %v7106_v30  ;;  %v3270_v43 = vmul.f32 %v8382_v23, %v3213_v21  ;;  %v3335_v26 = vmax.f32 %v3319_v53, 0.0  ;;  %v7142_v27 = vld [vmem:[#allocation11 + $0x2c8] ss:$16 sps:$4 sm:$0xff]   ;;  %v7147_v58 = vld [vmem:[#allocation11 + $0x2e4] ss:$16 sps:$4 sm:$0xff]  }
 0x50a   :  { %4986 = vmatprep.mubr.bf16.mxu0 %v3348_v55  ;;  %5158 = vmatprep.mubr.bf16.mxu1 %v3348_v55  ;;  %v3344_v2 = vmax.f32 %v3328_v37, 0.0  ;;  %v7150_v44 = vld [vmem:[#allocation11 + $0x2ec] ss:$16 sps:$4 sm:$0xff]   ;;  %v7145_v61 = vld [vmem:[#allocation11 + $0x2e0] ss:$16 sps:$4 sm:$0xff]  }
 0x50b   :  { %4956 = vmatprep.subr.bf16.mxu0 %v7111_v57  ;;  %5128 = vmatprep.subr.bf16.mxu1 %v7114_v60  ;;  %v3327_v3 = vadd.f32 %v8385_v25, %v3270_v43  ;;  %v7129_v25 = vld [vmem:[#allocation11 + $0x284] ss:$16 sps:$4 sm:$0xff]   ;;  %v7148_v45 = vld [vmem:[#allocation11 + $0x2e8] ss:$16 sps:$4 sm:$0xff]   ;;  %v7156_v34 = vld [vmem:[#allocation11 + $0x30c] ss:$16 sps:$4 sm:$0xff]  }
 0x50c   :  { %v8427_v14 = vpack.c.bf16 %v3344_v2, %v3336_v5  ;;  %v7153_v10 = vld [vmem:[#allocation11 + $0x304] ss:$16 sps:$4 sm:$0xff]   ;;  %v7151_v28 = vld [vmem:[#allocation11 + $0x300] ss:$16 sps:$4 sm:$0xff]   ;;  %v7154_v35 = vld [vmem:[#allocation11 + $0x308] ss:$16 sps:$4 sm:$0xff]  }
 0x50d   :  { %4957 = vmatpush1.bf16.msra.mxu0 %v7109_v1  ;;  %5129 = vmatpush1.bf16.msra.mxu1 %v7112_v38  ;;  %v3343_v23 = vmax.f32 %v3327_v3, 0.0  ;;  %v7159_v59 = vld [vmem:[#allocation11 + $0x324] ss:$16 sps:$4 sm:$0xff]   ;;  %v7162_v48 = vld [vmem:[#allocation11 + $0x32c] ss:$16 sps:$4 sm:$0xff]  }
 0x50e   :  { %4958 = vmatprep.subr.bf16.mxu0 %v7117_v47  ;;  %5130 = vmatprep.subr.bf16.mxu1 %v7120_v9  ;;  %v7157_v24 = vld [vmem:[#allocation11 + $0x320] ss:$16 sps:$4 sm:$0xff]   ;;  %v7160_v52 = vld [vmem:[#allocation11 + $0x328] ss:$16 sps:$4 sm:$0xff]   ;;  %v7165_v50 = vld [vmem:[#allocation11 + $0x344] ss:$16 sps:$4 sm:$0xff]  }
 0x50f   :  { %v8429_v33 = vpack.c.bf16 %v3343_v23, %v3335_v26  ;;  %v7168_v49 = vld [vmem:[#allocation11 + $0x34c] ss:$16 sps:$4 sm:$0xff]   ;;  %v7163_v30 = vld [vmem:[#allocation11 + $0x340] ss:$16 sps:$4 sm:$0xff]   ;;  %v7166_v22 = vld [vmem:[#allocation11 + $0x348] ss:$16 sps:$4 sm:$0xff]  }
 0x510   :  { %v7171_v41 = vld [vmem:[#allocation11 + $0x364] ss:$16 sps:$4 sm:$0xff]   ;;  %v7174_v56 = vld [vmem:[#allocation11 + $0x36c] ss:$16 sps:$4 sm:$0xff]   ;;  %v7169_v11 = vld [vmem:[#allocation11 + $0x360] ss:$16 sps:$4 sm:$0xff]  }
 0x511   :  { %4959 = vmatpush1.bf16.msra.mxu0 %v7115_v42  ;;  %5131 = vmatpush1.bf16.msra.mxu1 %v7118_v4  ;;  %v7172_v20 = vld [vmem:[#allocation11 + $0x368] ss:$16 sps:$4 sm:$0xff]   ;;  %v7177_v17 = vld [vmem:[#allocation11 + $0x384] ss:$16 sps:$4 sm:$0xff]   ;;  %v7180_v55 = vld [vmem:[#allocation11 + $0x38c] ss:$16 sps:$4 sm:$0xff]  }
 0x512   :  { %4960 = vmatprep.subr.bf16.mxu0 %v7123_v54  ;;  %5132 = vmatprep.subr.bf16.mxu1 %v7126_v6  ;;  %v7175_v57 = vld [vmem:[#allocation11 + $0x380] ss:$16 sps:$4 sm:$0xff]   ;;  %v7178_v60 = vld [vmem:[#allocation11 + $0x388] ss:$16 sps:$4 sm:$0xff]   ;;  %v7183_v21 = vld [vmem:[#allocation11 + $0x3a4] ss:$16 sps:$4 sm:$0xff]  }
 0x513   :  { %v7186_v37 = vld [vmem:[#allocation11 + $0x3ac] ss:$16 sps:$4 sm:$0xff]   ;;  %v7181_v1 = vld [vmem:[#allocation11 + $0x3a0] ss:$16 sps:$4 sm:$0xff]   ;;  %v7184_v38 = vld [vmem:[#allocation11 + $0x3a8] ss:$16 sps:$4 sm:$0xff]  }
 0x514   :  { %v7189_v43 = vld [vmem:[#allocation11 + $0x3c4] ss:$16 sps:$4 sm:$0xff]   ;;  %v7192_v53 = vld [vmem:[#allocation11 + $0x3cc] ss:$16 sps:$4 sm:$0xff]   ;;  %v7187_v47 = vld [vmem:[#allocation11 + $0x3c0] ss:$16 sps:$4 sm:$0xff]  }
 0x515   :  { %4961 = vmatpush1.bf16.msra.mxu0 %v7121_v7  ;;  %5133 = vmatpush1.bf16.msra.mxu1 %v7124_v29  ;;  %v7190_v9 = vld [vmem:[#allocation11 + $0x3c8] ss:$16 sps:$4 sm:$0xff]   ;;  %v7195_v5 = vld [vmem:[#allocation11 + $0x3e4] ss:$16 sps:$4 sm:$0xff]   ;;  %v7198_v2 = vld [vmem:[#allocation11 + $0x3ec] ss:$16 sps:$4 sm:$0xff]  }
 0x516   :  { %4962 = vmatprep.subr.bf16.mxu0 %v7129_v25  ;;  %5134 = vmatprep.subr.bf16.mxu1 %v7132_v12  ;;  %v7193_v3 = vld [vmem:[#allocation11 + $0x3e0] ss:$16 sps:$4 sm:$0xff]   ;;  %v7196_v42 = vld [vmem:[#allocation11 + $0x3e8] ss:$16 sps:$4 sm:$0xff]   ;;  %v7201_v4 = vld [vmem:[#allocation11 + $0x404] ss:$16 sps:$4 sm:$0xff]  }
 0x517   :  { %v7204_v26 = vld [vmem:[#allocation11 + $0x40c] ss:$16 sps:$4 sm:$0xff]   ;;  %v7199_v23 = vld [vmem:[#allocation11 + $0x400] ss:$16 sps:$4 sm:$0xff]   ;;  %v7202_v54 = vld [vmem:[#allocation11 + $0x408] ss:$16 sps:$4 sm:$0xff]  }
 0x518   :  { %v7207_v6 = vld [vmem:[#allocation11 + $0x424] ss:$16 sps:$4 sm:$0xff]   ;;  %v7210_v7 = vld [vmem:[#allocation11 + $0x42c] ss:$16 sps:$4 sm:$0xff]   ;;  %v7205_v29 = vld [vmem:[#allocation11 + $0x420] ss:$16 sps:$4 sm:$0xff]  }
 0x519   :  { %4963 = vmatpush1.bf16.msra.mxu0 %v7127_v13  ;;  %5135 = vmatpush1.bf16.msra.mxu1 %v7130_v15  ;;  %v7208_v25 = vld [vmem:[#allocation11 + $0x428] ss:$16 sps:$4 sm:$0xff]   ;;  %v7213_v12 = vld [vmem:[#allocation11 + $0x444] ss:$16 sps:$4 sm:$0xff]   ;;  %v7216_v13 = vld [vmem:[#allocation11 + $0x44c] ss:$16 sps:$4 sm:$0xff]  }
 0x51a   :  { %4964 = vmatprep.subr.bf16.mxu0 %v7135_v16  ;;  %5136 = vmatprep.subr.bf16.mxu1 %v7138_v31  ;;  %v7211_v15 = vld [vmem:[#allocation11 + $0x440] ss:$16 sps:$4 sm:$0xff]   ;;  %v7214_v16 = vld [vmem:[#allocation11 + $0x448] ss:$16 sps:$4 sm:$0xff]   ;;  %v7219_v31 = vld [vmem:[#allocation11 + $0x464] ss:$16 sps:$4 sm:$0xff]  }
 0x51d   :  { %4965 = vmatpush1.bf16.msra.mxu0 %v7133_v18  ;;  %5137 = vmatpush1.bf16.msra.mxu1 %v7136_v46  ;;  %v7217_v18 = vld [vmem:[#allocation11 + $0x460] ss:$16 sps:$4 sm:$0xff]   ;;  %v7220_v46 = vld [vmem:[#allocation11 + $0x468] ss:$16 sps:$4 sm:$0xff]  }
 0x51e   :  { %4966 = vmatprep.subr.bf16.mxu0 %v7141_v40  ;;  %5138 = vmatprep.subr.bf16.mxu1 %v7144_v19  ;;  %v7225_v40 = vld [vmem:[#allocation11 + $0x484] ss:$16 sps:$4 sm:$0xff]   ;;  %v7223_v19 = vld [vmem:[#allocation11 + $0x480] ss:$16 sps:$4 sm:$0xff]  }
 0x521   :  { %4967 = vmatpush1.bf16.msra.mxu0 %v7139_v51  ;;  %5139 = vmatpush1.bf16.msra.mxu1 %v7142_v27  ;;  %v7226_v51 = vld [vmem:[#allocation11 + $0x488] ss:$16 sps:$4 sm:$0xff]   ;;  %v7231_v27 = vld [vmem:[#allocation11 + $0x4a4] ss:$16 sps:$4 sm:$0xff]  }
 0x522   :  { %4968 = vmatprep.subr.bf16.mxu0 %v7147_v58  ;;  %5140 = vmatprep.subr.bf16.mxu1 %v7150_v44  ;;  %v7234_v58 = vld [vmem:[#allocation11 + $0x4ac] ss:$16 sps:$4 sm:$0xff]   ;;  %v7229_v44 = vld [vmem:[#allocation11 + $0x4a0] ss:$16 sps:$4 sm:$0xff]  }
 0x525   :  { %4969 = vmatpush1.bf16.msra.mxu0 %v7145_v61  ;;  %5141 = vmatpush1.bf16.msra.mxu1 %v7148_v45  ;;  %v7232_v61 = vld [vmem:[#allocation11 + $0x4a8] ss:$16 sps:$4 sm:$0xff]   ;;  %v7237_v45 = vld [vmem:[#allocation11 + $0x4c4] ss:$16 sps:$4 sm:$0xff]  }
 0x526   :  { %4970 = vmatprep.subr.bf16.mxu0 %v7153_v10  ;;  %5142 = vmatprep.subr.bf16.mxu1 %v7156_v34  ;;  %v7240_v10 = vld [vmem:[#allocation11 + $0x4cc] ss:$16 sps:$4 sm:$0xff]   ;;  %v7235_v34 = vld [vmem:[#allocation11 + $0x4c0] ss:$16 sps:$4 sm:$0xff]  }
 0x529   :  { %4971 = vmatpush1.bf16.msra.mxu0 %v7151_v28  ;;  %5143 = vmatpush1.bf16.msra.mxu1 %v7154_v35  ;;  %v7238_v28 = vld [vmem:[#allocation11 + $0x4c8] ss:$16 sps:$4 sm:$0xff]   ;;  %v7243_v35 = vld [vmem:[#allocation11 + $0x4e4] ss:$16 sps:$4 sm:$0xff]  }
 0x52a   :  { %4972 = vmatprep.subr.bf16.mxu0 %v7159_v59  ;;  %5144 = vmatprep.subr.bf16.mxu1 %v7162_v48  ;;  %v7246_v59 = vld [vmem:[#allocation11 + $0x4ec] ss:$16 sps:$4 sm:$0xff]   ;;  %v7241_v48 = vld [vmem:[#allocation11 + $0x4e0] ss:$16 sps:$4 sm:$0xff]  }
 0x52d   :  { %4973 = vmatpush1.bf16.msra.mxu0 %v7157_v24  ;;  %5145 = vmatpush1.bf16.msra.mxu1 %v7160_v52  ;;  %v7244_v24 = vld [vmem:[#allocation11 + $0x4e8] ss:$16 sps:$4 sm:$0xff]   ;;  %v7249_v52 = vld [vmem:[#allocation11 + $0x504] ss:$16 sps:$4 sm:$0xff]  }
 0x52e   :  { %4974 = vmatprep.subr.bf16.mxu0 %v7165_v50  ;;  %5146 = vmatprep.subr.bf16.mxu1 %v7168_v49  ;;  %v7252_v50 = vld [vmem:[#allocation11 + $0x50c] ss:$16 sps:$4 sm:$0xff]   ;;  %v7247_v49 = vld [vmem:[#allocation11 + $0x500] ss:$16 sps:$4 sm:$0xff]  }
 0x531   :  { %4975 = vmatpush1.bf16.msra.mxu0 %v7163_v30  ;;  %5147 = vmatpush1.bf16.msra.mxu1 %v7166_v22  ;;  %v7250_v30 = vld [vmem:[#allocation11 + $0x508] ss:$16 sps:$4 sm:$0xff]   ;;  %v7255_v22 = vld [vmem:[#allocation11 + $0x524] ss:$16 sps:$4 sm:$0xff]  }
 0x532   :  { %4976 = vmatprep.subr.bf16.mxu0 %v7171_v41  ;;  %5148 = vmatprep.subr.bf16.mxu1 %v7174_v56  ;;  %v7258_v41 = vld [vmem:[#allocation11 + $0x52c] ss:$16 sps:$4 sm:$0xff]   ;;  %v7253_v56 = vld [vmem:[#allocation11 + $0x520] ss:$16 sps:$4 sm:$0xff]  }
 0x535   :  { %4977 = vmatpush1.bf16.msra.mxu0 %v7169_v11  ;;  %5149 = vmatpush1.bf16.msra.mxu1 %v7172_v20  ;;  %v7256_v11 = vld [vmem:[#allocation11 + $0x528] ss:$16 sps:$4 sm:$0xff]   ;;  %v7261_v20 = vld [vmem:[#allocation11 + $0x544] ss:$16 sps:$4 sm:$0xff]  }
 0x536   :  { %4978 = vmatprep.subr.bf16.mxu0 %v7177_v17  ;;  %5150 = vmatprep.subr.bf16.mxu1 %v7180_v55  ;;  %v7264_v17 = vld [vmem:[#allocation11 + $0x54c] ss:$16 sps:$4 sm:$0xff]   ;;  %v7259_v55 = vld [vmem:[#allocation11 + $0x540] ss:$16 sps:$4 sm:$0xff]  }
 0x539   :  { %4979 = vmatpush1.bf16.msra.mxu0 %v7175_v57  ;;  %5151 = vmatpush1.bf16.msra.mxu1 %v7178_v60  ;;  %v7262_v57 = vld [vmem:[#allocation11 + $0x548] ss:$16 sps:$4 sm:$0xff]   ;;  %v7267_v60 = vld [vmem:[#allocation11 + $0x564] ss:$16 sps:$4 sm:$0xff]  }
 0x53a   :  { %4980 = vmatprep.subr.bf16.mxu0 %v7183_v21  ;;  %5152 = vmatprep.subr.bf16.mxu1 %v7186_v37  ;;  %v7270_v21 = vld [vmem:[#allocation11 + $0x56c] ss:$16 sps:$4 sm:$0xff]   ;;  %v7265_v37 = vld [vmem:[#allocation11 + $0x560] ss:$16 sps:$4 sm:$0xff]  }
 0x53d   :  { %4981 = vmatpush1.bf16.msra.mxu0 %v7181_v1  ;;  %5153 = vmatpush1.bf16.msra.mxu1 %v7184_v38  ;;  %v7268_v1 = vld [vmem:[#allocation11 + $0x568] ss:$16 sps:$4 sm:$0xff]   ;;  %v7273_v38 = vld [vmem:[#allocation11 + $0x584] ss:$16 sps:$4 sm:$0xff]  }
 0x53e   :  { %4982 = vmatprep.subr.bf16.mxu0 %v7189_v43  ;;  %5154 = vmatprep.subr.bf16.mxu1 %v7192_v53  ;;  %v7276_v43 = vld [vmem:[#allocation11 + $0x58c] ss:$16 sps:$4 sm:$0xff]   ;;  %v7271_v53 = vld [vmem:[#allocation11 + $0x580] ss:$16 sps:$4 sm:$0xff]  }
 0x541   :  { %4983 = vmatpush1.bf16.msra.mxu0 %v7187_v47  ;;  %5155 = vmatpush1.bf16.msra.mxu1 %v7190_v9  ;;  %v7274_v47 = vld [vmem:[#allocation11 + $0x588] ss:$16 sps:$4 sm:$0xff]   ;;  %v7279_v9 = vld [vmem:[#allocation11 + $0x5a4] ss:$16 sps:$4 sm:$0xff]  }
 0x542   :  { %4984 = vmatprep.subr.bf16.mxu0 %v7195_v5  ;;  %5156 = vmatprep.subr.bf16.mxu1 %v7198_v2  ;;  %v7282_v5 = vld [vmem:[#allocation11 + $0x5ac] ss:$16 sps:$4 sm:$0xff]   ;;  %v7277_v2 = vld [vmem:[#allocation11 + $0x5a0] ss:$16 sps:$4 sm:$0xff]  }
 0x545   :  { %4985 = vmatpush1.bf16.msra.mxu0 %v7193_v3  ;;  %5157 = vmatpush1.bf16.msra.mxu1 %v7196_v42  ;;  %v7280_v3 = vld [vmem:[#allocation11 + $0x5a8] ss:$16 sps:$4 sm:$0xff]   ;;  %v7285_v42 = vld [vmem:[#allocation11 + $0x5c4] ss:$16 sps:$4 sm:$0xff]  }
 0x546   :  { %4997 = vmatprep.subr.bf16.mxu0 %v7201_v4  ;;  %5169 = vmatprep.subr.bf16.mxu1 %v7204_v26  ;;  %v7288_v4 = vld [vmem:[#allocation11 + $0x5cc] ss:$16 sps:$4 sm:$0xff]   ;;  %v7283_v26 = vld [vmem:[#allocation11 + $0x5c0] ss:$16 sps:$4 sm:$0xff]  }
 0x548   :  { %4987 = vmatmul.mubr.bf16.vlgmr.msra.gmra.mrb[8].mxu0 %v8417_v39  ;;  %5159 = vmatmul.mubr.bf16.vlgmr.msra.gmra.mrb[12].mxu1 %v8417_v39  ;;  %v7222_v39 = vld [vmem:[#allocation11 + $0x46c] ss:$16 sps:$4 sm:$0xff]  }
 0x549   :  { %4998 = vmatpush1.bf16.msra.mxu0 %v7199_v23  ;;  %5029 = vmatprep.mubr.bf16.mxu0 %v8420_v8  ;;  %v7286_v23 = vld [vmem:[#allocation11 + $0x5c8] ss:$16 sps:$4 sm:$0xff]  }
 0x54a   :  { %5170 = vmatpush1.bf16.msra.mxu1 %v7202_v54  ;;  %5201 = vmatprep.mubr.bf16.mxu1 %v8420_v8  ;;  %v7228_v8 = vld [vmem:[#allocation11 + $0x48c] ss:$16 sps:$4 sm:$0xff]   ;;  %v7291_v54 = vld [vmem:[#allocation11 + $0x5e4] ss:$16 sps:$4 sm:$0xff]  }
 0x54b   :  { %4999 = vmatprep.subr.bf16.mxu0 %v7207_v6  ;;  %5171 = vmatprep.subr.bf16.mxu1 %v7210_v7  ;;  %v7294_v6 = vld [vmem:[#allocation11 + $0x5ec] ss:$16 sps:$4 sm:$0xff]   ;;  %v7289_v7 = vld [vmem:[#allocation11 + $0x5e0] ss:$16 sps:$4 sm:$0xff]  }
 0x54d   :  { %5000 = vmatpush1.bf16.msra.mxu0 %v7205_v29  ;;  %v7292_v29 = vld [vmem:[#allocation11 + $0x5e8] ss:$16 sps:$4 sm:$0xff]  }
 0x54e   :  { %5172 = vmatpush1.bf16.msra.mxu1 %v7208_v25  ;;  %5001 = vmatprep.subr.bf16.mxu0 %v7213_v12  ;;  %v7297_v25 = vld [vmem:[#allocation11 + $0x604] ss:$16 sps:$4 sm:$0xff]   ;;  %v7300_v12 = vld [vmem:[#allocation11 + $0x60c] ss:$16 sps:$4 sm:$0xff]  }
 0x54f   :  { %5173 = vmatprep.subr.bf16.mxu1 %v7216_v13  ;;  %v7295_v13 = vld [vmem:[#allocation11 + $0x600] ss:$16 sps:$4 sm:$0xff]  }
 0x551   :  { %5002 = vmatpush1.bf16.msra.mxu0 %v7211_v15  ;;  %v7298_v15 = vld [vmem:[#allocation11 + $0x608] ss:$16 sps:$4 sm:$0xff]  }
 0x552   :  { %5174 = vmatpush1.bf16.msra.mxu1 %v7214_v16  ;;  %5003 = vmatprep.subr.bf16.mxu0 %v7219_v31  ;;  %v7303_v16 = vld [vmem:[#allocation11 + $0x624] ss:$16 sps:$4 sm:$0xff]   ;;  %v7306_v31 = vld [vmem:[#allocation11 + $0x62c] ss:$16 sps:$4 sm:$0xff]  }
 0x553   :  { %5175 = vmatprep.subr.bf16.mxu1 %v7222_v39  ;;  %v7301_v39 = vld [vmem:[#allocation11 + $0x620] ss:$16 sps:$4 sm:$0xff]  }
 0x555   :  { %5004 = vmatpush1.bf16.msra.mxu0 %v7217_v18  ;;  %v7304_v18 = vld [vmem:[#allocation11 + $0x628] ss:$16 sps:$4 sm:$0xff]  }
 0x556   :  { %5176 = vmatpush1.bf16.msra.mxu1 %v7220_v46  ;;  %5005 = vmatprep.subr.bf16.mxu0 %v7225_v40  ;;  %v7309_v46 = vld [vmem:[#allocation11 + $0x644] ss:$16 sps:$4 sm:$0xff]   ;;  %v7312_v40 = vld [vmem:[#allocation11 + $0x64c] ss:$16 sps:$4 sm:$0xff]  }
 0x557   :  { %5177 = vmatprep.subr.bf16.mxu1 %v7228_v8  ;;  %v7307_v8 = vld [vmem:[#allocation11 + $0x640] ss:$16 sps:$4 sm:$0xff]  }
 0x559   :  { %5006 = vmatpush1.bf16.msra.mxu0 %v7223_v19  ;;  %v7310_v19 = vld [vmem:[#allocation11 + $0x648] ss:$16 sps:$4 sm:$0xff]  }
 0x55a   :  { %5178 = vmatpush1.bf16.msra.mxu1 %v7226_v51  ;;  %5007 = vmatprep.subr.bf16.mxu0 %v7231_v27  ;;  %v7315_v51 = vld [vmem:[#allocation11 + $0x664] ss:$16 sps:$4 sm:$0xff]   ;;  %v7313_v27 = vld [vmem:[#allocation11 + $0x660] ss:$16 sps:$4 sm:$0xff]  }
 0x55b   :  { %5179 = vmatprep.subr.bf16.mxu1 %v7234_v58  ;;  %v7316_v58 = vld [vmem:[#allocation11 + $0x668] ss:$16 sps:$4 sm:$0xff]  }
 0x55d   :  { %5008 = vmatpush1.bf16.msra.mxu0 %v7229_v44  ;;  %v7321_v44 = vld [vmem:[#allocation11 + $0x684] ss:$16 sps:$4 sm:$0xff]  }
 0x55e   :  { %5180 = vmatpush1.bf16.msra.mxu1 %v7232_v61  ;;  %5009 = vmatprep.subr.bf16.mxu0 %v7237_v45  ;;  %v7324_v61 = vld [vmem:[#allocation11 + $0x68c] ss:$16 sps:$4 sm:$0xff]   ;;  %v7322_v45 = vld [vmem:[#allocation11 + $0x688] ss:$16 sps:$4 sm:$0xff]  }
 0x55f   :  { %5181 = vmatprep.subr.bf16.mxu1 %v7240_v10  ;;  %v7327_v10 = vld [vmem:[#allocation11 + $0x6a4] ss:$16 sps:$4 sm:$0xff]  }
 0x561   :  { %5010 = vmatpush1.bf16.msra.mxu0 %v7235_v34  ;;  %v7330_v34 = vld [vmem:[#allocation11 + $0x6ac] ss:$16 sps:$4 sm:$0xff]  }
 0x562   :  { %5182 = vmatpush1.bf16.msra.mxu1 %v7238_v28  ;;  %5011 = vmatprep.subr.bf16.mxu0 %v7243_v35  ;;  %v7325_v28 = vld [vmem:[#allocation11 + $0x6a0] ss:$16 sps:$4 sm:$0xff]   ;;  %v7328_v35 = vld [vmem:[#allocation11 + $0x6a8] ss:$16 sps:$4 sm:$0xff]  }
 0x563   :  { %5183 = vmatprep.subr.bf16.mxu1 %v7246_v59  ;;  %v7333_v59 = vld [vmem:[#allocation11 + $0x6c4] ss:$16 sps:$4 sm:$0xff]  }
 0x565   :  { %5012 = vmatpush1.bf16.msra.mxu0 %v7241_v48  ;;  %v7336_v48 = vld [vmem:[#allocation11 + $0x6cc] ss:$16 sps:$4 sm:$0xff]  }
 0x566   :  { %5184 = vmatpush1.bf16.msra.mxu1 %v7244_v24  ;;  %5013 = vmatprep.subr.bf16.mxu0 %v7249_v52  ;;  %v7331_v24 = vld [vmem:[#allocation11 + $0x6c0] ss:$16 sps:$4 sm:$0xff]   ;;  %v7334_v52 = vld [vmem:[#allocation11 + $0x6c8] ss:$16 sps:$4 sm:$0xff]  }
 0x567   :  { %5185 = vmatprep.subr.bf16.mxu1 %v7252_v50  ;;  %v7339_v50 = vld [vmem:[#allocation11 + $0x6e4] ss:$16 sps:$4 sm:$0xff]  }
 0x569   :  { %5014 = vmatpush1.bf16.msra.mxu0 %v7247_v49  ;;  %v7342_v49 = vld [vmem:[#allocation11 + $0x6ec] ss:$16 sps:$4 sm:$0xff]  }
 0x56a   :  { %5186 = vmatpush1.bf16.msra.mxu1 %v7250_v30  ;;  %5015 = vmatprep.subr.bf16.mxu0 %v7255_v22  ;;  %v7337_v30 = vld [vmem:[#allocation11 + $0x6e0] ss:$16 sps:$4 sm:$0xff]   ;;  %v7340_v22 = vld [vmem:[#allocation11 + $0x6e8] ss:$16 sps:$4 sm:$0xff]  }
 0x56b   :  { %5187 = vmatprep.subr.bf16.mxu1 %v7258_v41  ;;  %v7345_v41 = vld [vmem:[#allocation11 + $0x704] ss:$16 sps:$4 sm:$0xff]  }
 0x56d   :  { %5016 = vmatpush1.bf16.msra.mxu0 %v7253_v56  ;;  %v7348_v56 = vld [vmem:[#allocation11 + $0x70c] ss:$16 sps:$4 sm:$0xff]  }
 0x56e   :  { %5188 = vmatpush1.bf16.msra.mxu1 %v7256_v11  ;;  %5017 = vmatprep.subr.bf16.mxu0 %v7261_v20  ;;  %v7343_v11 = vld [vmem:[#allocation11 + $0x700] ss:$16 sps:$4 sm:$0xff]   ;;  %v7346_v20 = vld [vmem:[#allocation11 + $0x708] ss:$16 sps:$4 sm:$0xff]  }
 0x56f   :  { %5189 = vmatprep.subr.bf16.mxu1 %v7264_v17  ;;  %v7351_v17 = vld [vmem:[#allocation11 + $0x724] ss:$16 sps:$4 sm:$0xff]  }
 0x571   :  { %5018 = vmatpush1.bf16.msra.mxu0 %v7259_v55  ;;  %v7354_v55 = vld [vmem:[#allocation11 + $0x72c] ss:$16 sps:$4 sm:$0xff]  }
 0x572   :  { %5190 = vmatpush1.bf16.msra.mxu1 %v7262_v57  ;;  %5019 = vmatprep.subr.bf16.mxu0 %v7267_v60  ;;  %v7349_v57 = vld [vmem:[#allocation11 + $0x720] ss:$16 sps:$4 sm:$0xff]   ;;  %v7352_v60 = vld [vmem:[#allocation11 + $0x728] ss:$16 sps:$4 sm:$0xff]  }
 0x573   :  { %5191 = vmatprep.subr.bf16.mxu1 %v7270_v21  ;;  %v7357_v21 = vld [vmem:[#allocation11 + $0x744] ss:$16 sps:$4 sm:$0xff]  }
 0x575   :  { %5020 = vmatpush1.bf16.msra.mxu0 %v7265_v37  ;;  %v7360_v37 = vld [vmem:[#allocation11 + $0x74c] ss:$16 sps:$4 sm:$0xff]  }
 0x576   :  { %5192 = vmatpush1.bf16.msra.mxu1 %v7268_v1  ;;  %5021 = vmatprep.subr.bf16.mxu0 %v7273_v38  ;;  %v7355_v1 = vld [vmem:[#allocation11 + $0x740] ss:$16 sps:$4 sm:$0xff]   ;;  %v7358_v38 = vld [vmem:[#allocation11 + $0x748] ss:$16 sps:$4 sm:$0xff]  }
 0x577   :  { %5193 = vmatprep.subr.bf16.mxu1 %v7276_v43  ;;  %v7363_v43 = vld [vmem:[#allocation11 + $0x764] ss:$16 sps:$4 sm:$0xff]  }
 0x579   :  { %5022 = vmatpush1.bf16.msra.mxu0 %v7271_v53  ;;  %v7366_v53 = vld [vmem:[#allocation11 + $0x76c] ss:$16 sps:$4 sm:$0xff]  }
 0x57a   :  { %5194 = vmatpush1.bf16.msra.mxu1 %v7274_v47  ;;  %5023 = vmatprep.subr.bf16.mxu0 %v7279_v9  ;;  %v7361_v47 = vld [vmem:[#allocation11 + $0x760] ss:$16 sps:$4 sm:$0xff]   ;;  %v7364_v9 = vld [vmem:[#allocation11 + $0x768] ss:$16 sps:$4 sm:$0xff]  }
 0x57b   :  { %5195 = vmatprep.subr.bf16.mxu1 %v7282_v5  ;;  %v7369_v5 = vld [vmem:[#allocation11 + $0x784] ss:$16 sps:$4 sm:$0xff]  }
 0x57d   :  { %5024 = vmatpush1.bf16.msra.mxu0 %v7277_v2  ;;  %v7372_v2 = vld [vmem:[#allocation11 + $0x78c] ss:$16 sps:$4 sm:$0xff]  }
 0x57e   :  { %5196 = vmatpush1.bf16.msra.mxu1 %v7280_v3  ;;  %5025 = vmatprep.subr.bf16.mxu0 %v7285_v42  ;;  %v7367_v3 = vld [vmem:[#allocation11 + $0x780] ss:$16 sps:$4 sm:$0xff]   ;;  %v7370_v42 = vld [vmem:[#allocation11 + $0x788] ss:$16 sps:$4 sm:$0xff]  }
 0x57f   :  { %5197 = vmatprep.subr.bf16.mxu1 %v7288_v4  ;;  %v7375_v4 = vld [vmem:[#allocation11 + $0x7a4] ss:$16 sps:$4 sm:$0xff]  }
 0x581   :  { %5026 = vmatpush1.bf16.msra.mxu0 %v7283_v26  ;;  %v7378_v26 = vld [vmem:[#allocation11 + $0x7ac] ss:$16 sps:$4 sm:$0xff]  }
 0x582   :  { %5198 = vmatpush1.bf16.msra.mxu1 %v7286_v23  ;;  %5027 = vmatprep.subr.bf16.mxu0 %v7291_v54  ;;  %v7373_v23 = vld [vmem:[#allocation11 + $0x7a0] ss:$16 sps:$4 sm:$0xff]   ;;  %v7376_v54 = vld [vmem:[#allocation11 + $0x7a8] ss:$16 sps:$4 sm:$0xff]  }
 0x583   :  { %5199 = vmatprep.subr.bf16.mxu1 %v7294_v6  ;;  %v7381_v6 = vld [vmem:[#allocation11 + $0x7c4] ss:$16 sps:$4 sm:$0xff]  }
 0x585   :  { %5028 = vmatpush1.bf16.msra.mxu0 %v7289_v7  ;;  %v7384_v7 = vld [vmem:[#allocation11 + $0x7cc] ss:$16 sps:$4 sm:$0xff]  }
 0x586   :  { %5200 = vmatpush1.bf16.msra.mxu1 %v7292_v29  ;;  %5040 = vmatprep.subr.bf16.mxu0 %v7297_v25  ;;  %v7379_v29 = vld [vmem:[#allocation11 + $0x7c0] ss:$16 sps:$4 sm:$0xff]   ;;  %v7382_v25 = vld [vmem:[#allocation11 + $0x7c8] ss:$16 sps:$4 sm:$0xff]  }
 0x587   :  { %5212 = vmatprep.subr.bf16.mxu1 %v7300_v12  ;;  %v7387_v12 = vld [vmem:[#allocation11 + $0x7e4] ss:$16 sps:$4 sm:$0xff]  }
 0x588   :  { %5030 = vmatmul.mubr.bf16.vlgmr.msra.gmra.mrb[8].mxu0 %v8422_v63 }
 0x589   :  { %5202 = vmatmul.mubr.bf16.vlgmr.msra.gmra.mrb[12].mxu1 %v8422_v63  ;;  %5041 = vmatpush1.bf16.msra.mxu0 %v7295_v13  ;;  %v7318_v63 = vld [vmem:[#allocation11 + $0x66c] ss:$16 sps:$4 sm:$0xff]  }
 0x58a   :  { %5072 = vmatprep.mubr.bf16.mxu0 %v8427_v14  ;;  %5213 = vmatpush1.bf16.msra.mxu1 %v7298_v15  ;;  %v7390_v13 = vld [vmem:[#allocation11 + $0x7ec] ss:$16 sps:$4 sm:$0xff]   ;;  %v7385_v15 = vld [vmem:[#allocation11 + $0x7e0] ss:$16 sps:$4 sm:$0xff]  }
 0x58b   :  { %5244 = vmatprep.mubr.bf16.mxu1 %v8427_v14  ;;  %5042 = vmatprep.subr.bf16.mxu0 %v7303_v16  ;;  %v7319_v14 = vld [vmem:[#allocation11 + $0x680] ss:$16 sps:$4 sm:$0xff]   ;;  %v7388_v16 = vld [vmem:[#allocation11 + $0x7e8] ss:$16 sps:$4 sm:$0xff]  }
 0x58c   :  { %5214 = vmatprep.subr.bf16.mxu1 %v7306_v31  ;;  %v3609_v31 = vld [vmem:[#allocation13] sm:$0xf] }
 0x58d   :  { %5043 = vmatpush1.bf16.msra.mxu0 %v7301_v39  ;;  %v3614_v39 = vrot.slane %v3609_v31, %v8201_v32 }
 0x58e   :  { %5215 = vmatpush1.bf16.msra.mxu1 %v7304_v18  ;;  %5044 = vmatprep.subr.bf16.mxu0 %v7309_v46  ;;  %v3618_v18 = vrot.slane %v3609_v31, %v8206_v36 }
 0x58f   :  { %5216 = vmatprep.subr.bf16.mxu1 %v7312_v40  ;;  %v3622_v40 = vrot.slane %v3609_v31, %v8228_v62 }
 0x591   :  { %5045 = vmatpush1.bf16.msra.mxu0 %v7307_v8 }
 0x592   :  { %5217 = vmatpush1.bf16.msra.mxu1 %v7310_v19  ;;  %5046 = vmatprep.subr.bf16.mxu0 %v7315_v51 }
 0x593   :  { %5218 = vmatprep.subr.bf16.mxu1 %v7318_v63 }
 0x595   :  { %5047 = vmatpush1.bf16.msra.mxu0 %v7313_v27  ;;  %v3626_v27 = vrot.slane %v3609_v31, %v8233_v0 }
 0x596   :  { %5219 = vmatpush1.bf16.msra.mxu1 %v7316_v58  ;;  %5048 = vmatprep.subr.bf16.mxu0 %v7321_v44 }
 0x597   :  { %5220 = vmatprep.subr.bf16.mxu1 %v7324_v61 }
 0x599   :  { %5049 = vmatpush1.bf16.msra.mxu0 %v7319_v14 }
 0x59a   :  { %5221 = vmatpush1.bf16.msra.mxu1 %v7322_v45  ;;  %5050 = vmatprep.subr.bf16.mxu0 %v7327_v10 }
 0x59b   :  { %5222 = vmatprep.subr.bf16.mxu1 %v7330_v34 }
 0x59d   :  { %5051 = vmatpush1.bf16.msra.mxu0 %v7325_v28 }
 0x59e   :  { %5223 = vmatpush1.bf16.msra.mxu1 %v7328_v35  ;;  %5052 = vmatprep.subr.bf16.mxu0 %v7333_v59 }
 0x59f   :  { %5224 = vmatprep.subr.bf16.mxu1 %v7336_v48 }
 0x5a1   :  { %5053 = vmatpush1.bf16.msra.mxu0 %v7331_v24 }
 0x5a2   :  { %5225 = vmatpush1.bf16.msra.mxu1 %v7334_v52  ;;  %5054 = vmatprep.subr.bf16.mxu0 %v7339_v50 }
 0x5a3   :  { %5226 = vmatprep.subr.bf16.mxu1 %v7342_v49 }
 0x5a5   :  { %5055 = vmatpush1.bf16.msra.mxu0 %v7337_v30 }
 0x5a6   :  { %5227 = vmatpush1.bf16.msra.mxu1 %v7340_v22  ;;  %5056 = vmatprep.subr.bf16.mxu0 %v7345_v41  ;;  %v7391_v22 = vld [vmem:[#allocation17] ss:$8 sps:$4 sm:$0xff]   ;;  %v7393_v41 = vld [vmem:[#allocation17 + $0x4] ss:$8 sps:$4 sm:$0xff]  }
 0x5a7   :  { %5228 = vmatprep.subr.bf16.mxu1 %v7348_v56  ;;  %v7396_v56 = vld [vmem:[#allocation17 + $0x14] ss:$8 sps:$4 sm:$0xff]  }
 0x5a9   :  { %5057 = vmatpush1.bf16.msra.mxu0 %v7343_v11  ;;  %v7394_v11 = vld [vmem:[#allocation17 + $0x10] ss:$8 sps:$4 sm:$0xff]  }
 0x5aa   :  { %5229 = vmatpush1.bf16.msra.mxu1 %v7346_v20  ;;  %5058 = vmatprep.subr.bf16.mxu0 %v7351_v17  ;;  %v7399_v20 = vld [vmem:[#allocation17 + $0x24] ss:$8 sps:$4 sm:$0xff]   ;;  %v7397_v17 = vld [vmem:[#allocation17 + $0x20] ss:$8 sps:$4 sm:$0xff]  }
 0x5ab   :  { %5230 = vmatprep.subr.bf16.mxu1 %v7354_v55  ;;  %v7402_v55 = vld [vmem:[#allocation17 + $0x34] ss:$8 sps:$4 sm:$0xff]  }
 0x5ad   :  { %5059 = vmatpush1.bf16.msra.mxu0 %v7349_v57  ;;  %v7400_v57 = vld [vmem:[#allocation17 + $0x30] ss:$8 sps:$4 sm:$0xff]  }
 0x5ae   :  { %5231 = vmatpush1.bf16.msra.mxu1 %v7352_v60  ;;  %5060 = vmatprep.subr.bf16.mxu0 %v7357_v21  ;;  %v7405_v60 = vld [vmem:[#allocation17 + $0x44] ss:$8 sps:$4 sm:$0xff]   ;;  %v7403_v21 = vld [vmem:[#allocation17 + $0x40] ss:$8 sps:$4 sm:$0xff]  }
 0x5af   :  { %5232 = vmatprep.subr.bf16.mxu1 %v7360_v37  ;;  %v7408_v37 = vld [vmem:[#allocation17 + $0x54] ss:$8 sps:$4 sm:$0xff]  }
 0x5b1   :  { %5061 = vmatpush1.bf16.msra.mxu0 %v7355_v1  ;;  %v7406_v1 = vld [vmem:[#allocation17 + $0x50] ss:$8 sps:$4 sm:$0xff]  }
 0x5b2   :  { %5233 = vmatpush1.bf16.msra.mxu1 %v7358_v38  ;;  %5062 = vmatprep.subr.bf16.mxu0 %v7363_v43  ;;  %v7411_v38 = vld [vmem:[#allocation17 + $0x64] ss:$8 sps:$4 sm:$0xff]   ;;  %v7409_v43 = vld [vmem:[#allocation17 + $0x60] ss:$8 sps:$4 sm:$0xff]  }
 0x5b3   :  { %5234 = vmatprep.subr.bf16.mxu1 %v7366_v53  ;;  %v7414_v53 = vld [vmem:[#allocation17 + $0x74] ss:$8 sps:$4 sm:$0xff]  }
 0x5b5   :  { %5063 = vmatpush1.bf16.msra.mxu0 %v7361_v47  ;;  %v7412_v47 = vld [vmem:[#allocation17 + $0x70] ss:$8 sps:$4 sm:$0xff]  }
 0x5b6   :  { %5235 = vmatpush1.bf16.msra.mxu1 %v7364_v9  ;;  %5064 = vmatprep.subr.bf16.mxu0 %v7369_v5  ;;  %v7417_v9 = vld [vmem:[#allocation17 + $0x84] ss:$8 sps:$4 sm:$0xff]   ;;  %v7415_v5 = vld [vmem:[#allocation17 + $0x80] ss:$8 sps:$4 sm:$0xff]  }
 0x5b7   :  { %5236 = vmatprep.subr.bf16.mxu1 %v7372_v2  ;;  %v7420_v2 = vld [vmem:[#allocation17 + $0x94] ss:$8 sps:$4 sm:$0xff]  }
 0x5b9   :  { %5065 = vmatpush1.bf16.msra.mxu0 %v7367_v3  ;;  %v7418_v3 = vld [vmem:[#allocation17 + $0x90] ss:$8 sps:$4 sm:$0xff]  }
 0x5ba   :  { %5237 = vmatpush1.bf16.msra.mxu1 %v7370_v42  ;;  %5066 = vmatprep.subr.bf16.mxu0 %v7375_v4 }
 0x5bb   :  { %5238 = vmatprep.subr.bf16.mxu1 %v7378_v26 }
 0x5bd   :  { %5067 = vmatpush1.bf16.msra.mxu0 %v7373_v23 }
 0x5be   :  { %5239 = vmatpush1.bf16.msra.mxu1 %v7376_v54  ;;  %5068 = vmatprep.subr.bf16.mxu0 %v7381_v6 }
 0x5bf   :  { %5240 = vmatprep.subr.bf16.mxu1 %v7384_v7 }
 0x5c1   :  { %5069 = vmatpush1.bf16.msra.mxu0 %v7379_v29 }
 0x5c2   :  { %5241 = vmatpush1.bf16.msra.mxu1 %v7382_v25  ;;  %5070 = vmatprep.subr.bf16.mxu0 %v7387_v12 }
 0x5c3   :  { %5242 = vmatprep.subr.bf16.mxu1 %v7390_v13 }
 0x5c5   :  { %5071 = vmatpush1.bf16.msra.mxu0 %v7385_v15 }
 0x5c6   :  { %5243 = vmatpush1.bf16.msra.mxu1 %v7388_v16  ;;  %5776 = vmatprep.subr.bf16.mxu0 %v7393_v41 }
 0x5c8   :  { %5073 = vmatmul.mubr.bf16.vlgmr.msra.gmra.mrb[8].mxu0 %v8429_v33 }
 0x5c9   :  { %5245 = vmatmul.mubr.bf16.vlgmr.msra.gmra.mrb[12].mxu1 %v8429_v33  ;;  %5777 = vmatpush1.bf16.msra.mxu0 %v7391_v22 }
 0x5ca   :  { %5778 = vmatprep.subr.bf16.mxu0 %v7396_v56 }
 0x5cd   :  { %5779 = vmatpush1.bf16.msra.mxu0 %v7394_v11 }
 0x5ce   :  { %5780 = vmatprep.subr.bf16.mxu0 %v7399_v20 }
 0x5d1   :  { %5781 = vmatpush1.bf16.msra.mxu0 %v7397_v17  ;;  %v5255_v17 = vld [vmem:[#allocation14] sm:$0xf] }
 0x5d2   :  { %5782 = vmatprep.subr.bf16.mxu0 %v7402_v55  ;;  %v5256_v55 = vld [vmem:[#allocation16] sm:$0xf] }
 0x5d5   :  { %5783 = vmatpush1.bf16.msra.mxu0 %v7400_v57  ;;  %v5318_v57 = vrot.slane %v5255_v17, %v8206_v36 }
 0x5d6   :  { %5784 = vmatprep.subr.bf16.mxu0 %v7405_v60  ;;  %v5314_v60 = vrot.slane %v5255_v17, %v8201_v32 }
 0x5d9   :  { %5785 = vmatpush1.bf16.msra.mxu0 %v7403_v21 }
 0x5da   :  { %5786 = vmatprep.subr.bf16.mxu0 %v7408_v37  ;;  %v5347_v37 = vrot.slane %v5256_v55, %v8206_v36 }
 0x5dd   :  { %5787 = vmatpush1.bf16.msra.mxu0 %v7406_v1  ;;  %v5343_v1 = vrot.slane %v5256_v55, %v8201_v32 }
 0x5de   :  { %5788 = vmatprep.subr.bf16.mxu0 %v7411_v38  ;;  %v5326_v38 = vrot.slane %v5255_v17, %v8233_v0 }
 0x5e1   :  { %5789 = vmatpush1.bf16.msra.mxu0 %v7409_v43  ;;  %v5322_v43 = vrot.slane %v5255_v17, %v8228_v62  ;;  %v7460_v17 = vld [vmem:[#allocation17 + $0x170] ss:$8 sps:$4 sm:$0xff]  }
 0x5e2   :  { %5790 = vmatprep.subr.bf16.mxu0 %v7414_v53 }
 0x5e5   :  { %5791 = vmatpush1.bf16.msra.mxu0 %v7412_v47 }
 0x5e6   :  { %5792 = vmatprep.subr.bf16.mxu0 %v7417_v9 }
 0x5e9   :  { %5793 = vmatpush1.bf16.msra.mxu0 %v7415_v5 }
 0x5ea   :  { %5794 = vmatprep.subr.bf16.mxu0 %v7420_v2 }
 0x5ed   :  { %5795 = vmatpush1.bf16.msra.mxu0 %v7418_v3  ;;  %v5355_v3 = vrot.slane %v5256_v55, %v8233_v0 }
 0x69b   :  { %v5074_v46 = vpop.f32.mrb[8].mxu0 }
 0x69c   :  { %v8444_v8 = vadd.f32 %v5074_v46, %v3614_v39  ;;  %v5246_v19 = vpop.f32.mrb[12].mxu1  ;;  %v5076_v51 = vpop.f32.mrb[9].mxu0 }
 0x69d   :  { %v8446_v63 = vadd.f32 %v5076_v51, %v3618_v18  ;;  %v5248_v58 = vpop.f32.mrb[13].mxu1  ;;  %v5078_v44 = vpop.f32.mrb[10].mxu0  ;;  %v6920_v45 = vadd.f32 %v5246_v19, %v3622_v40 }
 0x69e   :  { %v8449_v61 = vadd.f32 %v5078_v44, %v3614_v39  ;;  %v5250_v33 = vpop.f32.mrb[14].mxu1  ;;  %v5080_v14 = vpop.f32.mrb[11].mxu0  ;;  %v6921_v35 = vadd.f32 %v5248_v58, %v3626_v27 }
 0x69f   :  { %v5257_v10 = vadd.f32 %v8446_v63, %v8444_v8  ;;  %v6919_v34 = vadd.f32 %v5080_v14, %v3618_v18  ;;  %v5252_v28 = vpop.f32.mrb[15].mxu1  ;;  %v6922_v59 = vadd.f32 %v5250_v33, %v3622_v40  ;;  %v7421_v33 = vld [vmem:[#allocation17 + $0xa0] ss:$8 sps:$4 sm:$0xff]   ;;  %v7423_v14 = vld [vmem:[#allocation17 + $0xa4] ss:$8 sps:$4 sm:$0xff]  }
 0x6a0   :  { %v6923_v52 = vadd.f32 %v5252_v28, %v3626_v27  ;;  %5796 = vmatprep.subr.bf16.mxu0 %v7423_v14  ;;  %v7427_v28 = vld [vmem:[#allocation17 + $0xc0] ss:$8 sps:$4 sm:$0xff]  }
 0x6a1   :  { %v5262_v48 = vadd.f32 %v6919_v34, %v8449_v61  ;;  %v5258_v24 = vadd.f32 %v6920_v45, %v5257_v10  ;;  %5797 = vmatpush1.bf16.msra.mxu0 %v7421_v33  ;;  %v7424_v10 = vld [vmem:[#allocation17 + $0xb0] ss:$8 sps:$4 sm:$0xff]   ;;  %v7439_v14 = vld [vmem:[#allocation17 + $0x100] ss:$8 sps:$4 sm:$0xff]  }
 0x6a3   :  { %v5259_v50 = vadd.f32 %v6921_v35, %v5258_v24  ;;  %v5263_v49 = vadd.f32 %v6922_v59, %v5262_v48  ;;  %v7435_v48 = vld [vmem:[#allocation17 + $0xe4] ss:$8 sps:$4 sm:$0xff]   ;;  %v7433_v24 = vld [vmem:[#allocation17 + $0xe0] ss:$8 sps:$4 sm:$0xff]  }
 0x6a5   :  { %5260 = vadd.xlane.f32.xlu0 %v5259_v50  ;;  %v5264_v30 = vadd.f32 %v6923_v52, %v5263_v49  ;;  %v7436_v50 = vld [vmem:[#allocation17 + $0xf0] ss:$8 sps:$4 sm:$0xff]   ;;  %v7441_v49 = vld [vmem:[#allocation17 + $0x104] ss:$8 sps:$4 sm:$0xff]  }
 0x6a7   :  { %5265 = vadd.xlane.f32.xlu1 %v5264_v30 }
 0x732   :  { %v5261_v42 = vpop.xlane.xlu0 %5260 }
 0x733   :  { %v5268_v4 = vmul.f32 0.001953125, %v5261_v42  ;;  %v5351_v42 = vrot.slane %v5256_v55, %v8228_v62  ;;  %v7465_v55 = vld [vmem:[#allocation17 + $0x184] ss:$8 sps:$4 sm:$0xff]  }
 0x734   :  { %v5266_v26 = vpop.xlane.xlu1 %5265 }
 0x735   :  { %v8455_v23 = vsub.f32 %v8444_v8, %v5268_v4  ;;  %v8458_v54 = vsub.f32 %v8446_v63, %v5268_v4  ;;  %v5269_v6 = vmul.f32 0.001953125, %v5266_v26  ;;  %v8460_v7 = vsub.f32 %v6920_v45, %v5268_v4  ;;  %v7426_v45 = vld [vmem:[#allocation17 + $0xb4] ss:$8 sps:$4 sm:$0xff]  }
 0x736   :  { %v8462_v29 = vsub.f32 %v6921_v35, %v5268_v4  ;;  %5798 = vmatprep.subr.bf16.mxu0 %v7426_v45  ;;  %v7432_v35 = vld [vmem:[#allocation17 + $0xd4] ss:$8 sps:$4 sm:$0xff]  }
 0x737   :  { %v8465_v25 = vsub.f32 %v8449_v61, %v5269_v6  ;;  %v8467_v12 = vsub.f32 %v6919_v34, %v5269_v6  ;;  %v5278_v13 = vmul.f32 %v8455_v23, %v8455_v23  ;;  %v5279_v15 = vmul.f32 %v8458_v54, %v8458_v54  ;;  %v7429_v34 = vld [vmem:[#allocation17 + $0xc4] ss:$8 sps:$4 sm:$0xff]   ;;  %5799 = vmatpush1.bf16.msra.mxu0 %v7424_v10 }
 0x738   :  { %v5280_v16 = vmul.f32 %v8460_v7, %v8460_v7  ;;  %v8475_v31 = vsub.f32 %v6922_v59, %v5269_v6  ;;  %v8477_v18 = vsub.f32 %v6923_v52, %v5269_v6  ;;  %v5281_v8 = vmul.f32 %v8462_v29, %v8462_v29  ;;  %5800 = vmatprep.subr.bf16.mxu0 %v7429_v34  ;;  %v7430_v59 = vld [vmem:[#allocation17 + $0xd0] ss:$8 sps:$4 sm:$0xff]   ;;  %v7438_v52 = vld [vmem:[#allocation17 + $0xf4] ss:$8 sps:$4 sm:$0xff]  }
 0x739   :  { %v5286_v39 = vadd.f32 %v5279_v15, %v5278_v13  ;;  %v5282_v46 = vmul.f32 %v8465_v25, %v8465_v25  ;;  %v5283_v40 = vmul.f32 %v8467_v12, %v8467_v12  ;;  %v7444_v34 = vld [vmem:[#allocation17 + $0x114] ss:$8 sps:$4 sm:$0xff]  }
 0x73a   :  { %v5284_v51 = vmul.f32 %v8475_v31, %v8475_v31  ;;  %v5285_v58 = vmul.f32 %v8477_v18, %v8477_v18 }
 0x73b   :  { %v5287_v19 = vadd.f32 %v5286_v39, %v5280_v16  ;;  %v5291_v63 = vadd.f32 %v5283_v40, %v5282_v46  ;;  %5801 = vmatpush1.bf16.msra.mxu0 %v7427_v28 }
 0x73c   :  { %5802 = vmatprep.subr.bf16.mxu0 %v7432_v35 }
 0x73d   :  { %v5288_v27 = vadd.f32 %v5287_v19, %v5281_v8  ;;  %v5292_v44 = vadd.f32 %v5291_v63, %v5284_v51 }
 0x73f   :  { %5289 = vadd.xlane.f32.xlu0 %v5288_v27  ;;  %v5293_v61 = vadd.f32 %v5292_v44, %v5285_v58  ;;  %5803 = vmatpush1.bf16.msra.mxu0 %v7430_v59  ;;  %v7442_v59 = vld [vmem:[#allocation17 + $0x110] ss:$8 sps:$4 sm:$0xff]  }
 0x740   :  { %5804 = vmatprep.subr.bf16.mxu0 %v7435_v48  ;;  %v7447_v48 = vld [vmem:[#allocation17 + $0x124] ss:$8 sps:$4 sm:$0xff]  }
 0x741   :  { %5294 = vadd.xlane.f32.xlu1 %v5293_v61 }
 0x743   :  { %5805 = vmatpush1.bf16.msra.mxu0 %v7433_v24  ;;  %v7445_v24 = vld [vmem:[#allocation17 + $0x120] ss:$8 sps:$4 sm:$0xff]  }
 0x744   :  { %5806 = vmatprep.subr.bf16.mxu0 %v7438_v52  ;;  %v7450_v52 = vld [vmem:[#allocation17 + $0x134] ss:$8 sps:$4 sm:$0xff]  }
 0x747   :  { %5807 = vmatpush1.bf16.msra.mxu0 %v7436_v50  ;;  %v7448_v50 = vld [vmem:[#allocation17 + $0x130] ss:$8 sps:$4 sm:$0xff]  }
 0x748   :  { %5819 = vmatprep.subr.bf16.mxu0 %v7441_v49  ;;  %v7453_v49 = vld [vmem:[#allocation17 + $0x144] ss:$8 sps:$4 sm:$0xff]  }
 0x7cc   :  { %v5290_v30 = vpop.xlane.xlu0 %5289 }
 0x7cd   :  { %v5296_v22 = vmul.f32 0.001953125, %v5290_v30  ;;  %v7451_v30 = vld [vmem:[#allocation17 + $0x140] ss:$8 sps:$4 sm:$0xff]  }
 0x7ce   :  { %v5295_v41 = vpop.xlane.xlu1 %5294 }
 0x7cf   :  { %v5298_v56 = vadd.f32 1e-05, %v5296_v22  ;;  %v5297_v11 = vmul.f32 0.001953125, %v5295_v41  ;;  %v7456_v22 = vld [vmem:[#allocation17 + $0x154] ss:$8 sps:$4 sm:$0xff]  }
 0x7d0   :  { %v7454_v41 = vld [vmem:[#allocation17 + $0x150] ss:$8 sps:$4 sm:$0xff]  }
 0x7d1   :  { %7507 = vrsqrt.f32 %v5298_v56  ;;  %v5299_v20 = vadd.f32 1e-05, %v5297_v11  ;;  %v7459_v56 = vld [vmem:[#allocation17 + $0x164] ss:$8 sps:$4 sm:$0xff]   ;;  %v7457_v11 = vld [vmem:[#allocation17 + $0x160] ss:$8 sps:$4 sm:$0xff]  }
 0x7d3   :  { %7509 = vrsqrt.f32 %v5299_v20  ;;  %v7462_v20 = vld [vmem:[#allocation17 + $0x174] ss:$8 sps:$4 sm:$0xff]  }
 0x7db   :  { %v7508_v21 = vpop.eup %7507 }
 0x7dc   :  { %v5303_v53 = vmul.f32 %v7508_v21, %v8458_v54  ;;  %v5302_v47 = vmul.f32 %v7508_v21, %v8455_v23  ;;  %v5305_v9 = vmul.f32 %v7508_v21, %v8462_v29  ;;  %v5304_v5 = vmul.f32 %v7508_v21, %v8460_v7  ;;  %v7466_v21 = vld [vmem:[#allocation17 + $0x190] ss:$8 sps:$4 sm:$0xff]  }
 0x7dd   :  { %v7510_v2 = vpop.eup %7509 }
 0x7de   :  { %v5307_v4 = vmul.f32 %v7510_v2, %v8467_v12  ;;  %v5332_v26 = vmul.f32 %v5318_v57, %v5303_v53  ;;  %v5306_v6 = vmul.f32 %v7510_v2, %v8465_v25  ;;  %v5331_v13 = vmul.f32 %v5314_v60, %v5302_v47  ;;  %v7477_v53 = vld [vmem:[#allocation17 + $0x1c4] ss:$8 sps:$4 sm:$0xff]   ;;  %v7475_v47 = vld [vmem:[#allocation17 + $0x1c0] ss:$8 sps:$4 sm:$0xff]  }
 0x7df   :  { %v5309_v15 = vmul.f32 %v7510_v2, %v8477_v18  ;;  %v5334_v54 = vmul.f32 %v5326_v38, %v5305_v9  ;;  %v5308_v23 = vmul.f32 %v7510_v2, %v8475_v31  ;;  %v5333_v16 = vmul.f32 %v5322_v43, %v5304_v5  ;;  %v7480_v9 = vld [vmem:[#allocation17 + $0x1d4] ss:$8 sps:$4 sm:$0xff]   ;;  %v7478_v5 = vld [vmem:[#allocation17 + $0x1d0] ss:$8 sps:$4 sm:$0xff]   ;;  %v7483_v2 = vld [vmem:[#allocation17 + $0x1e4] ss:$8 sps:$4 sm:$0xff]  }
 0x7e0   :  { %v5336_v29 = vmul.f32 %v5318_v57, %v5307_v4  ;;  %v5361_v39 = vadd.f32 %v5347_v37, %v5332_v26  ;;  %v5335_v7 = vmul.f32 %v5314_v60, %v5306_v6  ;;  %v5360_v46 = vadd.f32 %v5343_v1, %v5331_v13  ;;  %v7463_v57 = vld [vmem:[#allocation17 + $0x180] ss:$8 sps:$4 sm:$0xff]   ;;  %v7468_v60 = vld [vmem:[#allocation17 + $0x194] ss:$8 sps:$4 sm:$0xff]   ;;  %v7484_v4 = vld [vmem:[#allocation17 + $0x1f0] ss:$8 sps:$4 sm:$0xff]  }
 0x7e1   :  { %v5338_v40 = vmul.f32 %v5326_v38, %v5309_v15  ;;  %v5337_v0 = vmul.f32 %v5322_v43, %v5308_v23  ;;  %v5362_v8 = vadd.f32 %v5351_v42, %v5333_v16  ;;  %v5363_v12 = vadd.f32 %v5355_v3, %v5334_v54  ;;  %v7474_v38 = vld [vmem:[#allocation17 + $0x1b4] ss:$8 sps:$4 sm:$0xff]   ;;  %v7472_v43 = vld [vmem:[#allocation17 + $0x1b0] ss:$8 sps:$4 sm:$0xff]   ;;  %v5444_v26 = vld [vmem:[#allocation19] sm:$0x3] }
 0x7e2   :  { %v5365_v62 = vadd.f32 %v5347_v37, %v5336_v29  ;;  %v5364_v19 = vadd.f32 %v5343_v1, %v5335_v7  ;;  %v5369_v25 = vmax.f32 %v5361_v39, 0.0  ;;  %v5368_v58 = vmax.f32 %v5360_v46, 0.0  ;;  %v7471_v37 = vld [vmem:[#allocation17 + $0x1a4] ss:$8 sps:$4 sm:$0xff]   ;;  %v7469_v1 = vld [vmem:[#allocation17 + $0x1a0] ss:$8 sps:$4 sm:$0xff]  }
 0x7e3   :  { %v5367_v51 = vadd.f32 %v5355_v3, %v5338_v40  ;;  %v5366_v63 = vadd.f32 %v5351_v42, %v5337_v0  ;;  %v5370_v61 = vmax.f32 %v5362_v8, 0.0  ;;  %v5371_v10 = vmax.f32 %v5363_v12, 0.0  ;;  %v7481_v3 = vld [vmem:[#allocation17 + $0x1e0] ss:$8 sps:$4 sm:$0xff]   ;;  %v7486_v42 = vld [vmem:[#allocation17 + $0x1f4] ss:$8 sps:$4 sm:$0xff]  }
 0x7e4   :  { %v5373_v27 = vmax.f32 %v5365_v62, 0.0  ;;  %v5372_v18 = vmax.f32 %v5364_v19, 0.0  ;;  %v5449_v6 = vrot.slane %v5444_v26, %v8201_v32  ;;  %v5453_v13 = vrot.slane %v5444_v26, %v8206_v36  ;;  %v7487_v8 = vld [vmem:[%s8581_s13 + $0x40] sm:$0xff]  }
 0x7e5   :  { %v5375_v44 = vmax.f32 %v5367_v51, 0.0  ;;  %v5374_v31 = vmax.f32 %v5366_v63, 0.0  ;;  %v7488_v62 = vld [vmem:[%s8581_s13] sm:$0xff]   ;;  %6874 = vmatprep.subr.bf16.mxu1 %v7487_v8 }
 0x7e6   :  { %v5377_v33 = vpack.c.bf16 %v5373_v27, %v5369_v25  ;;  %v5376_v45 = vpack.c.bf16 %v5372_v18, %v5368_v58  ;;  %6875 = vmatpush3.bf16.msra.mxu1 %v7488_v62 }
 0x7e7   :  { %v8505_v28 = vpack.c.bf16 %v5374_v31, %v5370_v61  ;;  %v5379_v35 = vpack.c.bf16 %v5375_v44, %v5371_v10  ;;  %v7489_v10 = vld [vmem:[%s8581_s13 + $0x48] sm:$0xff]  }
 0x7e8   :  { %5808 = vmatprep.mubr.bf16.mxu0 %v5377_v33  ;;  %6876 = vmatprep.subr.bf16.mxu1 %v7489_v10 }
 0x7e9   :  { %5809 = vmatmul.mubr.bf16.vlgmr.msra.gmra.mrb[12].mxu0 %v5376_v45 }
 0x7ea   :  { %5820 = vmatpush1.bf16.msra.mxu0 %v7439_v14  ;;  %5851 = vmatprep.mubr.bf16.mxu0 %v5379_v35  ;;  %v7492_v35 = vld [vmem:[%s8581_s13 + $0x10] sm:$0xff]  }
 0x7eb   :  { %5821 = vmatprep.subr.bf16.mxu0 %v7444_v34  ;;  %v7490_v34 = vld [vmem:[%s8581_s13 + $0x8] sm:$0xff]  }
 0x7ec   :  { %6877 = vmatpush3.bf16.msra.mxu1 %v7490_v34 }
 0x7ee   :  { %5822 = vmatpush1.bf16.msra.mxu0 %v7442_v59  ;;  %v7493_v59 = vld [vmem:[%s8581_s13 + $0x58] sm:$0xff]  }
 0x7ef   :  { %5823 = vmatprep.subr.bf16.mxu0 %v7447_v48  ;;  %v7494_v48 = vld [vmem:[%s8581_s13 + $0x18] sm:$0xff]  }
 0x7f2   :  { %5824 = vmatpush1.bf16.msra.mxu0 %v7445_v24  ;;  %v7495_v24 = vld [vmem:[%s8581_s13 + $0x60] sm:$0xff]  }
 0x7f3   :  { %5825 = vmatprep.subr.bf16.mxu0 %v7450_v52  ;;  %v7496_v52 = vld [vmem:[%s8581_s13 + $0x20] sm:$0xff]  }
 0x7f6   :  { %5826 = vmatpush1.bf16.msra.mxu0 %v7448_v50  ;;  %v7497_v50 = vld [vmem:[%s8581_s13 + $0x68] sm:$0xff]  }
 0x7f7   :  { %5827 = vmatprep.subr.bf16.mxu0 %v7453_v49  ;;  %v7498_v49 = vld [vmem:[%s8581_s13 + $0x28] sm:$0xff]  }
 0x7fa   :  { %5828 = vmatpush1.bf16.msra.mxu0 %v7451_v30  ;;  %v7499_v30 = vld [vmem:[%s8581_s13 + $0x70] sm:$0xff]  }
 0x7fb   :  { %5829 = vmatprep.subr.bf16.mxu0 %v7456_v22  ;;  %v7500_v22 = vld [vmem:[%s8581_s13 + $0x30] sm:$0xff]  }
 0x7fe   :  { %5830 = vmatpush1.bf16.msra.mxu0 %v7454_v41  ;;  %v7501_v41 = vld [vmem:[%s8581_s13 + $0x78] sm:$0xff]  }
 0x7ff   :  { %5831 = vmatprep.subr.bf16.mxu0 %v7459_v56  ;;  %v7502_v56 = vld [vmem:[%s8581_s13 + $0x38] sm:$0xff]  }
 0x802   :  { %5832 = vmatpush1.bf16.msra.mxu0 %v7457_v11 }
 0x803   :  { %5833 = vmatprep.subr.bf16.mxu0 %v7462_v20 }
 0x806   :  { %5834 = vmatpush1.bf16.msra.mxu0 %v7460_v17 }
 0x807   :  { %5835 = vmatprep.subr.bf16.mxu0 %v7465_v55 }
 0x80a   :  { %5836 = vmatpush1.bf16.msra.mxu0 %v7463_v57 }
 0x80b   :  { %5837 = vmatprep.subr.bf16.mxu0 %v7468_v60 }
 0x80e   :  { %5838 = vmatpush1.bf16.msra.mxu0 %v7466_v21  ;;  %v5862_v21 = vld [vmem:[#allocation20] sm:$0x3] }
 0x80f   :  { %5839 = vmatprep.subr.bf16.mxu0 %v7471_v37  ;;  %v5863_v37 = vld [vmem:[#allocation22] sm:$0x3] }
 0x812   :  { %5840 = vmatpush1.bf16.msra.mxu0 %v7469_v1  ;;  %v5901_v1 = vrot.slane %v5862_v21, %v8201_v32 }
 0x813   :  { %5841 = vmatprep.subr.bf16.mxu0 %v7474_v38  ;;  %v5905_v38 = vrot.slane %v5862_v21, %v8206_v36 }
 0x816   :  { %5842 = vmatpush1.bf16.msra.mxu0 %v7472_v43 }
 0x817   :  { %5843 = vmatprep.subr.bf16.mxu0 %v7477_v53 }
 0x81a   :  { %5844 = vmatpush1.bf16.msra.mxu0 %v7475_v47 }
 0x81b   :  { %5845 = vmatprep.subr.bf16.mxu0 %v7480_v9  ;;  %v5916_v9 = vrot.slane %v5863_v37, %v8201_v32 }
 0x81e   :  { %5846 = vmatpush1.bf16.msra.mxu0 %v7478_v5  ;;  %v5920_v5 = vrot.slane %v5863_v37, %v8206_v36  ;;  %v6855_v36 = vld [vmem:[#allocation23] ss:$0 sm:$0xff] }
 0x81f   :  { %5847 = vmatprep.subr.bf16.mxu0 %v7483_v2 }
 0x822   :  { %5848 = vmatpush1.bf16.msra.mxu0 %v7481_v3 }
 0x823   :  { %5849 = vmatprep.subr.bf16.mxu0 %v7486_v42 }
 0x826   :  { %5850 = vmatpush1.bf16.msra.mxu0 %v7484_v4 }
 0x829   :  { %5852 = vmatmul.mubr.bf16.vlgmr.msra.gmra.mrb[12].mxu0 %v8505_v28  ;;  %v7491_v28 = vld [vmem:[%s8581_s13 + $0x50] sm:$0xff]  }
 0x82a   :  { %6878 = vmatprep.subr.bf16.mxu1 %v7491_v28 }
 0x82b   :  { %6879 = vmatpush3.bf16.msra.mxu1 %v7492_v35 }
 0x82c   :  { %6880 = vmatprep.subr.bf16.mxu1 %v7493_v59 }
 0x82f   :  { %6881 = vmatpush3.bf16.msra.mxu1 %v7494_v48 }
 0x830   :  { %6882 = vmatprep.subr.bf16.mxu1 %v7495_v24 }
 0x833   :  { %6883 = vmatpush3.bf16.msra.mxu1 %v7496_v52 }
 0x834   :  { %6884 = vmatprep.subr.bf16.mxu1 %v7497_v50 }
 0x837   :  { %6885 = vmatpush3.bf16.msra.mxu1 %v7498_v49 }
 0x838   :  { %6886 = vmatprep.subr.bf16.mxu1 %v7499_v30 }
 0x83b   :  { %6887 = vmatpush3.bf16.msra.mxu1 %v7500_v22 }
 0x83c   :  { %6888 = vmatprep.subr.bf16.mxu1 %v7501_v41 }
 0x83f   :  { %6889 = vmatpush3.bf16.msra.mxu1 %v7502_v56 }
 0x8fc   :  { %v5853_v15 = vpop.f32.mrb[12].mxu0 }
 0x8fd   :  { %v6924_v54 = vadd.f32 %v5853_v15, %v5449_v6  ;;  %v5855_v23 = vpop.f32.mrb[13].mxu0 }
 0x8fe   :  { %v6925_v16 = vadd.f32 %v5855_v23, %v5453_v13  ;;  %v5857_v29 = vpop.f32.mrb[14].mxu0 }
 0x8ff   :  { %v6926_v39 = vadd.f32 %v5857_v29, %v5449_v6  ;;  %v5859_v7 = vpop.f32.mrb[15].mxu0 }
 0x900   :  { %v6927_v46 = vadd.f32 %v5859_v7, %v5453_v13  ;;  %v5864_v40 = vadd.f32 %v6925_v16, %v6924_v54 }
 0x902   :  { %5865 = vadd.xlane.f32.xlu0 %v5864_v40  ;;  %v5867_v0 = vadd.f32 %v6927_v46, %v6926_v39 }
 0x904   :  { %5868 = vadd.xlane.f32.xlu1 %v5867_v0 }
 0x98f   :  { %v5866_v19 = vpop.xlane.xlu0 %5865 }
 0x990   :  { %v5871_v12 = vmul.f32 0.00390625, %v5866_v19 }
 0x991   :  { %v5869_v51 = vpop.xlane.xlu1 %5868 }
 0x992   :  { %v5873_v63 = vsub.f32 %v6924_v54, %v5871_v12  ;;  %v5874_v25 = vsub.f32 %v6925_v16, %v5871_v12  ;;  %v5872_v27 = vmul.f32 0.00390625, %v5869_v51 }
 0x994   :  { %v5875_v58 = vsub.f32 %v6926_v39, %v5872_v27  ;;  %v5876_v18 = vsub.f32 %v6927_v46, %v5872_v27  ;;  %v5877_v44 = vmul.f32 %v5873_v63, %v5873_v63  ;;  %v5878_v61 = vmul.f32 %v5874_v25, %v5874_v25 }
 0x996   :  { %v5881_v31 = vadd.f32 %v5878_v61, %v5877_v44  ;;  %v5879_v33 = vmul.f32 %v5875_v58, %v5875_v58  ;;  %v5880_v14 = vmul.f32 %v5876_v18, %v5876_v18 }
 0x998   :  { %5882 = vadd.xlane.f32.xlu0 %v5881_v31  ;;  %v5884_v45 = vadd.f32 %v5880_v14, %v5879_v33  ;;  %v6873_v14 = vld [vmem:[#allocation2] ss:$0 sm:$0xff] }
 0x99a   :  { %5885 = vadd.xlane.f32.xlu1 %v5884_v45 }
 0xa25   :  { %v5883_v11 = vpop.xlane.xlu0 %5882 }
 0xa26   :  { %v5887_v20 = vmul.f32 0.00390625, %v5883_v11 }
 0xa27   :  { %v5886_v17 = vpop.xlane.xlu1 %5885 }
 0xa28   :  { %v5889_v55 = vadd.f32 1e-05, %v5887_v20  ;;  %v5888_v57 = vmul.f32 0.00390625, %v5886_v17 }
 0xa2a   :  { %7511 = vrsqrt.f32 %v5889_v55  ;;  %v5890_v60 = vadd.f32 1e-05, %v5888_v57 }
 0xa2c   :  { %7513 = vrsqrt.f32 %v5890_v60 }
 0xa34   :  { %v7512_v43 = vpop.eup %7511 }
 0xa35   :  { %v5893_v53 = vmul.f32 %v7512_v43, %v5873_v63  ;;  %v5894_v47 = vmul.f32 %v7512_v43, %v5874_v25  ;;  %v6872_v25 = vld [vmem:[#allocation25] ss:$0 sm:$0xff] }
 0xa36   :  { %v7514_v2 = vpop.eup %7513 }
 0xa37   :  { %v5895_v3 = vmul.f32 %v7514_v2, %v5875_v58  ;;  %v5896_v42 = vmul.f32 %v7514_v2, %v5876_v18  ;;  %v5909_v4 = vmul.f32 %v5905_v38, %v5894_v47  ;;  %v5908_v26 = vmul.f32 %v5901_v1, %v5893_v53 }
 0xa39   :  { %v5911_v6 = vmul.f32 %v5905_v38, %v5896_v42  ;;  %v5924_v13 = vadd.f32 %v5920_v5, %v5909_v4  ;;  %v5910_v15 = vmul.f32 %v5901_v1, %v5895_v3  ;;  %v5923_v54 = vadd.f32 %v5916_v9, %v5908_v26 }
 0xa3b   :  { %v5926_v23 = vadd.f32 %v5920_v5, %v5911_v6  ;;  %v5925_v16 = vadd.f32 %v5916_v9, %v5910_v15  ;;  %v5928_v29 = vmax.f32 %v5924_v13, 0.0  ;;  %v5927_v7 = vmax.f32 %v5923_v54, 0.0 }
 0xa3d   :  { %v5930_v39 = vmax.f32 %v5926_v23, 0.0  ;;  %v5929_v46 = vmax.f32 %v5925_v16, 0.0 }
 0xa3f   :  { %v5932_v40 = vpack.c.bf16 %v5930_v39, %v5928_v29  ;;  %v5931_v0 = vpack.c.bf16 %v5929_v46, %v5927_v7 }
 0xa41   :  { %6100 = vmatprep.mubr.bf16.mxu1 %v5932_v40 }
 0xa42   :  { %6101 = vmatmul.mubr.bf16.vlgmr.msra.gmra.mrb[16].mxu1 %v5931_v0 }
 0xb15   :  { %v6890_v32 = vpop.f32.mrb[16].mxu1 }
 0xb16   :  { %v6891_v8 = vpop.f32.mrb[17].mxu1 }
 0xb17   :  { %v6892_v62 = vadd.f32 %v6891_v8, %v6890_v32  ;;  %v6893_v19 = vpop.f32.mrb[18].mxu1 }
 0xb18   :  { %v6894_v12 = vpop.f32.mrb[19].mxu1 }
 0xb19   :  { %v6103_v51 = vadd.f32 %v6892_v62, %v6855_v36  ;;  %v6895_v63 = vadd.f32 %v6894_v12, %v6893_v19 }
 0xb1b   :  { %v6109_v27 = vmax.f32 %v6103_v51, 0.0  ;;  %v6106_v58 = vadd.f32 %v6895_v63, %v6855_v36 }
 0xb1d   :  { %v6110_v18 = vmax.f32 %v6106_v58, 0.0  ;;  %v6118_v44 = vmul.f32 %v6872_v25, %v6109_v27 }
 0xb1f   :  { %v6121_v61 = vsel %vm6120_vm0, %v6118_v44, 0.0  ;;  %v6119_v31 = vmul.f32 %v6872_v25, %v6110_v18 }
 0xb20   :  { %6122 = vadd.xlane.f32.xlu0 %v6121_v61 }
 0xb21   :  { %v6124_v33 = vsel %vm6120_vm0, %v6119_v31, 0.0 }
 0xb22   :  { %6125 = vadd.xlane.f32.xlu1 %v6124_v33 }
 0xbad   :  { %v6123_v45 = vpop.xlane.xlu0 %6122 }
 0xbae   :  { %v6134_v10 = vadd.f32 %v6873_v14, %v6123_v45 }
 0xbaf   :  { %v6126_v34 = vpop.xlane.xlu1 %6125 }
 0xbb0   :  { %6137 = vst.msk [vmem:[%s8594_s18] sm:$0xff] %vm6136_vm1, %v6134_v10  ;;  %v6135_v28 = vadd.f32 %v6873_v14, %v6126_v34 }
 0xbb2   :  { %6138 = vst.msk [vmem:[%s8594_s18 + $0x8] sm:$0xff] %vm6136_vm1, %v6135_v28 }
 0xbb3   :  { %6143 = vsyncpa [#allocation4], 1 }
 0xbb4   :  { %6144 = vsyncpa [#allocation6], 1 }
 0xbb5   :  { %6145 = vsyncpa [#allocation9], 1 }
 0xbb6   :  { %6146 = vsyncpa [#allocation12], 1 }
 0xbb7   :  { %6147 = vsyncpa [#allocation15], 1 }
 0xbb8   :  { %6148 = vsyncpa [#allocation18], 1 }
 0xbb9   :  { %6149 = vsyncpa [#allocation21], 1 }
 0xbba   :  { %6150 = vsyncpa [#allocation24], 1 }

// kernel: tpu_custom_call.1
= control target key start
LH: loop header
LB: loop body
LE: loop exit
PB: predicated region body
PF: predicated region fallthrough
CT: control target
= control target key end

     0   :  { %s8568_s0 = inlined_call_operand.hbm [shape: f32[16,768], index: 0, kind: input, shape index: {}]   ;;  %s8569_s1 = inlined_call_operand.hbm [shape: bf16[768,1024], index: 1, kind: input, shape index: {}]   ;;  %s8570_s2 = inlined_call_operand.hbm [shape: f32[1,1024], index: 2, kind: input, shape index: {}]   ;;  %s8571_s3 = inlined_call_operand.hbm [shape: f32[1,1024], index: 3, kind: input, shape index: {}]   ;;  %s8572_s4 = inlined_call_operand.hbm [shape: f32[1,1024], index: 4, kind: input, shape index: {}]   ;;  %s8573_s5 = inlined_call_operand.hbm [shape: bf16[1024,512], index: 5, kind: input, shape index: {}]   ;;  %s8574_s6 = inlined_call_operand.hbm [shape: f32[1,512], index: 6, kind: input, shape index: {}]   ;;  %s8575_s7 = inlined_call_operand.hbm [shape: f32[1,512], index: 7, kind: input, shape index: {}]   ;;  %s8576_s8 = inlined_call_operand.hbm [shape: f32[1,512], index: 8, kind: input, shape index: {}]   ;;  %s8577_s9 = inlined_call_operand.hbm [shape: bf16[512,256], index: 9, kind: input, shape index: {}]   ;;  %s8578_s10 = inlined_call_operand.hbm [shape: f32[1,256], index: 10, kind: input, shape index: {}]   ;;  %s8579_s11 = inlined_call_operand.hbm [shape: f32[1,256], index: 11, kind: input, shape index: {}]   ;;  %s8580_s12 = inlined_call_operand.hbm [shape: f32[1,256], index: 12, kind: input, shape index: {}]   ;;  %s8581_s13 = inlined_call_operand.vmem [shape: bf16[256,64], index: 13, kind: input, shape index: {}]   ;;  %s8582_s14 = inlined_call_operand.hbm [shape: f32[1,64], index: 14, kind: input, shape index: {}]   ;;  %s8583_s15 = inlined_call_operand.hbm [shape: f32[1,64], index: 15, kind: input, shape index: {}]   ;;  %s8584_s16 = inlined_call_operand.<no memory space> [shape: f32[1,1], index: 16, kind: input, shape index: {}]   ;;  %s8585_s17 = inlined_call_operand.vmem [shape: f32[16,1], index: 17, kind: output, shape index: {}]  }
   0x1   :  { %8589 = sst [smem:[#allocation34_spill]] %s8568_s0  ;;  %v22_v0 = vstv %s8584_s16 }
   0x2   :  { %8590 = sst [smem:[#allocation35_spill]] %s8569_s1  ;;  %23 = vst [vmem:[#allocation2] sm:$0x1] %v22_v0 }
   0x3   :  { %8591 = sst [smem:[#allocation36_spill]] %s8585_s17 }
   0x4   :  { %24 = vsyncpa [#allocation4], 0 }
   0x5   :  { %25 = vsyncpa [#allocation6], 0 }
   0x6   :  { %26 = vsyncpa [#allocation9], 0 }
   0x7   :  { %27 = vsyncpa [#allocation12], 0 }
   0x8   :  { %28 = vsyncpa [#allocation15], 0 }
   0x9   :  { %29 = vsyncpa [#allocation18], 0 }
   0xa   :  { %30 = vsyncpa [#allocation21], 0 }
   0xb   :  { %31 = vsyncpa [#allocation24], 0  ;;  %s7861_s26 = smov [#allocation5]   ;;  %s8592_s0 = sld [smem:[#allocation35_spill]] }
   0xc   :  { %s49_s27 = sshll.u32 %s7861_s26, 4  ;;  %s50_s27 = int_to_ptr.vmem [resolvable:$true] %s49_s27 }
  0x11   :  { %s7515_s30 = scalar_lea.hbm %s8592_s0, 49152 }
  0x12   :  { %p7516_p0 = scmp.ne.s32.totalorder %s8592_s0, %s7515_s30  ;;  %p7519_p1 = scmp.lt.u32.totalorder %s7515_s30, %s8592_s0 }
  0x14   :  { %p7521_p2 = pnand %p7519_p1, %p7516_p0 }
  0x16   :  { %7524 = shalt.err (!%p7521_p2)
}
  0x17   :  { %s7525_s20 = scalar_lea.vmem %s50_s27, 49152  ;;  %p7530_p4 = scmp.lt.s32.totalorder %s50_s27, %s50_s27 }
  0x18   :  { %p7526_p3 = scmp.ne.s32.totalorder %s50_s27, %s7525_s20  ;;  %p7531_p5 = scmp.lt.s32.totalorder %s7525_s20, %s7525_s20 }
  0x1a   :  { %p7532_p6 = por %p7531_p5, %p7530_p4 }
  0x1c   :  { %p7533_p7 = pnand %p7532_p6, %p7526_p3 }
  0x1e   :  { %7536 = shalt.err (!%p7533_p7)
}
  0x1f   :  { %s7862_s21 = smov 512   ;;  %s7863_s22 = smov 32  }
  0x20   :  { %55 = dma.hbm_to_vmem [thread:$0]  %s8592_s0, 49152, %s50_s27, [#allocation6], %s7862_s21, %s7862_s21, %s7863_s22  }
  0x21   :  { %s7864_s25 = smov [#allocation8]   ;;  %s7865_s28 = smov [#allocation11]  }
  0x22   :  { %s72_s26 = sshll.u32 %s7864_s25, 4  ;;  %s91_s29 = sshll.u32 %s7865_s28, 4  ;;  %s73_s26 = int_to_ptr.vmem [resolvable:$true] %s72_s26  ;;  %s92_s29 = int_to_ptr.vmem [resolvable:$true] %s91_s29 }
  0x23   :  { %s7537_s19 = scalar_lea.hbm %s8571_s3, 128 }
  0x24   :  { %p7538_p8 = scmp.ne.s32.totalorder %s8571_s3, %s7537_s19  ;;  %p7541_p9 = scmp.lt.u32.totalorder %s7537_s19, %s8571_s3 }
  0x26   :  { %p7543_p10 = pnand %p7541_p9, %p7538_p8 }
  0x28   :  { %7546 = shalt.err (!%p7543_p10)
}
  0x29   :  { %s7547_s27 = scalar_lea.vmem %s73_s26, 128  ;;  %p7552_p12 = scmp.lt.s32.totalorder %s73_s26, %s73_s26 }
  0x2a   :  { %p7548_p11 = scmp.ne.s32.totalorder %s73_s26, %s7547_s27  ;;  %p7553_p13 = scmp.lt.s32.totalorder %s7547_s27, %s7547_s27 }
  0x2c   :  { %p7554_p0 = por %p7553_p13, %p7552_p12 }
  0x2e   :  { %p7555_p1 = pnand %p7554_p0, %p7548_p11 }
  0x30   :  { %7558 = shalt.err (!%p7555_p1)
}
  0x31   :  { %75 = dma.hbm_to_vmem [thread:$0]  %s8571_s3, 128, %s73_s26, [#allocation9]  }
  0x32   :  { %s7559_s24 = scalar_lea.hbm %s8573_s5, 32768 }
  0x33   :  { %p7560_p2 = scmp.ne.s32.totalorder %s8573_s5, %s7559_s24  ;;  %p7563_p3 = scmp.lt.u32.totalorder %s7559_s24, %s8573_s5 }
  0x35   :  { %p7565_p4 = pnand %p7563_p3, %p7560_p2 }
  0x37   :  { %7568 = shalt.err (!%p7565_p4)
}
  0x38   :  { %s7569_s18 = scalar_lea.vmem %s92_s29, 32768  ;;  %p7574_p6 = scmp.lt.s32.totalorder %s92_s29, %s92_s29 }
  0x39   :  { %p7570_p5 = scmp.ne.s32.totalorder %s92_s29, %s7569_s18  ;;  %p7575_p7 = scmp.lt.s32.totalorder %s7569_s18, %s7569_s18 }
  0x3b   :  { %p7576_p8 = por %p7575_p7, %p7574_p6 }
  0x3d   :  { %p7577_p9 = pnand %p7576_p8, %p7570_p5 }
  0x3f   :  { %7580 = shalt.err (!%p7577_p9)
}
  0x40   :  { %s7866_s3 = smov 256   ;;  %s7867_s26 = smov 16  }
  0x41   :  { %97 = dma.hbm_to_vmem [thread:$0]  %s8573_s5, 32768, %s92_s29, [#allocation12], %s7866_s3, %s7866_s3, %s7867_s26  }
  0x42   :  { %s7868_s1 = smov [#allocation14]   ;;  %s7869_s27 = smov [#allocation17]  }
  0x43   :  { %s114_s20 = sshll.u32 %s7868_s1, 4  ;;  %s133_s0 = sshll.u32 %s7869_s27, 4  ;;  %s115_s20 = int_to_ptr.vmem [resolvable:$true] %s114_s20  ;;  %s134_s0 = int_to_ptr.vmem [resolvable:$true] %s133_s0 }
  0x44   :  { %s7581_s23 = scalar_lea.hbm %s8575_s7, 64 }
  0x45   :  { %p7582_p10 = scmp.ne.s32.totalorder %s8575_s7, %s7581_s23  ;;  %p7585_p11 = scmp.lt.u32.totalorder %s7581_s23, %s8575_s7 }
  0x47   :  { %p7587_p12 = pnand %p7585_p11, %p7582_p10 }
  0x49   :  { %7590 = shalt.err (!%p7587_p12)
}
  0x4a   :  { %s7591_s5 = scalar_lea.vmem %s115_s20, 64  ;;  %p7596_p0 = scmp.lt.s32.totalorder %s115_s20, %s115_s20 }
  0x4b   :  { %p7592_p13 = scmp.ne.s32.totalorder %s115_s20, %s7591_s5  ;;  %p7597_p1 = scmp.lt.s32.totalorder %s7591_s5, %s7591_s5 }
  0x4d   :  { %p7598_p2 = por %p7597_p1, %p7596_p0 }
  0x4f   :  { %p7599_p3 = pnand %p7598_p2, %p7592_p13 }
  0x51   :  { %7602 = shalt.err (!%p7599_p3)
}
  0x52   :  { %117 = dma.hbm_to_vmem [thread:$0]  %s8575_s7, 64, %s115_s20, [#allocation15]  }
  0x53   :  { %s7603_s26 = scalar_lea.hbm %s8577_s9, 8192 }
  0x54   :  { %p7604_p4 = scmp.ne.s32.totalorder %s8577_s9, %s7603_s26  ;;  %p7607_p5 = scmp.lt.u32.totalorder %s7603_s26, %s8577_s9 }
  0x56   :  { %p7609_p6 = pnand %p7607_p5, %p7604_p4 }
  0x58   :  { %7612 = shalt.err (!%p7609_p6)
}
  0x59   :  { %s7613_s21 = scalar_lea.vmem %s134_s0, 8192  ;;  %p7618_p8 = scmp.lt.s32.totalorder %s134_s0, %s134_s0 }
  0x5a   :  { %p7614_p7 = scmp.ne.s32.totalorder %s134_s0, %s7613_s21  ;;  %p7619_p9 = scmp.lt.s32.totalorder %s7613_s21, %s7613_s21 }
  0x5c   :  { %p7620_p10 = por %p7619_p9, %p7618_p8 }
  0x5e   :  { %p7621_p11 = pnand %p7620_p10, %p7614_p7 }
  0x60   :  { %7624 = shalt.err (!%p7621_p11)
}
  0x61   :  { %s7870_s7 = smov 128   ;;  %s7871_s20 = smov 8  }
  0x62   :  { %139 = dma.hbm_to_vmem [thread:$0]  %s8577_s9, 8192, %s134_s0, [#allocation18], %s7870_s7, %s7870_s7, %s7871_s20  }
  0x63   :  { %s7872_s24 = smov [#allocation20]   ;;  %s7873_s25 = smov [#allocation23]  }
  0x64   :  { %s156_s17 = sshll.u32 %s7872_s24, 4  ;;  %s178_s28 = sshll.u32 %s7873_s25, 4  ;;  %s157_s17 = int_to_ptr.vmem [resolvable:$true] %s156_s17  ;;  %s179_s28 = int_to_ptr.vmem [resolvable:$true] %s178_s28 }
  0x65   :  { %s7625_s30 = scalar_lea.hbm %s8579_s11, 32 }
  0x66   :  { %p7626_p12 = scmp.ne.s32.totalorder %s8579_s11, %s7625_s30  ;;  %p7629_p13 = scmp.lt.u32.totalorder %s7625_s30, %s8579_s11 }
  0x68   :  { %p7631_p0 = pnand %p7629_p13, %p7626_p12 }
  0x6a   :  { %7634 = shalt.err (!%p7631_p0)
}
  0x6b   :  { %s7635_s9 = scalar_lea.vmem %s157_s17, 32  ;;  %p7640_p2 = scmp.lt.s32.totalorder %s157_s17, %s157_s17 }
  0x6c   :  { %p7636_p1 = scmp.ne.s32.totalorder %s157_s17, %s7635_s9  ;;  %p7641_p3 = scmp.lt.s32.totalorder %s7635_s9, %s7635_s9 }
  0x6e   :  { %p7642_p4 = por %p7641_p3, %p7640_p2 }
  0x70   :  { %p7643_p5 = pnand %p7642_p4, %p7636_p1 }
  0x72   :  { %7646 = shalt.err (!%p7643_p5)
}
  0x73   :  { %159 = dma.hbm_to_vmem [thread:$0]  %s8579_s11, 32, %s157_s17, [#allocation21]  }
  0x74   :  { %s7647_s21 = scalar_lea.hbm %s8582_s14, 16 }
  0x75   :  { %p7648_p6 = scmp.ne.s32.totalorder %s8582_s14, %s7647_s21  ;;  %p7651_p7 = scmp.lt.u32.totalorder %s7647_s21, %s8582_s14 }
  0x77   :  { %p7653_p8 = pnand %p7651_p7, %p7648_p6 }
  0x79   :  { %7656 = shalt.err (!%p7653_p8)
}
  0x7a   :  { %s7657_s24 = scalar_lea.vmem %s179_s28, 16  ;;  %s7661_s25 = scalar_lea.vmem %s179_s28, 32 }
  0x7b   :  { %p7658_p9 = scmp.ne.s32.totalorder %s179_s28, %s7657_s24  ;;  %p7662_p10 = scmp.lt.s32.totalorder %s179_s28, %s179_s28 }
  0x7c   :  { %p7663_p11 = scmp.lt.s32.totalorder %s7661_s25, %s7657_s24 }
  0x7e   :  { %p7664_p12 = por %p7663_p11, %p7662_p10 }
  0x80   :  { %p7665_p13 = pnand %p7664_p12, %p7658_p9 }
  0x82   :  { %7668 = shalt.err (!%p7665_p13)
}
  0x83   :  { %181 = dma.hbm_to_vmem [thread:$0]  %s8582_s14, 16, %s179_s28, [#allocation24]  }
  0x84   :  { %s7874_s5 = smov [#allocation3]   ;;  %s8593_s3 = sld [smem:[#allocation34_spill]] }
  0x85   :  { %s37_s29 = sshll.u32 %s7874_s5, 4  ;;  %s38_s29 = int_to_ptr.vmem [resolvable:$true] %s37_s29 }
  0x8a   :  { %s7669_s26 = scalar_lea.hbm %s8593_s3, 1536 }
  0x8b   :  { %p7670_p0 = scmp.ne.s32.totalorder %s8593_s3, %s7669_s26  ;;  %p7673_p1 = scmp.lt.u32.totalorder %s7669_s26, %s8593_s3 }
  0x8d   :  { %p7675_p2 = pnand %p7673_p1, %p7670_p0 }
  0x8f   :  { %7678 = shalt.err (!%p7675_p2)
}
  0x90   :  { %s7679_s1 = scalar_lea.vmem %s38_s29, 1536  ;;  %p7684_p4 = scmp.lt.s32.totalorder %s38_s29, %s38_s29 }
  0x91   :  { %p7680_p3 = scmp.ne.s32.totalorder %s38_s29, %s7679_s1  ;;  %p7685_p5 = scmp.lt.s32.totalorder %s7679_s1, %s7679_s1 }
  0x93   :  { %p7686_p6 = por %p7685_p5, %p7684_p4 }
  0x95   :  { %p7687_p7 = pnand %p7686_p6, %p7680_p3 }
  0x97   :  { %7690 = shalt.err (!%p7687_p7)
}
  0x98   :  { %s7875_s14 = smov 768   ;;  %s7876_s28 = smov 48  }
  0x99   :  { %43 = dma.hbm_to_vmem [thread:$0]  %s8593_s3, 1536, %s38_s29, [#allocation4], %s7875_s14, %s7875_s14, %s7876_s28  }
  0x9a   :  { %s7877_s7 = smov [#allocation7]   ;;  %s7878_s22 = smov [#allocation10]  }
  0x9b   :  { %s62_s20 = sshll.u32 %s7877_s7, 4  ;;  %s82_s23 = sshll.u32 %s7878_s22, 4  ;;  %s63_s20 = int_to_ptr.vmem [resolvable:$true] %s62_s20  ;;  %s83_s23 = int_to_ptr.vmem [resolvable:$true] %s82_s23 }
  0x9c   :  { %s7691_s11 = scalar_lea.hbm %s8570_s2, 128 }
  0x9d   :  { %p7692_p8 = scmp.ne.s32.totalorder %s8570_s2, %s7691_s11  ;;  %p7695_p9 = scmp.lt.u32.totalorder %s7691_s11, %s8570_s2 }
  0x9f   :  { %p7697_p10 = pnand %p7695_p9, %p7692_p8 }
  0xa1   :  { %7700 = shalt.err (!%p7697_p10)
}
  0xa2   :  { %s7701_s29 = scalar_lea.vmem %s63_s20, 128  ;;  %p7706_p12 = scmp.lt.s32.totalorder %s63_s20, %s63_s20 }
  0xa3   :  { %p7702_p11 = scmp.ne.s32.totalorder %s63_s20, %s7701_s29  ;;  %p7707_p13 = scmp.lt.s32.totalorder %s7701_s29, %s7701_s29 }
  0xa5   :  { %p7708_p0 = por %p7707_p13, %p7706_p12 }
  0xa7   :  { %p7709_p1 = pnand %p7708_p0, %p7702_p11 }
  0xa9   :  { %7712 = shalt.err (!%p7709_p1)
}
  0xaa   :  { %65 = dma.hbm_to_vmem [thread:$0]  %s8570_s2, 128, %s63_s20, [#allocation6]  }
  0xab   :  { %s7713_s0 = scalar_lea.hbm %s8572_s4, 128 }
  0xac   :  { %p7714_p2 = scmp.ne.s32.totalorder %s8572_s4, %s7713_s0  ;;  %p7717_p3 = scmp.lt.u32.totalorder %s7713_s0, %s8572_s4 }
  0xae   :  { %p7719_p4 = pnand %p7717_p3, %p7714_p2 }
  0xb0   :  { %7722 = shalt.err (!%p7719_p4)
}
  0xb1   :  { %s7723_s27 = scalar_lea.vmem %s83_s23, 128  ;;  %p7728_p6 = scmp.lt.s32.totalorder %s83_s23, %s83_s23 }
  0xb2   :  { %p7724_p5 = scmp.ne.s32.totalorder %s83_s23, %s7723_s27  ;;  %p7729_p7 = scmp.lt.s32.totalorder %s7723_s27, %s7723_s27 }
  0xb4   :  { %p7730_p8 = por %p7729_p7, %p7728_p6 }
  0xb6   :  { %p7731_p9 = pnand %p7730_p8, %p7724_p5 }
  0xb8   :  { %7734 = shalt.err (!%p7731_p9)
}
  0xb9   :  { %85 = dma.hbm_to_vmem [thread:$0]  %s8572_s4, 128, %s83_s23, [#allocation9]  }
  0xba   :  { %s7879_s7 = smov [#allocation13]   ;;  %s7880_s22 = smov [#allocation16]  }
  0xbb   :  { %s104_s20 = sshll.u32 %s7879_s7, 4  ;;  %s124_s24 = sshll.u32 %s7880_s22, 4  ;;  %s105_s20 = int_to_ptr.vmem [resolvable:$true] %s104_s20  ;;  %s125_s24 = int_to_ptr.vmem [resolvable:$true] %s124_s24 }
  0xbc   :  { %s7735_s17 = scalar_lea.hbm %s8574_s6, 64 }
  0xbd   :  { %p7736_p10 = scmp.ne.s32.totalorder %s8574_s6, %s7735_s17  ;;  %p7739_p11 = scmp.lt.u32.totalorder %s7735_s17, %s8574_s6 }
  0xbf   :  { %p7741_p12 = pnand %p7739_p11, %p7736_p10 }
  0xc1   :  { %7744 = shalt.err (!%p7741_p12)
}
  0xc2   :  { %s7745_s4 = scalar_lea.vmem %s105_s20, 64  ;;  %p7750_p0 = scmp.lt.s32.totalorder %s105_s20, %s105_s20 }
  0xc3   :  { %p7746_p13 = scmp.ne.s32.totalorder %s105_s20, %s7745_s4  ;;  %p7751_p1 = scmp.lt.s32.totalorder %s7745_s4, %s7745_s4 }
  0xc5   :  { %p7752_p2 = por %p7751_p1, %p7750_p0 }
  0xc7   :  { %p7753_p3 = pnand %p7752_p2, %p7746_p13 }
  0xc9   :  { %7756 = shalt.err (!%p7753_p3)
}
  0xca   :  { %107 = dma.hbm_to_vmem [thread:$0]  %s8574_s6, 64, %s105_s20, [#allocation12]  }
  0xcb   :  { %s7757_s9 = scalar_lea.hbm %s8576_s8, 64 }
  0xcc   :  { %p7758_p4 = scmp.ne.s32.totalorder %s8576_s8, %s7757_s9  ;;  %p7761_p5 = scmp.lt.u32.totalorder %s7757_s9, %s8576_s8 }
  0xce   :  { %p7763_p6 = pnand %p7761_p5, %p7758_p4 }
  0xd0   :  { %7766 = shalt.err (!%p7763_p6)
}
  0xd1   :  { %s7767_s28 = scalar_lea.vmem %s125_s24, 64  ;;  %p7772_p8 = scmp.lt.s32.totalorder %s125_s24, %s125_s24 }
  0xd2   :  { %p7768_p7 = scmp.ne.s32.totalorder %s125_s24, %s7767_s28  ;;  %p7773_p9 = scmp.lt.s32.totalorder %s7767_s28, %s7767_s28 }
  0xd4   :  { %p7774_p10 = por %p7773_p9, %p7772_p8 }
  0xd6   :  { %p7775_p11 = pnand %p7774_p10, %p7768_p7 }
  0xd8   :  { %7778 = shalt.err (!%p7775_p11)
}
  0xd9   :  { %127 = dma.hbm_to_vmem [thread:$0]  %s8576_s8, 64, %s125_s24, [#allocation15]  }
  0xda   :  { %s7881_s2 = smov [#allocation19]   ;;  %s7882_s7 = smov [#allocation22]  }
  0xdb   :  { %s146_s21 = sshll.u32 %s7881_s2, 4  ;;  %s166_s20 = sshll.u32 %s7882_s7, 4  ;;  %s147_s21 = int_to_ptr.vmem [resolvable:$true] %s146_s21  ;;  %s167_s20 = int_to_ptr.vmem [resolvable:$true] %s166_s20 }
  0xdc   :  { %s7779_s11 = scalar_lea.hbm %s8578_s10, 32 }
  0xdd   :  { %p7780_p12 = scmp.ne.s32.totalorder %s8578_s10, %s7779_s11  ;;  %p7783_p13 = scmp.lt.u32.totalorder %s7779_s11, %s8578_s10 }
  0xdf   :  { %p7785_p0 = pnand %p7783_p13, %p7780_p12 }
  0xe1   :  { %7788 = shalt.err (!%p7785_p0)
}
  0xe2   :  { %s7789_s8 = scalar_lea.vmem %s147_s21, 32  ;;  %p7794_p2 = scmp.lt.s32.totalorder %s147_s21, %s147_s21 }
  0xe3   :  { %p7790_p1 = scmp.ne.s32.totalorder %s147_s21, %s7789_s8  ;;  %p7795_p3 = scmp.lt.s32.totalorder %s7789_s8, %s7789_s8 }
  0xe5   :  { %p7796_p4 = por %p7795_p3, %p7794_p2 }
  0xe7   :  { %p7797_p5 = pnand %p7796_p4, %p7790_p1 }
  0xe9   :  { %7800 = shalt.err (!%p7797_p5)
}
  0xea   :  { %149 = dma.hbm_to_vmem [thread:$0]  %s8578_s10, 32, %s147_s21, [#allocation18]  }
  0xeb   :  { %s7801_s3 = scalar_lea.hbm %s8580_s12, 32 }
  0xec   :  { %p7802_p6 = scmp.ne.s32.totalorder %s8580_s12, %s7801_s3  ;;  %p7805_p7 = scmp.lt.u32.totalorder %s7801_s3, %s8580_s12 }
  0xee   :  { %p7807_p8 = pnand %p7805_p7, %p7802_p6 }
  0xf0   :  { %7810 = shalt.err (!%p7807_p8)
}
  0xf1   :  { %s7811_s16 = scalar_lea.vmem %s167_s20, 32  ;;  %p7816_p10 = scmp.lt.s32.totalorder %s167_s20, %s167_s20 }
  0xf2   :  { %p7812_p9 = scmp.ne.s32.totalorder %s167_s20, %s7811_s16  ;;  %p7817_p11 = scmp.lt.s32.totalorder %s7811_s16, %s7811_s16 }
  0xf4   :  { %p7818_p12 = por %p7817_p11, %p7816_p10 }
  0xf6   :  { %p7819_p13 = pnand %p7818_p12, %p7812_p9 }
  0xf8   :  { %7822 = shalt.err (!%p7819_p13)
}
  0xf9   :  { %169 = dma.hbm_to_vmem [thread:$0]  %s8580_s12, 32, %s167_s20, [#allocation21]  }
  0xfa   :  { %s7883_s14 = smov [#allocation25]   ;;  %s7823_s2 = scalar_lea.hbm %s8583_s15, 16 }
  0xfb   :  { %s188_s28 = sshll.u32 %s7883_s14, 4  ;;  %p7824_p0 = scmp.ne.s32.totalorder %s8583_s15, %s7823_s2  ;;  %s189_s28 = int_to_ptr.vmem [resolvable:$true] %s188_s28 }
  0xfc   :  { %p7827_p1 = scmp.lt.u32.totalorder %s7823_s2, %s8583_s15 }
  0xfe   :  { %p7829_p2 = pnand %p7827_p1, %p7824_p0 }
 0x100   :  { %7832 = shalt.err (!%p7829_p2)
}
 0x101   :  { %s7833_s11 = scalar_lea.vmem %s189_s28, 16  ;;  %s7837_s12 = scalar_lea.vmem %s189_s28, 32 }
 0x102   :  { %p7834_p3 = scmp.ne.s32.totalorder %s189_s28, %s7833_s11  ;;  %p7838_p4 = scmp.lt.s32.totalorder %s189_s28, %s189_s28 }
 0x103   :  { %p7839_p5 = scmp.lt.s32.totalorder %s7837_s12, %s7833_s11 }
 0x105   :  { %p7840_p6 = por %p7839_p5, %p7838_p4 }
 0x107   :  { %p7841_p7 = pnand %p7840_p6, %p7834_p3 }
 0x109   :  { %7844 = shalt.err (!%p7841_p7)
}
 0x10a   :  { %191 = dma.hbm_to_vmem [thread:$0]  %s8583_s15, 16, %s189_s28, [#allocation24]  }
 0x10b   :  { %7845 = dma.done.wait [#allocation4], 1536  }
 0x10c   :  { %7846 = vsyncadd [#allocation4], 4294965760 }
 0x10d   :  { %7847 = dma.done.wait [#allocation6], 49280  }
 0x10e   :  { %7848 = vsyncadd [#allocation6], 4294918016 }
 0x10f   :  { %7849 = dma.done.wait [#allocation9], 256  }
 0x110   :  { %7850 = vsyncadd [#allocation9], 4294967040 }
 0x111   :  { %7851 = dma.done.wait [#allocation12], 32832  }
 0x112   :  { %7852 = vsyncadd [#allocation12], 4294934464 }
 0x113   :  { %7853 = dma.done.wait [#allocation15], 128  }
 0x114   :  { %7854 = vsyncadd [#allocation15], 4294967168 }
 0x115   :  { %7855 = dma.done.wait [#allocation18], 8224  }
 0x116   :  { %7856 = vsyncadd [#allocation18], 4294959072 }
 0x117   :  { %7857 = dma.done.wait [#allocation21], 64  }
 0x118   :  { %7858 = vsyncadd [#allocation21], 4294967232 }
 0x119   :  { %7859 = dma.done.wait [#allocation24], 32  }
 0x11a   :  { %7860 = vsyncadd [#allocation24], 4294967264  ;;  %v258_v1 = vld [vmem:[#allocation5] sm:$0xff]  ;;  %v241_v54 = vld [vmem:[#allocation3 + $0x8] sm:$0xff]  ;;  %vm6120_vm0 = vcmask 523264   ;;  %vm6136_vm1 = vcmask 7168  }
 0x11b   :  { %v262_v2 = vld [vmem:[#allocation5 + $0x20] sm:$0xff]  ;;  %v247_v55 = vld [vmem:[#allocation3 + $0x38] sm:$0xff]  ;;  %v249_v63 = vld [vmem:[#allocation3 + $0x48] sm:$0xff]  ;;  %s8594_s18 = sld [smem:[#allocation36_spill]] }
 0x11c   :  { %v386_v3 = vld [vmem:[#allocation5 + $0x400] sm:$0xff]  ;;  %v6152_v4 = vcombine.high %v258_v1, %v262_v2  ;;  %v6151_v6 = vcombine.low %v258_v1, %v262_v2  ;;  %v8157_v59 = vpack.c.bf16 %v247_v55, %v241_v54  ;;  %v243_v60 = vld [vmem:[#allocation3 + $0x18] sm:$0xff] }
 0x11d   :  { %v390_v5 = vld [vmem:[#allocation5 + $0x420] sm:$0xff]  ;;  %v8160_v1 = vpack.c.bf16 %v249_v63, %v243_v60 }
 0x11e   :  { %v266_v7 = vld [vmem:[#allocation5 + $0x40] sm:$0xff]  ;;  %v6280_v9 = vcombine.high %v386_v3, %v390_v5  ;;  %v6279_v10 = vcombine.low %v386_v3, %v390_v5  ;;  %2604 = vmatprep.subr.bf16.mxu1 %v6152_v4  ;;  %2636 = vmatprep.mubr.bf16.mxu1 %v8157_v59 }
 0x11f   :  { %v270_v8 = vld [vmem:[#allocation5 + $0x60] sm:$0xff]  ;;  %2605 = vmatpush1.bf16.msra.mxu1 %v6151_v6  ;;  %2679 = vmatprep.mubr.bf16.mxu0 %v8160_v1 }
 0x120   :  { %v6160_v11 = vcombine.high %v266_v7, %v270_v8  ;;  %v394_v12 = vld [vmem:[#allocation5 + $0x440] sm:$0xff]  ;;  %2647 = vmatprep.subr.bf16.mxu0 %v6280_v9  ;;  %v6159_v19 = vcombine.low %v266_v7, %v270_v8 }
 0x121   :  { %v398_v13 = vld [vmem:[#allocation5 + $0x460] sm:$0xff]  ;;  %2648 = vmatpush1.bf16.msra.mxu0 %v6279_v10 }
 0x122   :  { %v274_v14 = vld [vmem:[#allocation5 + $0x80] sm:$0xff]  ;;  %v6288_v15 = vcombine.high %v394_v12, %v398_v13  ;;  %2606 = vmatprep.subr.bf16.mxu1 %v6160_v11  ;;  %v6287_v20 = vcombine.low %v394_v12, %v398_v13 }
 0x123   :  { %v278_v16 = vld [vmem:[#allocation5 + $0xa0] sm:$0xff]  ;;  %2607 = vmatpush1.bf16.msra.mxu1 %v6159_v19 }
 0x124   :  { %v402_v17 = vld [vmem:[#allocation5 + $0x480] sm:$0xff]  ;;  %v6168_v21 = vcombine.high %v274_v14, %v278_v16  ;;  %2649 = vmatprep.subr.bf16.mxu0 %v6288_v15  ;;  %v6167_v27 = vcombine.low %v274_v14, %v278_v16 }
 0x125   :  { %v406_v18 = vld [vmem:[#allocation5 + $0x4a0] sm:$0xff]  ;;  %2650 = vmatpush1.bf16.msra.mxu0 %v6287_v20 }
 0x126   :  { %v6296_v22 = vcombine.high %v402_v17, %v406_v18  ;;  %v282_v23 = vld [vmem:[#allocation5 + $0xc0] sm:$0xff]  ;;  %2608 = vmatprep.subr.bf16.mxu1 %v6168_v21  ;;  %v6295_v28 = vcombine.low %v402_v17, %v406_v18 }
 0x127   :  { %v286_v24 = vld [vmem:[#allocation5 + $0xe0] sm:$0xff]  ;;  %2609 = vmatpush1.bf16.msra.mxu1 %v6167_v27 }
 0x128   :  { %v410_v25 = vld [vmem:[#allocation5 + $0x4c0] sm:$0xff]  ;;  %v6176_v29 = vcombine.high %v282_v23, %v286_v24  ;;  %2651 = vmatprep.subr.bf16.mxu0 %v6296_v22  ;;  %v6175_v35 = vcombine.low %v282_v23, %v286_v24 }
 0x129   :  { %v414_v26 = vld [vmem:[#allocation5 + $0x4e0] sm:$0xff]  ;;  %2652 = vmatpush1.bf16.msra.mxu0 %v6295_v28 }
 0x12a   :  { %v6304_v30 = vcombine.high %v410_v25, %v414_v26  ;;  %v290_v31 = vld [vmem:[#allocation5 + $0x100] sm:$0xff]  ;;  %2610 = vmatprep.subr.bf16.mxu1 %v6176_v29  ;;  %v6303_v36 = vcombine.low %v410_v25, %v414_v26 }
 0x12b   :  { %v294_v32 = vld [vmem:[#allocation5 + $0x120] sm:$0xff]  ;;  %2611 = vmatpush1.bf16.msra.mxu1 %v6175_v35 }
 0x12c   :  { %v418_v33 = vld [vmem:[#allocation5 + $0x500] sm:$0xff]  ;;  %v6184_v37 = vcombine.high %v290_v31, %v294_v32  ;;  %2653 = vmatprep.subr.bf16.mxu0 %v6304_v30  ;;  %v6183_v43 = vcombine.low %v290_v31, %v294_v32 }
 0x12d   :  { %v422_v34 = vld [vmem:[#allocation5 + $0x520] sm:$0xff]  ;;  %2654 = vmatpush1.bf16.msra.mxu0 %v6303_v36 }
 0x12e   :  { %v6312_v38 = vcombine.high %v418_v33, %v422_v34  ;;  %v298_v39 = vld [vmem:[#allocation5 + $0x140] sm:$0xff]  ;;  %2612 = vmatprep.subr.bf16.mxu1 %v6184_v37  ;;  %v6311_v44 = vcombine.low %v418_v33, %v422_v34 }
 0x12f   :  { %v302_v40 = vld [vmem:[#allocation5 + $0x160] sm:$0xff]  ;;  %2613 = vmatpush1.bf16.msra.mxu1 %v6183_v43 }
 0x130   :  { %v426_v41 = vld [vmem:[#allocation5 + $0x540] sm:$0xff]  ;;  %v6192_v45 = vcombine.high %v298_v39, %v302_v40  ;;  %2655 = vmatprep.subr.bf16.mxu0 %v6312_v38  ;;  %v6191_v51 = vcombine.low %v298_v39, %v302_v40 }
 0x131   :  { %v430_v42 = vld [vmem:[#allocation5 + $0x560] sm:$0xff]  ;;  %2656 = vmatpush1.bf16.msra.mxu0 %v6311_v44 }
 0x132   :  { %v6320_v46 = vcombine.high %v426_v41, %v430_v42  ;;  %v306_v47 = vld [vmem:[#allocation5 + $0x180] sm:$0xff]  ;;  %2614 = vmatprep.subr.bf16.mxu1 %v6192_v45  ;;  %v6319_v52 = vcombine.low %v426_v41, %v430_v42 }
 0x133   :  { %v310_v48 = vld [vmem:[#allocation5 + $0x1a0] sm:$0xff]  ;;  %2615 = vmatpush1.bf16.msra.mxu1 %v6191_v51 }
 0x134   :  { %v434_v49 = vld [vmem:[#allocation5 + $0x580] sm:$0xff]  ;;  %v6200_v53 = vcombine.high %v306_v47, %v310_v48  ;;  %2657 = vmatprep.subr.bf16.mxu0 %v6320_v46  ;;  %v6199_v0 = vcombine.low %v306_v47, %v310_v48 }
 0x135   :  { %v438_v50 = vld [vmem:[#allocation5 + $0x5a0] sm:$0xff]  ;;  %2658 = vmatpush1.bf16.msra.mxu0 %v6319_v52 }
 0x136   :  { %v6328_v56 = vcombine.high %v434_v49, %v438_v50  ;;  %v314_v57 = vld [vmem:[#allocation5 + $0x1c0] sm:$0xff]  ;;  %2616 = vmatprep.subr.bf16.mxu1 %v6200_v53  ;;  %v6327_v2 = vcombine.low %v434_v49, %v438_v50 }
 0x137   :  { %v318_v58 = vld [vmem:[#allocation5 + $0x1e0] sm:$0xff]  ;;  %2617 = vmatpush1.bf16.msra.mxu1 %v6199_v0 }
 0x138   :  { %v442_v61 = vld [vmem:[#allocation5 + $0x5c0] sm:$0xff]  ;;  %v6208_v3 = vcombine.high %v314_v57, %v318_v58  ;;  %2659 = vmatprep.subr.bf16.mxu0 %v6328_v56  ;;  %v6207_v9 = vcombine.low %v314_v57, %v318_v58 }
 0x139   :  { %v446_v62 = vld [vmem:[#allocation5 + $0x5e0] sm:$0xff]  ;;  %2660 = vmatpush1.bf16.msra.mxu0 %v6327_v2 }
 0x13a   :  { %v6336_v4 = vcombine.high %v442_v61, %v446_v62  ;;  %v322_v5 = vld [vmem:[#allocation5 + $0x200] sm:$0xff]  ;;  %2618 = vmatprep.subr.bf16.mxu1 %v6208_v3  ;;  %v6335_v10 = vcombine.low %v442_v61, %v446_v62 }
 0x13b   :  { %v326_v6 = vld [vmem:[#allocation5 + $0x220] sm:$0xff]  ;;  %2619 = vmatpush1.bf16.msra.mxu1 %v6207_v9 }
 0x13c   :  { %v450_v7 = vld [vmem:[#allocation5 + $0x600] sm:$0xff]  ;;  %v6216_v11 = vcombine.high %v322_v5, %v326_v6  ;;  %2661 = vmatprep.subr.bf16.mxu0 %v6336_v4  ;;  %v6215_v17 = vcombine.low %v322_v5, %v326_v6 }
 0x13d   :  { %v454_v8 = vld [vmem:[#allocation5 + $0x620] sm:$0xff]  ;;  %2662 = vmatpush1.bf16.msra.mxu0 %v6335_v10 }
 0x13e   :  { %v6344_v12 = vcombine.high %v450_v7, %v454_v8  ;;  %v330_v13 = vld [vmem:[#allocation5 + $0x240] sm:$0xff]  ;;  %2620 = vmatprep.subr.bf16.mxu1 %v6216_v11  ;;  %v6343_v18 = vcombine.low %v450_v7, %v454_v8  ;;  %v259_v7 = vld [vmem:[#allocation5 + $0x8] sm:$0xff] }
 0x13f   :  { %v334_v14 = vld [vmem:[#allocation5 + $0x260] sm:$0xff]  ;;  %2621 = vmatpush1.bf16.msra.mxu1 %v6215_v17  ;;  %v263_v8 = vld [vmem:[#allocation5 + $0x28] sm:$0xff] }
 0x140   :  { %v458_v15 = vld [vmem:[#allocation5 + $0x640] sm:$0xff]  ;;  %v6224_v19 = vcombine.high %v330_v13, %v334_v14  ;;  %2663 = vmatprep.subr.bf16.mxu0 %v6344_v12  ;;  %v6223_v25 = vcombine.low %v330_v13, %v334_v14  ;;  %v246_v13 = vld [vmem:[#allocation3 + $0x30] sm:$0xff] }
 0x141   :  { %v462_v16 = vld [vmem:[#allocation5 + $0x660] sm:$0xff]  ;;  %2664 = vmatpush1.bf16.msra.mxu0 %v6343_v18 }
 0x142   :  { %v6352_v20 = vcombine.high %v458_v15, %v462_v16  ;;  %v338_v21 = vld [vmem:[#allocation5 + $0x280] sm:$0xff]  ;;  %2622 = vmatprep.subr.bf16.mxu1 %v6224_v19  ;;  %v6351_v26 = vcombine.low %v458_v15, %v462_v16  ;;  %v6154_v15 = vcombine.high %v259_v7, %v263_v8  ;;  %v242_v16 = vld [vmem:[#allocation3 + $0x10] sm:$0xff] }
 0x143   :  { %v342_v22 = vld [vmem:[#allocation5 + $0x2a0] sm:$0xff]  ;;  %2623 = vmatpush1.bf16.msra.mxu1 %v6223_v25  ;;  %v251_v25 = vld [vmem:[#allocation3 + $0x58] sm:$0xff] }
 0x144   :  { %v466_v23 = vld [vmem:[#allocation5 + $0x680] sm:$0xff]  ;;  %v6232_v27 = vcombine.high %v338_v21, %v342_v22  ;;  %2665 = vmatprep.subr.bf16.mxu0 %v6352_v20  ;;  %v6231_v33 = vcombine.low %v338_v21, %v342_v22  ;;  %v267_v20 = vld [vmem:[#allocation5 + $0x48] sm:$0xff] }
 0x145   :  { %v470_v24 = vld [vmem:[#allocation5 + $0x6a0] sm:$0xff]  ;;  %2666 = vmatpush1.bf16.msra.mxu0 %v6351_v26  ;;  %v271_v21 = vld [vmem:[#allocation5 + $0x68] sm:$0xff]  ;;  %v6153_v26 = vcombine.low %v259_v7, %v263_v8 }
 0x146   :  { %v6360_v28 = vcombine.high %v466_v23, %v470_v24  ;;  %v346_v29 = vld [vmem:[#allocation5 + $0x2c0] sm:$0xff]  ;;  %2624 = vmatprep.subr.bf16.mxu1 %v6232_v27  ;;  %v6359_v34 = vcombine.low %v466_v23, %v470_v24  ;;  %v245_v24 = vld [vmem:[#allocation3 + $0x28] sm:$0xff] }
 0x147   :  { %v350_v30 = vld [vmem:[#allocation5 + $0x2e0] sm:$0xff]  ;;  %2625 = vmatpush1.bf16.msra.mxu1 %v6231_v33  ;;  %v8167_v33 = vpack.c.bf16 %v251_v25, %v245_v24 }
 0x148   :  { %v474_v31 = vld [vmem:[#allocation5 + $0x6c0] sm:$0xff]  ;;  %v6240_v35 = vcombine.high %v346_v29, %v350_v30  ;;  %2667 = vmatprep.subr.bf16.mxu0 %v6360_v28  ;;  %v6239_v41 = vcombine.low %v346_v29, %v350_v30  ;;  %v6162_v29 = vcombine.high %v267_v20, %v271_v21 }
 0x149   :  { %v478_v32 = vld [vmem:[#allocation5 + $0x6e0] sm:$0xff]  ;;  %2668 = vmatpush1.bf16.msra.mxu0 %v6359_v34 }
 0x14a   :  { %v6368_v36 = vcombine.high %v474_v31, %v478_v32  ;;  %v354_v37 = vld [vmem:[#allocation5 + $0x300] sm:$0xff]  ;;  %2626 = vmatprep.subr.bf16.mxu1 %v6240_v35  ;;  %v6367_v42 = vcombine.low %v474_v31, %v478_v32  ;;  %v275_v31 = vld [vmem:[#allocation5 + $0x88] sm:$0xff] }
 0x14b   :  { %v358_v38 = vld [vmem:[#allocation5 + $0x320] sm:$0xff]  ;;  %2627 = vmatpush1.bf16.msra.mxu1 %v6239_v41  ;;  %v279_v32 = vld [vmem:[#allocation5 + $0xa8] sm:$0xff] }
 0x14c   :  { %v482_v39 = vld [vmem:[#allocation5 + $0x700] sm:$0xff]  ;;  %v6248_v43 = vcombine.high %v354_v37, %v358_v38  ;;  %2669 = vmatprep.subr.bf16.mxu0 %v6368_v36  ;;  %v6247_v49 = vcombine.low %v354_v37, %v358_v38  ;;  %v6161_v36 = vcombine.low %v267_v20, %v271_v21  ;;  %v6170_v38 = vcombine.high %v275_v31, %v279_v32  ;;  %v327_v21 = vld [vmem:[#allocation5 + $0x228] sm:$0xff] }
 0x14d   :  { %v486_v40 = vld [vmem:[#allocation5 + $0x720] sm:$0xff]  ;;  %2670 = vmatpush1.bf16.msra.mxu0 %v6367_v42  ;;  %v283_v42 = vld [vmem:[#allocation5 + $0xc8] sm:$0xff] }
 0x14e   :  { %v6376_v44 = vcombine.high %v482_v39, %v486_v40  ;;  %v362_v45 = vld [vmem:[#allocation5 + $0x340] sm:$0xff]  ;;  %2628 = vmatprep.subr.bf16.mxu1 %v6248_v43  ;;  %v6375_v50 = vcombine.low %v482_v39, %v486_v40  ;;  %v287_v43 = vld [vmem:[#allocation5 + $0xe8] sm:$0xff] }
 0x14f   :  { %v366_v46 = vld [vmem:[#allocation5 + $0x360] sm:$0xff]  ;;  %2629 = vmatpush1.bf16.msra.mxu1 %v6247_v49  ;;  %v291_v49 = vld [vmem:[#allocation5 + $0x108] sm:$0xff] }
 0x150   :  { %v490_v47 = vld [vmem:[#allocation5 + $0x740] sm:$0xff]  ;;  %v6256_v51 = vcombine.high %v362_v45, %v366_v46  ;;  %2671 = vmatprep.subr.bf16.mxu0 %v6376_v44  ;;  %v6255_v57 = vcombine.low %v362_v45, %v366_v46  ;;  %v6169_v44 = vcombine.low %v275_v31, %v279_v32  ;;  %v6178_v46 = vcombine.high %v283_v42, %v287_v43  ;;  %v335_v31 = vld [vmem:[#allocation5 + $0x268] sm:$0xff] }
 0x151   :  { %v494_v48 = vld [vmem:[#allocation5 + $0x760] sm:$0xff]  ;;  %2672 = vmatpush1.bf16.msra.mxu0 %v6375_v50 }
 0x152   :  { %v6384_v52 = vcombine.high %v490_v47, %v494_v48  ;;  %v370_v53 = vld [vmem:[#allocation5 + $0x380] sm:$0xff]  ;;  %2630 = vmatprep.subr.bf16.mxu1 %v6256_v51  ;;  %v6383_v58 = vcombine.low %v490_v47, %v494_v48  ;;  %v295_v51 = vld [vmem:[#allocation5 + $0x128] sm:$0xff] }
 0x153   :  { %v374_v54 = vld [vmem:[#allocation5 + $0x3a0] sm:$0xff]  ;;  %2631 = vmatpush1.bf16.msra.mxu1 %v6255_v57  ;;  %v299_v57 = vld [vmem:[#allocation5 + $0x148] sm:$0xff] }
 0x154   :  { %v498_v55 = vld [vmem:[#allocation5 + $0x780] sm:$0xff]  ;;  %v6264_v60 = vcombine.high %v370_v53, %v374_v54  ;;  %2673 = vmatprep.subr.bf16.mxu0 %v6384_v52  ;;  %v6263_v3 = vcombine.low %v370_v53, %v374_v54  ;;  %v6177_v52 = vcombine.low %v283_v42, %v287_v43  ;;  %v6186_v54 = vcombine.high %v291_v49, %v295_v51 }
 0x155   :  { %v502_v56 = vld [vmem:[#allocation5 + $0x7a0] sm:$0xff]  ;;  %2674 = vmatpush1.bf16.msra.mxu0 %v6383_v58 }
 0x156   :  { %v6392_v61 = vcombine.high %v498_v55, %v502_v56  ;;  %v378_v62 = vld [vmem:[#allocation5 + $0x3c0] sm:$0xff]  ;;  %2632 = vmatprep.subr.bf16.mxu1 %v6264_v60  ;;  %v6391_v4 = vcombine.low %v498_v55, %v502_v56  ;;  %v303_v60 = vld [vmem:[#allocation5 + $0x168] sm:$0xff] }
 0x157   :  { %v382_v63 = vld [vmem:[#allocation5 + $0x3e0] sm:$0xff]  ;;  %2633 = vmatpush1.bf16.msra.mxu1 %v6263_v3  ;;  %v307_v3 = vld [vmem:[#allocation5 + $0x188] sm:$0xff] }
 0x158   :  { %v506_v0 = vld [vmem:[#allocation5 + $0x7c0] sm:$0xff]  ;;  %v6272_v5 = vcombine.high %v378_v62, %v382_v63  ;;  %2675 = vmatprep.subr.bf16.mxu0 %v6392_v61  ;;  %v6271_v11 = vcombine.low %v378_v62, %v382_v63  ;;  %v6185_v61 = vcombine.low %v291_v49, %v295_v51  ;;  %v6194_v63 = vcombine.high %v299_v57, %v303_v60 }
 0x159   :  { %v510_v2 = vld [vmem:[#allocation5 + $0x7e0] sm:$0xff]  ;;  %2676 = vmatpush1.bf16.msra.mxu0 %v6391_v4 }
 0x15a   :  { %v6400_v6 = vcombine.high %v506_v0, %v510_v2  ;;  %v514_v9 = vld [vmem:[#allocation5 + $0x800] sm:$0xff]  ;;  %2634 = vmatprep.subr.bf16.mxu1 %v6272_v5  ;;  %v6399_v14 = vcombine.low %v506_v0, %v510_v2  ;;  %v311_v5 = vld [vmem:[#allocation5 + $0x1a8] sm:$0xff] }
 0x15b   :  { %v518_v10 = vld [vmem:[#allocation5 + $0x820] sm:$0xff]  ;;  %2635 = vmatpush1.bf16.msra.mxu1 %v6271_v11  ;;  %v6202_v8 = vcombine.high %v307_v3, %v311_v5  ;;  %v315_v11 = vld [vmem:[#allocation5 + $0x1c8] sm:$0xff] }
 0x15c   :  { %v240_v12 = vld [vmem:[#allocation3] sm:$0xff]  ;;  %2677 = vmatprep.subr.bf16.mxu0 %v6400_v6  ;;  %v6408_v18 = vcombine.high %v514_v9, %v518_v10  ;;  %v6407_v28 = vcombine.low %v514_v9, %v518_v10  ;;  %2733 = vmatprep.subr.bf16.mxu1 %v6154_v15  ;;  %v6193_v6 = vcombine.low %v299_v57, %v303_v60 }
 0x15d   :  { %v248_v17 = vld [vmem:[#allocation3 + $0x40] sm:$0xff]  ;;  %v8163_v22 = vpack.c.bf16 %v246_v13, %v240_v12  ;;  %2678 = vmatpush1.bf16.msra.mxu0 %v6399_v14  ;;  %v319_v13 = vld [vmem:[#allocation5 + $0x1e8] sm:$0xff]  ;;  %v6201_v14 = vcombine.low %v307_v3, %v311_v5 }
 0x15e   :  { %v522_v19 = vld [vmem:[#allocation5 + $0x840] sm:$0xff]  ;;  %v8165_v27 = vpack.c.bf16 %v248_v17, %v242_v16  ;;  %2690 = vmatprep.subr.bf16.mxu0 %v6408_v18  ;;  %v6210_v16 = vcombine.high %v315_v11, %v319_v13 }
 0x15f   :  { %v526_v23 = vld [vmem:[#allocation5 + $0x860] sm:$0xff]  ;;  %2637 = vmatmul.mubr.bf16.vlgmr.msra.gmra.mrb[0].mxu1 %v8163_v22 }
 0x160   :  { %v6416_v30 = vcombine.high %v522_v19, %v526_v23  ;;  %v530_v34 = vld [vmem:[#allocation5 + $0x880] sm:$0xff]  ;;  %2680 = vmatmul.mubr.bf16.vlgmr.msra.gmra.mrb[0].mxu0 %v8165_v27  ;;  %2734 = vmatpush1.bf16.msra.mxu1 %v6153_v26  ;;  %v6415_v37 = vcombine.low %v522_v19, %v526_v23  ;;  %v323_v19 = vld [vmem:[#allocation5 + $0x208] sm:$0xff]  ;;  %v6209_v23 = vcombine.low %v315_v11, %v319_v13 }
 0x161   :  { %v534_v35 = vld [vmem:[#allocation5 + $0x8a0] sm:$0xff]  ;;  %2691 = vmatpush1.bf16.msra.mxu0 %v6407_v28  ;;  %2735 = vmatprep.subr.bf16.mxu1 %v6162_v29  ;;  %v6218_v25 = vcombine.high %v323_v19, %v327_v21  ;;  %v331_v29 = vld [vmem:[#allocation5 + $0x248] sm:$0xff]  ;;  %v6217_v32 = vcombine.low %v323_v19, %v327_v21 }
 0x162   :  { %v538_v39 = vld [vmem:[#allocation5 + $0x8c0] sm:$0xff]  ;;  %2692 = vmatprep.subr.bf16.mxu0 %v6416_v30  ;;  %v6424_v41 = vcombine.high %v530_v34, %v534_v35  ;;  %2722 = vmatprep.mubr.bf16.mxu0 %v8167_v33  ;;  %v6423_v45 = vcombine.low %v530_v34, %v534_v35  ;;  %v6226_v35 = vcombine.high %v331_v29, %v335_v31 }
 0x163   :  { %v542_v40 = vld [vmem:[#allocation5 + $0x8e0] sm:$0xff]  ;;  %2765 = vmatprep.mubr.bf16.mxu1 %v8157_v59 }
 0x164   :  { %2736 = vmatpush1.bf16.msra.mxu1 %v6161_v36  ;;  %v546_v47 = vld [vmem:[#allocation5 + $0x900] sm:$0xff]  ;;  %v6432_v50 = vcombine.high %v538_v39, %v542_v40  ;;  %v6431_v53 = vcombine.low %v538_v39, %v542_v40  ;;  %v343_v40 = vld [vmem:[#allocation5 + $0x2a8] sm:$0xff] }
 0x165   :  { %2693 = vmatpush1.bf16.msra.mxu0 %v6415_v37  ;;  %2737 = vmatprep.subr.bf16.mxu1 %v6170_v38  ;;  %v550_v48 = vld [vmem:[#allocation5 + $0x920] sm:$0xff]  ;;  %v339_v38 = vld [vmem:[#allocation5 + $0x288] sm:$0xff] }
 0x166   :  { %2694 = vmatprep.subr.bf16.mxu0 %v6424_v41  ;;  %v554_v55 = vld [vmem:[#allocation5 + $0x940] sm:$0xff]  ;;  %v6440_v58 = vcombine.high %v546_v47, %v550_v48  ;;  %v6439_v62 = vcombine.low %v546_v47, %v550_v48  ;;  %v6225_v41 = vcombine.low %v331_v29, %v335_v31  ;;  %v6234_v43 = vcombine.high %v339_v38, %v343_v40  ;;  %v351_v48 = vld [vmem:[#allocation5 + $0x2e8] sm:$0xff] }
 0x167   :  { %v558_v56 = vld [vmem:[#allocation5 + $0x960] sm:$0xff]  ;;  %v6233_v49 = vcombine.low %v339_v38, %v343_v40 }
 0x168   :  { %2738 = vmatpush1.bf16.msra.mxu1 %v6169_v44  ;;  %v562_v0 = vld [vmem:[#allocation5 + $0x980] sm:$0xff]  ;;  %v6448_v4 = vcombine.high %v554_v55, %v558_v56  ;;  %v6447_v7 = vcombine.low %v554_v55, %v558_v56  ;;  %v359_v56 = vld [vmem:[#allocation5 + $0x328] sm:$0xff] }
 0x169   :  { %2695 = vmatpush1.bf16.msra.mxu0 %v6423_v45  ;;  %2739 = vmatprep.subr.bf16.mxu1 %v6178_v46  ;;  %v566_v2 = vld [vmem:[#allocation5 + $0x9a0] sm:$0xff]  ;;  %v347_v46 = vld [vmem:[#allocation5 + $0x2c8] sm:$0xff] }
 0x16a   :  { %2696 = vmatprep.subr.bf16.mxu0 %v6432_v50  ;;  %v570_v9 = vld [vmem:[#allocation5 + $0x9c0] sm:$0xff]  ;;  %v6456_v12 = vcombine.high %v562_v0, %v566_v2  ;;  %v6455_v15 = vcombine.low %v562_v0, %v566_v2  ;;  %v6242_v51 = vcombine.high %v347_v46, %v351_v48  ;;  %v6241_v57 = vcombine.low %v347_v46, %v351_v48  ;;  %v367_v2 = vld [vmem:[#allocation5 + $0x368] sm:$0xff]  ;;  %v276_v46 = vld [vmem:[#allocation5 + $0x90] sm:$0xff] }
 0x16b   :  { %v574_v10 = vld [vmem:[#allocation5 + $0x9e0] sm:$0xff]  ;;  %v280_v48 = vld [vmem:[#allocation5 + $0xb0] sm:$0xff] }
 0x16c   :  { %2740 = vmatpush1.bf16.msra.mxu1 %v6177_v52  ;;  %v578_v17 = vld [vmem:[#allocation5 + $0xa00] sm:$0xff]  ;;  %v6464_v20 = vcombine.high %v570_v9, %v574_v10  ;;  %v6463_v24 = vcombine.low %v570_v9, %v574_v10  ;;  %v375_v10 = vld [vmem:[#allocation5 + $0x3a8] sm:$0xff] }
 0x16d   :  { %2697 = vmatpush1.bf16.msra.mxu0 %v6431_v53  ;;  %2741 = vmatprep.subr.bf16.mxu1 %v6186_v54  ;;  %v582_v18 = vld [vmem:[#allocation5 + $0xa20] sm:$0xff]  ;;  %v355_v54 = vld [vmem:[#allocation5 + $0x308] sm:$0xff] }
 0x16e   :  { %2698 = vmatprep.subr.bf16.mxu0 %v6440_v58  ;;  %v586_v26 = vld [vmem:[#allocation5 + $0xa40] sm:$0xff]  ;;  %v6472_v30 = vcombine.high %v578_v17, %v582_v18  ;;  %v6471_v34 = vcombine.low %v578_v17, %v582_v18  ;;  %v6250_v60 = vcombine.high %v355_v54, %v359_v56  ;;  %v6249_v3 = vcombine.low %v355_v54, %v359_v56  ;;  %v383_v18 = vld [vmem:[#allocation5 + $0x3e8] sm:$0xff]  ;;  %v284_v54 = vld [vmem:[#allocation5 + $0xd0] sm:$0xff] }
 0x16f   :  { %v590_v28 = vld [vmem:[#allocation5 + $0xa60] sm:$0xff]  ;;  %v288_v56 = vld [vmem:[#allocation5 + $0xf0] sm:$0xff] }
 0x170   :  { %2742 = vmatpush1.bf16.msra.mxu1 %v6185_v61  ;;  %v594_v36 = vld [vmem:[#allocation5 + $0xa80] sm:$0xff]  ;;  %v6480_v39 = vcombine.high %v586_v26, %v590_v28  ;;  %v6479_v42 = vcombine.low %v586_v26, %v590_v28  ;;  %v264_v28 = vld [vmem:[#allocation5 + $0x30] sm:$0xff] }
 0x171   :  { %2699 = vmatpush1.bf16.msra.mxu0 %v6439_v62  ;;  %2743 = vmatprep.subr.bf16.mxu1 %v6194_v63  ;;  %v598_v37 = vld [vmem:[#allocation5 + $0xaa0] sm:$0xff]  ;;  %v363_v63 = vld [vmem:[#allocation5 + $0x348] sm:$0xff] }
 0x172   :  { %2700 = vmatprep.subr.bf16.mxu0 %v6448_v4  ;;  %v602_v44 = vld [vmem:[#allocation5 + $0xac0] sm:$0xff]  ;;  %v6488_v47 = vcombine.high %v594_v36, %v598_v37  ;;  %v6487_v50 = vcombine.low %v594_v36, %v598_v37  ;;  %v6258_v5 = vcombine.high %v363_v63, %v367_v2  ;;  %v6257_v11 = vcombine.low %v363_v63, %v367_v2  ;;  %v399_v36 = vld [vmem:[#allocation5 + $0x468] sm:$0xff]  ;;  %v268_v37 = vld [vmem:[#allocation5 + $0x50] sm:$0xff] }
 0x173   :  { %v606_v45 = vld [vmem:[#allocation5 + $0xae0] sm:$0xff]  ;;  %v292_v63 = vld [vmem:[#allocation5 + $0x110] sm:$0xff] }
 0x174   :  { %2744 = vmatpush1.bf16.msra.mxu1 %v6193_v6  ;;  %v610_v52 = vld [vmem:[#allocation5 + $0xb00] sm:$0xff]  ;;  %v6496_v55 = vcombine.high %v602_v44, %v606_v45  ;;  %v6495_v58 = vcombine.low %v602_v44, %v606_v45  ;;  %v403_v44 = vld [vmem:[#allocation5 + $0x488] sm:$0xff]  ;;  %v296_v2 = vld [vmem:[#allocation5 + $0x130] sm:$0xff] }
 0x175   :  { %2701 = vmatpush1.bf16.msra.mxu0 %v6447_v7  ;;  %2745 = vmatprep.subr.bf16.mxu1 %v6202_v8  ;;  %v614_v53 = vld [vmem:[#allocation5 + $0xb20] sm:$0xff]  ;;  %v371_v8 = vld [vmem:[#allocation5 + $0x388] sm:$0xff] }
 0x176   :  { %2702 = vmatprep.subr.bf16.mxu0 %v6456_v12  ;;  %v618_v61 = vld [vmem:[#allocation5 + $0xb40] sm:$0xff]  ;;  %v6504_v0 = vcombine.high %v610_v52, %v614_v53  ;;  %v6503_v4 = vcombine.low %v610_v52, %v614_v53  ;;  %v6266_v13 = vcombine.high %v371_v8, %v375_v10  ;;  %v6265_v19 = vcombine.low %v371_v8, %v375_v10  ;;  %v407_v45 = vld [vmem:[#allocation5 + $0x4a8] sm:$0xff]  ;;  %v300_v8 = vld [vmem:[#allocation5 + $0x150] sm:$0xff] }
 0x177   :  { %v622_v62 = vld [vmem:[#allocation5 + $0xb60] sm:$0xff]  ;;  %v411_v52 = vld [vmem:[#allocation5 + $0x4c8] sm:$0xff]  ;;  %v304_v10 = vld [vmem:[#allocation5 + $0x170] sm:$0xff] }
 0x178   :  { %2746 = vmatpush1.bf16.msra.mxu1 %v6201_v14  ;;  %v626_v6 = vld [vmem:[#allocation5 + $0xb80] sm:$0xff]  ;;  %v6512_v9 = vcombine.high %v618_v61, %v622_v62  ;;  %v6511_v12 = vcombine.low %v618_v61, %v622_v62  ;;  %v415_v53 = vld [vmem:[#allocation5 + $0x4e8] sm:$0xff] }
 0x179   :  { %2703 = vmatpush1.bf16.msra.mxu0 %v6455_v15  ;;  %2747 = vmatprep.subr.bf16.mxu1 %v6210_v16  ;;  %v630_v7 = vld [vmem:[#allocation5 + $0xba0] sm:$0xff]  ;;  %v379_v16 = vld [vmem:[#allocation5 + $0x3c8] sm:$0xff] }
 0x17a   :  { %2704 = vmatprep.subr.bf16.mxu0 %v6464_v20  ;;  %v634_v14 = vld [vmem:[#allocation5 + $0xbc0] sm:$0xff]  ;;  %v6520_v17 = vcombine.high %v626_v6, %v630_v7  ;;  %v6519_v20 = vcombine.low %v626_v6, %v630_v7  ;;  %v6274_v21 = vcombine.high %v379_v16, %v383_v18  ;;  %v6273_v31 = vcombine.low %v379_v16, %v383_v18  ;;  %v419_v61 = vld [vmem:[#allocation5 + $0x508] sm:$0xff]  ;;  %v308_v16 = vld [vmem:[#allocation5 + $0x190] sm:$0xff] }
 0x17b   :  { %v638_v15 = vld [vmem:[#allocation5 + $0xbe0] sm:$0xff]  ;;  %v423_v62 = vld [vmem:[#allocation5 + $0x528] sm:$0xff]  ;;  %v312_v18 = vld [vmem:[#allocation5 + $0x1b0] sm:$0xff] }
 0x17c   :  { %2748 = vmatpush1.bf16.msra.mxu1 %v6209_v23  ;;  %v387_v23 = vld [vmem:[#allocation5 + $0x408] sm:$0xff]  ;;  %v6528_v26 = vcombine.high %v634_v14, %v638_v15  ;;  %v244_v29 = vld [vmem:[#allocation3 + $0x20] sm:$0xff] }
 0x17d   :  { %2705 = vmatpush1.bf16.msra.mxu0 %v6463_v24  ;;  %2749 = vmatprep.subr.bf16.mxu1 %v6218_v25  ;;  %v391_v24 = vld [vmem:[#allocation5 + $0x428] sm:$0xff]  ;;  %v260_v25 = vld [vmem:[#allocation5 + $0x10] sm:$0xff] }
 0x17e   :  { %2706 = vmatprep.subr.bf16.mxu0 %v6472_v30  ;;  %v250_v30 = vld [vmem:[#allocation3 + $0x50] sm:$0xff]  ;;  %v6156_v38 = vcombine.high %v260_v25, %v264_v28  ;;  %v427_v6 = vld [vmem:[#allocation5 + $0x548] sm:$0xff] }
 0x17f   :  { %v8173_v40 = vpack.c.bf16 %v250_v30, %v244_v29  ;;  %v431_v7 = vld [vmem:[#allocation5 + $0x568] sm:$0xff]  ;;  %v6203_v30 = vcombine.low %v308_v16, %v312_v18 }
 0x180   :  { %2750 = vmatpush1.bf16.msra.mxu1 %v6217_v32  ;;  %v6527_v32 = vcombine.low %v634_v14, %v638_v15  ;;  %v435_v14 = vld [vmem:[#allocation5 + $0x588] sm:$0xff] }
 0x181   :  { %2707 = vmatpush1.bf16.msra.mxu0 %v6471_v34  ;;  %2751 = vmatprep.subr.bf16.mxu1 %v6226_v35  ;;  %v6282_v34 = vcombine.high %v387_v23, %v391_v24  ;;  %v395_v35 = vld [vmem:[#allocation5 + $0x448] sm:$0xff] }
 0x182   :  { %2708 = vmatprep.subr.bf16.mxu0 %v6480_v39  ;;  %v272_v39 = vld [vmem:[#allocation5 + $0x70] sm:$0xff]  ;;  %v439_v15 = vld [vmem:[#allocation5 + $0x5a8] sm:$0xff] }
 0x183   :  { %v6329_v29 = vcombine.low %v435_v14, %v439_v15 }
 0x184   :  { %2752 = vmatpush1.bf16.msra.mxu1 %v6225_v41  ;;  %v6281_v41 = vcombine.low %v387_v23, %v391_v24  ;;  %v443_v23 = vld [vmem:[#allocation5 + $0x5c8] sm:$0xff] }
 0x185   :  { %2709 = vmatpush1.bf16.msra.mxu0 %v6479_v42  ;;  %2753 = vmatprep.subr.bf16.mxu1 %v6234_v43  ;;  %v6155_v42 = vcombine.low %v260_v25, %v264_v28  ;;  %v6290_v43 = vcombine.high %v395_v35, %v399_v36  ;;  %v447_v24 = vld [vmem:[#allocation5 + $0x5e8] sm:$0xff]  ;;  %v6204_v25 = vcombine.high %v308_v16, %v312_v18  ;;  %v320_v28 = vld [vmem:[#allocation5 + $0x1f0] sm:$0xff] }
 0x186   :  { %2710 = vmatprep.subr.bf16.mxu0 %v6488_v47  ;;  %v6164_v47 = vcombine.high %v268_v37, %v272_v39  ;;  %v368_v16 = vld [vmem:[#allocation5 + $0x370] sm:$0xff] }
 0x188   :  { %2754 = vmatpush1.bf16.msra.mxu1 %v6233_v49  ;;  %v6289_v49 = vcombine.low %v395_v35, %v399_v36  ;;  %v324_v35 = vld [vmem:[#allocation5 + $0x210] sm:$0xff] }
 0x189   :  { %2711 = vmatpush1.bf16.msra.mxu0 %v6487_v50  ;;  %2755 = vmatprep.subr.bf16.mxu1 %v6242_v51  ;;  %v6163_v50 = vcombine.low %v268_v37, %v272_v39  ;;  %v6298_v51 = vcombine.high %v403_v44, %v407_v45  ;;  %v328_v37 = vld [vmem:[#allocation5 + $0x230] sm:$0xff] }
 0x18a   :  { %2712 = vmatprep.subr.bf16.mxu0 %v6496_v55  ;;  %v6172_v55 = vcombine.high %v276_v46, %v280_v48 }
 0x18c   :  { %2756 = vmatpush1.bf16.msra.mxu1 %v6241_v57  ;;  %v6297_v57 = vcombine.low %v403_v44, %v407_v45  ;;  %v332_v44 = vld [vmem:[#allocation5 + $0x250] sm:$0xff]  ;;  %v6220_v45 = vcombine.high %v324_v35, %v328_v37 }
 0x18d   :  { %2713 = vmatpush1.bf16.msra.mxu0 %v6495_v58  ;;  %2757 = vmatprep.subr.bf16.mxu1 %v6250_v60  ;;  %v6171_v58 = vcombine.low %v276_v46, %v280_v48  ;;  %v6306_v60 = vcombine.high %v411_v52, %v415_v53  ;;  %v336_v46 = vld [vmem:[#allocation5 + $0x270] sm:$0xff]  ;;  %v6219_v48 = vcombine.low %v324_v35, %v328_v37 }
 0x18e   :  { %2714 = vmatprep.subr.bf16.mxu0 %v6504_v0  ;;  %v6180_v0 = vcombine.high %v284_v54, %v288_v56  ;;  %v384_v35 = vld [vmem:[#allocation5 + $0x3f0] sm:$0xff] }
 0x190   :  { %2758 = vmatpush1.bf16.msra.mxu1 %v6249_v3  ;;  %v6305_v3 = vcombine.low %v411_v52, %v415_v53  ;;  %v340_v52 = vld [vmem:[#allocation5 + $0x290] sm:$0xff]  ;;  %v6228_v53 = vcombine.high %v332_v44, %v336_v46 }
 0x191   :  { %2715 = vmatpush1.bf16.msra.mxu0 %v6503_v4  ;;  %2759 = vmatprep.subr.bf16.mxu1 %v6258_v5  ;;  %v6179_v4 = vcombine.low %v284_v54, %v288_v56  ;;  %v6314_v5 = vcombine.high %v419_v61, %v423_v62  ;;  %v344_v54 = vld [vmem:[#allocation5 + $0x2b0] sm:$0xff]  ;;  %v6227_v56 = vcombine.low %v332_v44, %v336_v46 }
 0x192   :  { %2716 = vmatprep.subr.bf16.mxu0 %v6512_v9  ;;  %v6188_v9 = vcombine.high %v292_v63, %v296_v2  ;;  %v392_v44 = vld [vmem:[#allocation5 + $0x430] sm:$0xff] }
 0x194   :  { %2760 = vmatpush1.bf16.msra.mxu1 %v6257_v11  ;;  %v6313_v11 = vcombine.low %v419_v61, %v423_v62  ;;  %v348_v61 = vld [vmem:[#allocation5 + $0x2d0] sm:$0xff]  ;;  %v6236_v62 = vcombine.high %v340_v52, %v344_v54 }
 0x195   :  { %2717 = vmatpush1.bf16.msra.mxu0 %v6511_v12  ;;  %2761 = vmatprep.subr.bf16.mxu1 %v6266_v13  ;;  %v6187_v12 = vcombine.low %v292_v63, %v296_v2  ;;  %v6322_v13 = vcombine.high %v427_v6, %v431_v7  ;;  %v352_v63 = vld [vmem:[#allocation5 + $0x2f0] sm:$0xff]  ;;  %v6235_v2 = vcombine.low %v340_v52, %v344_v54  ;;  %v531_v54 = vld [vmem:[#allocation5 + $0x888] sm:$0xff] }
 0x196   :  { %2718 = vmatprep.subr.bf16.mxu0 %v6520_v17  ;;  %v6196_v17 = vcombine.high %v300_v8, %v304_v10  ;;  %v400_v52 = vld [vmem:[#allocation5 + $0x470] sm:$0xff] }
 0x198   :  { %2762 = vmatpush1.bf16.msra.mxu1 %v6265_v19  ;;  %v6321_v19 = vcombine.low %v427_v6, %v431_v7  ;;  %v356_v6 = vld [vmem:[#allocation5 + $0x310] sm:$0xff]  ;;  %v6244_v7 = vcombine.high %v348_v61, %v352_v63 }
 0x199   :  { %2719 = vmatpush1.bf16.msra.mxu0 %v6519_v20  ;;  %2763 = vmatprep.subr.bf16.mxu1 %v6274_v21  ;;  %v6195_v20 = vcombine.low %v300_v8, %v304_v10  ;;  %v6330_v21 = vcombine.high %v435_v14, %v439_v15  ;;  %v360_v8 = vld [vmem:[#allocation5 + $0x330] sm:$0xff]  ;;  %v6243_v10 = vcombine.low %v348_v61, %v352_v63  ;;  %v539_v63 = vld [vmem:[#allocation5 + $0x8c8] sm:$0xff] }
 0x19a   :  { %2720 = vmatprep.subr.bf16.mxu0 %v6528_v26  ;;  %v316_v26 = vld [vmem:[#allocation5 + $0x1d0] sm:$0xff]  ;;  %v6252_v15 = vcombine.high %v356_v6, %v360_v8  ;;  %v6251_v18 = vcombine.low %v356_v6, %v360_v8  ;;  %v547_v8 = vld [vmem:[#allocation5 + $0x908] sm:$0xff] }
 0x19b   :  { %v6212_v36 = vcombine.high %v316_v26, %v320_v28  ;;  %v6211_v39 = vcombine.low %v316_v26, %v320_v28  ;;  %v364_v14 = vld [vmem:[#allocation5 + $0x350] sm:$0xff] }
 0x19c   :  { %2764 = vmatpush1.bf16.msra.mxu1 %v6273_v31  ;;  %v6338_v31 = vcombine.high %v443_v23, %v447_v24  ;;  %v6259_v28 = vcombine.low %v364_v14, %v368_v16 }
 0x19d   :  { %2721 = vmatpush1.bf16.msra.mxu0 %v6527_v32  ;;  %2776 = vmatprep.subr.bf16.mxu1 %v6282_v34  ;;  %v451_v32 = vld [vmem:[#allocation5 + $0x608] sm:$0xff] }
 0x19e   :  { %2862 = vmatprep.subr.bf16.mxu0 %v6156_v38  ;;  %v455_v34 = vld [vmem:[#allocation5 + $0x628] sm:$0xff]  ;;  %v6337_v38 = vcombine.low %v443_v23, %v447_v24  ;;  %v372_v23 = vld [vmem:[#allocation5 + $0x390] sm:$0xff]  ;;  %v6260_v24 = vcombine.high %v364_v14, %v368_v16 }
 0x19f   :  { %2766 = vmatmul.mubr.bf16.vlgmr.msra.gmra.mrb[4].mxu1 %v8163_v22  ;;  %v555_v16 = vld [vmem:[#allocation5 + $0x948] sm:$0xff] }
 0x1a0   :  { %2723 = vmatmul.mubr.bf16.vlgmr.msra.gmra.mrb[0].mxu0 %v8173_v40  ;;  %2777 = vmatpush1.bf16.msra.mxu1 %v6281_v41  ;;  %v6346_v41 = vcombine.high %v451_v32, %v455_v34 }
 0x1a1   :  { %2863 = vmatpush1.bf16.msra.mxu0 %v6155_v42  ;;  %2778 = vmatprep.subr.bf16.mxu1 %v6290_v43  ;;  %v459_v42 = vld [vmem:[#allocation5 + $0x648] sm:$0xff] }
 0x1a2   :  { %2864 = vmatprep.subr.bf16.mxu0 %v6164_v47  ;;  %2808 = vmatprep.mubr.bf16.mxu1 %v8160_v1  ;;  %v463_v43 = vld [vmem:[#allocation5 + $0x668] sm:$0xff]  ;;  %v6345_v47 = vcombine.low %v451_v32, %v455_v34  ;;  %v380_v32 = vld [vmem:[#allocation5 + $0x3d0] sm:$0xff] }
 0x1a3   :  { %2894 = vmatprep.mubr.bf16.mxu0 %v8157_v59  ;;  %v6275_v46 = vcombine.low %v380_v32, %v384_v35 }
 0x1a4   :  { %2779 = vmatpush1.bf16.msra.mxu1 %v6289_v49  ;;  %v6354_v49 = vcombine.high %v459_v42, %v463_v43 }
 0x1a5   :  { %2865 = vmatpush1.bf16.msra.mxu0 %v6163_v50  ;;  %2780 = vmatprep.subr.bf16.mxu1 %v6298_v51  ;;  %v467_v50 = vld [vmem:[#allocation5 + $0x688] sm:$0xff] }
 0x1a6   :  { %2866 = vmatprep.subr.bf16.mxu0 %v6172_v55  ;;  %v471_v51 = vld [vmem:[#allocation5 + $0x6a8] sm:$0xff]  ;;  %v6353_v55 = vcombine.low %v459_v42, %v463_v43  ;;  %v388_v42 = vld [vmem:[#allocation5 + $0x410] sm:$0xff]  ;;  %v6276_v43 = vcombine.high %v380_v32, %v384_v35 }
 0x1a7   :  { %v571_v35 = vld [vmem:[#allocation5 + $0x9c8] sm:$0xff] }
 0x1a8   :  { %2781 = vmatpush1.bf16.msra.mxu1 %v6297_v57  ;;  %v6362_v57 = vcombine.high %v467_v50, %v471_v51 }
 0x1a9   :  { %2867 = vmatpush1.bf16.msra.mxu0 %v6171_v58  ;;  %2782 = vmatprep.subr.bf16.mxu1 %v6306_v60  ;;  %v475_v58 = vld [vmem:[#allocation5 + $0x6c8] sm:$0xff] }
 0x1aa   :  { %2868 = vmatprep.subr.bf16.mxu0 %v6180_v0  ;;  %v479_v60 = vld [vmem:[#allocation5 + $0x6e8] sm:$0xff]  ;;  %v6361_v0 = vcombine.low %v467_v50, %v471_v51  ;;  %v396_v50 = vld [vmem:[#allocation5 + $0x450] sm:$0xff]  ;;  %v6284_v51 = vcombine.high %v388_v42, %v392_v44 }
 0x1ab   :  { %v6292_v61 = vcombine.high %v396_v50, %v400_v52 }
 0x1ac   :  { %2783 = vmatpush1.bf16.msra.mxu1 %v6305_v3  ;;  %v6370_v3 = vcombine.high %v475_v58, %v479_v60 }
 0x1ad   :  { %2869 = vmatpush1.bf16.msra.mxu0 %v6179_v4  ;;  %2784 = vmatprep.subr.bf16.mxu1 %v6314_v5  ;;  %v483_v4 = vld [vmem:[#allocation5 + $0x708] sm:$0xff] }
 0x1ae   :  { %2870 = vmatprep.subr.bf16.mxu0 %v6188_v9  ;;  %v487_v5 = vld [vmem:[#allocation5 + $0x728] sm:$0xff]  ;;  %v6369_v9 = vcombine.low %v475_v58, %v479_v60  ;;  %v404_v58 = vld [vmem:[#allocation5 + $0x490] sm:$0xff] }
 0x1af   :  { %v408_v60 = vld [vmem:[#allocation5 + $0x4b0] sm:$0xff] }
 0x1b0   :  { %2785 = vmatpush1.bf16.msra.mxu1 %v6313_v11  ;;  %v6378_v11 = vcombine.high %v483_v4, %v487_v5  ;;  %v6300_v6 = vcombine.high %v404_v58, %v408_v60 }
 0x1b1   :  { %2871 = vmatpush1.bf16.msra.mxu0 %v6187_v12  ;;  %2786 = vmatprep.subr.bf16.mxu1 %v6322_v13  ;;  %v491_v12 = vld [vmem:[#allocation5 + $0x748] sm:$0xff] }
 0x1b2   :  { %2872 = vmatprep.subr.bf16.mxu0 %v6196_v17  ;;  %v495_v13 = vld [vmem:[#allocation5 + $0x768] sm:$0xff]  ;;  %v6377_v17 = vcombine.low %v483_v4, %v487_v5  ;;  %v412_v4 = vld [vmem:[#allocation5 + $0x4d0] sm:$0xff] }
 0x1b3   :  { %v6385_v26 = vcombine.low %v491_v12, %v495_v13  ;;  %v416_v5 = vld [vmem:[#allocation5 + $0x4f0] sm:$0xff] }
 0x1b4   :  { %2787 = vmatpush1.bf16.msra.mxu1 %v6321_v19  ;;  %v6386_v19 = vcombine.high %v491_v12, %v495_v13  ;;  %v420_v12 = vld [vmem:[#allocation5 + $0x510] sm:$0xff]  ;;  %v6308_v14 = vcombine.high %v412_v4, %v416_v5 }
 0x1b5   :  { %2873 = vmatpush1.bf16.msra.mxu0 %v6195_v20  ;;  %2788 = vmatprep.subr.bf16.mxu1 %v6330_v21  ;;  %v499_v20 = vld [vmem:[#allocation5 + $0x788] sm:$0xff]  ;;  %v424_v13 = vld [vmem:[#allocation5 + $0x530] sm:$0xff] }
 0x1b6   :  { %2874 = vmatprep.subr.bf16.mxu0 %v6204_v25  ;;  %v503_v21 = vld [vmem:[#allocation5 + $0x7a8] sm:$0xff]  ;;  %v376_v25 = vld [vmem:[#allocation5 + $0x3b0] sm:$0xff] }
 0x1b7   :  { %v6268_v34 = vcombine.high %v372_v23, %v376_v25  ;;  %v6267_v37 = vcombine.low %v372_v23, %v376_v25  ;;  %v6316_v23 = vcombine.high %v420_v12, %v424_v13  ;;  %v563_v25 = vld [vmem:[#allocation5 + $0x988] sm:$0xff] }
 0x1b8   :  { %2789 = vmatpush1.bf16.msra.mxu1 %v6329_v29  ;;  %v6394_v29 = vcombine.high %v499_v20, %v503_v21 }
 0x1b9   :  { %2875 = vmatpush1.bf16.msra.mxu0 %v6203_v30  ;;  %2790 = vmatprep.subr.bf16.mxu1 %v6338_v31  ;;  %v507_v30 = vld [vmem:[#allocation5 + $0x7c8] sm:$0xff] }
 0x1ba   :  { %2876 = vmatprep.subr.bf16.mxu0 %v6212_v36  ;;  %v511_v31 = vld [vmem:[#allocation5 + $0x7e8] sm:$0xff]  ;;  %v6393_v36 = vcombine.low %v499_v20, %v503_v21  ;;  %v428_v20 = vld [vmem:[#allocation5 + $0x550] sm:$0xff] }
 0x1bb   :  { %v432_v21 = vld [vmem:[#allocation5 + $0x570] sm:$0xff] }
 0x1bc   :  { %2791 = vmatpush1.bf16.msra.mxu1 %v6337_v38  ;;  %v6402_v38 = vcombine.high %v507_v30, %v511_v31  ;;  %v6324_v32 = vcombine.high %v428_v20, %v432_v21 }
 0x1bd   :  { %2877 = vmatpush1.bf16.msra.mxu0 %v6211_v39  ;;  %2792 = vmatprep.subr.bf16.mxu1 %v6346_v41  ;;  %v515_v39 = vld [vmem:[#allocation5 + $0x808] sm:$0xff] }
 0x1be   :  { %2878 = vmatprep.subr.bf16.mxu0 %v6220_v45  ;;  %v519_v41 = vld [vmem:[#allocation5 + $0x828] sm:$0xff]  ;;  %v6401_v45 = vcombine.low %v507_v30, %v511_v31  ;;  %v436_v30 = vld [vmem:[#allocation5 + $0x590] sm:$0xff] }
 0x1bf   :  { %v440_v31 = vld [vmem:[#allocation5 + $0x5b0] sm:$0xff] }
 0x1c0   :  { %2793 = vmatpush1.bf16.msra.mxu1 %v6345_v47  ;;  %v6410_v47 = vcombine.high %v515_v39, %v519_v41 }
 0x1c1   :  { %2879 = vmatpush1.bf16.msra.mxu0 %v6219_v48  ;;  %2794 = vmatprep.subr.bf16.mxu1 %v6354_v49  ;;  %v523_v48 = vld [vmem:[#allocation5 + $0x848] sm:$0xff] }
 0x1c2   :  { %2880 = vmatprep.subr.bf16.mxu0 %v6228_v53  ;;  %v527_v49 = vld [vmem:[#allocation5 + $0x868] sm:$0xff]  ;;  %v6409_v53 = vcombine.low %v515_v39, %v519_v41  ;;  %v444_v39 = vld [vmem:[#allocation5 + $0x5d0] sm:$0xff] }
 0x1c3   :  { %v448_v41 = vld [vmem:[#allocation5 + $0x5f0] sm:$0xff] }
 0x1c4   :  { %2795 = vmatpush1.bf16.msra.mxu1 %v6353_v55  ;;  %v535_v55 = vld [vmem:[#allocation5 + $0x8a8] sm:$0xff] }
 0x1c5   :  { %2881 = vmatpush1.bf16.msra.mxu0 %v6227_v56  ;;  %2796 = vmatprep.subr.bf16.mxu1 %v6362_v57  ;;  %v6283_v56 = vcombine.low %v388_v42, %v392_v44  ;;  %v6418_v57 = vcombine.high %v523_v48, %v527_v49  ;;  %v6332_v42 = vcombine.high %v436_v30, %v440_v31  ;;  %v579_v44 = vld [vmem:[#allocation5 + $0xa08] sm:$0xff] }
 0x1c6   :  { %2882 = vmatprep.subr.bf16.mxu0 %v6236_v62  ;;  %v6417_v62 = vcombine.low %v523_v48, %v527_v49  ;;  %v452_v48 = vld [vmem:[#allocation5 + $0x610] sm:$0xff] }
 0x1c7   :  { %v456_v49 = vld [vmem:[#allocation5 + $0x630] sm:$0xff] }
 0x1c8   :  { %2797 = vmatpush1.bf16.msra.mxu1 %v6361_v0  ;;  %v543_v0 = vld [vmem:[#allocation5 + $0x8e8] sm:$0xff] }
 0x1c9   :  { %2883 = vmatpush1.bf16.msra.mxu0 %v6235_v2  ;;  %2798 = vmatprep.subr.bf16.mxu1 %v6370_v3  ;;  %v6291_v2 = vcombine.low %v396_v50, %v400_v52  ;;  %v6426_v3 = vcombine.high %v531_v54, %v535_v55  ;;  %v6340_v50 = vcombine.high %v444_v39, %v448_v41  ;;  %v587_v52 = vld [vmem:[#allocation5 + $0xa48] sm:$0xff] }
 0x1ca   :  { %2884 = vmatprep.subr.bf16.mxu0 %v6244_v7  ;;  %v6425_v7 = vcombine.low %v531_v54, %v535_v55  ;;  %v6339_v54 = vcombine.low %v444_v39, %v448_v41  ;;  %v504_v39 = vld [vmem:[#allocation5 + $0x7b0] sm:$0xff] }
 0x1cc   :  { %2799 = vmatpush1.bf16.msra.mxu1 %v6369_v9  ;;  %v551_v9 = vld [vmem:[#allocation5 + $0x928] sm:$0xff] }
 0x1cd   :  { %2885 = vmatpush1.bf16.msra.mxu0 %v6243_v10  ;;  %2800 = vmatprep.subr.bf16.mxu1 %v6378_v11  ;;  %v6299_v10 = vcombine.low %v404_v58, %v408_v60  ;;  %v6434_v11 = vcombine.high %v539_v63, %v543_v0  ;;  %v6348_v58 = vcombine.high %v452_v48, %v456_v49 }
 0x1ce   :  { %2886 = vmatprep.subr.bf16.mxu0 %v6252_v15  ;;  %v6433_v15 = vcombine.low %v539_v63, %v543_v0  ;;  %v6347_v63 = vcombine.low %v452_v48, %v456_v49  ;;  %v512_v48 = vld [vmem:[#allocation5 + $0x7f0] sm:$0xff] }
 0x1d0   :  { %2801 = vmatpush1.bf16.msra.mxu1 %v6377_v17  ;;  %v559_v17 = vld [vmem:[#allocation5 + $0x968] sm:$0xff] }
 0x1d1   :  { %2887 = vmatpush1.bf16.msra.mxu0 %v6251_v18  ;;  %2802 = vmatprep.subr.bf16.mxu1 %v6386_v19  ;;  %v6307_v18 = vcombine.low %v412_v4, %v416_v5  ;;  %v6442_v19 = vcombine.high %v547_v8, %v551_v9 }
 0x1d2   :  { %2888 = vmatprep.subr.bf16.mxu0 %v6260_v24  ;;  %v6441_v24 = vcombine.low %v547_v8, %v551_v9 }
 0x1d4   :  { %2803 = vmatpush1.bf16.msra.mxu1 %v6385_v26  ;;  %v567_v26 = vld [vmem:[#allocation5 + $0x9a8] sm:$0xff] }
 0x1d5   :  { %2889 = vmatpush1.bf16.msra.mxu0 %v6259_v28  ;;  %2804 = vmatprep.subr.bf16.mxu1 %v6394_v29  ;;  %v6315_v28 = vcombine.low %v420_v12, %v424_v13  ;;  %v6450_v29 = vcombine.high %v555_v16, %v559_v17 }
 0x1d6   :  { %2890 = vmatprep.subr.bf16.mxu0 %v6268_v34  ;;  %v6449_v34 = vcombine.low %v555_v16, %v559_v17 }
 0x1d8   :  { %2805 = vmatpush1.bf16.msra.mxu1 %v6393_v36  ;;  %v575_v36 = vld [vmem:[#allocation5 + $0x9e8] sm:$0xff] }
 0x1d9   :  { %2891 = vmatpush1.bf16.msra.mxu0 %v6267_v37  ;;  %2806 = vmatprep.subr.bf16.mxu1 %v6402_v38  ;;  %v6323_v37 = vcombine.low %v428_v20, %v432_v21  ;;  %v6458_v38 = vcombine.high %v563_v25, %v567_v26  ;;  %v488_v20 = vld [vmem:[#allocation5 + $0x730] sm:$0xff] }
 0x1da   :  { %2892 = vmatprep.subr.bf16.mxu0 %v6276_v43  ;;  %v6457_v43 = vcombine.low %v563_v25, %v567_v26  ;;  %v619_v26 = vld [vmem:[#allocation5 + $0xb48] sm:$0xff] }
 0x1dc   :  { %2807 = vmatpush1.bf16.msra.mxu1 %v6401_v45  ;;  %v583_v45 = vld [vmem:[#allocation5 + $0xa28] sm:$0xff] }
 0x1dd   :  { %2893 = vmatpush1.bf16.msra.mxu0 %v6275_v46  ;;  %2819 = vmatprep.subr.bf16.mxu1 %v6410_v47  ;;  %v6331_v46 = vcombine.low %v436_v30, %v440_v31  ;;  %v6466_v47 = vcombine.high %v571_v35, %v575_v36  ;;  %v6474_v55 = vcombine.high %v579_v44, %v583_v45  ;;  %v496_v30 = vld [vmem:[#allocation5 + $0x770] sm:$0xff] }
 0x1de   :  { %2905 = vmatprep.subr.bf16.mxu0 %v6284_v51  ;;  %v6465_v51 = vcombine.low %v571_v35, %v575_v36  ;;  %v6473_v60 = vcombine.low %v579_v44, %v583_v45  ;;  %v627_v36 = vld [vmem:[#allocation5 + $0xb88] sm:$0xff] }
 0x1df   :  { %2809 = vmatmul.mubr.bf16.vlgmr.msra.gmra.mrb[4].mxu1 %v8165_v27  ;;  %v635_v45 = vld [vmem:[#allocation5 + $0xbc8] sm:$0xff] }
 0x1e0   :  { %2820 = vmatpush1.bf16.msra.mxu1 %v6409_v53  ;;  %2895 = vmatmul.mubr.bf16.vlgmr.msra.gmra.mrb[4].mxu0 %v8163_v22  ;;  %v591_v53 = vld [vmem:[#allocation5 + $0xa68] sm:$0xff] }
 0x1e1   :  { %2906 = vmatpush1.bf16.msra.mxu0 %v6283_v56  ;;  %2821 = vmatprep.subr.bf16.mxu1 %v6418_v57  ;;  %v460_v56 = vld [vmem:[#allocation5 + $0x650] sm:$0xff]  ;;  %v6482_v0 = vcombine.high %v587_v52, %v591_v53  ;;  %v6481_v5 = vcombine.low %v587_v52, %v591_v53  ;;  %v261_v53 = vld [vmem:[#allocation5 + $0x18] sm:$0xff] }
 0x1e2   :  { %2907 = vmatprep.subr.bf16.mxu0 %v6292_v61  ;;  %2851 = vmatprep.mubr.bf16.mxu1 %v8167_v33  ;;  %v464_v57 = vld [vmem:[#allocation5 + $0x670] sm:$0xff]  ;;  %v595_v61 = vld [vmem:[#allocation5 + $0xa88] sm:$0xff] }
 0x1e3   :  { %2937 = vmatprep.mubr.bf16.mxu0 %v8160_v1  ;;  %v6356_v4 = vcombine.high %v460_v56, %v464_v57  ;;  %v6355_v8 = vcombine.low %v460_v56, %v464_v57  ;;  %v520_v56 = vld [vmem:[#allocation5 + $0x830] sm:$0xff] }
 0x1e4   :  { %2822 = vmatpush1.bf16.msra.mxu1 %v6417_v62  ;;  %v599_v62 = vld [vmem:[#allocation5 + $0xaa8] sm:$0xff] }
 0x1e5   :  { %2908 = vmatpush1.bf16.msra.mxu0 %v6291_v2  ;;  %2823 = vmatprep.subr.bf16.mxu1 %v6426_v3  ;;  %v468_v2 = vld [vmem:[#allocation5 + $0x690] sm:$0xff]  ;;  %v6490_v9 = vcombine.high %v595_v61, %v599_v62  ;;  %v6489_v13 = vcombine.low %v595_v61, %v599_v62  ;;  %v269_v62 = vld [vmem:[#allocation5 + $0x58] sm:$0xff] }
 0x1e6   :  { %2909 = vmatprep.subr.bf16.mxu0 %v6300_v6  ;;  %v472_v3 = vld [vmem:[#allocation5 + $0x6b0] sm:$0xff]  ;;  %v603_v6 = vld [vmem:[#allocation5 + $0xac8] sm:$0xff] }
 0x1e7   :  { %v6364_v12 = vcombine.high %v468_v2, %v472_v3  ;;  %v6363_v16 = vcombine.low %v468_v2, %v472_v3  ;;  %v528_v2 = vld [vmem:[#allocation5 + $0x870] sm:$0xff] }
 0x1e8   :  { %2824 = vmatpush1.bf16.msra.mxu1 %v6425_v7  ;;  %v607_v7 = vld [vmem:[#allocation5 + $0xae8] sm:$0xff] }
 0x1e9   :  { %2910 = vmatpush1.bf16.msra.mxu0 %v6299_v10  ;;  %2825 = vmatprep.subr.bf16.mxu1 %v6434_v11  ;;  %v476_v10 = vld [vmem:[#allocation5 + $0x6d0] sm:$0xff]  ;;  %v6498_v17 = vcombine.high %v603_v6, %v607_v7  ;;  %v6497_v21 = vcombine.low %v603_v6, %v607_v7  ;;  %v277_v7 = vld [vmem:[#allocation5 + $0x98] sm:$0xff] }
 0x1ea   :  { %2911 = vmatprep.subr.bf16.mxu0 %v6308_v14  ;;  %v480_v11 = vld [vmem:[#allocation5 + $0x6f0] sm:$0xff]  ;;  %v611_v14 = vld [vmem:[#allocation5 + $0xb08] sm:$0xff] }
 0x1ec   :  { %2826 = vmatpush1.bf16.msra.mxu1 %v6433_v15  ;;  %v615_v15 = vld [vmem:[#allocation5 + $0xb28] sm:$0xff] }
 0x1ed   :  { %2912 = vmatpush1.bf16.msra.mxu0 %v6307_v18  ;;  %2827 = vmatprep.subr.bf16.mxu1 %v6442_v19  ;;  %v484_v18 = vld [vmem:[#allocation5 + $0x710] sm:$0xff]  ;;  %v6372_v19 = vcombine.high %v476_v10, %v480_v11  ;;  %v6505_v31 = vcombine.low %v611_v14, %v615_v15 }
 0x1ee   :  { %2913 = vmatprep.subr.bf16.mxu0 %v6316_v23  ;;  %v6371_v23 = vcombine.low %v476_v10, %v480_v11  ;;  %v6380_v25 = vcombine.high %v484_v18, %v488_v20  ;;  %v536_v10 = vld [vmem:[#allocation5 + $0x8b0] sm:$0xff] }
 0x1f0   :  { %2828 = vmatpush1.bf16.msra.mxu1 %v6441_v24  ;;  %v6506_v24 = vcombine.high %v611_v14, %v615_v15  ;;  %v285_v15 = vld [vmem:[#allocation5 + $0xd8] sm:$0xff] }
 0x1f1   :  { %2914 = vmatpush1.bf16.msra.mxu0 %v6315_v28  ;;  %2829 = vmatprep.subr.bf16.mxu1 %v6450_v29  ;;  %v623_v28 = vld [vmem:[#allocation5 + $0xb68] sm:$0xff]  ;;  %v492_v29 = vld [vmem:[#allocation5 + $0x750] sm:$0xff] }
 0x1f2   :  { %2915 = vmatprep.subr.bf16.mxu0 %v6324_v32  ;;  %v6379_v32 = vcombine.low %v484_v18, %v488_v20  ;;  %v6388_v35 = vcombine.high %v492_v29, %v496_v30  ;;  %v6513_v41 = vcombine.low %v619_v26, %v623_v28  ;;  %v544_v18 = vld [vmem:[#allocation5 + $0x8f0] sm:$0xff] }
 0x1f4   :  { %2830 = vmatpush1.bf16.msra.mxu1 %v6449_v34  ;;  %v6514_v34 = vcombine.high %v619_v26, %v623_v28  ;;  %v548_v26 = vld [vmem:[#allocation5 + $0x910] sm:$0xff] }
 0x1f5   :  { %2916 = vmatpush1.bf16.msra.mxu0 %v6323_v37  ;;  %2831 = vmatprep.subr.bf16.mxu1 %v6458_v38  ;;  %v631_v37 = vld [vmem:[#allocation5 + $0xba8] sm:$0xff]  ;;  %v500_v38 = vld [vmem:[#allocation5 + $0x790] sm:$0xff] }
 0x1f6   :  { %2917 = vmatprep.subr.bf16.mxu0 %v6332_v42  ;;  %v6387_v42 = vcombine.low %v492_v29, %v496_v30  ;;  %v6396_v44 = vcombine.high %v500_v38, %v504_v39  ;;  %v6521_v49 = vcombine.low %v627_v36, %v631_v37  ;;  %v552_v28 = vld [vmem:[#allocation5 + $0x930] sm:$0xff] }
 0x1f8   :  { %2832 = vmatpush1.bf16.msra.mxu1 %v6457_v43  ;;  %v6522_v43 = vcombine.high %v627_v36, %v631_v37  ;;  %v560_v36 = vld [vmem:[#allocation5 + $0x970] sm:$0xff] }
 0x1f9   :  { %2918 = vmatpush1.bf16.msra.mxu0 %v6331_v46  ;;  %2833 = vmatprep.subr.bf16.mxu1 %v6466_v47  ;;  %v639_v46 = vld [vmem:[#allocation5 + $0xbe8] sm:$0xff]  ;;  %v508_v47 = vld [vmem:[#allocation5 + $0x7d0] sm:$0xff] }
 0x1fa   :  { %2919 = vmatprep.subr.bf16.mxu0 %v6340_v50  ;;  %v6395_v50 = vcombine.low %v500_v38, %v504_v39  ;;  %v6404_v52 = vcombine.high %v508_v47, %v512_v48  ;;  %v6529_v57 = vcombine.low %v635_v45, %v639_v46  ;;  %v6443_v38 = vcombine.low %v548_v26, %v552_v28 }
 0x1fc   :  { %2834 = vmatpush1.bf16.msra.mxu1 %v6465_v51  ;;  %v6530_v51 = vcombine.high %v635_v45, %v639_v46  ;;  %v568_v45 = vld [vmem:[#allocation5 + $0x9b0] sm:$0xff] }
 0x1fd   :  { %2920 = vmatpush1.bf16.msra.mxu0 %v6339_v54  ;;  %2835 = vmatprep.subr.bf16.mxu1 %v6474_v55  ;;  %v265_v54 = vld [vmem:[#allocation5 + $0x38] sm:$0xff]  ;;  %v516_v55 = vld [vmem:[#allocation5 + $0x810] sm:$0xff] }
 0x1fe   :  { %2921 = vmatprep.subr.bf16.mxu0 %v6348_v58  ;;  %v6403_v58 = vcombine.low %v508_v47, %v512_v48  ;;  %v6412_v61 = vcombine.high %v516_v55, %v520_v56  ;;  %v6157_v3 = vcombine.low %v261_v53, %v265_v54 }
 0x200   :  { %2836 = vmatpush1.bf16.msra.mxu1 %v6473_v60  ;;  %v6158_v60 = vcombine.high %v261_v53, %v265_v54  ;;  %v572_v54 = vld [vmem:[#allocation5 + $0x9d0] sm:$0xff] }
 0x201   :  { %2922 = vmatpush1.bf16.msra.mxu0 %v6347_v63  ;;  %2837 = vmatprep.subr.bf16.mxu1 %v6482_v0  ;;  %v273_v63 = vld [vmem:[#allocation5 + $0x78] sm:$0xff]  ;;  %v524_v0 = vld [vmem:[#allocation5 + $0x850] sm:$0xff] }
 0x202   :  { %2923 = vmatprep.subr.bf16.mxu0 %v6356_v4  ;;  %v6411_v4 = vcombine.low %v516_v55, %v520_v56  ;;  %v6420_v6 = vcombine.high %v524_v0, %v528_v2  ;;  %v6165_v11 = vcombine.low %v269_v62, %v273_v63  ;;  %v576_v55 = vld [vmem:[#allocation5 + $0x9f0] sm:$0xff] }
 0x204   :  { %2838 = vmatpush1.bf16.msra.mxu1 %v6481_v5  ;;  %v6166_v5 = vcombine.high %v269_v62, %v273_v63  ;;  %v6468_v62 = vcombine.high %v572_v54, %v576_v55  ;;  %v325_v63 = vld [vmem:[#allocation5 + $0x218] sm:$0xff] }
 0x205   :  { %2924 = vmatpush1.bf16.msra.mxu0 %v6355_v8  ;;  %2839 = vmatprep.subr.bf16.mxu1 %v6490_v9  ;;  %v281_v8 = vld [vmem:[#allocation5 + $0xb8] sm:$0xff]  ;;  %v532_v9 = vld [vmem:[#allocation5 + $0x890] sm:$0xff] }
 0x206   :  { %2925 = vmatprep.subr.bf16.mxu0 %v6364_v12  ;;  %v6419_v12 = vcombine.low %v524_v0, %v528_v2  ;;  %v6428_v14 = vcombine.high %v532_v9, %v536_v10  ;;  %v6427_v20 = vcombine.low %v532_v9, %v536_v10  ;;  %v329_v0 = vld [vmem:[#allocation5 + $0x238] sm:$0xff]  ;;  %v580_v2 = vld [vmem:[#allocation5 + $0xa10] sm:$0xff] }
 0x207   :  { %v337_v9 = vld [vmem:[#allocation5 + $0x278] sm:$0xff]  ;;  %v588_v10 = vld [vmem:[#allocation5 + $0xa50] sm:$0xff] }
 0x208   :  { %2840 = vmatpush1.bf16.msra.mxu1 %v6489_v13  ;;  %v6174_v13 = vcombine.high %v277_v7, %v281_v8 }
 0x209   :  { %2926 = vmatpush1.bf16.msra.mxu0 %v6363_v16  ;;  %2841 = vmatprep.subr.bf16.mxu1 %v6498_v17  ;;  %v289_v16 = vld [vmem:[#allocation5 + $0xf8] sm:$0xff]  ;;  %v540_v17 = vld [vmem:[#allocation5 + $0x8d0] sm:$0xff] }
 0x20a   :  { %2927 = vmatprep.subr.bf16.mxu0 %v6372_v19  ;;  %v6173_v19 = vcombine.low %v277_v7, %v281_v8  ;;  %v6181_v29 = vcombine.low %v285_v15, %v289_v16  ;;  %v6435_v30 = vcombine.low %v540_v17, %v544_v18  ;;  %v333_v8 = vld [vmem:[#allocation5 + $0x258] sm:$0xff] }
 0x20c   :  { %2842 = vmatpush1.bf16.msra.mxu1 %v6497_v21  ;;  %v6182_v21 = vcombine.high %v285_v15, %v289_v16  ;;  %v341_v16 = vld [vmem:[#allocation5 + $0x298] sm:$0xff] }
 0x20d   :  { %2928 = vmatpush1.bf16.msra.mxu0 %v6371_v23  ;;  %2843 = vmatprep.subr.bf16.mxu1 %v6506_v24  ;;  %v6436_v23 = vcombine.high %v540_v17, %v544_v18  ;;  %v293_v24 = vld [vmem:[#allocation5 + $0x118] sm:$0xff]  ;;  %v596_v18 = vld [vmem:[#allocation5 + $0xa90] sm:$0xff] }
 0x20e   :  { %2929 = vmatprep.subr.bf16.mxu0 %v6380_v25  ;;  %v297_v25 = vld [vmem:[#allocation5 + $0x138] sm:$0xff] }
 0x20f   :  { %v6189_v37 = vcombine.low %v293_v24, %v297_v25  ;;  %v345_v17 = vld [vmem:[#allocation5 + $0x2b8] sm:$0xff] }
 0x210   :  { %2844 = vmatpush1.bf16.msra.mxu1 %v6505_v31  ;;  %v6190_v31 = vcombine.high %v293_v24, %v297_v25  ;;  %v349_v25 = vld [vmem:[#allocation5 + $0x2d8] sm:$0xff] }
 0x211   :  { %2930 = vmatpush1.bf16.msra.mxu0 %v6379_v32  ;;  %2845 = vmatprep.subr.bf16.mxu1 %v6514_v34  ;;  %v301_v32 = vld [vmem:[#allocation5 + $0x158] sm:$0xff] }
 0x212   :  { %2931 = vmatprep.subr.bf16.mxu0 %v6388_v35  ;;  %v305_v34 = vld [vmem:[#allocation5 + $0x178] sm:$0xff]  ;;  %v556_v35 = vld [vmem:[#allocation5 + $0x950] sm:$0xff] }
 0x213   :  { %v6198_v39 = vcombine.high %v301_v32, %v305_v34  ;;  %v6197_v46 = vcombine.low %v301_v32, %v305_v34  ;;  %v6451_v47 = vcombine.low %v556_v35, %v560_v36  ;;  %v357_v34 = vld [vmem:[#allocation5 + $0x318] sm:$0xff] }
 0x214   :  { %2846 = vmatpush1.bf16.msra.mxu1 %v6513_v41  ;;  %v6452_v41 = vcombine.high %v556_v35, %v560_v36  ;;  %v361_v35 = vld [vmem:[#allocation5 + $0x338] sm:$0xff]  ;;  %v612_v36 = vld [vmem:[#allocation5 + $0xb10] sm:$0xff] }
 0x215   :  { %2932 = vmatpush1.bf16.msra.mxu0 %v6387_v42  ;;  %2847 = vmatprep.subr.bf16.mxu1 %v6522_v43  ;;  %v309_v42 = vld [vmem:[#allocation5 + $0x198] sm:$0xff] }
 0x216   :  { %2933 = vmatprep.subr.bf16.mxu0 %v6396_v44  ;;  %v313_v43 = vld [vmem:[#allocation5 + $0x1b8] sm:$0xff]  ;;  %v564_v44 = vld [vmem:[#allocation5 + $0x990] sm:$0xff] }
 0x217   :  { %v6206_v48 = vcombine.high %v309_v42, %v313_v43 }
 0x218   :  { %2848 = vmatpush1.bf16.msra.mxu1 %v6521_v49 }
 0x219   :  { %2934 = vmatpush1.bf16.msra.mxu0 %v6395_v50  ;;  %2849 = vmatprep.subr.bf16.mxu1 %v6530_v51  ;;  %v6460_v50 = vcombine.high %v564_v44, %v568_v45  ;;  %v317_v51 = vld [vmem:[#allocation5 + $0x1d8] sm:$0xff] }
 0x21a   :  { %2935 = vmatprep.subr.bf16.mxu0 %v6404_v52  ;;  %v321_v52 = vld [vmem:[#allocation5 + $0x1f8] sm:$0xff] }
 0x21c   :  { %2850 = vmatpush1.bf16.msra.mxu1 %v6529_v57  ;;  %v6205_v57 = vcombine.low %v309_v42, %v313_v43  ;;  %v365_v43 = vld [vmem:[#allocation5 + $0x358] sm:$0xff] }
 0x21d   :  { %2936 = vmatpush1.bf16.msra.mxu0 %v6403_v58  ;;  %2991 = vmatprep.subr.bf16.mxu1 %v6158_v60  ;;  %v6459_v60 = vcombine.low %v564_v44, %v568_v45  ;;  %v369_v44 = vld [vmem:[#allocation5 + $0x378] sm:$0xff]  ;;  %v620_v45 = vld [vmem:[#allocation5 + $0xb50] sm:$0xff] }
 0x21e   :  { %2948 = vmatprep.subr.bf16.mxu0 %v6412_v61  ;;  %v6214_v61 = vcombine.high %v317_v51, %v321_v52 }
 0x21f   :  { %2852 = vmatmul.mubr.bf16.vlgmr.msra.gmra.mrb[4].mxu1 %v8173_v40 }
 0x220   :  { %2938 = vmatmul.mubr.bf16.vlgmr.msra.gmra.mrb[4].mxu0 %v8165_v27  ;;  %2992 = vmatpush1.bf16.msra.mxu1 %v6157_v3  ;;  %v584_v3 = vld [vmem:[#allocation5 + $0xa30] sm:$0xff] }
 0x221   :  { %2949 = vmatpush1.bf16.msra.mxu0 %v6411_v4  ;;  %2993 = vmatprep.subr.bf16.mxu1 %v6166_v5  ;;  %v6213_v4 = vcombine.low %v317_v51, %v321_v52  ;;  %v6467_v5 = vcombine.low %v572_v54, %v576_v55  ;;  %v6476_v7 = vcombine.high %v580_v2, %v584_v3  ;;  %v373_v52 = vld [vmem:[#allocation5 + $0x398] sm:$0xff]  ;;  %v628_v55 = vld [vmem:[#allocation5 + $0xb90] sm:$0xff] }
 0x222   :  { %2950 = vmatprep.subr.bf16.mxu0 %v6420_v6  ;;  %2980 = vmatprep.mubr.bf16.mxu0 %v8167_v33  ;;  %v6222_v6 = vcombine.high %v325_v63, %v329_v0  ;;  %v377_v54 = vld [vmem:[#allocation5 + $0x3b8] sm:$0xff] }
 0x223   :  { %3023 = vmatprep.mubr.bf16.mxu1 %v8157_v59  ;;  %v6444_v59 = vcombine.high %v548_v26, %v552_v28  ;;  %v353_v26 = vld [vmem:[#allocation5 + $0x2f8] sm:$0xff]  ;;  %v604_v28 = vld [vmem:[#allocation5 + $0xad0] sm:$0xff] }
 0x224   :  { %2994 = vmatpush1.bf16.msra.mxu1 %v6165_v11  ;;  %v592_v11 = vld [vmem:[#allocation5 + $0xa70] sm:$0xff] }
 0x225   :  { %2951 = vmatpush1.bf16.msra.mxu0 %v6419_v12  ;;  %2995 = vmatprep.subr.bf16.mxu1 %v6174_v13  ;;  %v6221_v12 = vcombine.low %v325_v63, %v329_v0  ;;  %v6475_v13 = vcombine.low %v580_v2, %v584_v3  ;;  %v6484_v15 = vcombine.high %v588_v10, %v592_v11  ;;  %v381_v0 = vld [vmem:[#allocation5 + $0x3d8] sm:$0xff]  ;;  %v636_v3 = vld [vmem:[#allocation5 + $0xbd0] sm:$0xff] }
 0x226   :  { %2952 = vmatprep.subr.bf16.mxu0 %v6428_v14  ;;  %v6230_v14 = vcombine.high %v333_v8, %v337_v9  ;;  %v385_v2 = vld [vmem:[#allocation5 + $0x3f8] sm:$0xff] }
 0x228   :  { %2996 = vmatpush1.bf16.msra.mxu1 %v6173_v19  ;;  %v600_v19 = vld [vmem:[#allocation5 + $0xab0] sm:$0xff] }
 0x229   :  { %2953 = vmatpush1.bf16.msra.mxu0 %v6427_v20  ;;  %2997 = vmatprep.subr.bf16.mxu1 %v6182_v21  ;;  %v6229_v20 = vcombine.low %v333_v8, %v337_v9  ;;  %v6483_v21 = vcombine.low %v588_v10, %v592_v11  ;;  %v6492_v24 = vcombine.high %v596_v18, %v600_v19  ;;  %v389_v9 = vld [vmem:[#allocation5 + $0x418] sm:$0xff] }
 0x22a   :  { %2954 = vmatprep.subr.bf16.mxu0 %v6436_v23  ;;  %v6238_v23 = vcombine.high %v341_v16, %v345_v17  ;;  %v393_v10 = vld [vmem:[#allocation5 + $0x438] sm:$0xff]  ;;  %v6277_v11 = vcombine.low %v381_v0, %v385_v2 }
 0x22c   :  { %2998 = vmatpush1.bf16.msra.mxu1 %v6181_v29  ;;  %v608_v29 = vld [vmem:[#allocation5 + $0xaf0] sm:$0xff] }
 0x22d   :  { %2955 = vmatpush1.bf16.msra.mxu0 %v6435_v30  ;;  %2999 = vmatprep.subr.bf16.mxu1 %v6190_v31  ;;  %v6237_v30 = vcombine.low %v341_v16, %v345_v17  ;;  %v6491_v31 = vcombine.low %v596_v18, %v600_v19  ;;  %v6500_v32 = vcombine.high %v604_v28, %v608_v29  ;;  %v405_v18 = vld [vmem:[#allocation5 + $0x498] sm:$0xff] }
 0x22e   :  { %2956 = vmatprep.subr.bf16.mxu0 %v6444_v59  ;;  %v6246_v59 = vcombine.high %v349_v25, %v353_v26  ;;  %v6285_v16 = vcombine.low %v389_v9, %v393_v10  ;;  %v409_v19 = vld [vmem:[#allocation5 + $0x4b8] sm:$0xff] }
 0x230   :  { %3000 = vmatpush1.bf16.msra.mxu1 %v6189_v37  ;;  %v616_v37 = vld [vmem:[#allocation5 + $0xb30] sm:$0xff] }
 0x231   :  { %2957 = vmatpush1.bf16.msra.mxu0 %v6443_v38  ;;  %3001 = vmatprep.subr.bf16.mxu1 %v6198_v39  ;;  %v6245_v38 = vcombine.low %v349_v25, %v353_v26  ;;  %v6499_v39 = vcombine.low %v604_v28, %v608_v29  ;;  %v6508_v42 = vcombine.high %v612_v36, %v616_v37  ;;  %v417_v25 = vld [vmem:[#allocation5 + $0x4f8] sm:$0xff] }
 0x232   :  { %v8187_v49 = vpop.f32.mrb[0].mxu1  ;;  %2958 = vmatprep.subr.bf16.mxu0 %v6452_v41  ;;  %v6254_v41 = vcombine.high %v357_v34, %v361_v35  ;;  %v6301_v26 = vcombine.low %v405_v18, %v409_v19 }
 0x233   :  { %v8189_v53 = vpop.f32.mrb[1].mxu1 }
 0x234   :  { %v8191_v56 = vpop.f32.mrb[2].mxu1  ;;  %3002 = vmatpush1.bf16.msra.mxu1 %v6197_v46  ;;  %v624_v46 = vld [vmem:[#allocation5 + $0xb70] sm:$0xff] }
 0x235   :  { %2959 = vmatpush1.bf16.msra.mxu0 %v6451_v47  ;;  %v8193_v58 = vpop.f32.mrb[3].mxu1  ;;  %3003 = vmatprep.subr.bf16.mxu1 %v6206_v48  ;;  %v6253_v47 = vcombine.low %v357_v34, %v361_v35  ;;  %v6507_v48 = vcombine.low %v612_v36, %v616_v37  ;;  %v6516_v51 = vcombine.high %v620_v45, %v624_v46  ;;  %v429_v34 = vld [vmem:[#allocation5 + $0x558] sm:$0xff]  ;;  %v8203_v35 = vld [vmem:[#allocation7] sm:$0xff] }
 0x236   :  { %2960 = vmatprep.subr.bf16.mxu0 %v6460_v50  ;;  %v6262_v50 = vcombine.high %v365_v43, %v369_v44 }
 0x238   :  { %3004 = vmatpush1.bf16.msra.mxu1 %v6205_v57  ;;  %v632_v57 = vld [vmem:[#allocation5 + $0xbb0] sm:$0xff] }
 0x239   :  { %2961 = vmatpush1.bf16.msra.mxu0 %v6459_v60  ;;  %3005 = vmatprep.subr.bf16.mxu1 %v6214_v61  ;;  %v6261_v60 = vcombine.low %v365_v43, %v369_v44  ;;  %v6515_v61 = vcombine.low %v620_v45, %v624_v46  ;;  %v6524_v63 = vcombine.high %v628_v55, %v632_v57 }
 0x23a   :  { %2962 = vmatprep.subr.bf16.mxu0 %v6468_v62  ;;  %v6270_v62 = vcombine.high %v373_v52, %v377_v54 }
 0x23c   :  { %3006 = vmatpush1.bf16.msra.mxu1 %v6213_v4  ;;  %v640_v4 = vld [vmem:[#allocation5 + $0xbf0] sm:$0xff] }
 0x23d   :  { %2963 = vmatpush1.bf16.msra.mxu0 %v6467_v5  ;;  %3007 = vmatprep.subr.bf16.mxu1 %v6222_v6  ;;  %v6269_v5 = vcombine.low %v373_v52, %v377_v54  ;;  %v6523_v6 = vcombine.low %v628_v55, %v632_v57  ;;  %v6532_v8 = vcombine.high %v636_v3, %v640_v4 }
 0x23e   :  { %2964 = vmatprep.subr.bf16.mxu0 %v6476_v7  ;;  %v6278_v7 = vcombine.high %v381_v0, %v385_v2  ;;  %v453_v2 = vld [vmem:[#allocation5 + $0x618] sm:$0xff] }
 0x240   :  { %3008 = vmatpush1.bf16.msra.mxu1 %v6221_v12  ;;  %v6531_v12 = vcombine.low %v636_v3, %v640_v4 }
 0x241   :  { %2965 = vmatpush1.bf16.msra.mxu0 %v6475_v13  ;;  %3009 = vmatprep.subr.bf16.mxu1 %v6230_v14  ;;  %v6286_v13 = vcombine.high %v389_v9, %v393_v10  ;;  %v397_v14 = vld [vmem:[#allocation5 + $0x458] sm:$0xff] }
 0x242   :  { %2966 = vmatprep.subr.bf16.mxu0 %v6484_v15  ;;  %v401_v15 = vld [vmem:[#allocation5 + $0x478] sm:$0xff] }
 0x243   :  { %v6294_v17 = vcombine.high %v397_v14, %v401_v15  ;;  %v473_v9 = vld [vmem:[#allocation5 + $0x6b8] sm:$0xff] }
 0x244   :  { %3010 = vmatpush1.bf16.msra.mxu1 %v6229_v20  ;;  %v6293_v20 = vcombine.low %v397_v14, %v401_v15 }
 0x245   :  { %2967 = vmatpush1.bf16.msra.mxu0 %v6483_v21  ;;  %3011 = vmatprep.subr.bf16.mxu1 %v6238_v23  ;;  %v6302_v21 = vcombine.high %v405_v18, %v409_v19  ;;  %v644_v23 = vlaneseq }
 0x246   :  { %2968 = vmatprep.subr.bf16.mxu0 %v6492_v24  ;;  %v413_v24 = vld [vmem:[#allocation5 + $0x4d8] sm:$0xff] }
 0x247   :  { %v6310_v28 = vcombine.high %v413_v24, %v417_v25  ;;  %v8198_v29 = vshrl.u32 %v644_v23, 7 }
 0x248   :  { %3012 = vmatpush1.bf16.msra.mxu1 %v6237_v30  ;;  %v421_v30 = vld [vmem:[#allocation5 + $0x518] sm:$0xff] }
 0x249   :  { %2969 = vmatpush1.bf16.msra.mxu0 %v6491_v31  ;;  %3013 = vmatprep.subr.bf16.mxu1 %v6246_v59  ;;  %v425_v31 = vld [vmem:[#allocation5 + $0x538] sm:$0xff]  ;;  %v8206_v36 = vsub.s32 1, %v8198_v29 }
 0x24a   :  { %2970 = vmatprep.subr.bf16.mxu0 %v6500_v32  ;;  %v6318_v59 = vcombine.high %v421_v30, %v425_v31  ;;  %v8201_v32 = vsub.s32 0, %v8198_v29  ;;  %v6317_v37 = vcombine.low %v421_v30, %v425_v31  ;;  %v509_v31 = vld [vmem:[#allocation5 + $0x7d8] sm:$0xff] }
 0x24b   :  { %v651_v43 = vrot.slane %v8203_v35, %v8206_v36 }
 0x24c   :  { %3014 = vmatpush1.bf16.msra.mxu1 %v6245_v38 }
 0x24d   :  { %2971 = vmatpush1.bf16.msra.mxu0 %v6499_v39  ;;  %3015 = vmatprep.subr.bf16.mxu1 %v6254_v41  ;;  %v647_v39 = vrot.slane %v8203_v35, %v8201_v32  ;;  %v437_v41 = vld [vmem:[#allocation5 + $0x598] sm:$0xff] }
 0x24e   :  { %2972 = vmatprep.subr.bf16.mxu0 %v6508_v42  ;;  %v441_v42 = vld [vmem:[#allocation5 + $0x5b8] sm:$0xff] }
 0x24f   :  { %v6334_v45 = vcombine.high %v437_v41, %v441_v42  ;;  %v2639_v46 = vadd.f32 %v8187_v49, %v647_v39  ;;  %v2643_v52 = vadd.f32 %v8191_v56, %v647_v39  ;;  %v6333_v57 = vcombine.low %v437_v41, %v441_v42  ;;  %v525_v41 = vld [vmem:[#allocation5 + $0x858] sm:$0xff] }
 0x250   :  { %3016 = vmatpush1.bf16.msra.mxu1 %v6253_v47  ;;  %v445_v47 = vld [vmem:[#allocation5 + $0x5d8] sm:$0xff] }
 0x251   :  { %2973 = vmatpush1.bf16.msra.mxu0 %v6507_v48  ;;  %3017 = vmatprep.subr.bf16.mxu1 %v6262_v50  ;;  %v449_v48 = vld [vmem:[#allocation5 + $0x5f8] sm:$0xff]  ;;  %v2641_v50 = vadd.f32 %v8189_v53, %v651_v43 }
 0x252   :  { %2974 = vmatprep.subr.bf16.mxu0 %v6516_v51  ;;  %v457_v53 = vld [vmem:[#allocation5 + $0x638] sm:$0xff]  ;;  %v6341_v56 = vcombine.low %v445_v47, %v449_v48 }
 0x253   :  { %v6350_v4 = vcombine.high %v453_v2, %v457_v53  ;;  %v529_v42 = vld [vmem:[#allocation5 + $0x878] sm:$0xff] }
 0x254   :  { %3018 = vmatpush1.bf16.msra.mxu1 %v6261_v60  ;;  %v2645_v60 = vadd.f32 %v8193_v58, %v651_v43  ;;  %v6349_v58 = vcombine.low %v453_v2, %v457_v53  ;;  %v565_v53 = vld [vmem:[#allocation5 + $0x998] sm:$0xff] }
 0x255   :  { %2975 = vmatpush1.bf16.msra.mxu0 %v6515_v61  ;;  %3019 = vmatprep.subr.bf16.mxu1 %v6270_v62 }
 0x256   :  { %2976 = vmatprep.subr.bf16.mxu0 %v6524_v63  ;;  %v6342_v63 = vcombine.high %v445_v47, %v449_v48  ;;  %v6421_v47 = vcombine.low %v525_v41, %v529_v42 }
 0x258   :  { %3020 = vmatpush1.bf16.msra.mxu1 %v6269_v5  ;;  %v461_v5 = vld [vmem:[#allocation5 + $0x658] sm:$0xff] }
 0x259   :  { %2977 = vmatpush1.bf16.msra.mxu0 %v6523_v6  ;;  %3021 = vmatprep.subr.bf16.mxu1 %v6278_v7  ;;  %v465_v6 = vld [vmem:[#allocation5 + $0x678] sm:$0xff] }
 0x25a   :  { %2978 = vmatprep.subr.bf16.mxu0 %v6532_v8  ;;  %v6358_v7 = vcombine.high %v461_v5, %v465_v6  ;;  %v469_v8 = vld [vmem:[#allocation5 + $0x698] sm:$0xff]  ;;  %v6357_v10 = vcombine.low %v461_v5, %v465_v6 }
 0x25b   :  { %v6365_v14 = vcombine.low %v469_v8, %v473_v9  ;;  %v573_v6 = vld [vmem:[#allocation5 + $0x9d8] sm:$0xff] }
 0x25c   :  { %3022 = vmatpush1.bf16.msra.mxu1 %v6277_v11  ;;  %v6366_v11 = vcombine.high %v469_v8, %v473_v9  ;;  %v581_v9 = vld [vmem:[#allocation5 + $0xa18] sm:$0xff] }
 0x25d   :  { %2979 = vmatpush1.bf16.msra.mxu0 %v6531_v12  ;;  %3034 = vmatprep.subr.bf16.mxu1 %v6286_v13  ;;  %v477_v12 = vld [vmem:[#allocation5 + $0x6d8] sm:$0xff] }
 0x25e   :  { %v481_v13 = vld [vmem:[#allocation5 + $0x6f8] sm:$0xff] }
 0x25f   :  { %3024 = vmatmul.mubr.bf16.vlgmr.msra.gmra.mrb[8].mxu1 %v8163_v22  ;;  %v6309_v22 = vcombine.low %v413_v24, %v417_v25  ;;  %v6374_v15 = vcombine.high %v477_v12, %v481_v13  ;;  %v6373_v18 = vcombine.low %v477_v12, %v481_v13  ;;  %v501_v25 = vld [vmem:[#allocation5 + $0x798] sm:$0xff] }
 0x260   :  { %2981 = vmatmul.mubr.bf16.vlgmr.msra.gmra.mrb[4].mxu0 %v8173_v40  ;;  %3035 = vmatpush1.bf16.msra.mxu1 %v6285_v16  ;;  %v485_v16 = vld [vmem:[#allocation5 + $0x718] sm:$0xff] }
 0x261   :  { %3036 = vmatprep.subr.bf16.mxu1 %v6294_v17  ;;  %3066 = vmatprep.mubr.bf16.mxu1 %v8160_v1  ;;  %v433_v1 = vld [vmem:[#allocation5 + $0x578] sm:$0xff] }
 0x262   :  { %v6326_v38 = vcombine.high %v429_v34, %v433_v1  ;;  %v6325_v44 = vcombine.low %v429_v34, %v433_v1  ;;  %v489_v17 = vld [vmem:[#allocation5 + $0x738] sm:$0xff] }
 0x263   :  { %v6382_v19 = vcombine.high %v485_v16, %v489_v17  ;;  %v6381_v23 = vcombine.low %v485_v16, %v489_v17  ;;  %v517_v1 = vld [vmem:[#allocation5 + $0x818] sm:$0xff] }
 0x264   :  { %3037 = vmatpush1.bf16.msra.mxu1 %v6293_v20  ;;  %v493_v20 = vld [vmem:[#allocation5 + $0x758] sm:$0xff] }
 0x265   :  { %3038 = vmatprep.subr.bf16.mxu1 %v6302_v21  ;;  %v497_v21 = vld [vmem:[#allocation5 + $0x778] sm:$0xff] }
 0x266   :  { %v6390_v24 = vcombine.high %v493_v20, %v497_v21  ;;  %v589_v13 = vld [vmem:[#allocation5 + $0xa58] sm:$0xff] }
 0x267   :  { %v597_v17 = vld [vmem:[#allocation5 + $0xa98] sm:$0xff] }
 0x268   :  { %3039 = vmatpush1.bf16.msra.mxu1 %v6301_v26  ;;  %v505_v26 = vld [vmem:[#allocation5 + $0x7b8] sm:$0xff] }
 0x269   :  { %3040 = vmatprep.subr.bf16.mxu1 %v6310_v28  ;;  %v6389_v28 = vcombine.low %v493_v20, %v497_v21  ;;  %v6398_v30 = vcombine.high %v501_v25, %v505_v26  ;;  %v605_v21 = vld [vmem:[#allocation5 + $0xad8] sm:$0xff] }
 0x26c   :  { %3041 = vmatpush1.bf16.msra.mxu1 %v6309_v22  ;;  %v513_v22 = vld [vmem:[#allocation5 + $0x7f8] sm:$0xff] }
 0x26d   :  { %3042 = vmatprep.subr.bf16.mxu1 %v6318_v59  ;;  %v6397_v59 = vcombine.low %v501_v25, %v505_v26  ;;  %v6406_v34 = vcombine.high %v509_v31, %v513_v22  ;;  %v613_v26 = vld [vmem:[#allocation5 + $0xb18] sm:$0xff] }
 0x270   :  { %3043 = vmatpush1.bf16.msra.mxu1 %v6317_v37  ;;  %v521_v37 = vld [vmem:[#allocation5 + $0x838] sm:$0xff] }
 0x271   :  { %3044 = vmatprep.subr.bf16.mxu1 %v6326_v38  ;;  %v6405_v38 = vcombine.low %v509_v31, %v513_v22  ;;  %v6414_v39 = vcombine.high %v517_v1, %v521_v37  ;;  %v6413_v43 = vcombine.low %v517_v1, %v521_v37  ;;  %v621_v22 = vld [vmem:[#allocation5 + $0xb58] sm:$0xff] }
 0x272   :  { %v629_v37 = vld [vmem:[#allocation5 + $0xb98] sm:$0xff] }
 0x273   :  { %v2724_v51 = vpop.f32.mrb[0].mxu0 }
 0x274   :  { %v8215_v54 = vadd.f32 %v2724_v51, %v2639_v46  ;;  %v2726_v55 = vpop.f32.mrb[1].mxu0  ;;  %3045 = vmatpush1.bf16.msra.mxu1 %v6325_v44  ;;  %v6422_v44 = vcombine.high %v525_v41, %v529_v42  ;;  %v537_v46 = vld [vmem:[#allocation5 + $0x8b8] sm:$0xff] }
 0x275   :  { %v8218_v61 = vadd.f32 %v2726_v55, %v2641_v50  ;;  %v2728_v62 = vpop.f32.mrb[2].mxu0  ;;  %3046 = vmatprep.subr.bf16.mxu1 %v6334_v45  ;;  %v533_v45 = vld [vmem:[#allocation5 + $0x898] sm:$0xff] }
 0x276   :  { %v8220_v49 = vadd.f32 %v2728_v62, %v2643_v52  ;;  %v2730_v0 = vpop.f32.mrb[3].mxu0  ;;  %v6430_v48 = vcombine.high %v533_v45, %v537_v46  ;;  %v541_v50 = vld [vmem:[#allocation5 + $0x8d8] sm:$0xff]  ;;  %v6429_v52 = vcombine.low %v533_v45, %v537_v46 }
 0x277   :  { %v8222_v3 = vadd.f32 %v2730_v0, %v2645_v60  ;;  %v545_v51 = vld [vmem:[#allocation5 + $0x8f8] sm:$0xff] }
 0x278   :  { %3047 = vmatpush1.bf16.msra.mxu1 %v6333_v57  ;;  %v6438_v55 = vcombine.high %v541_v50, %v545_v51  ;;  %v549_v57 = vld [vmem:[#allocation5 + $0x918] sm:$0xff]  ;;  %v6437_v62 = vcombine.low %v541_v50, %v545_v51 }
 0x279   :  { %3048 = vmatprep.subr.bf16.mxu1 %v6342_v63  ;;  %v553_v60 = vld [vmem:[#allocation5 + $0x938] sm:$0xff] }
 0x27a   :  { %v6446_v63 = vcombine.high %v549_v57, %v553_v60  ;;  %v557_v0 = vld [vmem:[#allocation5 + $0x958] sm:$0xff]  ;;  %v6445_v2 = vcombine.low %v549_v57, %v553_v60 }
 0x27b   :  { %v637_v42 = vld [vmem:[#allocation5 + $0xbd8] sm:$0xff] }
 0x27c   :  { %3049 = vmatpush1.bf16.msra.mxu1 %v6341_v56  ;;  %v569_v56 = vld [vmem:[#allocation5 + $0x9b8] sm:$0xff] }
 0x27d   :  { %3050 = vmatprep.subr.bf16.mxu1 %v6350_v4  ;;  %v6462_v5 = vcombine.high %v565_v53, %v569_v56 }
 0x280   :  { %3051 = vmatpush1.bf16.msra.mxu1 %v6349_v58  ;;  %v577_v58 = vld [vmem:[#allocation5 + $0x9f8] sm:$0xff] }
 0x281   :  { %3052 = vmatprep.subr.bf16.mxu1 %v6358_v7  ;;  %v6461_v7 = vcombine.low %v565_v53, %v569_v56  ;;  %v6470_v8 = vcombine.high %v573_v6, %v577_v58  ;;  %v3122_v53 = vadd.f32 %v8218_v61, %v8215_v54 }
 0x284   :  { %3053 = vmatpush1.bf16.msra.mxu1 %v6357_v10  ;;  %v585_v10 = vld [vmem:[#allocation5 + $0xa38] sm:$0xff] }
 0x285   :  { %3054 = vmatprep.subr.bf16.mxu1 %v6366_v11  ;;  %v6469_v11 = vcombine.low %v573_v6, %v577_v58  ;;  %v6478_v12 = vcombine.high %v581_v9, %v585_v10 }
 0x288   :  { %3055 = vmatpush1.bf16.msra.mxu1 %v6365_v14  ;;  %v593_v14 = vld [vmem:[#allocation5 + $0xa78] sm:$0xff] }
 0x289   :  { %3056 = vmatprep.subr.bf16.mxu1 %v6374_v15  ;;  %v6477_v15 = vcombine.low %v581_v9, %v585_v10  ;;  %v6486_v16 = vcombine.high %v589_v13, %v593_v14 }
 0x28c   :  { %3057 = vmatpush1.bf16.msra.mxu1 %v6373_v18  ;;  %v601_v18 = vld [vmem:[#allocation5 + $0xab8] sm:$0xff] }
 0x28d   :  { %3058 = vmatprep.subr.bf16.mxu1 %v6382_v19  ;;  %v6485_v19 = vcombine.low %v589_v13, %v593_v14  ;;  %v6494_v20 = vcombine.high %v597_v17, %v601_v18 }
 0x290   :  { %3059 = vmatpush1.bf16.msra.mxu1 %v6381_v23  ;;  %v609_v23 = vld [vmem:[#allocation5 + $0xaf8] sm:$0xff] }
 0x291   :  { %3060 = vmatprep.subr.bf16.mxu1 %v6390_v24  ;;  %v6493_v24 = vcombine.low %v597_v17, %v601_v18  ;;  %v6502_v25 = vcombine.high %v605_v21, %v609_v23 }
 0x294   :  { %3061 = vmatpush1.bf16.msra.mxu1 %v6389_v28  ;;  %v617_v28 = vld [vmem:[#allocation5 + $0xb38] sm:$0xff] }
 0x295   :  { %3062 = vmatprep.subr.bf16.mxu1 %v6398_v30  ;;  %v6501_v30 = vcombine.low %v605_v21, %v609_v23  ;;  %v6510_v31 = vcombine.high %v613_v26, %v617_v28 }
 0x298   :  { %3063 = vmatpush1.bf16.msra.mxu1 %v6397_v59  ;;  %v625_v59 = vld [vmem:[#allocation5 + $0xb78] sm:$0xff] }
 0x299   :  { %3064 = vmatprep.subr.bf16.mxu1 %v6406_v34  ;;  %v6509_v34 = vcombine.low %v613_v26, %v617_v28  ;;  %v6518_v1 = vcombine.high %v621_v22, %v625_v59 }
 0x29c   :  { %3065 = vmatpush1.bf16.msra.mxu1 %v6405_v38  ;;  %v633_v38 = vld [vmem:[#allocation5 + $0xbb8] sm:$0xff] }
 0x29d   :  { %3077 = vmatprep.subr.bf16.mxu1 %v6414_v39  ;;  %v6517_v39 = vcombine.low %v621_v22, %v625_v59  ;;  %v6526_v41 = vcombine.high %v629_v37, %v633_v38 }
 0x29f   :  { %3067 = vmatmul.mubr.bf16.vlgmr.msra.gmra.mrb[8].mxu1 %v8165_v27  ;;  %v561_v27 = vld [vmem:[#allocation5 + $0x978] sm:$0xff] }
 0x2a0   :  { %3078 = vmatpush1.bf16.msra.mxu1 %v6413_v43  ;;  %3109 = vmatprep.mubr.bf16.mxu1 %v8167_v33  ;;  %v6454_v33 = vcombine.high %v557_v0, %v561_v27  ;;  %v6453_v4 = vcombine.low %v557_v0, %v561_v27  ;;  %v641_v43 = vld [vmem:[#allocation5 + $0xbf8] sm:$0xff]  ;;  %v8233_v0 = vsub.s32 3, %v8198_v29  ;;  %v8236_v27 = vsub.s32 4, %v8198_v29 }
 0x2a1   :  { %3079 = vmatprep.subr.bf16.mxu1 %v6422_v44  ;;  %v6525_v44 = vcombine.low %v629_v37, %v633_v38  ;;  %v6534_v45 = vcombine.high %v637_v42, %v641_v43  ;;  %v6533_v46 = vcombine.low %v637_v42, %v641_v43  ;;  %v7007_v38 = vld [vmem:[#allocation11] ss:$16 sps:$4 sm:$0xff]   ;;  %v7012_v42 = vld [vmem:[#allocation11 + $0xc] ss:$16 sps:$4 sm:$0xff]   ;;  %v7015_v43 = vld [vmem:[#allocation11 + $0x24] ss:$16 sps:$4 sm:$0xff]  }
 0x2a4   :  { %3080 = vmatpush1.bf16.msra.mxu1 %v6421_v47 }
 0x2a5   :  { %3081 = vmatprep.subr.bf16.mxu1 %v6430_v48 }
 0x2a8   :  { %3082 = vmatpush1.bf16.msra.mxu1 %v6429_v52 }
 0x2a9   :  { %3083 = vmatprep.subr.bf16.mxu1 %v6438_v55 }
 0x2ac   :  { %3084 = vmatpush1.bf16.msra.mxu1 %v6437_v62  ;;  %v8228_v62 = vsub.s32 2, %v8198_v29 }
 0x2ad   :  { %3085 = vmatprep.subr.bf16.mxu1 %v6446_v63 }
 0x2ae   :  { %v655_v63 = vrot.slane %v8203_v35, %v8228_v62 }
 0x2b0   :  { %3086 = vmatpush1.bf16.msra.mxu1 %v6445_v2  ;;  %v659_v2 = vrot.slane %v8203_v35, %v8233_v0 }
 0x2b1   :  { %3087 = vmatprep.subr.bf16.mxu1 %v6454_v33  ;;  %v8243_v33 = vsub.s32 5, %v8198_v29 }
 0x2b4   :  { %3088 = vmatpush1.bf16.msra.mxu1 %v6453_v4  ;;  %v663_v4 = vrot.slane %v8203_v35, %v8236_v27 }
 0x2b5   :  { %3089 = vmatprep.subr.bf16.mxu1 %v6462_v5  ;;  %v3131_v5 = vadd.f32 %v8222_v3, %v8220_v49 }
 0x2b8   :  { %3090 = vmatpush1.bf16.msra.mxu1 %v6461_v7  ;;  %v667_v7 = vrot.slane %v8203_v35, %v8243_v33 }
 0x2b9   :  { %3091 = vmatprep.subr.bf16.mxu1 %v6470_v8 }
 0x2bc   :  { %3092 = vmatpush1.bf16.msra.mxu1 %v6469_v11  ;;  %v8264_v11 = vsub.s32 6, %v8198_v29 }
 0x2bd   :  { %3093 = vmatprep.subr.bf16.mxu1 %v6478_v12  ;;  %v8267_v12 = vsub.s32 7, %v8198_v29 }
 0x2be   :  { %v671_v18 = vrot.slane %v8203_v35, %v8264_v11 }
 0x2c0   :  { %3094 = vmatpush1.bf16.msra.mxu1 %v6477_v15 }
 0x2c1   :  { %3095 = vmatprep.subr.bf16.mxu1 %v6486_v16 }
 0x2c4   :  { %3096 = vmatpush1.bf16.msra.mxu1 %v6485_v19  ;;  %v675_v19 = vrot.slane %v8203_v35, %v8267_v12 }
 0x2c5   :  { %3097 = vmatprep.subr.bf16.mxu1 %v6494_v20 }
 0x2c8   :  { %3098 = vmatpush1.bf16.msra.mxu1 %v6493_v24 }
 0x2c9   :  { %3099 = vmatprep.subr.bf16.mxu1 %v6502_v25 }
 0x2cc   :  { %3100 = vmatpush1.bf16.msra.mxu1 %v6501_v30 }
 0x2cd   :  { %3101 = vmatprep.subr.bf16.mxu1 %v6510_v31 }
 0x2d0   :  { %3102 = vmatpush1.bf16.msra.mxu1 %v6509_v34 }
 0x2d1   :  { %3103 = vmatprep.subr.bf16.mxu1 %v6518_v1 }
 0x2d4   :  { %3104 = vmatpush1.bf16.msra.mxu1 %v6517_v39  ;;  %v7009_v39 = vld [vmem:[#allocation11 + $0x4] ss:$16 sps:$4 sm:$0xff]  }
 0x2d5   :  { %3105 = vmatprep.subr.bf16.mxu1 %v6526_v41  ;;  %v7010_v41 = vld [vmem:[#allocation11 + $0x8] ss:$16 sps:$4 sm:$0xff]   ;;  %4911 = vmatprep.subr.bf16.mxu0 %v7009_v39 }
 0x2d6   :  { %4912 = vmatpush1.bf16.msra.mxu0 %v7007_v38 }
 0x2d7   :  { %4913 = vmatprep.subr.bf16.mxu0 %v7015_v43 }
 0x2d8   :  { %3106 = vmatpush1.bf16.msra.mxu1 %v6525_v44  ;;  %v7018_v44 = vld [vmem:[#allocation11 + $0x2c] ss:$16 sps:$4 sm:$0xff]  }
 0x2d9   :  { %3107 = vmatprep.subr.bf16.mxu1 %v6534_v45  ;;  %v7013_v45 = vld [vmem:[#allocation11 + $0x20] ss:$16 sps:$4 sm:$0xff]  }
 0x2da   :  { %4914 = vmatpush1.bf16.msra.mxu0 %v7013_v45 }
 0x2dc   :  { %3108 = vmatpush1.bf16.msra.mxu1 %v6533_v46  ;;  %v7016_v46 = vld [vmem:[#allocation11 + $0x28] ss:$16 sps:$4 sm:$0xff]  }
 0x2dd   :  { %5083 = vmatprep.subr.bf16.mxu1 %v7012_v42 }
 0x2df   :  { %3110 = vmatmul.mubr.bf16.vlgmr.msra.gmra.mrb[8].mxu1 %v8173_v40 }
 0x2e0   :  { %5084 = vmatpush1.bf16.msra.mxu1 %v7010_v41 }
 0x2e1   :  { %5085 = vmatprep.subr.bf16.mxu1 %v7018_v44 }
 0x2e4   :  { %5086 = vmatpush1.bf16.msra.mxu1 %v7016_v46 }
 0x2f2   :  { %v2853_v47 = vpop.f32.mrb[4].mxu1 }
 0x2f3   :  { %v2855_v48 = vpop.f32.mrb[5].mxu1  ;;  %v8238_v40 = vadd.f32 %v2853_v47, %v655_v63  ;;  %v7021_v47 = vld [vmem:[#allocation11 + $0x44] ss:$16 sps:$4 sm:$0xff]  }
 0x2f4   :  { %v2857_v50 = vpop.f32.mrb[6].mxu1  ;;  %v8254_v58 = vadd.f32 %v2855_v48, %v659_v2  ;;  %v7024_v48 = vld [vmem:[#allocation11 + $0x4c] ss:$16 sps:$4 sm:$0xff]   ;;  %4915 = vmatprep.subr.bf16.mxu0 %v7021_v47 }
 0x2f5   :  { %v2859_v51 = vpop.f32.mrb[7].mxu1  ;;  %v8247_v56 = vadd.f32 %v2857_v50, %v655_v63  ;;  %v3123_v6 = vadd.f32 %v8238_v40, %v3122_v53  ;;  %v7019_v50 = vld [vmem:[#allocation11 + $0x40] ss:$16 sps:$4 sm:$0xff]   ;;  %5087 = vmatprep.subr.bf16.mxu1 %v7024_v48  ;;  %v7033_v63 = vld [vmem:[#allocation11 + $0x84] ss:$16 sps:$4 sm:$0xff]  }
 0x2f6   :  { %v8259_v9 = vadd.f32 %v2859_v51, %v659_v2  ;;  %v7022_v51 = vld [vmem:[#allocation11 + $0x48] ss:$16 sps:$4 sm:$0xff]   ;;  %4916 = vmatpush1.bf16.msra.mxu0 %v7019_v50  ;;  %v7036_v2 = vld [vmem:[#allocation11 + $0x8c] ss:$16 sps:$4 sm:$0xff]   ;;  %v7031_v53 = vld [vmem:[#allocation11 + $0x80] ss:$16 sps:$4 sm:$0xff]  }
 0x2f7   :  { %v3132_v8 = vadd.f32 %v8247_v56, %v3131_v5  ;;  %v3124_v13 = vadd.f32 %v8254_v58, %v3123_v6  ;;  %5088 = vmatpush1.bf16.msra.mxu1 %v7022_v51  ;;  %v7039_v5 = vld [vmem:[#allocation11 + $0xa4] ss:$16 sps:$4 sm:$0xff]   ;;  %v7042_v6 = vld [vmem:[#allocation11 + $0xac] ss:$16 sps:$4 sm:$0xff]  }
 0x2f9   :  { %v3133_v15 = vadd.f32 %v8259_v9, %v3132_v8  ;;  %v7040_v8 = vld [vmem:[#allocation11 + $0xa8] ss:$16 sps:$4 sm:$0xff]  }
 0x333   :  { %v2982_v52 = vpop.f32.mrb[4].mxu0 }
 0x334   :  { %v2984_v55 = vpop.f32.mrb[5].mxu0  ;;  %v8261_v10 = vadd.f32 %v2982_v52, %v663_v4  ;;  %v7027_v52 = vld [vmem:[#allocation11 + $0x64] ss:$16 sps:$4 sm:$0xff]  }
 0x335   :  { %v2986_v57 = vpop.f32.mrb[6].mxu0  ;;  %v8274_v17 = vadd.f32 %v2984_v55, %v667_v7  ;;  %v7030_v55 = vld [vmem:[#allocation11 + $0x6c] ss:$16 sps:$4 sm:$0xff]   ;;  %4917 = vmatprep.subr.bf16.mxu0 %v7027_v52 }
 0x336   :  { %v2988_v60 = vpop.f32.mrb[7].mxu0  ;;  %v8270_v14 = vadd.f32 %v2986_v57, %v663_v4  ;;  %v3125_v16 = vadd.f32 %v8261_v10, %v3124_v13  ;;  %v7025_v57 = vld [vmem:[#allocation11 + $0x60] ss:$16 sps:$4 sm:$0xff]   ;;  %5089 = vmatprep.subr.bf16.mxu1 %v7030_v55  ;;  %v7034_v4 = vld [vmem:[#allocation11 + $0x88] ss:$16 sps:$4 sm:$0xff]  }
 0x337   :  { %v8281_v29 = vadd.f32 %v2988_v60, %v667_v7  ;;  %v7028_v60 = vld [vmem:[#allocation11 + $0x68] ss:$16 sps:$4 sm:$0xff]   ;;  %4918 = vmatpush1.bf16.msra.mxu0 %v7025_v57  ;;  %v7037_v7 = vld [vmem:[#allocation11 + $0xa0] ss:$16 sps:$4 sm:$0xff]   ;;  %v7045_v13 = vld [vmem:[#allocation11 + $0xc4] ss:$16 sps:$4 sm:$0xff]  }
 0x338   :  { %v3134_v20 = vadd.f32 %v8270_v14, %v3133_v15  ;;  %v3126_v23 = vadd.f32 %v8274_v17, %v3125_v16  ;;  %5090 = vmatpush1.bf16.msra.mxu1 %v7028_v60  ;;  %4919 = vmatprep.subr.bf16.mxu0 %v7033_v63  ;;  %v7048_v15 = vld [vmem:[#allocation11 + $0xcc] ss:$16 sps:$4 sm:$0xff]   ;;  %v7043_v16 = vld [vmem:[#allocation11 + $0xc0] ss:$16 sps:$4 sm:$0xff]  }
 0x339   :  { %5091 = vmatprep.subr.bf16.mxu1 %v7036_v2 }
 0x33a   :  { %v3135_v30 = vadd.f32 %v8281_v29, %v3134_v20  ;;  %v7054_v20 = vld [vmem:[#allocation11 + $0xec] ss:$16 sps:$4 sm:$0xff]  }
 0x33b   :  { %4920 = vmatpush1.bf16.msra.mxu0 %v7031_v53 }
 0x33c   :  { %5092 = vmatpush1.bf16.msra.mxu1 %v7034_v4  ;;  %4921 = vmatprep.subr.bf16.mxu0 %v7039_v5 }
 0x33d   :  { %5093 = vmatprep.subr.bf16.mxu1 %v7042_v6 }
 0x33f   :  { %4922 = vmatpush1.bf16.msra.mxu0 %v7037_v7 }
 0x340   :  { %5094 = vmatpush1.bf16.msra.mxu1 %v7040_v8  ;;  %4923 = vmatprep.subr.bf16.mxu0 %v7045_v13 }
 0x341   :  { %5095 = vmatprep.subr.bf16.mxu1 %v7048_v15 }
 0x343   :  { %4924 = vmatpush1.bf16.msra.mxu0 %v7043_v16 }
 0x3b2   :  { %v3111_v21 = vpop.f32.mrb[8].mxu1 }
 0x3b3   :  { %v8284_v24 = vadd.f32 %v3111_v21, %v671_v18  ;;  %v3113_v25 = vpop.f32.mrb[9].mxu1  ;;  %v7049_v21 = vld [vmem:[#allocation11 + $0xe0] ss:$16 sps:$4 sm:$0xff]  }
 0x3b4   :  { %v8286_v26 = vadd.f32 %v3113_v25, %v675_v19  ;;  %v3115_v28 = vpop.f32.mrb[10].mxu1  ;;  %v7057_v25 = vld [vmem:[#allocation11 + $0x104] ss:$16 sps:$4 sm:$0xff]  }
 0x3b5   :  { %v8289_v31 = vadd.f32 %v3115_v28, %v671_v18  ;;  %v3117_v22 = vpop.f32.mrb[11].mxu1  ;;  %v3127_v35 = vadd.f32 %v8284_v24, %v3126_v23  ;;  %v7046_v18 = vld [vmem:[#allocation11 + $0xc8] ss:$16 sps:$4 sm:$0xff]   ;;  %v7060_v28 = vld [vmem:[#allocation11 + $0x10c] ss:$16 sps:$4 sm:$0xff]  }
 0x3b6   :  { %v8293_v34 = vadd.f32 %v3117_v22, %v675_v19  ;;  %v7051_v19 = vld [vmem:[#allocation11 + $0xe4] ss:$16 sps:$4 sm:$0xff]   ;;  %5096 = vmatpush1.bf16.msra.mxu1 %v7046_v18  ;;  %v7052_v23 = vld [vmem:[#allocation11 + $0xe8] ss:$16 sps:$4 sm:$0xff]  }
 0x3b7   :  { %v3136_v59 = vadd.f32 %v8289_v31, %v3135_v30  ;;  %v3128_v1 = vadd.f32 %v8286_v26, %v3127_v35  ;;  %4925 = vmatprep.subr.bf16.mxu0 %v7051_v19  ;;  %5097 = vmatprep.subr.bf16.mxu1 %v7054_v20  ;;  %v7055_v30 = vld [vmem:[#allocation11 + $0x100] ss:$16 sps:$4 sm:$0xff]   ;;  %v7058_v22 = vld [vmem:[#allocation11 + $0x108] ss:$16 sps:$4 sm:$0xff]  }
 0x3b8   :  { %4926 = vmatpush1.bf16.msra.mxu0 %v7049_v21 }
 0x3b9   :  { %3129 = vadd.xlane.f32.xlu0 %v3128_v1  ;;  %v3137_v37 = vadd.f32 %v8293_v34, %v3136_v59  ;;  %4927 = vmatprep.subr.bf16.mxu0 %v7057_v25  ;;  %v7066_v25 = vld [vmem:[#allocation11 + $0x12c] ss:$16 sps:$4 sm:$0xff]  }
 0x3ba   :  { %5098 = vmatpush1.bf16.msra.mxu1 %v7052_v23  ;;  %v7063_v23 = vld [vmem:[#allocation11 + $0x124] ss:$16 sps:$4 sm:$0xff]  }
 0x3bb   :  { %5099 = vmatprep.subr.bf16.mxu1 %v7060_v28  ;;  %v7064_v28 = vld [vmem:[#allocation11 + $0x128] ss:$16 sps:$4 sm:$0xff]  }
 0x3bc   :  { %4928 = vmatpush1.bf16.msra.mxu0 %v7055_v30  ;;  %v7069_v30 = vld [vmem:[#allocation11 + $0x144] ss:$16 sps:$4 sm:$0xff]  }
 0x3bd   :  { %3138 = vadd.xlane.f32.xlu0 %v3137_v37  ;;  %4929 = vmatprep.subr.bf16.mxu0 %v7063_v23 }
 0x3be   :  { %5100 = vmatpush1.bf16.msra.mxu1 %v7058_v22  ;;  %v7072_v22 = vld [vmem:[#allocation11 + $0x14c] ss:$16 sps:$4 sm:$0xff]  }
 0x3bf   :  { %5101 = vmatprep.subr.bf16.mxu1 %v7066_v25 }
 0x3c2   :  { %5102 = vmatpush1.bf16.msra.mxu1 %v7064_v28 }
 0x3c3   :  { %5103 = vmatprep.subr.bf16.mxu1 %v7072_v22 }
 0x446   :  { %v3130_v35 = vpop.xlane.xlu0 %3129 }
 0x447   :  { %v3141_v59 = vmul.f32 0.0009765625, %v3130_v35  ;;  %v7067_v35 = vld [vmem:[#allocation11 + $0x140] ss:$16 sps:$4 sm:$0xff]  }
 0x449   :  { %v8298_v1 = vsub.f32 %v8215_v54, %v3141_v59  ;;  %v8301_v37 = vsub.f32 %v8218_v61, %v3141_v59  ;;  %v8304_v38 = vsub.f32 %v8238_v40, %v3141_v59  ;;  %v8307_v42 = vsub.f32 %v8254_v58, %v3141_v59 }
 0x44a   :  { %v3139_v39 = vpop.xlane.xlu0 %3138  ;;  %v8314_v54 = vsub.f32 %v8261_v10, %v3141_v59  ;;  %v8328_v47 = vsub.f32 %v8274_v17, %v3141_v59 }
 0x44b   :  { %v3142_v41 = vmul.f32 0.0009765625, %v3139_v39  ;;  %v3159_v43 = vmul.f32 %v8298_v1, %v8298_v1  ;;  %v3160_v44 = vmul.f32 %v8301_v37, %v8301_v37  ;;  %v3161_v61 = vmul.f32 %v8304_v38, %v8304_v38  ;;  %v7073_v39 = vld [vmem:[#allocation11 + $0x160] ss:$16 sps:$4 sm:$0xff]  }
 0x44c   :  { %v3162_v10 = vmul.f32 %v8307_v42, %v8307_v42  ;;  %v3164_v60 = vmul.f32 %v8328_v47, %v8328_v47 }
 0x44d   :  { %v3175_v45 = vadd.f32 %v3160_v44, %v3159_v43  ;;  %v8319_v40 = vsub.f32 %v8220_v49, %v3142_v41  ;;  %v8322_v46 = vsub.f32 %v8222_v3, %v3142_v41  ;;  %v8325_v58 = vsub.f32 %v8247_v56, %v3142_v41  ;;  %v7076_v43 = vld [vmem:[#allocation11 + $0x168] ss:$16 sps:$4 sm:$0xff]   ;;  %v7078_v44 = vld [vmem:[#allocation11 + $0x16c] ss:$16 sps:$4 sm:$0xff]  }
 0x44e   :  { %v8335_v51 = vsub.f32 %v8259_v9, %v3142_v41  ;;  %v8340_v3 = vsub.f32 %v8284_v24, %v3141_v59  ;;  %v3163_v56 = vmul.f32 %v8314_v54, %v8314_v54  ;;  %v8345_v52 = vsub.f32 %v8270_v14, %v3142_v41 }
 0x44f   :  { %v3176_v48 = vadd.f32 %v3175_v45, %v3161_v61  ;;  %v3167_v50 = vmul.f32 %v8319_v40, %v8319_v40  ;;  %v3168_v49 = vmul.f32 %v8322_v46, %v8322_v46  ;;  %v3169_v55 = vmul.f32 %v8325_v58, %v8325_v58  ;;  %v7081_v61 = vld [vmem:[#allocation11 + $0x184] ss:$16 sps:$4 sm:$0xff]   ;;  %v7084_v45 = vld [vmem:[#allocation11 + $0x18c] ss:$16 sps:$4 sm:$0xff]  }
 0x450   :  { %v8350_v9 = vsub.f32 %v8286_v26, %v3141_v59  ;;  %v8355_v24 = vsub.f32 %v8281_v29, %v3142_v41  ;;  %v3170_v2 = vmul.f32 %v8335_v51, %v8335_v51  ;;  %v3165_v14 = vmul.f32 %v8340_v3, %v8340_v3  ;;  %v7070_v59 = vld [vmem:[#allocation11 + $0x148] ss:$16 sps:$4 sm:$0xff]  }
 0x451   :  { %v3177_v17 = vadd.f32 %v3176_v48, %v3162_v10  ;;  %v3184_v57 = vadd.f32 %v3168_v49, %v3167_v50  ;;  %v8362_v5 = vsub.f32 %v8289_v31, %v3142_v41  ;;  %v3171_v26 = vmul.f32 %v8345_v52, %v8345_v52  ;;  %5104 = vmatpush1.bf16.msra.mxu1 %v7070_v59  ;;  %v7079_v10 = vld [vmem:[#allocation11 + $0x180] ss:$16 sps:$4 sm:$0xff]   ;;  %v7082_v48 = vld [vmem:[#allocation11 + $0x188] ss:$16 sps:$4 sm:$0xff]   ;;  %v7087_v50 = vld [vmem:[#allocation11 + $0x1a4] ss:$16 sps:$4 sm:$0xff]  }
 0x452   :  { %v3166_v7 = vmul.f32 %v8350_v9, %v8350_v9  ;;  %v8369_v8 = vsub.f32 %v8293_v34, %v3142_v41  ;;  %v3172_v13 = vmul.f32 %v8355_v24, %v8355_v24  ;;  %v7061_v34 = vld [vmem:[#allocation11 + $0x120] ss:$16 sps:$4 sm:$0xff]   ;;  %v7075_v41 = vld [vmem:[#allocation11 + $0x164] ss:$16 sps:$4 sm:$0xff]   ;;  %5105 = vmatprep.subr.bf16.mxu1 %v7078_v44  ;;  %v7090_v49 = vld [vmem:[#allocation11 + $0x1ac] ss:$16 sps:$4 sm:$0xff]  }
 0x453   :  { %v3178_v63 = vadd.f32 %v3177_v17, %v3163_v56  ;;  %v3185_v53 = vadd.f32 %v3184_v57, %v3169_v55  ;;  %v3173_v31 = vmul.f32 %v8362_v5, %v8362_v5  ;;  %4930 = vmatpush1.bf16.msra.mxu0 %v7061_v34  ;;  %v7085_v56 = vld [vmem:[#allocation11 + $0x1a0] ss:$16 sps:$4 sm:$0xff]   ;;  %v7088_v17 = vld [vmem:[#allocation11 + $0x1a8] ss:$16 sps:$4 sm:$0xff]   ;;  %v7093_v55 = vld [vmem:[#allocation11 + $0x1c4] ss:$16 sps:$4 sm:$0xff]  }
 0x454   :  { %v3174_v19 = vmul.f32 %v8369_v8, %v8369_v8  ;;  %4931 = vmatprep.subr.bf16.mxu0 %v7069_v30  ;;  %v7096_v57 = vld [vmem:[#allocation11 + $0x1cc] ss:$16 sps:$4 sm:$0xff]  }
 0x455   :  { %v3179_v4 = vadd.f32 %v3178_v63, %v3164_v60  ;;  %v3186_v6 = vadd.f32 %v3185_v53, %v3170_v2  ;;  %5106 = vmatpush1.bf16.msra.mxu1 %v7076_v43  ;;  %v7091_v60 = vld [vmem:[#allocation11 + $0x1c0] ss:$16 sps:$4 sm:$0xff]   ;;  %v7094_v63 = vld [vmem:[#allocation11 + $0x1c8] ss:$16 sps:$4 sm:$0xff]   ;;  %v7099_v2 = vld [vmem:[#allocation11 + $0x1e4] ss:$16 sps:$4 sm:$0xff]  }
 0x456   :  { %5107 = vmatprep.subr.bf16.mxu1 %v7084_v45  ;;  %v7102_v53 = vld [vmem:[#allocation11 + $0x1ec] ss:$16 sps:$4 sm:$0xff]  }
 0x457   :  { %v3180_v29 = vadd.f32 %v3179_v4, %v3165_v14  ;;  %v3187_v15 = vadd.f32 %v3186_v6, %v3171_v26  ;;  %4932 = vmatpush1.bf16.msra.mxu0 %v7067_v35  ;;  %v7097_v14 = vld [vmem:[#allocation11 + $0x1e0] ss:$16 sps:$4 sm:$0xff]   ;;  %v7100_v4 = vld [vmem:[#allocation11 + $0x1e8] ss:$16 sps:$4 sm:$0xff]   ;;  %v7105_v26 = vld [vmem:[#allocation11 + $0x204] ss:$16 sps:$4 sm:$0xff]  }
 0x458   :  { %4933 = vmatprep.subr.bf16.mxu0 %v7075_v41  ;;  %v7108_v6 = vld [vmem:[#allocation11 + $0x20c] ss:$16 sps:$4 sm:$0xff]  }
 0x459   :  { %v3181_v16 = vadd.f32 %v3180_v29, %v3166_v7  ;;  %v3188_v18 = vadd.f32 %v3187_v15, %v3172_v13  ;;  %5108 = vmatpush1.bf16.msra.mxu1 %v7082_v48 }
 0x45a   :  { %5109 = vmatprep.subr.bf16.mxu1 %v7090_v49 }
 0x45b   :  { %3182 = vadd.xlane.f32.xlu1 %v3181_v16  ;;  %v3189_v20 = vadd.f32 %v3188_v18, %v3173_v31  ;;  %4934 = vmatpush1.bf16.msra.mxu0 %v7073_v39  ;;  %v3120_v18 = vld [vmem:[#allocation8] sm:$0xff] }
 0x45c   :  { %4935 = vmatprep.subr.bf16.mxu0 %v7081_v61  ;;  %v8382_v23 = vrot.slane %v3120_v18, %v8264_v11  ;;  %v3223_v34 = vrot.slane %v3120_v18, %v8206_v36  ;;  %v3219_v28 = vrot.slane %v3120_v18, %v8201_v32  ;;  %v3231_v35 = vrot.slane %v3120_v18, %v8233_v0 }
 0x45d   :  { %v3190_v21 = vadd.f32 %v3189_v20, %v3174_v19  ;;  %5110 = vmatpush1.bf16.msra.mxu1 %v7088_v17  ;;  %v3121_v19 = vld [vmem:[#allocation10] sm:$0xff]  ;;  %v3235_v20 = vrot.slane %v3120_v18, %v8236_v27  ;;  %v3227_v59 = vrot.slane %v3120_v18, %v8228_v62  ;;  %v3247_v43 = vrot.slane %v3120_v18, %v8267_v12 }
 0x45e   :  { %5111 = vmatprep.subr.bf16.mxu1 %v7096_v57  ;;  %v8385_v25 = vrot.slane %v3121_v19, %v8264_v11  ;;  %v3280_v30 = vrot.slane %v3121_v19, %v8206_v36  ;;  %v3276_v22 = vrot.slane %v3121_v19, %v8201_v32  ;;  %v3288_v39 = vrot.slane %v3121_v19, %v8233_v0 }
 0x45f   :  { %3191 = vadd.xlane.f32.xlu1 %v3190_v21  ;;  %4936 = vmatpush1.bf16.msra.mxu0 %v7079_v10  ;;  %v8379_v21 = vrot.slane %v3121_v19, %v8236_v27  ;;  %v3284_v41 = vrot.slane %v3121_v19, %v8228_v62  ;;  %v3239_v11 = vrot.slane %v3120_v18, %v8243_v33 }
 0x460   :  { %4937 = vmatprep.subr.bf16.mxu0 %v7087_v50 }
 0x461   :  { %5112 = vmatpush1.bf16.msra.mxu1 %v7094_v63 }
 0x462   :  { %5113 = vmatprep.subr.bf16.mxu1 %v7102_v53 }
 0x463   :  { %4938 = vmatpush1.bf16.msra.mxu0 %v7085_v56 }
 0x464   :  { %4939 = vmatprep.subr.bf16.mxu0 %v7093_v55 }
 0x465   :  { %5114 = vmatpush1.bf16.msra.mxu1 %v7100_v4 }
 0x466   :  { %5126 = vmatprep.subr.bf16.mxu1 %v7108_v6 }
 0x467   :  { %4940 = vmatpush1.bf16.msra.mxu0 %v7091_v60 }
 0x468   :  { %4941 = vmatprep.subr.bf16.mxu0 %v7099_v2 }
 0x46b   :  { %4942 = vmatpush1.bf16.msra.mxu0 %v7097_v14 }
 0x46c   :  { %4954 = vmatprep.subr.bf16.mxu0 %v7105_v26 }
 0x4e8   :  { %v3183_v7 = vpop.xlane.xlu1 %3182 }
 0x4e9   :  { %v3193_v29 = vmul.f32 0.0009765625, %v3183_v7 }
 0x4eb   :  { %v3195_v13 = vadd.f32 1e-05, %v3193_v29 }
 0x4ec   :  { %v3192_v15 = vpop.xlane.xlu1 %3191 }
 0x4ed   :  { %7503 = vrsqrt.f32 %v3195_v13  ;;  %v3194_v16 = vmul.f32 0.0009765625, %v3192_v15 }
 0x4ef   :  { %v3196_v31 = vadd.f32 1e-05, %v3194_v16 }
 0x4f1   :  { %7505 = vrsqrt.f32 %v3196_v31 }
 0x4f7   :  { %v7504_v27 = vpop.eup %7503 }
 0x4f8   :  { %v3200_v44 = vmul.f32 %v7504_v27, %v8301_v37  ;;  %v3199_v61 = vmul.f32 %v7504_v27, %v8298_v1  ;;  %v3202_v45 = vmul.f32 %v7504_v27, %v8307_v42  ;;  %v3201_v10 = vmul.f32 %v7504_v27, %v8304_v38 }
 0x4f9   :  { %v3204_v48 = vmul.f32 %v7504_v27, %v8328_v47  ;;  %v3203_v50 = vmul.f32 %v7504_v27, %v8314_v54  ;;  %v3206_v49 = vmul.f32 %v7504_v27, %v8350_v9  ;;  %v3205_v56 = vmul.f32 %v7504_v27, %v8340_v3 }
 0x4fa   :  { %v3257_v17 = vmul.f32 %v3223_v34, %v3200_v44  ;;  %v3256_v55 = vmul.f32 %v3219_v28, %v3199_v61  ;;  %v3259_v57 = vmul.f32 %v3231_v35, %v3202_v45  ;;  %v3258_v60 = vmul.f32 %v3227_v59, %v3201_v10 }
 0x4fb   :  { %v3261_v63 = vmul.f32 %v3239_v11, %v3204_v48  ;;  %v3296_v37 = vrot.slane %v3121_v19, %v8243_v33  ;;  %v3260_v1 = vmul.f32 %v3235_v20, %v3203_v50  ;;  %v3304_v42 = vrot.slane %v3121_v19, %v8267_v12  ;;  %v7506_v2 = vpop.eup %7505 }
 0x4fc   :  { %v3314_v38 = vadd.f32 %v3280_v30, %v3257_v17  ;;  %v3313_v53 = vadd.f32 %v3276_v22, %v3256_v55  ;;  %v3263_v47 = vmul.f32 %v3247_v43, %v3206_v49  ;;  %v3262_v54 = vmul.f32 %v8382_v23, %v3205_v56  ;;  %v7103_v49 = vld [vmem:[#allocation11 + $0x200] ss:$16 sps:$4 sm:$0xff]  }
 0x4fd   :  { %v3208_v9 = vmul.f32 %v7506_v2, %v8322_v46  ;;  %v3207_v3 = vmul.f32 %v7506_v2, %v8319_v40  ;;  %v3210_v14 = vmul.f32 %v7506_v2, %v8335_v51  ;;  %v3209_v4 = vmul.f32 %v7506_v2, %v8325_v58 }
 0x4fe   :  { %v3330_v26 = vmax.f32 %v3314_v38, 0.0  ;;  %v3329_v6 = vmax.f32 %v3313_v53, 0.0  ;;  %v3316_v33 = vadd.f32 %v3288_v39, %v3259_v57  ;;  %v3315_v7 = vadd.f32 %v3284_v41, %v3258_v60  ;;  %v7111_v57 = vld [vmem:[#allocation11 + $0x224] ss:$16 sps:$4 sm:$0xff]   ;;  %v7114_v60 = vld [vmem:[#allocation11 + $0x22c] ss:$16 sps:$4 sm:$0xff]  }
 0x4ff   :  { %v3265_v29 = vmul.f32 %v3223_v34, %v3208_v9  ;;  %v3264_v12 = vmul.f32 %v3219_v28, %v3207_v3  ;;  %v3267_v13 = vmul.f32 %v3231_v35, %v3210_v14  ;;  %v3266_v15 = vmul.f32 %v3227_v59, %v3209_v4  ;;  %v7112_v38 = vld [vmem:[#allocation11 + $0x228] ss:$16 sps:$4 sm:$0xff]   ;;  %v7120_v9 = vld [vmem:[#allocation11 + $0x24c] ss:$16 sps:$4 sm:$0xff]  }
 0x500   :  { %v3212_v16 = vmul.f32 %v7506_v2, %v8355_v24  ;;  %v3318_v31 = vadd.f32 %v3296_v37, %v3261_v63  ;;  %v3211_v18 = vmul.f32 %v7506_v2, %v8345_v52  ;;  %v3317_v46 = vadd.f32 %v8379_v21, %v3260_v1  ;;  %v7109_v1 = vld [vmem:[#allocation11 + $0x220] ss:$16 sps:$4 sm:$0xff]   ;;  %v7118_v4 = vld [vmem:[#allocation11 + $0x248] ss:$16 sps:$4 sm:$0xff]  }
 0x501   :  { %v3322_v40 = vadd.f32 %v3280_v30, %v3265_v29  ;;  %v3321_v19 = vadd.f32 %v3276_v22, %v3264_v12  ;;  %v3324_v51 = vadd.f32 %v3288_v39, %v3267_v13  ;;  %v3323_v27 = vadd.f32 %v3284_v41, %v3266_v15  ;;  %v7106_v30 = vld [vmem:[#allocation11 + $0x208] ss:$16 sps:$4 sm:$0xff]   ;;  %v7132_v12 = vld [vmem:[#allocation11 + $0x28c] ss:$16 sps:$4 sm:$0xff]   ;;  %v7127_v13 = vld [vmem:[#allocation11 + $0x280] ss:$16 sps:$4 sm:$0xff]  }
 0x502   :  { %v3332_v58 = vmax.f32 %v3316_v33, 0.0  ;;  %v3331_v44 = vmax.f32 %v3315_v7, 0.0  ;;  %v3269_v61 = vmul.f32 %v3239_v11, %v3212_v16  ;;  %v3268_v45 = vmul.f32 %v3235_v20, %v3211_v18  ;;  %v7121_v7 = vld [vmem:[#allocation11 + $0x260] ss:$16 sps:$4 sm:$0xff]   ;;  %v7124_v29 = vld [vmem:[#allocation11 + $0x268] ss:$16 sps:$4 sm:$0xff]  }
 0x503   :  { %v3338_v10 = vmax.f32 %v3322_v40, 0.0  ;;  %v3337_v34 = vmax.f32 %v3321_v19, 0.0  ;;  %v3340_v28 = vmax.f32 %v3324_v51, 0.0  ;;  %v3339_v35 = vmax.f32 %v3323_v27, 0.0  ;;  %v7130_v15 = vld [vmem:[#allocation11 + $0x288] ss:$16 sps:$4 sm:$0xff]  }
 0x504   :  { %v3326_v59 = vadd.f32 %v3296_v37, %v3269_v61  ;;  %v3334_v48 = vmax.f32 %v3318_v31, 0.0  ;;  %v3325_v24 = vadd.f32 %v8379_v21, %v3268_v45  ;;  %v3214_v52 = vmul.f32 %v7506_v2, %v8369_v8  ;;  %v7135_v16 = vld [vmem:[#allocation11 + $0x2a4] ss:$16 sps:$4 sm:$0xff]   ;;  %v7138_v31 = vld [vmem:[#allocation11 + $0x2ac] ss:$16 sps:$4 sm:$0xff]  }
 0x505   :  { %v3346_v50 = vpack.c.bf16 %v3338_v10, %v3330_v26  ;;  %v3345_v22 = vpack.c.bf16 %v3337_v34, %v3329_v6  ;;  %v8417_v39 = vpack.c.bf16 %v3339_v35, %v3331_v44  ;;  %v3333_v41 = vmax.f32 %v3317_v46, 0.0  ;;  %v7126_v6 = vld [vmem:[#allocation11 + $0x26c] ss:$16 sps:$4 sm:$0xff]   ;;  %v7133_v18 = vld [vmem:[#allocation11 + $0x2a0] ss:$16 sps:$4 sm:$0xff]  }
 0x506   :  { %v3342_v56 = vmax.f32 %v3326_v59, 0.0  ;;  %v3341_v11 = vmax.f32 %v3325_v24, 0.0  ;;  %v3271_v20 = vmul.f32 %v3247_v43, %v3214_v52  ;;  %v3320_v17 = vadd.f32 %v3304_v42, %v3263_v47  ;;  %v7117_v47 = vld [vmem:[#allocation11 + $0x244] ss:$16 sps:$4 sm:$0xff]   ;;  %v7136_v46 = vld [vmem:[#allocation11 + $0x2a8] ss:$16 sps:$4 sm:$0xff]  }
 0x507   :  { %4943 = vmatprep.mubr.bf16.mxu0 %v3346_v50  ;;  %5115 = vmatprep.mubr.bf16.mxu1 %v3346_v50  ;;  %v3348_v55 = vpack.c.bf16 %v3340_v28, %v3332_v58  ;;  %v3213_v21 = vmul.f32 %v7506_v2, %v8362_v5  ;;  %v3319_v53 = vadd.f32 %v8385_v25, %v3262_v54  ;;  %v7123_v54 = vld [vmem:[#allocation11 + $0x264] ss:$16 sps:$4 sm:$0xff]   ;;  %v7144_v19 = vld [vmem:[#allocation11 + $0x2cc] ss:$16 sps:$4 sm:$0xff]   ;;  %v7139_v51 = vld [vmem:[#allocation11 + $0x2c0] ss:$16 sps:$4 sm:$0xff]  }
 0x508   :  { %4944 = vmatmul.mubr.bf16.vlgmr.msra.gmra.mrb[8].mxu0 %v3345_v22  ;;  %5116 = vmatmul.mubr.bf16.vlgmr.msra.gmra.mrb[12].mxu1 %v3345_v22  ;;  %v8420_v8 = vpack.c.bf16 %v3342_v56, %v3334_v48  ;;  %v8422_v63 = vpack.c.bf16 %v3341_v11, %v3333_v41  ;;  %v3328_v37 = vadd.f32 %v3304_v42, %v3271_v20  ;;  %v3336_v5 = vmax.f32 %v3320_v17, 0.0  ;;  %v7115_v42 = vld [vmem:[#allocation11 + $0x240] ss:$16 sps:$4 sm:$0xff]   ;;  %v7141_v40 = vld [vmem:[#allocation11 + $0x2c4] ss:$16 sps:$4 sm:$0xff]  }
 0x509   :  { %4955 = vmatpush1.bf16.msra.mxu0 %v7103_v49  ;;  %5127 = vmatpush1.bf16.msra.mxu1 %v7106_v30  ;;  %v3270_v43 = vmul.f32 %v8382_v23, %v3213_v21  ;;  %v3335_v26 = vmax.f32 %v3319_v53, 0.0  ;;  %v7142_v27 = vld [vmem:[#allocation11 + $0x2c8] ss:$16 sps:$4 sm:$0xff]   ;;  %v7147_v58 = vld [vmem:[#allocation11 + $0x2e4] ss:$16 sps:$4 sm:$0xff]  }
 0x50a   :  { %4986 = vmatprep.mubr.bf16.mxu0 %v3348_v55  ;;  %5158 = vmatprep.mubr.bf16.mxu1 %v3348_v55  ;;  %v3344_v2 = vmax.f32 %v3328_v37, 0.0  ;;  %v7150_v44 = vld [vmem:[#allocation11 + $0x2ec] ss:$16 sps:$4 sm:$0xff]   ;;  %v7145_v61 = vld [vmem:[#allocation11 + $0x2e0] ss:$16 sps:$4 sm:$0xff]  }
 0x50b   :  { %4956 = vmatprep.subr.bf16.mxu0 %v7111_v57  ;;  %5128 = vmatprep.subr.bf16.mxu1 %v7114_v60  ;;  %v3327_v3 = vadd.f32 %v8385_v25, %v3270_v43  ;;  %v7129_v25 = vld [vmem:[#allocation11 + $0x284] ss:$16 sps:$4 sm:$0xff]   ;;  %v7148_v45 = vld [vmem:[#allocation11 + $0x2e8] ss:$16 sps:$4 sm:$0xff]   ;;  %v7156_v34 = vld [vmem:[#allocation11 + $0x30c] ss:$16 sps:$4 sm:$0xff]  }
 0x50c   :  { %v8427_v14 = vpack.c.bf16 %v3344_v2, %v3336_v5  ;;  %v7153_v10 = vld [vmem:[#allocation11 + $0x304] ss:$16 sps:$4 sm:$0xff]   ;;  %v7151_v28 = vld [vmem:[#allocation11 + $0x300] ss:$16 sps:$4 sm:$0xff]   ;;  %v7154_v35 = vld [vmem:[#allocation11 + $0x308] ss:$16 sps:$4 sm:$0xff]  }
 0x50d   :  { %4957 = vmatpush1.bf16.msra.mxu0 %v7109_v1  ;;  %5129 = vmatpush1.bf16.msra.mxu1 %v7112_v38  ;;  %v3343_v23 = vmax.f32 %v3327_v3, 0.0  ;;  %v7159_v59 = vld [vmem:[#allocation11 + $0x324] ss:$16 sps:$4 sm:$0xff]   ;;  %v7162_v48 = vld [vmem:[#allocation11 + $0x32c] ss:$16 sps:$4 sm:$0xff]  }
 0x50e   :  { %4958 = vmatprep.subr.bf16.mxu0 %v7117_v47  ;;  %5130 = vmatprep.subr.bf16.mxu1 %v7120_v9  ;;  %v7157_v24 = vld [vmem:[#allocation11 + $0x320] ss:$16 sps:$4 sm:$0xff]   ;;  %v7160_v52 = vld [vmem:[#allocation11 + $0x328] ss:$16 sps:$4 sm:$0xff]   ;;  %v7165_v50 = vld [vmem:[#allocation11 + $0x344] ss:$16 sps:$4 sm:$0xff]  }
 0x50f   :  { %v8429_v33 = vpack.c.bf16 %v3343_v23, %v3335_v26  ;;  %v7168_v49 = vld [vmem:[#allocation11 + $0x34c] ss:$16 sps:$4 sm:$0xff]   ;;  %v7163_v30 = vld [vmem:[#allocation11 + $0x340] ss:$16 sps:$4 sm:$0xff]   ;;  %v7166_v22 = vld [vmem:[#allocation11 + $0x348] ss:$16 sps:$4 sm:$0xff]  }
 0x510   :  { %v7171_v41 = vld [vmem:[#allocation11 + $0x364] ss:$16 sps:$4 sm:$0xff]   ;;  %v7174_v56 = vld [vmem:[#allocation11 + $0x36c] ss:$16 sps:$4 sm:$0xff]   ;;  %v7169_v11 = vld [vmem:[#allocation11 + $0x360] ss:$16 sps:$4 sm:$0xff]  }
 0x511   :  { %4959 = vmatpush1.bf16.msra.mxu0 %v7115_v42  ;;  %5131 = vmatpush1.bf16.msra.mxu1 %v7118_v4  ;;  %v7172_v20 = vld [vmem:[#allocation11 + $0x368] ss:$16 sps:$4 sm:$0xff]   ;;  %v7177_v17 = vld [vmem:[#allocation11 + $0x384] ss:$16 sps:$4 sm:$0xff]   ;;  %v7180_v55 = vld [vmem:[#allocation11 + $0x38c] ss:$16 sps:$4 sm:$0xff]  }
 0x512   :  { %4960 = vmatprep.subr.bf16.mxu0 %v7123_v54  ;;  %5132 = vmatprep.subr.bf16.mxu1 %v7126_v6  ;;  %v7175_v57 = vld [vmem:[#allocation11 + $0x380] ss:$16 sps:$4 sm:$0xff]   ;;  %v7178_v60 = vld [vmem:[#allocation11 + $0x388] ss:$16 sps:$4 sm:$0xff]   ;;  %v7183_v21 = vld [vmem:[#allocation11 + $0x3a4] ss:$16 sps:$4 sm:$0xff]  }
 0x513   :  { %v7186_v37 = vld [vmem:[#allocation11 + $0x3ac] ss:$16 sps:$4 sm:$0xff]   ;;  %v7181_v1 = vld [vmem:[#allocation11 + $0x3a0] ss:$16 sps:$4 sm:$0xff]   ;;  %v7184_v38 = vld [vmem:[#allocation11 + $0x3a8] ss:$16 sps:$4 sm:$0xff]  }
 0x514   :  { %v7189_v43 = vld [vmem:[#allocation11 + $0x3c4] ss:$16 sps:$4 sm:$0xff]   ;;  %v7192_v53 = vld [vmem:[#allocation11 + $0x3cc] ss:$16 sps:$4 sm:$0xff]   ;;  %v7187_v47 = vld [vmem:[#allocation11 + $0x3c0] ss:$16 sps:$4 sm:$0xff]  }
 0x515   :  { %4961 = vmatpush1.bf16.msra.mxu0 %v7121_v7  ;;  %5133 = vmatpush1.bf16.msra.mxu1 %v7124_v29  ;;  %v7190_v9 = vld [vmem:[#allocation11 + $0x3c8] ss:$16 sps:$4 sm:$0xff]   ;;  %v7195_v5 = vld [vmem:[#allocation11 + $0x3e4] ss:$16 sps:$4 sm:$0xff]   ;;  %v7198_v2 = vld [vmem:[#allocation11 + $0x3ec] ss:$16 sps:$4 sm:$0xff]  }
 0x516   :  { %4962 = vmatprep.subr.bf16.mxu0 %v7129_v25  ;;  %5134 = vmatprep.subr.bf16.mxu1 %v7132_v12  ;;  %v7193_v3 = vld [vmem:[#allocation11 + $0x3e0] ss:$16 sps:$4 sm:$0xff]   ;;  %v7196_v42 = vld [vmem:[#allocation11 + $0x3e8] ss:$16 sps:$4 sm:$0xff]   ;;  %v7201_v4 = vld [vmem:[#allocation11 + $0x404] ss:$16 sps:$4 sm:$0xff]  }
 0x517   :  { %v7204_v26 = vld [vmem:[#allocation11 + $0x40c] ss:$16 sps:$4 sm:$0xff]   ;;  %v7199_v23 = vld [vmem:[#allocation11 + $0x400] ss:$16 sps:$4 sm:$0xff]   ;;  %v7202_v54 = vld [vmem:[#allocation11 + $0x408] ss:$16 sps:$4 sm:$0xff]  }
 0x518   :  { %v7207_v6 = vld [vmem:[#allocation11 + $0x424] ss:$16 sps:$4 sm:$0xff]   ;;  %v7210_v7 = vld [vmem:[#allocation11 + $0x42c] ss:$16 sps:$4 sm:$0xff]   ;;  %v7205_v29 = vld [vmem:[#allocation11 + $0x420] ss:$16 sps:$4 sm:$0xff]  }
 0x519   :  { %4963 = vmatpush1.bf16.msra.mxu0 %v7127_v13  ;;  %5135 = vmatpush1.bf16.msra.mxu1 %v7130_v15  ;;  %v7208_v25 = vld [vmem:[#allocation11 + $0x428] ss:$16 sps:$4 sm:$0xff]   ;;  %v7213_v12 = vld [vmem:[#allocation11 + $0x444] ss:$16 sps:$4 sm:$0xff]   ;;  %v7216_v13 = vld [vmem:[#allocation11 + $0x44c] ss:$16 sps:$4 sm:$0xff]  }
 0x51a   :  { %4964 = vmatprep.subr.bf16.mxu0 %v7135_v16  ;;  %5136 = vmatprep.subr.bf16.mxu1 %v7138_v31  ;;  %v7211_v15 = vld [vmem:[#allocation11 + $0x440] ss:$16 sps:$4 sm:$0xff]   ;;  %v7214_v16 = vld [vmem:[#allocation11 + $0x448] ss:$16 sps:$4 sm:$0xff]   ;;  %v7219_v31 = vld [vmem:[#allocation11 + $0x464] ss:$16 sps:$4 sm:$0xff]  }
 0x51d   :  { %4965 = vmatpush1.bf16.msra.mxu0 %v7133_v18  ;;  %5137 = vmatpush1.bf16.msra.mxu1 %v7136_v46  ;;  %v7217_v18 = vld [vmem:[#allocation11 + $0x460] ss:$16 sps:$4 sm:$0xff]   ;;  %v7220_v46 = vld [vmem:[#allocation11 + $0x468] ss:$16 sps:$4 sm:$0xff]  }
 0x51e   :  { %4966 = vmatprep.subr.bf16.mxu0 %v7141_v40  ;;  %5138 = vmatprep.subr.bf16.mxu1 %v7144_v19  ;;  %v7225_v40 = vld [vmem:[#allocation11 + $0x484] ss:$16 sps:$4 sm:$0xff]   ;;  %v7223_v19 = vld [vmem:[#allocation11 + $0x480] ss:$16 sps:$4 sm:$0xff]  }
 0x521   :  { %4967 = vmatpush1.bf16.msra.mxu0 %v7139_v51  ;;  %5139 = vmatpush1.bf16.msra.mxu1 %v7142_v27  ;;  %v7226_v51 = vld [vmem:[#allocation11 + $0x488] ss:$16 sps:$4 sm:$0xff]   ;;  %v7231_v27 = vld [vmem:[#allocation11 + $0x4a4] ss:$16 sps:$4 sm:$0xff]  }
 0x522   :  { %4968 = vmatprep.subr.bf16.mxu0 %v7147_v58  ;;  %5140 = vmatprep.subr.bf16.mxu1 %v7150_v44  ;;  %v7234_v58 = vld [vmem:[#allocation11 + $0x4ac] ss:$16 sps:$4 sm:$0xff]   ;;  %v7229_v44 = vld [vmem:[#allocation11 + $0x4a0] ss:$16 sps:$4 sm:$0xff]  }
 0x525   :  { %4969 = vmatpush1.bf16.msra.mxu0 %v7145_v61  ;;  %5141 = vmatpush1.bf16.msra.mxu1 %v7148_v45  ;;  %v7232_v61 = vld [vmem:[#allocation11 + $0x4a8] ss:$16 sps:$4 sm:$0xff]   ;;  %v7237_v45 = vld [vmem:[#allocation11 + $0x4c4] ss:$16 sps:$4 sm:$0xff]  }
 0x526   :  { %4970 = vmatprep.subr.bf16.mxu0 %v7153_v10  ;;  %5142 = vmatprep.subr.bf16.mxu1 %v7156_v34  ;;  %v7240_v10 = vld [vmem:[#allocation11 + $0x4cc] ss:$16 sps:$4 sm:$0xff]   ;;  %v7235_v34 = vld [vmem:[#allocation11 + $0x4c0] ss:$16 sps:$4 sm:$0xff]  }
 0x529   :  { %4971 = vmatpush1.bf16.msra.mxu0 %v7151_v28  ;;  %5143 = vmatpush1.bf16.msra.mxu1 %v7154_v35  ;;  %v7238_v28 = vld [vmem:[#allocation11 + $0x4c8] ss:$16 sps:$4 sm:$0xff]   ;;  %v7243_v35 = vld [vmem:[#allocation11 + $0x4e4] ss:$16 sps:$4 sm:$0xff]  }
 0x52a   :  { %4972 = vmatprep.subr.bf16.mxu0 %v7159_v59  ;;  %5144 = vmatprep.subr.bf16.mxu1 %v7162_v48  ;;  %v7246_v59 = vld [vmem:[#allocation11 + $0x4ec] ss:$16 sps:$4 sm:$0xff]   ;;  %v7241_v48 = vld [vmem:[#allocation11 + $0x4e0] ss:$16 sps:$4 sm:$0xff]  }
 0x52d   :  { %4973 = vmatpush1.bf16.msra.mxu0 %v7157_v24  ;;  %5145 = vmatpush1.bf16.msra.mxu1 %v7160_v52  ;;  %v7244_v24 = vld [vmem:[#allocation11 + $0x4e8] ss:$16 sps:$4 sm:$0xff]   ;;  %v7249_v52 = vld [vmem:[#allocation11 + $0x504] ss:$16 sps:$4 sm:$0xff]  }
 0x52e   :  { %4974 = vmatprep.subr.bf16.mxu0 %v7165_v50  ;;  %5146 = vmatprep.subr.bf16.mxu1 %v7168_v49  ;;  %v7252_v50 = vld [vmem:[#allocation11 + $0x50c] ss:$16 sps:$4 sm:$0xff]   ;;  %v7247_v49 = vld [vmem:[#allocation11 + $0x500] ss:$16 sps:$4 sm:$0xff]  }
 0x531   :  { %4975 = vmatpush1.bf16.msra.mxu0 %v7163_v30  ;;  %5147 = vmatpush1.bf16.msra.mxu1 %v7166_v22  ;;  %v7250_v30 = vld [vmem:[#allocation11 + $0x508] ss:$16 sps:$4 sm:$0xff]   ;;  %v7255_v22 = vld [vmem:[#allocation11 + $0x524] ss:$16 sps:$4 sm:$0xff]  }
 0x532   :  { %4976 = vmatprep.subr.bf16.mxu0 %v7171_v41  ;;  %5148 = vmatprep.subr.bf16.mxu1 %v7174_v56  ;;  %v7258_v41 = vld [vmem:[#allocation11 + $0x52c] ss:$16 sps:$4 sm:$0xff]   ;;  %v7253_v56 = vld [vmem:[#allocation11 + $0x520] ss:$16 sps:$4 sm:$0xff]  }
 0x535   :  { %4977 = vmatpush1.bf16.msra.mxu0 %v7169_v11  ;;  %5149 = vmatpush1.bf16.msra.mxu1 %v7172_v20  ;;  %v7256_v11 = vld [vmem:[#allocation11 + $0x528] ss:$16 sps:$4 sm:$0xff]   ;;  %v7261_v20 = vld [vmem:[#allocation11 + $0x544] ss:$16 sps:$4 sm:$0xff]  }
 0x536   :  { %4978 = vmatprep.subr.bf16.mxu0 %v7177_v17  ;;  %5150 = vmatprep.subr.bf16.mxu1 %v7180_v55  ;;  %v7264_v17 = vld [vmem:[#allocation11 + $0x54c] ss:$16 sps:$4 sm:$0xff]   ;;  %v7259_v55 = vld [vmem:[#allocation11 + $0x540] ss:$16 sps:$4 sm:$0xff]  }
 0x539   :  { %4979 = vmatpush1.bf16.msra.mxu0 %v7175_v57  ;;  %5151 = vmatpush1.bf16.msra.mxu1 %v7178_v60  ;;  %v7262_v57 = vld [vmem:[#allocation11 + $0x548] ss:$16 sps:$4 sm:$0xff]   ;;  %v7267_v60 = vld [vmem:[#allocation11 + $0x564] ss:$16 sps:$4 sm:$0xff]  }
 0x53a   :  { %4980 = vmatprep.subr.bf16.mxu0 %v7183_v21  ;;  %5152 = vmatprep.subr.bf16.mxu1 %v7186_v37  ;;  %v7270_v21 = vld [vmem:[#allocation11 + $0x56c] ss:$16 sps:$4 sm:$0xff]   ;;  %v7265_v37 = vld [vmem:[#allocation11 + $0x560] ss:$16 sps:$4 sm:$0xff]  }
 0x53d   :  { %4981 = vmatpush1.bf16.msra.mxu0 %v7181_v1  ;;  %5153 = vmatpush1.bf16.msra.mxu1 %v7184_v38  ;;  %v7268_v1 = vld [vmem:[#allocation11 + $0x568] ss:$16 sps:$4 sm:$0xff]   ;;  %v7273_v38 = vld [vmem:[#allocation11 + $0x584] ss:$16 sps:$4 sm:$0xff]  }
 0x53e   :  { %4982 = vmatprep.subr.bf16.mxu0 %v7189_v43  ;;  %5154 = vmatprep.subr.bf16.mxu1 %v7192_v53  ;;  %v7276_v43 = vld [vmem:[#allocation11 + $0x58c] ss:$16 sps:$4 sm:$0xff]   ;;  %v7271_v53 = vld [vmem:[#allocation11 + $0x580] ss:$16 sps:$4 sm:$0xff]  }
 0x541   :  { %4983 = vmatpush1.bf16.msra.mxu0 %v7187_v47  ;;  %5155 = vmatpush1.bf16.msra.mxu1 %v7190_v9  ;;  %v7274_v47 = vld [vmem:[#allocation11 + $0x588] ss:$16 sps:$4 sm:$0xff]   ;;  %v7279_v9 = vld [vmem:[#allocation11 + $0x5a4] ss:$16 sps:$4 sm:$0xff]  }
 0x542   :  { %4984 = vmatprep.subr.bf16.mxu0 %v7195_v5  ;;  %5156 = vmatprep.subr.bf16.mxu1 %v7198_v2  ;;  %v7282_v5 = vld [vmem:[#allocation11 + $0x5ac] ss:$16 sps:$4 sm:$0xff]   ;;  %v7277_v2 = vld [vmem:[#allocation11 + $0x5a0] ss:$16 sps:$4 sm:$0xff]  }
 0x545   :  { %4985 = vmatpush1.bf16.msra.mxu0 %v7193_v3  ;;  %5157 = vmatpush1.bf16.msra.mxu1 %v7196_v42  ;;  %v7280_v3 = vld [vmem:[#allocation11 + $0x5a8] ss:$16 sps:$4 sm:$0xff]   ;;  %v7285_v42 = vld [vmem:[#allocation11 + $0x5c4] ss:$16 sps:$4 sm:$0xff]  }
 0x546   :  { %4997 = vmatprep.subr.bf16.mxu0 %v7201_v4  ;;  %5169 = vmatprep.subr.bf16.mxu1 %v7204_v26  ;;  %v7288_v4 = vld [vmem:[#allocation11 + $0x5cc] ss:$16 sps:$4 sm:$0xff]   ;;  %v7283_v26 = vld [vmem:[#allocation11 + $0x5c0] ss:$16 sps:$4 sm:$0xff]  }
 0x548   :  { %4987 = vmatmul.mubr.bf16.vlgmr.msra.gmra.mrb[8].mxu0 %v8417_v39  ;;  %5159 = vmatmul.mubr.bf16.vlgmr.msra.gmra.mrb[12].mxu1 %v8417_v39  ;;  %v7222_v39 = vld [vmem:[#allocation11 + $0x46c] ss:$16 sps:$4 sm:$0xff]  }
 0x549   :  { %4998 = vmatpush1.bf16.msra.mxu0 %v7199_v23  ;;  %5029 = vmatprep.mubr.bf16.mxu0 %v8420_v8  ;;  %v7286_v23 = vld [vmem:[#allocation11 + $0x5c8] ss:$16 sps:$4 sm:$0xff]  }
 0x54a   :  { %5170 = vmatpush1.bf16.msra.mxu1 %v7202_v54  ;;  %5201 = vmatprep.mubr.bf16.mxu1 %v8420_v8  ;;  %v7228_v8 = vld [vmem:[#allocation11 + $0x48c] ss:$16 sps:$4 sm:$0xff]   ;;  %v7291_v54 = vld [vmem:[#allocation11 + $0x5e4] ss:$16 sps:$4 sm:$0xff]  }
 0x54b   :  { %4999 = vmatprep.subr.bf16.mxu0 %v7207_v6  ;;  %5171 = vmatprep.subr.bf16.mxu1 %v7210_v7  ;;  %v7294_v6 = vld [vmem:[#allocation11 + $0x5ec] ss:$16 sps:$4 sm:$0xff]   ;;  %v7289_v7 = vld [vmem:[#allocation11 + $0x5e0] ss:$16 sps:$4 sm:$0xff]  }
 0x54d   :  { %5000 = vmatpush1.bf16.msra.mxu0 %v7205_v29  ;;  %v7292_v29 = vld [vmem:[#allocation11 + $0x5e8] ss:$16 sps:$4 sm:$0xff]  }
 0x54e   :  { %5172 = vmatpush1.bf16.msra.mxu1 %v7208_v25  ;;  %5001 = vmatprep.subr.bf16.mxu0 %v7213_v12  ;;  %v7297_v25 = vld [vmem:[#allocation11 + $0x604] ss:$16 sps:$4 sm:$0xff]   ;;  %v7300_v12 = vld [vmem:[#allocation11 + $0x60c] ss:$16 sps:$4 sm:$0xff]  }
 0x54f   :  { %5173 = vmatprep.subr.bf16.mxu1 %v7216_v13  ;;  %v7295_v13 = vld [vmem:[#allocation11 + $0x600] ss:$16 sps:$4 sm:$0xff]  }
 0x551   :  { %5002 = vmatpush1.bf16.msra.mxu0 %v7211_v15  ;;  %v7298_v15 = vld [vmem:[#allocation11 + $0x608] ss:$16 sps:$4 sm:$0xff]  }
 0x552   :  { %5174 = vmatpush1.bf16.msra.mxu1 %v7214_v16  ;;  %5003 = vmatprep.subr.bf16.mxu0 %v7219_v31  ;;  %v7303_v16 = vld [vmem:[#allocation11 + $0x624] ss:$16 sps:$4 sm:$0xff]   ;;  %v7306_v31 = vld [vmem:[#allocation11 + $0x62c] ss:$16 sps:$4 sm:$0xff]  }
 0x553   :  { %5175 = vmatprep.subr.bf16.mxu1 %v7222_v39  ;;  %v7301_v39 = vld [vmem:[#allocation11 + $0x620] ss:$16 sps:$4 sm:$0xff]  }
 0x555   :  { %5004 = vmatpush1.bf16.msra.mxu0 %v7217_v18  ;;  %v7304_v18 = vld [vmem:[#allocation11 + $0x628] ss:$16 sps:$4 sm:$0xff]  }
 0x556   :  { %5176 = vmatpush1.bf16.msra.mxu1 %v7220_v46  ;;  %5005 = vmatprep.subr.bf16.mxu0 %v7225_v40  ;;  %v7309_v46 = vld [vmem:[#allocation11 + $0x644] ss:$16 sps:$4 sm:$0xff]   ;;  %v7312_v40 = vld [vmem:[#allocation11 + $0x64c] ss:$16 sps:$4 sm:$0xff]  }
 0x557   :  { %5177 = vmatprep.subr.bf16.mxu1 %v7228_v8  ;;  %v7307_v8 = vld [vmem:[#allocation11 + $0x640] ss:$16 sps:$4 sm:$0xff]  }
 0x559   :  { %5006 = vmatpush1.bf16.msra.mxu0 %v7223_v19  ;;  %v7310_v19 = vld [vmem:[#allocation11 + $0x648] ss:$16 sps:$4 sm:$0xff]  }
 0x55a   :  { %5178 = vmatpush1.bf16.msra.mxu1 %v7226_v51  ;;  %5007 = vmatprep.subr.bf16.mxu0 %v7231_v27  ;;  %v7315_v51 = vld [vmem:[#allocation11 + $0x664] ss:$16 sps:$4 sm:$0xff]   ;;  %v7313_v27 = vld [vmem:[#allocation11 + $0x660] ss:$16 sps:$4 sm:$0xff]  }
 0x55b   :  { %5179 = vmatprep.subr.bf16.mxu1 %v7234_v58  ;;  %v7316_v58 = vld [vmem:[#allocation11 + $0x668] ss:$16 sps:$4 sm:$0xff]  }
 0x55d   :  { %5008 = vmatpush1.bf16.msra.mxu0 %v7229_v44  ;;  %v7321_v44 = vld [vmem:[#allocation11 + $0x684] ss:$16 sps:$4 sm:$0xff]  }
 0x55e   :  { %5180 = vmatpush1.bf16.msra.mxu1 %v7232_v61  ;;  %5009 = vmatprep.subr.bf16.mxu0 %v7237_v45  ;;  %v7324_v61 = vld [vmem:[#allocation11 + $0x68c] ss:$16 sps:$4 sm:$0xff]   ;;  %v7322_v45 = vld [vmem:[#allocation11 + $0x688] ss:$16 sps:$4 sm:$0xff]  }
 0x55f   :  { %5181 = vmatprep.subr.bf16.mxu1 %v7240_v10  ;;  %v7327_v10 = vld [vmem:[#allocation11 + $0x6a4] ss:$16 sps:$4 sm:$0xff]  }
 0x561   :  { %5010 = vmatpush1.bf16.msra.mxu0 %v7235_v34  ;;  %v7330_v34 = vld [vmem:[#allocation11 + $0x6ac] ss:$16 sps:$4 sm:$0xff]  }
 0x562   :  { %5182 = vmatpush1.bf16.msra.mxu1 %v7238_v28  ;;  %5011 = vmatprep.subr.bf16.mxu0 %v7243_v35  ;;  %v7325_v28 = vld [vmem:[#allocation11 + $0x6a0] ss:$16 sps:$4 sm:$0xff]   ;;  %v7328_v35 = vld [vmem:[#allocation11 + $0x6a8] ss:$16 sps:$4 sm:$0xff]  }
 0x563   :  { %5183 = vmatprep.subr.bf16.mxu1 %v7246_v59  ;;  %v7333_v59 = vld [vmem:[#allocation11 + $0x6c4] ss:$16 sps:$4 sm:$0xff]  }
 0x565   :  { %5012 = vmatpush1.bf16.msra.mxu0 %v7241_v48  ;;  %v7336_v48 = vld [vmem:[#allocation11 + $0x6cc] ss:$16 sps:$4 sm:$0xff]  }
 0x566   :  { %5184 = vmatpush1.bf16.msra.mxu1 %v7244_v24  ;;  %5013 = vmatprep.subr.bf16.mxu0 %v7249_v52  ;;  %v7331_v24 = vld [vmem:[#allocation11 + $0x6c0] ss:$16 sps:$4 sm:$0xff]   ;;  %v7334_v52 = vld [vmem:[#allocation11 + $0x6c8] ss:$16 sps:$4 sm:$0xff]  }
 0x567   :  { %5185 = vmatprep.subr.bf16.mxu1 %v7252_v50  ;;  %v7339_v50 = vld [vmem:[#allocation11 + $0x6e4] ss:$16 sps:$4 sm:$0xff]  }
 0x569   :  { %5014 = vmatpush1.bf16.msra.mxu0 %v7247_v49  ;;  %v7342_v49 = vld [vmem:[#allocation11 + $0x6ec] ss:$16 sps:$4 sm:$0xff]  }
 0x56a   :  { %5186 = vmatpush1.bf16.msra.mxu1 %v7250_v30  ;;  %5015 = vmatprep.subr.bf16.mxu0 %v7255_v22  ;;  %v7337_v30 = vld [vmem:[#allocation11 + $0x6e0] ss:$16 sps:$4 sm:$0xff]   ;;  %v7340_v22 = vld [vmem:[#allocation11 + $0x6e8] ss:$16 sps:$4 sm:$0xff]  }
 0x56b   :  { %5187 = vmatprep.subr.bf16.mxu1 %v7258_v41  ;;  %v7345_v41 = vld [vmem:[#allocation11 + $0x704] ss:$16 sps:$4 sm:$0xff]  }
 0x56d   :  { %5016 = vmatpush1.bf16.msra.mxu0 %v7253_v56  ;;  %v7348_v56 = vld [vmem:[#allocation11 + $0x70c] ss:$16 sps:$4 sm:$0xff]  }
 0x56e   :  { %5188 = vmatpush1.bf16.msra.mxu1 %v7256_v11  ;;  %5017 = vmatprep.subr.bf16.mxu0 %v7261_v20  ;;  %v7343_v11 = vld [vmem:[#allocation11 + $0x700] ss:$16 sps:$4 sm:$0xff]   ;;  %v7346_v20 = vld [vmem:[#allocation11 + $0x708] ss:$16 sps:$4 sm:$0xff]  }
 0x56f   :  { %5189 = vmatprep.subr.bf16.mxu1 %v7264_v17  ;;  %v7351_v17 = vld [vmem:[#allocation11 + $0x724] ss:$16 sps:$4 sm:$0xff]  }
 0x571   :  { %5018 = vmatpush1.bf16.msra.mxu0 %v7259_v55  ;;  %v7354_v55 = vld [vmem:[#allocation11 + $0x72c] ss:$16 sps:$4 sm:$0xff]  }
 0x572   :  { %5190 = vmatpush1.bf16.msra.mxu1 %v7262_v57  ;;  %5019 = vmatprep.subr.bf16.mxu0 %v7267_v60  ;;  %v7349_v57 = vld [vmem:[#allocation11 + $0x720] ss:$16 sps:$4 sm:$0xff]   ;;  %v7352_v60 = vld [vmem:[#allocation11 + $0x728] ss:$16 sps:$4 sm:$0xff]  }
 0x573   :  { %5191 = vmatprep.subr.bf16.mxu1 %v7270_v21  ;;  %v7357_v21 = vld [vmem:[#allocation11 + $0x744] ss:$16 sps:$4 sm:$0xff]  }
 0x575   :  { %5020 = vmatpush1.bf16.msra.mxu0 %v7265_v37  ;;  %v7360_v37 = vld [vmem:[#allocation11 + $0x74c] ss:$16 sps:$4 sm:$0xff]  }
 0x576   :  { %5192 = vmatpush1.bf16.msra.mxu1 %v7268_v1  ;;  %5021 = vmatprep.subr.bf16.mxu0 %v7273_v38  ;;  %v7355_v1 = vld [vmem:[#allocation11 + $0x740] ss:$16 sps:$4 sm:$0xff]   ;;  %v7358_v38 = vld [vmem:[#allocation11 + $0x748] ss:$16 sps:$4 sm:$0xff]  }
 0x577   :  { %5193 = vmatprep.subr.bf16.mxu1 %v7276_v43  ;;  %v7363_v43 = vld [vmem:[#allocation11 + $0x764] ss:$16 sps:$4 sm:$0xff]  }
 0x579   :  { %5022 = vmatpush1.bf16.msra.mxu0 %v7271_v53  ;;  %v7366_v53 = vld [vmem:[#allocation11 + $0x76c] ss:$16 sps:$4 sm:$0xff]  }
 0x57a   :  { %5194 = vmatpush1.bf16.msra.mxu1 %v7274_v47  ;;  %5023 = vmatprep.subr.bf16.mxu0 %v7279_v9  ;;  %v7361_v47 = vld [vmem:[#allocation11 + $0x760] ss:$16 sps:$4 sm:$0xff]   ;;  %v7364_v9 = vld [vmem:[#allocation11 + $0x768] ss:$16 sps:$4 sm:$0xff]  }
 0x57b   :  { %5195 = vmatprep.subr.bf16.mxu1 %v7282_v5  ;;  %v7369_v5 = vld [vmem:[#allocation11 + $0x784] ss:$16 sps:$4 sm:$0xff]  }
 0x57d   :  { %5024 = vmatpush1.bf16.msra.mxu0 %v7277_v2  ;;  %v7372_v2 = vld [vmem:[#allocation11 + $0x78c] ss:$16 sps:$4 sm:$0xff]  }
 0x57e   :  { %5196 = vmatpush1.bf16.msra.mxu1 %v7280_v3  ;;  %5025 = vmatprep.subr.bf16.mxu0 %v7285_v42  ;;  %v7367_v3 = vld [vmem:[#allocation11 + $0x780] ss:$16 sps:$4 sm:$0xff]   ;;  %v7370_v42 = vld [vmem:[#allocation11 + $0x788] ss:$16 sps:$4 sm:$0xff]  }
 0x57f   :  { %5197 = vmatprep.subr.bf16.mxu1 %v7288_v4  ;;  %v7375_v4 = vld [vmem:[#allocation11 + $0x7a4] ss:$16 sps:$4 sm:$0xff]  }
 0x581   :  { %5026 = vmatpush1.bf16.msra.mxu0 %v7283_v26  ;;  %v7378_v26 = vld [vmem:[#allocation11 + $0x7ac] ss:$16 sps:$4 sm:$0xff]  }
 0x582   :  { %5198 = vmatpush1.bf16.msra.mxu1 %v7286_v23  ;;  %5027 = vmatprep.subr.bf16.mxu0 %v7291_v54  ;;  %v7373_v23 = vld [vmem:[#allocation11 + $0x7a0] ss:$16 sps:$4 sm:$0xff]   ;;  %v7376_v54 = vld [vmem:[#allocation11 + $0x7a8] ss:$16 sps:$4 sm:$0xff]  }
 0x583   :  { %5199 = vmatprep.subr.bf16.mxu1 %v7294_v6  ;;  %v7381_v6 = vld [vmem:[#allocation11 + $0x7c4] ss:$16 sps:$4 sm:$0xff]  }
 0x585   :  { %5028 = vmatpush1.bf16.msra.mxu0 %v7289_v7  ;;  %v7384_v7 = vld [vmem:[#allocation11 + $0x7cc] ss:$16 sps:$4 sm:$0xff]  }
 0x586   :  { %5200 = vmatpush1.bf16.msra.mxu1 %v7292_v29  ;;  %5040 = vmatprep.subr.bf16.mxu0 %v7297_v25  ;;  %v7379_v29 = vld [vmem:[#allocation11 + $0x7c0] ss:$16 sps:$4 sm:$0xff]   ;;  %v7382_v25 = vld [vmem:[#allocation11 + $0x7c8] ss:$16 sps:$4 sm:$0xff]  }
 0x587   :  { %5212 = vmatprep.subr.bf16.mxu1 %v7300_v12  ;;  %v7387_v12 = vld [vmem:[#allocation11 + $0x7e4] ss:$16 sps:$4 sm:$0xff]  }
 0x588   :  { %5030 = vmatmul.mubr.bf16.vlgmr.msra.gmra.mrb[8].mxu0 %v8422_v63 }
 0x589   :  { %5202 = vmatmul.mubr.bf16.vlgmr.msra.gmra.mrb[12].mxu1 %v8422_v63  ;;  %5041 = vmatpush1.bf16.msra.mxu0 %v7295_v13  ;;  %v7318_v63 = vld [vmem:[#allocation11 + $0x66c] ss:$16 sps:$4 sm:$0xff]  }
 0x58a   :  { %5072 = vmatprep.mubr.bf16.mxu0 %v8427_v14  ;;  %5213 = vmatpush1.bf16.msra.mxu1 %v7298_v15  ;;  %v7390_v13 = vld [vmem:[#allocation11 + $0x7ec] ss:$16 sps:$4 sm:$0xff]   ;;  %v7385_v15 = vld [vmem:[#allocation11 + $0x7e0] ss:$16 sps:$4 sm:$0xff]  }
 0x58b   :  { %5244 = vmatprep.mubr.bf16.mxu1 %v8427_v14  ;;  %5042 = vmatprep.subr.bf16.mxu0 %v7303_v16  ;;  %v7319_v14 = vld [vmem:[#allocation11 + $0x680] ss:$16 sps:$4 sm:$0xff]   ;;  %v7388_v16 = vld [vmem:[#allocation11 + $0x7e8] ss:$16 sps:$4 sm:$0xff]  }
 0x58c   :  { %5214 = vmatprep.subr.bf16.mxu1 %v7306_v31  ;;  %v3609_v31 = vld [vmem:[#allocation13] sm:$0xf] }
 0x58d   :  { %5043 = vmatpush1.bf16.msra.mxu0 %v7301_v39  ;;  %v3614_v39 = vrot.slane %v3609_v31, %v8201_v32 }
 0x58e   :  { %5215 = vmatpush1.bf16.msra.mxu1 %v7304_v18  ;;  %5044 = vmatprep.subr.bf16.mxu0 %v7309_v46  ;;  %v3618_v18 = vrot.slane %v3609_v31, %v8206_v36 }
 0x58f   :  { %5216 = vmatprep.subr.bf16.mxu1 %v7312_v40  ;;  %v3622_v40 = vrot.slane %v3609_v31, %v8228_v62 }
 0x591   :  { %5045 = vmatpush1.bf16.msra.mxu0 %v7307_v8 }
 0x592   :  { %5217 = vmatpush1.bf16.msra.mxu1 %v7310_v19  ;;  %5046 = vmatprep.subr.bf16.mxu0 %v7315_v51 }
 0x593   :  { %5218 = vmatprep.subr.bf16.mxu1 %v7318_v63 }
 0x595   :  { %5047 = vmatpush1.bf16.msra.mxu0 %v7313_v27  ;;  %v3626_v27 = vrot.slane %v3609_v31, %v8233_v0 }
 0x596   :  { %5219 = vmatpush1.bf16.msra.mxu1 %v7316_v58  ;;  %5048 = vmatprep.subr.bf16.mxu0 %v7321_v44 }
 0x597   :  { %5220 = vmatprep.subr.bf16.mxu1 %v7324_v61 }
 0x599   :  { %5049 = vmatpush1.bf16.msra.mxu0 %v7319_v14 }
 0x59a   :  { %5221 = vmatpush1.bf16.msra.mxu1 %v7322_v45  ;;  %5050 = vmatprep.subr.bf16.mxu0 %v7327_v10 }
 0x59b   :  { %5222 = vmatprep.subr.bf16.mxu1 %v7330_v34 }
 0x59d   :  { %5051 = vmatpush1.bf16.msra.mxu0 %v7325_v28 }
 0x59e   :  { %5223 = vmatpush1.bf16.msra.mxu1 %v7328_v35  ;;  %5052 = vmatprep.subr.bf16.mxu0 %v7333_v59 }
 0x59f   :  { %5224 = vmatprep.subr.bf16.mxu1 %v7336_v48 }
 0x5a1   :  { %5053 = vmatpush1.bf16.msra.mxu0 %v7331_v24 }
 0x5a2   :  { %5225 = vmatpush1.bf16.msra.mxu1 %v7334_v52  ;;  %5054 = vmatprep.subr.bf16.mxu0 %v7339_v50 }
 0x5a3   :  { %5226 = vmatprep.subr.bf16.mxu1 %v7342_v49 }
 0x5a5   :  { %5055 = vmatpush1.bf16.msra.mxu0 %v7337_v30 }
 0x5a6   :  { %5227 = vmatpush1.bf16.msra.mxu1 %v7340_v22  ;;  %5056 = vmatprep.subr.bf16.mxu0 %v7345_v41  ;;  %v7391_v22 = vld [vmem:[#allocation17] ss:$8 sps:$4 sm:$0xff]   ;;  %v7393_v41 = vld [vmem:[#allocation17 + $0x4] ss:$8 sps:$4 sm:$0xff]  }
 0x5a7   :  { %5228 = vmatprep.subr.bf16.mxu1 %v7348_v56  ;;  %v7396_v56 = vld [vmem:[#allocation17 + $0x14] ss:$8 sps:$4 sm:$0xff]  }
 0x5a9   :  { %5057 = vmatpush1.bf16.msra.mxu0 %v7343_v11  ;;  %v7394_v11 = vld [vmem:[#allocation17 + $0x10] ss:$8 sps:$4 sm:$0xff]  }
 0x5aa   :  { %5229 = vmatpush1.bf16.msra.mxu1 %v7346_v20  ;;  %5058 = vmatprep.subr.bf16.mxu0 %v7351_v17  ;;  %v7399_v20 = vld [vmem:[#allocation17 + $0x24] ss:$8 sps:$4 sm:$0xff]   ;;  %v7397_v17 = vld [vmem:[#allocation17 + $0x20] ss:$8 sps:$4 sm:$0xff]  }
 0x5ab   :  { %5230 = vmatprep.subr.bf16.mxu1 %v7354_v55  ;;  %v7402_v55 = vld [vmem:[#allocation17 + $0x34] ss:$8 sps:$4 sm:$0xff]  }
 0x5ad   :  { %5059 = vmatpush1.bf16.msra.mxu0 %v7349_v57  ;;  %v7400_v57 = vld [vmem:[#allocation17 + $0x30] ss:$8 sps:$4 sm:$0xff]  }
 0x5ae   :  { %5231 = vmatpush1.bf16.msra.mxu1 %v7352_v60  ;;  %5060 = vmatprep.subr.bf16.mxu0 %v7357_v21  ;;  %v7405_v60 = vld [vmem:[#allocation17 + $0x44] ss:$8 sps:$4 sm:$0xff]   ;;  %v7403_v21 = vld [vmem:[#allocation17 + $0x40] ss:$8 sps:$4 sm:$0xff]  }
 0x5af   :  { %5232 = vmatprep.subr.bf16.mxu1 %v7360_v37  ;;  %v7408_v37 = vld [vmem:[#allocation17 + $0x54] ss:$8 sps:$4 sm:$0xff]  }
 0x5b1   :  { %5061 = vmatpush1.bf16.msra.mxu0 %v7355_v1  ;;  %v7406_v1 = vld [vmem:[#allocation17 + $0x50] ss:$8 sps:$4 sm:$0xff]  }
 0x5b2   :  { %5233 = vmatpush1.bf16.msra.mxu1 %v7358_v38  ;;  %5062 = vmatprep.subr.bf16.mxu0 %v7363_v43  ;;  %v7411_v38 = vld [vmem:[#allocation17 + $0x64] ss:$8 sps:$4 sm:$0xff]   ;;  %v7409_v43 = vld [vmem:[#allocation17 + $0x60] ss:$8 sps:$4 sm:$0xff]  }
 0x5b3   :  { %5234 = vmatprep.subr.bf16.mxu1 %v7366_v53  ;;  %v7414_v53 = vld [vmem:[#allocation17 + $0x74] ss:$8 sps:$4 sm:$0xff]  }
 0x5b5   :  { %5063 = vmatpush1.bf16.msra.mxu0 %v7361_v47  ;;  %v7412_v47 = vld [vmem:[#allocation17 + $0x70] ss:$8 sps:$4 sm:$0xff]  }
 0x5b6   :  { %5235 = vmatpush1.bf16.msra.mxu1 %v7364_v9  ;;  %5064 = vmatprep.subr.bf16.mxu0 %v7369_v5  ;;  %v7417_v9 = vld [vmem:[#allocation17 + $0x84] ss:$8 sps:$4 sm:$0xff]   ;;  %v7415_v5 = vld [vmem:[#allocation17 + $0x80] ss:$8 sps:$4 sm:$0xff]  }
 0x5b7   :  { %5236 = vmatprep.subr.bf16.mxu1 %v7372_v2  ;;  %v7420_v2 = vld [vmem:[#allocation17 + $0x94] ss:$8 sps:$4 sm:$0xff]  }
 0x5b9   :  { %5065 = vmatpush1.bf16.msra.mxu0 %v7367_v3  ;;  %v7418_v3 = vld [vmem:[#allocation17 + $0x90] ss:$8 sps:$4 sm:$0xff]  }
 0x5ba   :  { %5237 = vmatpush1.bf16.msra.mxu1 %v7370_v42  ;;  %5066 = vmatprep.subr.bf16.mxu0 %v7375_v4 }
 0x5bb   :  { %5238 = vmatprep.subr.bf16.mxu1 %v7378_v26 }
 0x5bd   :  { %5067 = vmatpush1.bf16.msra.mxu0 %v7373_v23 }
 0x5be   :  { %5239 = vmatpush1.bf16.msra.mxu1 %v7376_v54  ;;  %5068 = vmatprep.subr.bf16.mxu0 %v7381_v6 }
 0x5bf   :  { %5240 = vmatprep.subr.bf16.mxu1 %v7384_v7 }
 0x5c1   :  { %5069 = vmatpush1.bf16.msra.mxu0 %v7379_v29 }
 0x5c2   :  { %5241 = vmatpush1.bf16.msra.mxu1 %v7382_v25  ;;  %5070 = vmatprep.subr.bf16.mxu0 %v7387_v12 }
 0x5c3   :  { %5242 = vmatprep.subr.bf16.mxu1 %v7390_v13 }
 0x5c5   :  { %5071 = vmatpush1.bf16.msra.mxu0 %v7385_v15 }
 0x5c6   :  { %5243 = vmatpush1.bf16.msra.mxu1 %v7388_v16  ;;  %5776 = vmatprep.subr.bf16.mxu0 %v7393_v41 }
 0x5c8   :  { %5073 = vmatmul.mubr.bf16.vlgmr.msra.gmra.mrb[8].mxu0 %v8429_v33 }
 0x5c9   :  { %5245 = vmatmul.mubr.bf16.vlgmr.msra.gmra.mrb[12].mxu1 %v8429_v33  ;;  %5777 = vmatpush1.bf16.msra.mxu0 %v7391_v22 }
 0x5ca   :  { %5778 = vmatprep.subr.bf16.mxu0 %v7396_v56 }
 0x5cd   :  { %5779 = vmatpush1.bf16.msra.mxu0 %v7394_v11 }
 0x5ce   :  { %5780 = vmatprep.subr.bf16.mxu0 %v7399_v20 }
 0x5d1   :  { %5781 = vmatpush1.bf16.msra.mxu0 %v7397_v17  ;;  %v5255_v17 = vld [vmem:[#allocation14] sm:$0xf] }
 0x5d2   :  { %5782 = vmatprep.subr.bf16.mxu0 %v7402_v55  ;;  %v5256_v55 = vld [vmem:[#allocation16] sm:$0xf] }
 0x5d5   :  { %5783 = vmatpush1.bf16.msra.mxu0 %v7400_v57  ;;  %v5318_v57 = vrot.slane %v5255_v17, %v8206_v36 }
 0x5d6   :  { %5784 = vmatprep.subr.bf16.mxu0 %v7405_v60  ;;  %v5314_v60 = vrot.slane %v5255_v17, %v8201_v32 }
 0x5d9   :  { %5785 = vmatpush1.bf16.msra.mxu0 %v7403_v21 }
 0x5da   :  { %5786 = vmatprep.subr.bf16.mxu0 %v7408_v37  ;;  %v5347_v37 = vrot.slane %v5256_v55, %v8206_v36 }
 0x5dd   :  { %5787 = vmatpush1.bf16.msra.mxu0 %v7406_v1  ;;  %v5343_v1 = vrot.slane %v5256_v55, %v8201_v32 }
 0x5de   :  { %5788 = vmatprep.subr.bf16.mxu0 %v7411_v38  ;;  %v5326_v38 = vrot.slane %v5255_v17, %v8233_v0 }
 0x5e1   :  { %5789 = vmatpush1.bf16.msra.mxu0 %v7409_v43  ;;  %v5322_v43 = vrot.slane %v5255_v17, %v8228_v62  ;;  %v7460_v17 = vld [vmem:[#allocation17 + $0x170] ss:$8 sps:$4 sm:$0xff]  }
 0x5e2   :  { %5790 = vmatprep.subr.bf16.mxu0 %v7414_v53 }
 0x5e5   :  { %5791 = vmatpush1.bf16.msra.mxu0 %v7412_v47 }
 0x5e6   :  { %5792 = vmatprep.subr.bf16.mxu0 %v7417_v9 }
 0x5e9   :  { %5793 = vmatpush1.bf16.msra.mxu0 %v7415_v5 }
 0x5ea   :  { %5794 = vmatprep.subr.bf16.mxu0 %v7420_v2 }
 0x5ed   :  { %5795 = vmatpush1.bf16.msra.mxu0 %v7418_v3  ;;  %v5355_v3 = vrot.slane %v5256_v55, %v8233_v0 }
 0x69b   :  { %v5074_v46 = vpop.f32.mrb[8].mxu0 }
 0x69c   :  { %v8444_v8 = vadd.f32 %v5074_v46, %v3614_v39  ;;  %v5246_v19 = vpop.f32.mrb[12].mxu1  ;;  %v5076_v51 = vpop.f32.mrb[9].mxu0 }
 0x69d   :  { %v8446_v63 = vadd.f32 %v5076_v51, %v3618_v18  ;;  %v5248_v58 = vpop.f32.mrb[13].mxu1  ;;  %v5078_v44 = vpop.f32.mrb[10].mxu0  ;;  %v6920_v45 = vadd.f32 %v5246_v19, %v3622_v40 }
 0x69e   :  { %v8449_v61 = vadd.f32 %v5078_v44, %v3614_v39  ;;  %v5250_v33 = vpop.f32.mrb[14].mxu1  ;;  %v5080_v14 = vpop.f32.mrb[11].mxu0  ;;  %v6921_v35 = vadd.f32 %v5248_v58, %v3626_v27 }
 0x69f   :  { %v5257_v10 = vadd.f32 %v8446_v63, %v8444_v8  ;;  %v6919_v34 = vadd.f32 %v5080_v14, %v3618_v18  ;;  %v5252_v28 = vpop.f32.mrb[15].mxu1  ;;  %v6922_v59 = vadd.f32 %v5250_v33, %v3622_v40  ;;  %v7421_v33 = vld [vmem:[#allocation17 + $0xa0] ss:$8 sps:$4 sm:$0xff]   ;;  %v7423_v14 = vld [vmem:[#allocation17 + $0xa4] ss:$8 sps:$4 sm:$0xff]  }
 0x6a0   :  { %v6923_v52 = vadd.f32 %v5252_v28, %v3626_v27  ;;  %5796 = vmatprep.subr.bf16.mxu0 %v7423_v14  ;;  %v7427_v28 = vld [vmem:[#allocation17 + $0xc0] ss:$8 sps:$4 sm:$0xff]  }
 0x6a1   :  { %v5262_v48 = vadd.f32 %v6919_v34, %v8449_v61  ;;  %v5258_v24 = vadd.f32 %v6920_v45, %v5257_v10  ;;  %5797 = vmatpush1.bf16.msra.mxu0 %v7421_v33  ;;  %v7424_v10 = vld [vmem:[#allocation17 + $0xb0] ss:$8 sps:$4 sm:$0xff]   ;;  %v7439_v14 = vld [vmem:[#allocation17 + $0x100] ss:$8 sps:$4 sm:$0xff]  }
 0x6a3   :  { %v5259_v50 = vadd.f32 %v6921_v35, %v5258_v24  ;;  %v5263_v49 = vadd.f32 %v6922_v59, %v5262_v48  ;;  %v7435_v48 = vld [vmem:[#allocation17 + $0xe4] ss:$8 sps:$4 sm:$0xff]   ;;  %v7433_v24 = vld [vmem:[#allocation17 + $0xe0] ss:$8 sps:$4 sm:$0xff]  }
 0x6a5   :  { %5260 = vadd.xlane.f32.xlu0 %v5259_v50  ;;  %v5264_v30 = vadd.f32 %v6923_v52, %v5263_v49  ;;  %v7436_v50 = vld [vmem:[#allocation17 + $0xf0] ss:$8 sps:$4 sm:$0xff]   ;;  %v7441_v49 = vld [vmem:[#allocation17 + $0x104] ss:$8 sps:$4 sm:$0xff]  }
 0x6a7   :  { %5265 = vadd.xlane.f32.xlu1 %v5264_v30 }
 0x732   :  { %v5261_v42 = vpop.xlane.xlu0 %5260 }
 0x733   :  { %v5268_v4 = vmul.f32 0.001953125, %v5261_v42  ;;  %v5351_v42 = vrot.slane %v5256_v55, %v8228_v62  ;;  %v7465_v55 = vld [vmem:[#allocation17 + $0x184] ss:$8 sps:$4 sm:$0xff]  }
 0x734   :  { %v5266_v26 = vpop.xlane.xlu1 %5265 }
 0x735   :  { %v8455_v23 = vsub.f32 %v8444_v8, %v5268_v4  ;;  %v8458_v54 = vsub.f32 %v8446_v63, %v5268_v4  ;;  %v5269_v6 = vmul.f32 0.001953125, %v5266_v26  ;;  %v8460_v7 = vsub.f32 %v6920_v45, %v5268_v4  ;;  %v7426_v45 = vld [vmem:[#allocation17 + $0xb4] ss:$8 sps:$4 sm:$0xff]  }
 0x736   :  { %v8462_v29 = vsub.f32 %v6921_v35, %v5268_v4  ;;  %5798 = vmatprep.subr.bf16.mxu0 %v7426_v45  ;;  %v7432_v35 = vld [vmem:[#allocation17 + $0xd4] ss:$8 sps:$4 sm:$0xff]  }
 0x737   :  { %v8465_v25 = vsub.f32 %v8449_v61, %v5269_v6  ;;  %v8467_v12 = vsub.f32 %v6919_v34, %v5269_v6  ;;  %v5278_v13 = vmul.f32 %v8455_v23, %v8455_v23  ;;  %v5279_v15 = vmul.f32 %v8458_v54, %v8458_v54  ;;  %v7429_v34 = vld [vmem:[#allocation17 + $0xc4] ss:$8 sps:$4 sm:$0xff]   ;;  %5799 = vmatpush1.bf16.msra.mxu0 %v7424_v10 }
 0x738   :  { %v5280_v16 = vmul.f32 %v8460_v7, %v8460_v7  ;;  %v8475_v31 = vsub.f32 %v6922_v59, %v5269_v6  ;;  %v8477_v18 = vsub.f32 %v6923_v52, %v5269_v6  ;;  %v5281_v8 = vmul.f32 %v8462_v29, %v8462_v29  ;;  %5800 = vmatprep.subr.bf16.mxu0 %v7429_v34  ;;  %v7430_v59 = vld [vmem:[#allocation17 + $0xd0] ss:$8 sps:$4 sm:$0xff]   ;;  %v7438_v52 = vld [vmem:[#allocation17 + $0xf4] ss:$8 sps:$4 sm:$0xff]  }
 0x739   :  { %v5286_v39 = vadd.f32 %v5279_v15, %v5278_v13  ;;  %v5282_v46 = vmul.f32 %v8465_v25, %v8465_v25  ;;  %v5283_v40 = vmul.f32 %v8467_v12, %v8467_v12  ;;  %v7444_v34 = vld [vmem:[#allocation17 + $0x114] ss:$8 sps:$4 sm:$0xff]  }
 0x73a   :  { %v5284_v51 = vmul.f32 %v8475_v31, %v8475_v31  ;;  %v5285_v58 = vmul.f32 %v8477_v18, %v8477_v18 }
 0x73b   :  { %v5287_v19 = vadd.f32 %v5286_v39, %v5280_v16  ;;  %v5291_v63 = vadd.f32 %v5283_v40, %v5282_v46  ;;  %5801 = vmatpush1.bf16.msra.mxu0 %v7427_v28 }
 0x73c   :  { %5802 = vmatprep.subr.bf16.mxu0 %v7432_v35 }
 0x73d   :  { %v5288_v27 = vadd.f32 %v5287_v19, %v5281_v8  ;;  %v5292_v44 = vadd.f32 %v5291_v63, %v5284_v51 }
 0x73f   :  { %5289 = vadd.xlane.f32.xlu0 %v5288_v27  ;;  %v5293_v61 = vadd.f32 %v5292_v44, %v5285_v58  ;;  %5803 = vmatpush1.bf16.msra.mxu0 %v7430_v59  ;;  %v7442_v59 = vld [vmem:[#allocation17 + $0x110] ss:$8 sps:$4 sm:$0xff]  }
 0x740   :  { %5804 = vmatprep.subr.bf16.mxu0 %v7435_v48  ;;  %v7447_v48 = vld [vmem:[#allocation17 + $0x124] ss:$8 sps:$4 sm:$0xff]  }
 0x741   :  { %5294 = vadd.xlane.f32.xlu1 %v5293_v61 }
 0x743   :  { %5805 = vmatpush1.bf16.msra.mxu0 %v7433_v24  ;;  %v7445_v24 = vld [vmem:[#allocation17 + $0x120] ss:$8 sps:$4 sm:$0xff]  }
 0x744   :  { %5806 = vmatprep.subr.bf16.mxu0 %v7438_v52  ;;  %v7450_v52 = vld [vmem:[#allocation17 + $0x134] ss:$8 sps:$4 sm:$0xff]  }
 0x747   :  { %5807 = vmatpush1.bf16.msra.mxu0 %v7436_v50  ;;  %v7448_v50 = vld [vmem:[#allocation17 + $0x130] ss:$8 sps:$4 sm:$0xff]  }
 0x748   :  { %5819 = vmatprep.subr.bf16.mxu0 %v7441_v49  ;;  %v7453_v49 = vld [vmem:[#allocation17 + $0x144] ss:$8 sps:$4 sm:$0xff]  }
 0x7cc   :  { %v5290_v30 = vpop.xlane.xlu0 %5289 }
 0x7cd   :  { %v5296_v22 = vmul.f32 0.001953125, %v5290_v30  ;;  %v7451_v30 = vld [vmem:[#allocation17 + $0x140] ss:$8 sps:$4 sm:$0xff]  }
 0x7ce   :  { %v5295_v41 = vpop.xlane.xlu1 %5294 }
 0x7cf   :  { %v5298_v56 = vadd.f32 1e-05, %v5296_v22  ;;  %v5297_v11 = vmul.f32 0.001953125, %v5295_v41  ;;  %v7456_v22 = vld [vmem:[#allocation17 + $0x154] ss:$8 sps:$4 sm:$0xff]  }
 0x7d0   :  { %v7454_v41 = vld [vmem:[#allocation17 + $0x150] ss:$8 sps:$4 sm:$0xff]  }
 0x7d1   :  { %7507 = vrsqrt.f32 %v5298_v56  ;;  %v5299_v20 = vadd.f32 1e-05, %v5297_v11  ;;  %v7459_v56 = vld [vmem:[#allocation17 + $0x164] ss:$8 sps:$4 sm:$0xff]   ;;  %v7457_v11 = vld [vmem:[#allocation17 + $0x160] ss:$8 sps:$4 sm:$0xff]  }
 0x7d3   :  { %7509 = vrsqrt.f32 %v5299_v20  ;;  %v7462_v20 = vld [vmem:[#allocation17 + $0x174] ss:$8 sps:$4 sm:$0xff]  }
 0x7db   :  { %v7508_v21 = vpop.eup %7507 }
 0x7dc   :  { %v5303_v53 = vmul.f32 %v7508_v21, %v8458_v54  ;;  %v5302_v47 = vmul.f32 %v7508_v21, %v8455_v23  ;;  %v5305_v9 = vmul.f32 %v7508_v21, %v8462_v29  ;;  %v5304_v5 = vmul.f32 %v7508_v21, %v8460_v7  ;;  %v7466_v21 = vld [vmem:[#allocation17 + $0x190] ss:$8 sps:$4 sm:$0xff]  }
 0x7dd   :  { %v7510_v2 = vpop.eup %7509 }
 0x7de   :  { %v5307_v4 = vmul.f32 %v7510_v2, %v8467_v12  ;;  %v5332_v26 = vmul.f32 %v5318_v57, %v5303_v53  ;;  %v5306_v6 = vmul.f32 %v7510_v2, %v8465_v25  ;;  %v5331_v13 = vmul.f32 %v5314_v60, %v5302_v47  ;;  %v7477_v53 = vld [vmem:[#allocation17 + $0x1c4] ss:$8 sps:$4 sm:$0xff]   ;;  %v7475_v47 = vld [vmem:[#allocation17 + $0x1c0] ss:$8 sps:$4 sm:$0xff]  }
 0x7df   :  { %v5309_v15 = vmul.f32 %v7510_v2, %v8477_v18  ;;  %v5334_v54 = vmul.f32 %v5326_v38, %v5305_v9  ;;  %v5308_v23 = vmul.f32 %v7510_v2, %v8475_v31  ;;  %v5333_v16 = vmul.f32 %v5322_v43, %v5304_v5  ;;  %v7480_v9 = vld [vmem:[#allocation17 + $0x1d4] ss:$8 sps:$4 sm:$0xff]   ;;  %v7478_v5 = vld [vmem:[#allocation17 + $0x1d0] ss:$8 sps:$4 sm:$0xff]   ;;  %v7483_v2 = vld [vmem:[#allocation17 + $0x1e4] ss:$8 sps:$4 sm:$0xff]  }
 0x7e0   :  { %v5336_v29 = vmul.f32 %v5318_v57, %v5307_v4  ;;  %v5361_v39 = vadd.f32 %v5347_v37, %v5332_v26  ;;  %v5335_v7 = vmul.f32 %v5314_v60, %v5306_v6  ;;  %v5360_v46 = vadd.f32 %v5343_v1, %v5331_v13  ;;  %v7463_v57 = vld [vmem:[#allocation17 + $0x180] ss:$8 sps:$4 sm:$0xff]   ;;  %v7468_v60 = vld [vmem:[#allocation17 + $0x194] ss:$8 sps:$4 sm:$0xff]   ;;  %v7484_v4 = vld [vmem:[#allocation17 + $0x1f0] ss:$8 sps:$4 sm:$0xff]  }
 0x7e1   :  { %v5338_v40 = vmul.f32 %v5326_v38, %v5309_v15  ;;  %v5337_v0 = vmul.f32 %v5322_v43, %v5308_v23  ;;  %v5362_v8 = vadd.f32 %v5351_v42, %v5333_v16  ;;  %v5363_v12 = vadd.f32 %v5355_v3, %v5334_v54  ;;  %v7474_v38 = vld [vmem:[#allocation17 + $0x1b4] ss:$8 sps:$4 sm:$0xff]   ;;  %v7472_v43 = vld [vmem:[#allocation17 + $0x1b0] ss:$8 sps:$4 sm:$0xff]   ;;  %v5444_v26 = vld [vmem:[#allocation19] sm:$0x3] }
 0x7e2   :  { %v5365_v62 = vadd.f32 %v5347_v37, %v5336_v29  ;;  %v5364_v19 = vadd.f32 %v5343_v1, %v5335_v7  ;;  %v5369_v25 = vmax.f32 %v5361_v39, 0.0  ;;  %v5368_v58 = vmax.f32 %v5360_v46, 0.0  ;;  %v7471_v37 = vld [vmem:[#allocation17 + $0x1a4] ss:$8 sps:$4 sm:$0xff]   ;;  %v7469_v1 = vld [vmem:[#allocation17 + $0x1a0] ss:$8 sps:$4 sm:$0xff]  }
 0x7e3   :  { %v5367_v51 = vadd.f32 %v5355_v3, %v5338_v40  ;;  %v5366_v63 = vadd.f32 %v5351_v42, %v5337_v0  ;;  %v5370_v61 = vmax.f32 %v5362_v8, 0.0  ;;  %v5371_v10 = vmax.f32 %v5363_v12, 0.0  ;;  %v7481_v3 = vld [vmem:[#allocation17 + $0x1e0] ss:$8 sps:$4 sm:$0xff]   ;;  %v7486_v42 = vld [vmem:[#allocation17 + $0x1f4] ss:$8 sps:$4 sm:$0xff]  }
 0x7e4   :  { %v5373_v27 = vmax.f32 %v5365_v62, 0.0  ;;  %v5372_v18 = vmax.f32 %v5364_v19, 0.0  ;;  %v5449_v6 = vrot.slane %v5444_v26, %v8201_v32  ;;  %v5453_v13 = vrot.slane %v5444_v26, %v8206_v36  ;;  %v7487_v8 = vld [vmem:[%s8581_s13 + $0x40] sm:$0xff]  }
 0x7e5   :  { %v5375_v44 = vmax.f32 %v5367_v51, 0.0  ;;  %v5374_v31 = vmax.f32 %v5366_v63, 0.0  ;;  %v7488_v62 = vld [vmem:[%s8581_s13] sm:$0xff]   ;;  %6874 = vmatprep.subr.bf16.mxu1 %v7487_v8 }
 0x7e6   :  { %v5377_v33 = vpack.c.bf16 %v5373_v27, %v5369_v25  ;;  %v5376_v45 = vpack.c.bf16 %v5372_v18, %v5368_v58  ;;  %6875 = vmatpush3.bf16.msra.mxu1 %v7488_v62 }
 0x7e7   :  { %v8505_v28 = vpack.c.bf16 %v5374_v31, %v5370_v61  ;;  %v5379_v35 = vpack.c.bf16 %v5375_v44, %v5371_v10  ;;  %v7489_v10 = vld [vmem:[%s8581_s13 + $0x48] sm:$0xff]  }
 0x7e8   :  { %5808 = vmatprep.mubr.bf16.mxu0 %v5377_v33  ;;  %6876 = vmatprep.subr.bf16.mxu1 %v7489_v10 }
 0x7e9   :  { %5809 = vmatmul.mubr.bf16.vlgmr.msra.gmra.mrb[12].mxu0 %v5376_v45 }
 0x7ea   :  { %5820 = vmatpush1.bf16.msra.mxu0 %v7439_v14  ;;  %5851 = vmatprep.mubr.bf16.mxu0 %v5379_v35  ;;  %v7492_v35 = vld [vmem:[%s8581_s13 + $0x10] sm:$0xff]  }
 0x7eb   :  { %5821 = vmatprep.subr.bf16.mxu0 %v7444_v34  ;;  %v7490_v34 = vld [vmem:[%s8581_s13 + $0x8] sm:$0xff]  }
 0x7ec   :  { %6877 = vmatpush3.bf16.msra.mxu1 %v7490_v34 }
 0x7ee   :  { %5822 = vmatpush1.bf16.msra.mxu0 %v7442_v59  ;;  %v7493_v59 = vld [vmem:[%s8581_s13 + $0x58] sm:$0xff]  }
 0x7ef   :  { %5823 = vmatprep.subr.bf16.mxu0 %v7447_v48  ;;  %v7494_v48 = vld [vmem:[%s8581_s13 + $0x18] sm:$0xff]  }
 0x7f2   :  { %5824 = vmatpush1.bf16.msra.mxu0 %v7445_v24  ;;  %v7495_v24 = vld [vmem:[%s8581_s13 + $0x60] sm:$0xff]  }
 0x7f3   :  { %5825 = vmatprep.subr.bf16.mxu0 %v7450_v52  ;;  %v7496_v52 = vld [vmem:[%s8581_s13 + $0x20] sm:$0xff]  }
 0x7f6   :  { %5826 = vmatpush1.bf16.msra.mxu0 %v7448_v50  ;;  %v7497_v50 = vld [vmem:[%s8581_s13 + $0x68] sm:$0xff]  }
 0x7f7   :  { %5827 = vmatprep.subr.bf16.mxu0 %v7453_v49  ;;  %v7498_v49 = vld [vmem:[%s8581_s13 + $0x28] sm:$0xff]  }
 0x7fa   :  { %5828 = vmatpush1.bf16.msra.mxu0 %v7451_v30  ;;  %v7499_v30 = vld [vmem:[%s8581_s13 + $0x70] sm:$0xff]  }
 0x7fb   :  { %5829 = vmatprep.subr.bf16.mxu0 %v7456_v22  ;;  %v7500_v22 = vld [vmem:[%s8581_s13 + $0x30] sm:$0xff]  }
 0x7fe   :  { %5830 = vmatpush1.bf16.msra.mxu0 %v7454_v41  ;;  %v7501_v41 = vld [vmem:[%s8581_s13 + $0x78] sm:$0xff]  }
 0x7ff   :  { %5831 = vmatprep.subr.bf16.mxu0 %v7459_v56  ;;  %v7502_v56 = vld [vmem:[%s8581_s13 + $0x38] sm:$0xff]  }
 0x802   :  { %5832 = vmatpush1.bf16.msra.mxu0 %v7457_v11 }
 0x803   :  { %5833 = vmatprep.subr.bf16.mxu0 %v7462_v20 }
 0x806   :  { %5834 = vmatpush1.bf16.msra.mxu0 %v7460_v17 }
 0x807   :  { %5835 = vmatprep.subr.bf16.mxu0 %v7465_v55 }
 0x80a   :  { %5836 = vmatpush1.bf16.msra.mxu0 %v7463_v57 }
 0x80b   :  { %5837 = vmatprep.subr.bf16.mxu0 %v7468_v60 }
 0x80e   :  { %5838 = vmatpush1.bf16.msra.mxu0 %v7466_v21  ;;  %v5862_v21 = vld [vmem:[#allocation20] sm:$0x3] }
 0x80f   :  { %5839 = vmatprep.subr.bf16.mxu0 %v7471_v37  ;;  %v5863_v37 = vld [vmem:[#allocation22] sm:$0x3] }
 0x812   :  { %5840 = vmatpush1.bf16.msra.mxu0 %v7469_v1  ;;  %v5901_v1 = vrot.slane %v5862_v21, %v8201_v32 }
 0x813   :  { %5841 = vmatprep.subr.bf16.mxu0 %v7474_v38  ;;  %v5905_v38 = vrot.slane %v5862_v21, %v8206_v36 }
 0x816   :  { %5842 = vmatpush1.bf16.msra.mxu0 %v7472_v43 }
 0x817   :  { %5843 = vmatprep.subr.bf16.mxu0 %v7477_v53 }
 0x81a   :  { %5844 = vmatpush1.bf16.msra.mxu0 %v7475_v47 }
 0x81b   :  { %5845 = vmatprep.subr.bf16.mxu0 %v7480_v9  ;;  %v5916_v9 = vrot.slane %v5863_v37, %v8201_v32 }
 0x81e   :  { %5846 = vmatpush1.bf16.msra.mxu0 %v7478_v5  ;;  %v5920_v5 = vrot.slane %v5863_v37, %v8206_v36  ;;  %v6855_v36 = vld [vmem:[#allocation23] ss:$0 sm:$0xff] }
 0x81f   :  { %5847 = vmatprep.subr.bf16.mxu0 %v7483_v2 }
 0x822   :  { %5848 = vmatpush1.bf16.msra.mxu0 %v7481_v3 }
 0x823   :  { %5849 = vmatprep.subr.bf16.mxu0 %v7486_v42 }
 0x826   :  { %5850 = vmatpush1.bf16.msra.mxu0 %v7484_v4 }
 0x829   :  { %5852 = vmatmul.mubr.bf16.vlgmr.msra.gmra.mrb[12].mxu0 %v8505_v28  ;;  %v7491_v28 = vld [vmem:[%s8581_s13 + $0x50] sm:$0xff]  }
 0x82a   :  { %6878 = vmatprep.subr.bf16.mxu1 %v7491_v28 }
 0x82b   :  { %6879 = vmatpush3.bf16.msra.mxu1 %v7492_v35 }
 0x82c   :  { %6880 = vmatprep.subr.bf16.mxu1 %v7493_v59 }
 0x82f   :  { %6881 = vmatpush3.bf16.msra.mxu1 %v7494_v48 }
 0x830   :  { %6882 = vmatprep.subr.bf16.mxu1 %v7495_v24 }
 0x833   :  { %6883 = vmatpush3.bf16.msra.mxu1 %v7496_v52 }
 0x834   :  { %6884 = vmatprep.subr.bf16.mxu1 %v7497_v50 }
 0x837   :  { %6885 = vmatpush3.bf16.msra.mxu1 %v7498_v49 }
 0x838   :  { %6886 = vmatprep.subr.bf16.mxu1 %v7499_v30 }
 0x83b   :  { %6887 = vmatpush3.bf16.msra.mxu1 %v7500_v22 }
 0x83c   :  { %6888 = vmatprep.subr.bf16.mxu1 %v7501_v41 }
 0x83f   :  { %6889 = vmatpush3.bf16.msra.mxu1 %v7502_v56 }
 0x8fc   :  { %v5853_v15 = vpop.f32.mrb[12].mxu0 }
 0x8fd   :  { %v6924_v54 = vadd.f32 %v5853_v15, %v5449_v6  ;;  %v5855_v23 = vpop.f32.mrb[13].mxu0 }
 0x8fe   :  { %v6925_v16 = vadd.f32 %v5855_v23, %v5453_v13  ;;  %v5857_v29 = vpop.f32.mrb[14].mxu0 }
 0x8ff   :  { %v6926_v39 = vadd.f32 %v5857_v29, %v5449_v6  ;;  %v5859_v7 = vpop.f32.mrb[15].mxu0 }
 0x900   :  { %v6927_v46 = vadd.f32 %v5859_v7, %v5453_v13  ;;  %v5864_v40 = vadd.f32 %v6925_v16, %v6924_v54 }
 0x902   :  { %5865 = vadd.xlane.f32.xlu0 %v5864_v40  ;;  %v5867_v0 = vadd.f32 %v6927_v46, %v6926_v39 }
 0x904   :  { %5868 = vadd.xlane.f32.xlu1 %v5867_v0 }
 0x98f   :  { %v5866_v19 = vpop.xlane.xlu0 %5865 }
 0x990   :  { %v5871_v12 = vmul.f32 0.00390625, %v5866_v19 }
 0x991   :  { %v5869_v51 = vpop.xlane.xlu1 %5868 }
 0x992   :  { %v5873_v63 = vsub.f32 %v6924_v54, %v5871_v12  ;;  %v5874_v25 = vsub.f32 %v6925_v16, %v5871_v12  ;;  %v5872_v27 = vmul.f32 0.00390625, %v5869_v51 }
 0x994   :  { %v5875_v58 = vsub.f32 %v6926_v39, %v5872_v27  ;;  %v5876_v18 = vsub.f32 %v6927_v46, %v5872_v27  ;;  %v5877_v44 = vmul.f32 %v5873_v63, %v5873_v63  ;;  %v5878_v61 = vmul.f32 %v5874_v25, %v5874_v25 }
 0x996   :  { %v5881_v31 = vadd.f32 %v5878_v61, %v5877_v44  ;;  %v5879_v33 = vmul.f32 %v5875_v58, %v5875_v58  ;;  %v5880_v14 = vmul.f32 %v5876_v18, %v5876_v18 }
 0x998   :  { %5882 = vadd.xlane.f32.xlu0 %v5881_v31  ;;  %v5884_v45 = vadd.f32 %v5880_v14, %v5879_v33  ;;  %v6873_v14 = vld [vmem:[#allocation2] ss:$0 sm:$0xff] }
 0x99a   :  { %5885 = vadd.xlane.f32.xlu1 %v5884_v45 }
 0xa25   :  { %v5883_v11 = vpop.xlane.xlu0 %5882 }
 0xa26   :  { %v5887_v20 = vmul.f32 0.00390625, %v5883_v11 }
 0xa27   :  { %v5886_v17 = vpop.xlane.xlu1 %5885 }
 0xa28   :  { %v5889_v55 = vadd.f32 1e-05, %v5887_v20  ;;  %v5888_v57 = vmul.f32 0.00390625, %v5886_v17 }
 0xa2a   :  { %7511 = vrsqrt.f32 %v5889_v55  ;;  %v5890_v60 = vadd.f32 1e-05, %v5888_v57 }
 0xa2c   :  { %7513 = vrsqrt.f32 %v5890_v60 }
 0xa34   :  { %v7512_v43 = vpop.eup %7511 }
 0xa35   :  { %v5893_v53 = vmul.f32 %v7512_v43, %v5873_v63  ;;  %v5894_v47 = vmul.f32 %v7512_v43, %v5874_v25  ;;  %v6872_v25 = vld [vmem:[#allocation25] ss:$0 sm:$0xff] }
 0xa36   :  { %v7514_v2 = vpop.eup %7513 }
 0xa37   :  { %v5895_v3 = vmul.f32 %v7514_v2, %v5875_v58  ;;  %v5896_v42 = vmul.f32 %v7514_v2, %v5876_v18  ;;  %v5909_v4 = vmul.f32 %v5905_v38, %v5894_v47  ;;  %v5908_v26 = vmul.f32 %v5901_v1, %v5893_v53 }
 0xa39   :  { %v5911_v6 = vmul.f32 %v5905_v38, %v5896_v42  ;;  %v5924_v13 = vadd.f32 %v5920_v5, %v5909_v4  ;;  %v5910_v15 = vmul.f32 %v5901_v1, %v5895_v3  ;;  %v5923_v54 = vadd.f32 %v5916_v9, %v5908_v26 }
 0xa3b   :  { %v5926_v23 = vadd.f32 %v5920_v5, %v5911_v6  ;;  %v5925_v16 = vadd.f32 %v5916_v9, %v5910_v15  ;;  %v5928_v29 = vmax.f32 %v5924_v13, 0.0  ;;  %v5927_v7 = vmax.f32 %v5923_v54, 0.0 }
 0xa3d   :  { %v5930_v39 = vmax.f32 %v5926_v23, 0.0  ;;  %v5929_v46 = vmax.f32 %v5925_v16, 0.0 }
 0xa3f   :  { %v5932_v40 = vpack.c.bf16 %v5930_v39, %v5928_v29  ;;  %v5931_v0 = vpack.c.bf16 %v5929_v46, %v5927_v7 }
 0xa41   :  { %6100 = vmatprep.mubr.bf16.mxu1 %v5932_v40 }
 0xa42   :  { %6101 = vmatmul.mubr.bf16.vlgmr.msra.gmra.mrb[16].mxu1 %v5931_v0 }
 0xb15   :  { %v6890_v32 = vpop.f32.mrb[16].mxu1 }
 0xb16   :  { %v6891_v8 = vpop.f32.mrb[17].mxu1 }
 0xb17   :  { %v6892_v62 = vadd.f32 %v6891_v8, %v6890_v32  ;;  %v6893_v19 = vpop.f32.mrb[18].mxu1 }
 0xb18   :  { %v6894_v12 = vpop.f32.mrb[19].mxu1 }
 0xb19   :  { %v6103_v51 = vadd.f32 %v6892_v62, %v6855_v36  ;;  %v6895_v63 = vadd.f32 %v6894_v12, %v6893_v19 }
 0xb1b   :  { %v6109_v27 = vmax.f32 %v6103_v51, 0.0  ;;  %v6106_v58 = vadd.f32 %v6895_v63, %v6855_v36 }
 0xb1d   :  { %v6110_v18 = vmax.f32 %v6106_v58, 0.0  ;;  %v6118_v44 = vmul.f32 %v6872_v25, %v6109_v27 }
 0xb1f   :  { %v6121_v61 = vsel %vm6120_vm0, %v6118_v44, 0.0  ;;  %v6119_v31 = vmul.f32 %v6872_v25, %v6110_v18 }
 0xb20   :  { %6122 = vadd.xlane.f32.xlu0 %v6121_v61 }
 0xb21   :  { %v6124_v33 = vsel %vm6120_vm0, %v6119_v31, 0.0 }
 0xb22   :  { %6125 = vadd.xlane.f32.xlu1 %v6124_v33 }
 0xbad   :  { %v6123_v45 = vpop.xlane.xlu0 %6122 }
 0xbae   :  { %v6134_v10 = vadd.f32 %v6873_v14, %v6123_v45 }
 0xbaf   :  { %v6126_v34 = vpop.xlane.xlu1 %6125 }
 0xbb0   :  { %6137 = vst.msk [vmem:[%s8594_s18] sm:$0xff] %vm6136_vm1, %v6134_v10  ;;  %v6135_v28 = vadd.f32 %v6873_v14, %v6126_v34 }
 0xbb2   :  { %6138 = vst.msk [vmem:[%s8594_s18 + $0x8] sm:$0xff] %vm6136_vm1, %v6135_v28 }
 0xbb3   :  { %6143 = vsyncpa [#allocation4], 1 }
 0xbb4   :  { %6144 = vsyncpa [#allocation6], 1 }
 0xbb5   :  { %6145 = vsyncpa [#allocation9], 1 }
 0xbb6   :  { %6146 = vsyncpa [#allocation12], 1 }
 0xbb7   :  { %6147 = vsyncpa [#allocation15], 1 }
 0xbb8   :  { %6148 = vsyncpa [#allocation18], 1 }
 0xbb9   :  { %6149 = vsyncpa [#allocation21], 1 }
 0xbba   :  { %6150 = vsyncpa [#allocation24], 1 }

</bundles_post_ra>
